<compile_context>
chip_gen: v5e
topology: v5e:2x2
jax: 0.10.0
libtpu: 0.0.40
codegen_flags: <defaults>
</compile_context>

<pallas_src>
import functools

import numpy as np
import jax
import jax.numpy as jnp
from jax.experimental import pallas as pl
from jax.experimental.pallas import tpu as pltpu

DROPOUT = 0.1    # TODO(synk): F.dropout is stochastic; modeled as identity (inference semantics).
BN_EPS = 1e-5
CP = 128         # lane-dense padded channel width for all internal activations
STEM_K_PAD = 64  # stem im2col K = 7*7*1 = 49, zero-padded to 64


# ------------------------------------------------------------------ kernel

def _fused_cnn_kernel(*refs, plan):
    """Whole-network forward pass in one kernel.

    refs = [stem_slab, stem_w, stem_aff,
            (sel, w, aff) for conv1 / [downsample] / conv2 of every ResBlock,
            pool, fc_w, fc_b, out]
    All activations are flat (N*H*W, CP) bf16 values; every conv is an
    im2col-by-selection-matmul followed by one concatenated-K GEMM.
    """
    out_ref = refs[-1]
    pool_ref, fcw_ref, fcb_ref = refs[-4], refs[-3], refs[-2]

    idx = [0]

    def take():
        r = refs[idx[0]]
        idx[0] += 1
        return r

    def conv(x, taps, m_out):
        """conv (selection-matmul im2col + single big GEMM) + folded BN (f32)."""
        sel_ref, w_ref, aff_ref = take(), take(), take()
        parts = []
        for t in range(taps):
            # 0/1 selection matrix: gathers the tap's input rows (zero rows for
            # padding) as an MXU matmul — no strided/non-view slices, no relayouts.
            p = jnp.dot(sel_ref[t * m_out:(t + 1) * m_out, :], x,
                        preferred_element_type=jnp.float32)
            parts.append(p.astype(jnp.bfloat16))      # exact: rows are one-hot / zero
        slab = parts[0] if taps == 1 else jnp.concatenate(parts, axis=-1)
        y = jnp.dot(slab, w_ref[...], preferred_element_type=jnp.float32)
        return y * aff_ref[0:1, :] + aff_ref[1:2, :]  # folded BatchNorm (f32)

    # ---- stem: 7x7/s2 conv (im2col slab built once in the wrapper) + BN + ReLU
    slab_ref, w_ref, aff_ref = take(), take(), take()
    y = jnp.dot(slab_ref[...], w_ref[...], preferred_element_type=jnp.float32)
    y = y * aff_ref[0:1, :] + aff_ref[1:2, :]
    a = jnp.maximum(y, 0.0).astype(jnp.bfloat16)
    # dropout: identity (inference)

    # ---- residual blocks (conv1 -> bn -> relu -> conv2 -> bn -> +res -> relu)
    for blk in plan:
        m_out = blk['m_out']
        mid = jnp.maximum(conv(a, 9, m_out), 0.0).astype(jnp.bfloat16)  # conv1+bn1+relu
        if blk['has_down']:
            res = conv(a, 1, m_out)                                     # 1x1 downsample + bn
        else:
            res = a.astype(jnp.float32)
        y2 = conv(mid, 9, m_out) + res                                  # conv2+bn2 + residual
        a = jnp.maximum(y2, 0.0).astype(jnp.bfloat16)                   # relu (dropout = id)

    # ---- global average pool (as a pooling-matrix matmul) + FC, fused epilogue
    pooled = jnp.dot(pool_ref[...], a, preferred_element_type=jnp.float32)
    logits = jnp.dot(pooled.astype(jnp.bfloat16), fcw_ref[...],
                     preferred_element_type=jnp.float32) + fcb_ref[...]
    out_ref[...] = logits


# ------------------------------------------------------------- param setup

def _fold_bn(key, cout):
    """Folded BatchNorm affine (scale row 0, shift row 1), zero-padded to CP."""
    k1, k2, k3, k4 = jax.random.split(key, 4)
    gamma = 1.0 + 0.1 * jax.random.normal(k1, (cout,), jnp.float32)
    beta = 0.1 * jax.random.normal(k2, (cout,), jnp.float32)
    mean = 0.1 * jax.random.normal(k3, (cout,), jnp.float32)
    var = jax.random.uniform(k4, (cout,), jnp.float32, minval=0.5, maxval=1.5)
    scale = gamma * jax.lax.rsqrt(var + BN_EPS)
    shift = beta - mean * scale
    aff = jnp.zeros((2, CP), jnp.float32)
    return aff.at[0, :cout].set(scale).at[1, :cout].set(shift)


def _conv_w3(key, cin, cout):
    """3x3 conv weights in concatenated-K im2col layout: (9*CP, CP) bf16."""
    w = jax.random.normal(key, (3, 3, cin, cout), jnp.float32) / np.sqrt(9.0 * cin)
    wp = jnp.zeros((9, CP, CP), jnp.float32).at[:, :cin, :cout].set(w.reshape(9, cin, cout))
    return wp.reshape(9 * CP, CP).astype(jnp.bfloat16)


def _conv_w1(key, cin, cout):
    """1x1 conv weights: (CP, CP) bf16."""
    w = jax.random.normal(key, (cin, cout), jnp.float32) / np.sqrt(float(cin))
    return jnp.zeros((CP, CP), jnp.float32).at[:cin, :cout].set(w).astype(jnp.bfloat16)


def _stem_w(key, cout):
    """Stem 7x7, cin=1 weights in slab layout: (STEM_K_PAD, CP) bf16."""
    w = jax.random.normal(key, (7, 7, 1, cout), jnp.float32) / np.sqrt(49.0)
    wp = jnp.zeros((STEM_K_PAD, CP), jnp.float32).at[:49, :cout].set(w.reshape(49, cout))
    return wp.astype(jnp.bfloat16)


def _make_sel(n, h, w, oh, ow, k, stride, pad):
    """Per-tap 0/1 selection matrices stacked on rows: (k*k*Mout, Mx) bf16.

    Row (t, m_out) has a single 1 at the flattened (batch-folded) input row that
    feeds output position m_out through tap t, or all zeros when the tap lands
    in the zero-padding region. Handles stride and padding uniformly so the
    kernel needs only matmuls."""
    mo, mx = n * oh * ow, n * h * w
    sel = np.zeros((k * k * mo, mx), np.float32)
    for i in range(k):
        for j in range(k):
            t = i * k + j
            for b in range(n):
                for r in range(oh):
                    hi = r * stride - pad + i
                    if not (0 <= hi < h):
                        continue
                    for c in range(ow):
                        wi = c * stride - pad + j
                        if 0 <= wi < w:
                            sel[t * mo + b * oh * ow + r * ow + c,
                                b * h * w + hi * w + wi] = 1.0
    return jnp.asarray(sel, jnp.bfloat16)


def build_cnn(key, n, h_in, w_in, layers, channels, num_classes):
    """Builds all constants once and returns the jit-able forward function."""
    keys = iter(jax.random.split(key, 256))
    oh0 = (h_in + 2 * 3 - 7) // 2 + 1
    ow0 = (w_in + 2 * 3 - 7) // 2 + 1

    const_args = [_stem_w(next(keys), channels[0]), _fold_bn(next(keys), channels[0])]
    plan = []
    in_c, h, w = channels[0], oh0, ow0
    strides = [1] + [2] * (len(layers) - 1)
    blocks_per_stage = layers[0]   # matches the PyTorch module (blocks=layers[0] every stage)
    for si, out_c in enumerate(channels):
        for b in range(blocks_per_stage):
            s = strides[si] if b == 0 else 1
            oh = (h + 2 - 3) // s + 1
            ow = (w + 2 - 3) // s + 1
            has_down = (s != 1) or (in_c != out_c)
            # conv1 (3x3, stride s, pad 1)
            const_args += [_make_sel(n, h, w, oh, ow, 3, s, 1),
                           _conv_w3(next(keys), in_c, out_c),
                           _fold_bn(next(keys), out_c)]
            # downsample (1x1, stride s, pad 0) — consumed between conv1 and conv2
            if has_down:
                const_args += [_make_sel(n, h, w, oh, ow, 1, s, 0),
                               _conv_w1(next(keys), in_c, out_c),
                               _fold_bn(next(keys), out_c)]
            # conv2 (3x3, stride 1, pad 1)
            const_args += [_make_sel(n, oh, ow, oh, ow, 3, 1, 1),
                           _conv_w3(next(keys), out_c, out_c),
                           _fold_bn(next(keys), out_c)]
            plan.append({'m_out': n * oh * ow, 'has_down': has_down})
            in_c, h, w = out_c, oh, ow

    # global-avg-pool matrix (precomputed once, not per call) + FC params
    hw = h * w
    pool = np.zeros((n, n * hw), np.float32)
    for b in range(n):
        pool[b, b * hw:(b + 1) * hw] = 1.0 / hw
    fc_w = (jax.random.normal(next(keys), (channels[-1], num_classes), jnp.float32)
            / np.sqrt(float(channels[-1])))
    fcw_p = (jnp.zeros((CP, CP), jnp.float32)
             .at[:channels[-1], :num_classes].set(fc_w)).astype(jnp.bfloat16)
    fc_b = 0.1 * jax.random.normal(next(keys), (num_classes,), jnp.float32)
    fcb_p = jnp.zeros((1, CP), jnp.float32).at[0, :num_classes].set(fc_b)
    const_args += [jnp.asarray(pool, jnp.bfloat16), fcw_p, fcb_p]

    slab_shape = (n * oh0 * ow0, STEM_K_PAD)
    all_shapes = [slab_shape] + [tuple(a.shape) for a in const_args]
    in_specs = [pl.BlockSpec(shp, lambda i: (0, 0)) for shp in all_shapes]

    fused = pl.pallas_call(
        functools.partial(_fused_cnn_kernel, plan=tuple(plan)),
        out_shape=jax.ShapeDtypeStruct((n, CP), jnp.float32),
        grid=(1,),
        in_specs=in_specs,
        out_specs=pl.BlockSpec((n, CP), lambda i: (0, 0)),
        compiler_params=pltpu.CompilerParams(
            dimension_semantics=("arbitrary",)),  # single step, one TC (latency-bound net)
    )

    def stem_im2col(x_nchw):
        # One-time im2col of the tiny 1-channel network input for the 7x7/s2
        # stem. This is the only XLA preprocessing left; every layer boundary
        # stays inside the single fused kernel.
        x = jnp.transpose(x_nchw, (0, 2, 3, 1))                       # NCHW -> NHWC
        xp = jnp.pad(x, ((0, 0), (3, 3), (3, 3), (0, 0)))
        taps = [xp[:, i:i + 2 * oh0 - 1:2, j:j + 2 * ow0 - 1:2, 0]
                for i in range(7) for j in range(7)]
        slab = jnp.stack(taps, axis=-1).reshape(n * oh0 * ow0, 49)
        return jnp.pad(slab, ((0, 0), (0, STEM_K_PAD - 49))).astype(jnp.bfloat16)

    def forward(x_nchw):
        logits = fused(stem_im2col(x_nchw), *const_args)
        return logits[:, :num_classes]   # drop zero-padded lane-density columns

    return forward


# -------------------------------------------------------------------- main

if __name__ == "__main__":
    key = jax.random.PRNGKey(0)
    k_param, k_x = jax.random.split(key)

    layers = [1, 1, 1]          # small block counts
    channels = [8, 16, 32]      # small channel widths
    num_classes = 10
    n, h, w = 2, 16, 16

    fwd = jax.jit(build_cnn(k_param, n, h, w, layers, channels, num_classes))
    x = jax.random.normal(k_x, (n, 1, h, w), jnp.float32)  # NCHW, 1-channel input

    logits = jax.block_until_ready(fwd(x))

    assert logits.shape == (n, num_classes), logits.shape
    assert bool(jnp.all(jnp.isfinite(logits)))
    print("KERNEL_OK")
</pallas_src>

<mosaic_0001>
module attributes {stable_mosaic.version = 11 : i64} {
  func.func @_fused_cnn_kernel(%arg0: i32, %arg1: memref<128x64xbf16, #tpu.memory_space<vmem>>, %arg2: memref<64x128xbf16, #tpu.memory_space<vmem>>, %arg3: memref<2x128xf32, #tpu.memory_space<vmem>>, %arg4: memref<1152x128xbf16, #tpu.memory_space<vmem>>, %arg5: memref<1152x128xbf16, #tpu.memory_space<vmem>>, %arg6: memref<2x128xf32, #tpu.memory_space<vmem>>, %arg7: memref<1152x128xbf16, #tpu.memory_space<vmem>>, %arg8: memref<1152x128xbf16, #tpu.memory_space<vmem>>, %arg9: memref<2x128xf32, #tpu.memory_space<vmem>>, %arg10: memref<288x128xbf16, #tpu.memory_space<vmem>>, %arg11: memref<1152x128xbf16, #tpu.memory_space<vmem>>, %arg12: memref<2x128xf32, #tpu.memory_space<vmem>>, %arg13: memref<32x128xbf16, #tpu.memory_space<vmem>>, %arg14: memref<128x128xbf16, #tpu.memory_space<vmem>>, %arg15: memref<2x128xf32, #tpu.memory_space<vmem>>, %arg16: memref<288x32xbf16, #tpu.memory_space<vmem>>, %arg17: memref<1152x128xbf16, #tpu.memory_space<vmem>>, %arg18: memref<2x128xf32, #tpu.memory_space<vmem>>, %arg19: memref<72x32xbf16, #tpu.memory_space<vmem>>, %arg20: memref<1152x128xbf16, #tpu.memory_space<vmem>>, %arg21: memref<2x128xf32, #tpu.memory_space<vmem>>, %arg22: memref<8x32xbf16, #tpu.memory_space<vmem>>, %arg23: memref<128x128xbf16, #tpu.memory_space<vmem>>, %arg24: memref<2x128xf32, #tpu.memory_space<vmem>>, %arg25: memref<72x8xbf16, #tpu.memory_space<vmem>>, %arg26: memref<1152x128xbf16, #tpu.memory_space<vmem>>, %arg27: memref<2x128xf32, #tpu.memory_space<vmem>>, %arg28: memref<2x8xbf16, #tpu.memory_space<vmem>>, %arg29: memref<128x128xbf16, #tpu.memory_space<vmem>>, %arg30: memref<1x128xf32, #tpu.memory_space<vmem>>, %arg31: memref<2x128xf32, #tpu.memory_space<vmem>>) attributes {dimension_semantics = [#tpu.dimension_semantics<arbitrary>], iteration_bounds = array<i64: 1>, scalar_prefetch = 0 : i64, scratch_operands = 0 : i64, tpu.core_type = #tpu.core_type<tc>, window_params = [{pipeline_mode = #tpu.pipeline_mode<synchronous>, transform_indices = @transform_0, window_bounds = array<i64: 128, 64>}, {pipeline_mode = #tpu.pipeline_mode<synchronous>, transform_indices = @transform_1, window_bounds = array<i64: 64, 128>}, {pipeline_mode = #tpu.pipeline_mode<synchronous>, transform_indices = @transform_2, window_bounds = array<i64: 2, 128>}, {pipeline_mode = #tpu.pipeline_mode<synchronous>, transform_indices = @transform_3, window_bounds = array<i64: 1152, 128>}, {pipeline_mode = #tpu.pipeline_mode<synchronous>, transform_indices = @transform_4, window_bounds = array<i64: 1152, 128>}, {pipeline_mode = #tpu.pipeline_mode<synchronous>, transform_indices = @transform_5, window_bounds = array<i64: 2, 128>}, {pipeline_mode = #tpu.pipeline_mode<synchronous>, transform_indices = @transform_6, window_bounds = array<i64: 1152, 128>}, {pipeline_mode = #tpu.pipeline_mode<synchronous>, transform_indices = @transform_7, window_bounds = array<i64: 1152, 128>}, {pipeline_mode = #tpu.pipeline_mode<synchronous>, transform_indices = @transform_8, window_bounds = array<i64: 2, 128>}, {pipeline_mode = #tpu.pipeline_mode<synchronous>, transform_indices = @transform_9, window_bounds = array<i64: 288, 128>}, {pipeline_mode = #tpu.pipeline_mode<synchronous>, transform_indices = @transform_10, window_bounds = array<i64: 1152, 128>}, {pipeline_mode = #tpu.pipeline_mode<synchronous>, transform_indices = @transform_11, window_bounds = array<i64: 2, 128>}, {pipeline_mode = #tpu.pipeline_mode<synchronous>, transform_indices = @transform_12, window_bounds = array<i64: 32, 128>}, {pipeline_mode = #tpu.pipeline_mode<synchronous>, transform_indices = @transform_13, window_bounds = array<i64: 128, 128>}, {pipeline_mode = #tpu.pipeline_mode<synchronous>, transform_indices = @transform_14, window_bounds = array<i64: 2, 128>}, {pipeline_mode = #tpu.pipeline_mode<synchronous>, transform_indices = @transform_15, window_bounds = array<i64: 288, 32>}, {pipeline_mode = #tpu.pipeline_mode<synchronous>, transform_indices = @transform_16, window_bounds = array<i64: 1152, 128>}, {pipeline_mode = #tpu.pipeline_mode<synchronous>, transform_indices = @transform_17, window_bounds = array<i64: 2, 128>}, {pipeline_mode = #tpu.pipeline_mode<synchronous>, transform_indices = @transform_18, window_bounds = array<i64: 72, 32>}, {pipeline_mode = #tpu.pipeline_mode<synchronous>, transform_indices = @transform_19, window_bounds = array<i64: 1152, 128>}, {pipeline_mode = #tpu.pipeline_mode<synchronous>, transform_indices = @transform_20, window_bounds = array<i64: 2, 128>}, {pipeline_mode = #tpu.pipeline_mode<synchronous>, transform_indices = @transform_21, window_bounds = array<i64: 8, 32>}, {pipeline_mode = #tpu.pipeline_mode<synchronous>, transform_indices = @transform_22, window_bounds = array<i64: 128, 128>}, {pipeline_mode = #tpu.pipeline_mode<synchronous>, transform_indices = @transform_23, window_bounds = array<i64: 2, 128>}, {pipeline_mode = #tpu.pipeline_mode<synchronous>, transform_indices = @transform_24, window_bounds = array<i64: 72, 8>}, {pipeline_mode = #tpu.pipeline_mode<synchronous>, transform_indices = @transform_25, window_bounds = array<i64: 1152, 128>}, {pipeline_mode = #tpu.pipeline_mode<synchronous>, transform_indices = @transform_26, window_bounds = array<i64: 2, 128>}, {pipeline_mode = #tpu.pipeline_mode<synchronous>, transform_indices = @transform_27, window_bounds = array<i64: 2, 8>}, {pipeline_mode = #tpu.pipeline_mode<synchronous>, transform_indices = @transform_28, window_bounds = array<i64: 128, 128>}, {pipeline_mode = #tpu.pipeline_mode<synchronous>, transform_indices = @transform_29, window_bounds = array<i64: 1, 128>}, {pipeline_mode = #tpu.pipeline_mode<synchronous>, transform_indices = @transform_30, window_bounds = array<i64: 2, 128>}]} {
    %c0 = arith.constant 0 : index
    %c0_0 = arith.constant 0 : index
    %0 = vector.load %arg1[%c0, %c0_0] : memref<128x64xbf16, #tpu.memory_space<vmem>>, vector<128x64xbf16>
    %c0_1 = arith.constant 0 : index
    %c0_2 = arith.constant 0 : index
    %1 = vector.load %arg2[%c0_1, %c0_2] : memref<64x128xbf16, #tpu.memory_space<vmem>>, vector<64x128xbf16>
    %cst = arith.constant dense<0.000000e+00> : vector<128x128xf32>
    %2 = tpu.matmul %0, %1, %cst {dimension_numbers = #tpu.dot_dimension_numbers<[1], [0], [0], [1], [0, 0, 1, 1], [], []>} : vector<128x64xbf16>, vector<64x128xbf16>, vector<128x128xf32> -> vector<128x128xf32>
    %c0_3 = arith.constant 0 : index
    %c0_4 = arith.constant 0 : index
    %3 = vector.load %arg3[%c0_3, %c0_4] : memref<2x128xf32, #tpu.memory_space<vmem>>, vector<1x128xf32>
    %4 = vector.broadcast %3 : vector<1x128xf32> to vector<128x128xf32>
    %5 = arith.mulf %2, %4 : vector<128x128xf32>
    %c1 = arith.constant 1 : index
    %c0_5 = arith.constant 0 : index
    %6 = vector.load %arg3[%c1, %c0_5] : memref<2x128xf32, #tpu.memory_space<vmem>>, vector<1x128xf32>
    %7 = vector.broadcast %6 : vector<1x128xf32> to vector<128x128xf32>
    %8 = arith.addf %5, %7 : vector<128x128xf32>
    %cst_6 = arith.constant 0.000000e+00 : f32
    %9 = vector.broadcast %cst_6 : f32 to vector<128x128xf32>
    %10 = arith.maximumf %8, %9 : vector<128x128xf32>
    %11 = arith.truncf %10 : vector<128x128xf32> to vector<128x128xbf16>
    %c0_7 = arith.constant 0 : index
    %c0_8 = arith.constant 0 : index
    %12 = vector.load %arg4[%c0_7, %c0_8] : memref<1152x128xbf16, #tpu.memory_space<vmem>>, vector<128x128xbf16>
    %cst_9 = arith.constant dense<0.000000e+00> : vector<128x128xf32>
    %13 = tpu.matmul %12, %11, %cst_9 {dimension_numbers = #tpu.dot_dimension_numbers<[1], [0], [0], [1], [0, 0, 1, 1], [], []>} : vector<128x128xbf16>, vector<128x128xbf16>, vector<128x128xf32> -> vector<128x128xf32>
    %14 = arith.truncf %13 : vector<128x128xf32> to vector<128x128xbf16>
    %c128 = arith.constant 128 : index
    %c0_10 = arith.constant 0 : index
    %15 = vector.load %arg4[%c128, %c0_10] : memref<1152x128xbf16, #tpu.memory_space<vmem>>, vector<128x128xbf16>
    %cst_11 = arith.constant dense<0.000000e+00> : vector<128x128xf32>
    %16 = tpu.matmul %15, %11, %cst_11 {dimension_numbers = #tpu.dot_dimension_numbers<[1], [0], [0], [1], [0, 0, 1, 1], [], []>} : vector<128x128xbf16>, vector<128x128xbf16>, vector<128x128xf32> -> vector<128x128xf32>
    %17 = arith.truncf %16 : vector<128x128xf32> to vector<128x128xbf16>
    %c256 = arith.constant 256 : index
    %c0_12 = arith.constant 0 : index
    %18 = vector.load %arg4[%c256, %c0_12] : memref<1152x128xbf16, #tpu.memory_space<vmem>>, vector<128x128xbf16>
    %cst_13 = arith.constant dense<0.000000e+00> : vector<128x128xf32>
    %19 = tpu.matmul %18, %11, %cst_13 {dimension_numbers = #tpu.dot_dimension_numbers<[1], [0], [0], [1], [0, 0, 1, 1], [], []>} : vector<128x128xbf16>, vector<128x128xbf16>, vector<128x128xf32> -> vector<128x128xf32>
    %20 = arith.truncf %19 : vector<128x128xf32> to vector<128x128xbf16>
    %c384 = arith.constant 384 : index
    %c0_14 = arith.constant 0 : index
    %21 = vector.load %arg4[%c384, %c0_14] : memref<1152x128xbf16, #tpu.memory_space<vmem>>, vector<128x128xbf16>
    %cst_15 = arith.constant dense<0.000000e+00> : vector<128x128xf32>
    %22 = tpu.matmul %21, %11, %cst_15 {dimension_numbers = #tpu.dot_dimension_numbers<[1], [0], [0], [1], [0, 0, 1, 1], [], []>} : vector<128x128xbf16>, vector<128x128xbf16>, vector<128x128xf32> -> vector<128x128xf32>
    %23 = arith.truncf %22 : vector<128x128xf32> to vector<128x128xbf16>
    %c512 = arith.constant 512 : index
    %c0_16 = arith.constant 0 : index
    %24 = vector.load %arg4[%c512, %c0_16] : memref<1152x128xbf16, #tpu.memory_space<vmem>>, vector<128x128xbf16>
    %cst_17 = arith.constant dense<0.000000e+00> : vector<128x128xf32>
    %25 = tpu.matmul %24, %11, %cst_17 {dimension_numbers = #tpu.dot_dimension_numbers<[1], [0], [0], [1], [0, 0, 1, 1], [], []>} : vector<128x128xbf16>, vector<128x128xbf16>, vector<128x128xf32> -> vector<128x128xf32>
    %26 = arith.truncf %25 : vector<128x128xf32> to vector<128x128xbf16>
    %c640 = arith.constant 640 : index
    %c0_18 = arith.constant 0 : index
    %27 = vector.load %arg4[%c640, %c0_18] : memref<1152x128xbf16, #tpu.memory_space<vmem>>, vector<128x128xbf16>
    %cst_19 = arith.constant dense<0.000000e+00> : vector<128x128xf32>
    %28 = tpu.matmul %27, %11, %cst_19 {dimension_numbers = #tpu.dot_dimension_numbers<[1], [0], [0], [1], [0, 0, 1, 1], [], []>} : vector<128x128xbf16>, vector<128x128xbf16>, vector<128x128xf32> -> vector<128x128xf32>
    %29 = arith.truncf %28 : vector<128x128xf32> to vector<128x128xbf16>
    %c768 = arith.constant 768 : index
    %c0_20 = arith.constant 0 : index
    %30 = vector.load %arg4[%c768, %c0_20] : memref<1152x128xbf16, #tpu.memory_space<vmem>>, vector<128x128xbf16>
    %cst_21 = arith.constant dense<0.000000e+00> : vector<128x128xf32>
    %31 = tpu.matmul %30, %11, %cst_21 {dimension_numbers = #tpu.dot_dimension_numbers<[1], [0], [0], [1], [0, 0, 1, 1], [], []>} : vector<128x128xbf16>, vector<128x128xbf16>, vector<128x128xf32> -> vector<128x128xf32>
    %32 = arith.truncf %31 : vector<128x128xf32> to vector<128x128xbf16>
    %c896 = arith.constant 896 : index
    %c0_22 = arith.constant 0 : index
    %33 = vector.load %arg4[%c896, %c0_22] : memref<1152x128xbf16, #tpu.memory_space<vmem>>, vector<128x128xbf16>
    %cst_23 = arith.constant dense<0.000000e+00> : vector<128x128xf32>
    %34 = tpu.matmul %33, %11, %cst_23 {dimension_numbers = #tpu.dot_dimension_numbers<[1], [0], [0], [1], [0, 0, 1, 1], [], []>} : vector<128x128xbf16>, vector<128x128xbf16>, vector<128x128xf32> -> vector<128x128xf32>
    %35 = arith.truncf %34 : vector<128x128xf32> to vector<128x128xbf16>
    %c1024 = arith.constant 1024 : index
    %c0_24 = arith.constant 0 : index
    %36 = vector.load %arg4[%c1024, %c0_24] : memref<1152x128xbf16, #tpu.memory_space<vmem>>, vector<128x128xbf16>
    %cst_25 = arith.constant dense<0.000000e+00> : vector<128x128xf32>
    %37 = tpu.matmul %36, %11, %cst_25 {dimension_numbers = #tpu.dot_dimension_numbers<[1], [0], [0], [1], [0, 0, 1, 1], [], []>} : vector<128x128xbf16>, vector<128x128xbf16>, vector<128x128xf32> -> vector<128x128xf32>
    %38 = arith.truncf %37 : vector<128x128xf32> to vector<128x128xbf16>
    %39 = tpu.concatenate %14, %17, %20, %23, %26, %29, %32, %35, %38 in 1 : vector<128x128xbf16>, vector<128x128xbf16>, vector<128x128xbf16>, vector<128x128xbf16>, vector<128x128xbf16>, vector<128x128xbf16>, vector<128x128xbf16>, vector<128x128xbf16>, vector<128x128xbf16> -> vector<128x1152xbf16>
    %c0_26 = arith.constant 0 : index
    %c0_27 = arith.constant 0 : index
    %40 = vector.load %arg5[%c0_26, %c0_27] : memref<1152x128xbf16, #tpu.memory_space<vmem>>, vector<1152x128xbf16>
    %cst_28 = arith.constant dense<0.000000e+00> : vector<128x128xf32>
    %41 = tpu.matmul %39, %40, %cst_28 {dimension_numbers = #tpu.dot_dimension_numbers<[1], [0], [0], [1], [0, 0, 1, 1], [], []>} : vector<128x1152xbf16>, vector<1152x128xbf16>, vector<128x128xf32> -> vector<128x128xf32>
    %c0_29 = arith.constant 0 : index
    %c0_30 = arith.constant 0 : index
    %42 = vector.load %arg6[%c0_29, %c0_30] : memref<2x128xf32, #tpu.memory_space<vmem>>, vector<1x128xf32>
    %43 = vector.broadcast %42 : vector<1x128xf32> to vector<128x128xf32>
    %44 = arith.mulf %41, %43 : vector<128x128xf32>
    %c1_31 = arith.constant 1 : index
    %c0_32 = arith.constant 0 : index
    %45 = vector.load %arg6[%c1_31, %c0_32] : memref<2x128xf32, #tpu.memory_space<vmem>>, vector<1x128xf32>
    %46 = vector.broadcast %45 : vector<1x128xf32> to vector<128x128xf32>
    %47 = arith.addf %44, %46 : vector<128x128xf32>
    %cst_33 = arith.constant 0.000000e+00 : f32
    %48 = vector.broadcast %cst_33 : f32 to vector<128x128xf32>
    %49 = arith.maximumf %47, %48 : vector<128x128xf32>
    %50 = arith.truncf %49 : vector<128x128xf32> to vector<128x128xbf16>
    %51 = arith.extf %11 : vector<128x128xbf16> to vector<128x128xf32>
    %c0_34 = arith.constant 0 : index
    %c0_35 = arith.constant 0 : index
    %52 = vector.load %arg7[%c0_34, %c0_35] : memref<1152x128xbf16, #tpu.memory_space<vmem>>, vector<128x128xbf16>
    %cst_36 = arith.constant dense<0.000000e+00> : vector<128x128xf32>
    %53 = tpu.matmul %52, %50, %cst_36 {dimension_numbers = #tpu.dot_dimension_numbers<[1], [0], [0], [1], [0, 0, 1, 1], [], []>} : vector<128x128xbf16>, vector<128x128xbf16>, vector<128x128xf32> -> vector<128x128xf32>
    %54 = arith.truncf %53 : vector<128x128xf32> to vector<128x128xbf16>
    %c128_37 = arith.constant 128 : index
    %c0_38 = arith.constant 0 : index
    %55 = vector.load %arg7[%c128_37, %c0_38] : memref<1152x128xbf16, #tpu.memory_space<vmem>>, vector<128x128xbf16>
    %cst_39 = arith.constant dense<0.000000e+00> : vector<128x128xf32>
    %56 = tpu.matmul %55, %50, %cst_39 {dimension_numbers = #tpu.dot_dimension_numbers<[1], [0], [0], [1], [0, 0, 1, 1], [], []>} : vector<128x128xbf16>, vector<128x128xbf16>, vector<128x128xf32> -> vector<128x128xf32>
    %57 = arith.truncf %56 : vector<128x128xf32> to vector<128x128xbf16>
    %c256_40 = arith.constant 256 : index
    %c0_41 = arith.constant 0 : index
    %58 = vector.load %arg7[%c256_40, %c0_41] : memref<1152x128xbf16, #tpu.memory_space<vmem>>, vector<128x128xbf16>
    %cst_42 = arith.constant dense<0.000000e+00> : vector<128x128xf32>
    %59 = tpu.matmul %58, %50, %cst_42 {dimension_numbers = #tpu.dot_dimension_numbers<[1], [0], [0], [1], [0, 0, 1, 1], [], []>} : vector<128x128xbf16>, vector<128x128xbf16>, vector<128x128xf32> -> vector<128x128xf32>
    %60 = arith.truncf %59 : vector<128x128xf32> to vector<128x128xbf16>
    %c384_43 = arith.constant 384 : index
    %c0_44 = arith.constant 0 : index
    %61 = vector.load %arg7[%c384_43, %c0_44] : memref<1152x128xbf16, #tpu.memory_space<vmem>>, vector<128x128xbf16>
    %cst_45 = arith.constant dense<0.000000e+00> : vector<128x128xf32>
    %62 = tpu.matmul %61, %50, %cst_45 {dimension_numbers = #tpu.dot_dimension_numbers<[1], [0], [0], [1], [0, 0, 1, 1], [], []>} : vector<128x128xbf16>, vector<128x128xbf16>, vector<128x128xf32> -> vector<128x128xf32>
    %63 = arith.truncf %62 : vector<128x128xf32> to vector<128x128xbf16>
    %c512_46 = arith.constant 512 : index
    %c0_47 = arith.constant 0 : index
    %64 = vector.load %arg7[%c512_46, %c0_47] : memref<1152x128xbf16, #tpu.memory_space<vmem>>, vector<128x128xbf16>
    %cst_48 = arith.constant dense<0.000000e+00> : vector<128x128xf32>
    %65 = tpu.matmul %64, %50, %cst_48 {dimension_numbers = #tpu.dot_dimension_numbers<[1], [0], [0], [1], [0, 0, 1, 1], [], []>} : vector<128x128xbf16>, vector<128x128xbf16>, vector<128x128xf32> -> vector<128x128xf32>
    %66 = arith.truncf %65 : vector<128x128xf32> to vector<128x128xbf16>
    %c640_49 = arith.constant 640 : index
    %c0_50 = arith.constant 0 : index
    %67 = vector.load %arg7[%c640_49, %c0_50] : memref<1152x128xbf16, #tpu.memory_space<vmem>>, vector<128x128xbf16>
    %cst_51 = arith.constant dense<0.000000e+00> : vector<128x128xf32>
    %68 = tpu.matmul %67, %50, %cst_51 {dimension_numbers = #tpu.dot_dimension_numbers<[1], [0], [0], [1], [0, 0, 1, 1], [], []>} : vector<128x128xbf16>, vector<128x128xbf16>, vector<128x128xf32> -> vector<128x128xf32>
    %69 = arith.truncf %68 : vector<128x128xf32> to vector<128x128xbf16>
    %c768_52 = arith.constant 768 : index
    %c0_53 = arith.constant 0 : index
    %70 = vector.load %arg7[%c768_52, %c0_53] : memref<1152x128xbf16, #tpu.memory_space<vmem>>, vector<128x128xbf16>
    %cst_54 = arith.constant dense<0.000000e+00> : vector<128x128xf32>
    %71 = tpu.matmul %70, %50, %cst_54 {dimension_numbers = #tpu.dot_dimension_numbers<[1], [0], [0], [1], [0, 0, 1, 1], [], []>} : vector<128x128xbf16>, vector<128x128xbf16>, vector<128x128xf32> -> vector<128x128xf32>
    %72 = arith.truncf %71 : vector<128x128xf32> to vector<128x128xbf16>
    %c896_55 = arith.constant 896 : index
    %c0_56 = arith.constant 0 : index
    %73 = vector.load %arg7[%c896_55, %c0_56] : memref<1152x128xbf16, #tpu.memory_space<vmem>>, vector<128x128xbf16>
    %cst_57 = arith.constant dense<0.000000e+00> : vector<128x128xf32>
    %74 = tpu.matmul %73, %50, %cst_57 {dimension_numbers = #tpu.dot_dimension_numbers<[1], [0], [0], [1], [0, 0, 1, 1], [], []>} : vector<128x128xbf16>, vector<128x128xbf16>, vector<128x128xf32> -> vector<128x128xf32>
    %75 = arith.truncf %74 : vector<128x128xf32> to vector<128x128xbf16>
    %c1024_58 = arith.constant 1024 : index
    %c0_59 = arith.constant 0 : index
    %76 = vector.load %arg7[%c1024_58, %c0_59] : memref<1152x128xbf16, #tpu.memory_space<vmem>>, vector<128x128xbf16>
    %cst_60 = arith.constant dense<0.000000e+00> : vector<128x128xf32>
    %77 = tpu.matmul %76, %50, %cst_60 {dimension_numbers = #tpu.dot_dimension_numbers<[1], [0], [0], [1], [0, 0, 1, 1], [], []>} : vector<128x128xbf16>, vector<128x128xbf16>, vector<128x128xf32> -> vector<128x128xf32>
    %78 = arith.truncf %77 : vector<128x128xf32> to vector<128x128xbf16>
    %79 = tpu.concatenate %54, %57, %60, %63, %66, %69, %72, %75, %78 in 1 : vector<128x128xbf16>, vector<128x128xbf16>, vector<128x128xbf16>, vector<128x128xbf16>, vector<128x128xbf16>, vector<128x128xbf16>, vector<128x128xbf16>, vector<128x128xbf16>, vector<128x128xbf16> -> vector<128x1152xbf16>
    %c0_61 = arith.constant 0 : index
    %c0_62 = arith.constant 0 : index
    %80 = vector.load %arg8[%c0_61, %c0_62] : memref<1152x128xbf16, #tpu.memory_space<vmem>>, vector<1152x128xbf16>
    %cst_63 = arith.constant dense<0.000000e+00> : vector<128x128xf32>
    %81 = tpu.matmul %79, %80, %cst_63 {dimension_numbers = #tpu.dot_dimension_numbers<[1], [0], [0], [1], [0, 0, 1, 1], [], []>} : vector<128x1152xbf16>, vector<1152x128xbf16>, vector<128x128xf32> -> vector<128x128xf32>
    %c0_64 = arith.constant 0 : index
    %c0_65 = arith.constant 0 : index
    %82 = vector.load %arg9[%c0_64, %c0_65] : memref<2x128xf32, #tpu.memory_space<vmem>>, vector<1x128xf32>
    %83 = vector.broadcast %82 : vector<1x128xf32> to vector<128x128xf32>
    %84 = arith.mulf %81, %83 : vector<128x128xf32>
    %c1_66 = arith.constant 1 : index
    %c0_67 = arith.constant 0 : index
    %85 = vector.load %arg9[%c1_66, %c0_67] : memref<2x128xf32, #tpu.memory_space<vmem>>, vector<1x128xf32>
    %86 = vector.broadcast %85 : vector<1x128xf32> to vector<128x128xf32>
    %87 = arith.addf %84, %86 : vector<128x128xf32>
    %88 = arith.addf %87, %51 : vector<128x128xf32>
    %cst_68 = arith.constant 0.000000e+00 : f32
    %89 = vector.broadcast %cst_68 : f32 to vector<128x128xf32>
    %90 = arith.maximumf %88, %89 : vector<128x128xf32>
    %91 = arith.truncf %90 : vector<128x128xf32> to vector<128x128xbf16>
    %c0_69 = arith.constant 0 : index
    %c0_70 = arith.constant 0 : index
    %92 = vector.load %arg10[%c0_69, %c0_70] : memref<288x128xbf16, #tpu.memory_space<vmem>>, vector<32x128xbf16>
    %cst_71 = arith.constant dense<0.000000e+00> : vector<32x128xf32>
    %93 = tpu.matmul %92, %91, %cst_71 {dimension_numbers = #tpu.dot_dimension_numbers<[1], [0], [0], [1], [0, 0, 1, 1], [], []>} : vector<32x128xbf16>, vector<128x128xbf16>, vector<32x128xf32> -> vector<32x128xf32>
    %94 = arith.truncf %93 : vector<32x128xf32> to vector<32x128xbf16>
    %c32 = arith.constant 32 : index
    %c0_72 = arith.constant 0 : index
    %95 = vector.load %arg10[%c32, %c0_72] : memref<288x128xbf16, #tpu.memory_space<vmem>>, vector<32x128xbf16>
    %cst_73 = arith.constant dense<0.000000e+00> : vector<32x128xf32>
    %96 = tpu.matmul %95, %91, %cst_73 {dimension_numbers = #tpu.dot_dimension_numbers<[1], [0], [0], [1], [0, 0, 1, 1], [], []>} : vector<32x128xbf16>, vector<128x128xbf16>, vector<32x128xf32> -> vector<32x128xf32>
    %97 = arith.truncf %96 : vector<32x128xf32> to vector<32x128xbf16>
    %c64 = arith.constant 64 : index
    %c0_74 = arith.constant 0 : index
    %98 = vector.load %arg10[%c64, %c0_74] : memref<288x128xbf16, #tpu.memory_space<vmem>>, vector<32x128xbf16>
    %cst_75 = arith.constant dense<0.000000e+00> : vector<32x128xf32>
    %99 = tpu.matmul %98, %91, %cst_75 {dimension_numbers = #tpu.dot_dimension_numbers<[1], [0], [0], [1], [0, 0, 1, 1], [], []>} : vector<32x128xbf16>, vector<128x128xbf16>, vector<32x128xf32> -> vector<32x128xf32>
    %100 = arith.truncf %99 : vector<32x128xf32> to vector<32x128xbf16>
    %c96 = arith.constant 96 : index
    %c0_76 = arith.constant 0 : index
    %101 = vector.load %arg10[%c96, %c0_76] : memref<288x128xbf16, #tpu.memory_space<vmem>>, vector<32x128xbf16>
    %cst_77 = arith.constant dense<0.000000e+00> : vector<32x128xf32>
    %102 = tpu.matmul %101, %91, %cst_77 {dimension_numbers = #tpu.dot_dimension_numbers<[1], [0], [0], [1], [0, 0, 1, 1], [], []>} : vector<32x128xbf16>, vector<128x128xbf16>, vector<32x128xf32> -> vector<32x128xf32>
    %103 = arith.truncf %102 : vector<32x128xf32> to vector<32x128xbf16>
    %c128_78 = arith.constant 128 : index
    %c0_79 = arith.constant 0 : index
    %104 = vector.load %arg10[%c128_78, %c0_79] : memref<288x128xbf16, #tpu.memory_space<vmem>>, vector<32x128xbf16>
    %cst_80 = arith.constant dense<0.000000e+00> : vector<32x128xf32>
    %105 = tpu.matmul %104, %91, %cst_80 {dimension_numbers = #tpu.dot_dimension_numbers<[1], [0], [0], [1], [0, 0, 1, 1], [], []>} : vector<32x128xbf16>, vector<128x128xbf16>, vector<32x128xf32> -> vector<32x128xf32>
    %106 = arith.truncf %105 : vector<32x128xf32> to vector<32x128xbf16>
    %c160 = arith.constant 160 : index
    %c0_81 = arith.constant 0 : index
    %107 = vector.load %arg10[%c160, %c0_81] : memref<288x128xbf16, #tpu.memory_space<vmem>>, vector<32x128xbf16>
    %cst_82 = arith.constant dense<0.000000e+00> : vector<32x128xf32>
    %108 = tpu.matmul %107, %91, %cst_82 {dimension_numbers = #tpu.dot_dimension_numbers<[1], [0], [0], [1], [0, 0, 1, 1], [], []>} : vector<32x128xbf16>, vector<128x128xbf16>, vector<32x128xf32> -> vector<32x128xf32>
    %109 = arith.truncf %108 : vector<32x128xf32> to vector<32x128xbf16>
    %c192 = arith.constant 192 : index
    %c0_83 = arith.constant 0 : index
    %110 = vector.load %arg10[%c192, %c0_83] : memref<288x128xbf16, #tpu.memory_space<vmem>>, vector<32x128xbf16>
    %cst_84 = arith.constant dense<0.000000e+00> : vector<32x128xf32>
    %111 = tpu.matmul %110, %91, %cst_84 {dimension_numbers = #tpu.dot_dimension_numbers<[1], [0], [0], [1], [0, 0, 1, 1], [], []>} : vector<32x128xbf16>, vector<128x128xbf16>, vector<32x128xf32> -> vector<32x128xf32>
    %112 = arith.truncf %111 : vector<32x128xf32> to vector<32x128xbf16>
    %c224 = arith.constant 224 : index
    %c0_85 = arith.constant 0 : index
    %113 = vector.load %arg10[%c224, %c0_85] : memref<288x128xbf16, #tpu.memory_space<vmem>>, vector<32x128xbf16>
    %cst_86 = arith.constant dense<0.000000e+00> : vector<32x128xf32>
    %114 = tpu.matmul %113, %91, %cst_86 {dimension_numbers = #tpu.dot_dimension_numbers<[1], [0], [0], [1], [0, 0, 1, 1], [], []>} : vector<32x128xbf16>, vector<128x128xbf16>, vector<32x128xf32> -> vector<32x128xf32>
    %115 = arith.truncf %114 : vector<32x128xf32> to vector<32x128xbf16>
    %c256_87 = arith.constant 256 : index
    %c0_88 = arith.constant 0 : index
    %116 = vector.load %arg10[%c256_87, %c0_88] : memref<288x128xbf16, #tpu.memory_space<vmem>>, vector<32x128xbf16>
    %cst_89 = arith.constant dense<0.000000e+00> : vector<32x128xf32>
    %117 = tpu.matmul %116, %91, %cst_89 {dimension_numbers = #tpu.dot_dimension_numbers<[1], [0], [0], [1], [0, 0, 1, 1], [], []>} : vector<32x128xbf16>, vector<128x128xbf16>, vector<32x128xf32> -> vector<32x128xf32>
    %118 = arith.truncf %117 : vector<32x128xf32> to vector<32x128xbf16>
    %119 = tpu.concatenate %94, %97, %100, %103, %106, %109, %112, %115, %118 in 1 : vector<32x128xbf16>, vector<32x128xbf16>, vector<32x128xbf16>, vector<32x128xbf16>, vector<32x128xbf16>, vector<32x128xbf16>, vector<32x128xbf16>, vector<32x128xbf16>, vector<32x128xbf16> -> vector<32x1152xbf16>
    %c0_90 = arith.constant 0 : index
    %c0_91 = arith.constant 0 : index
    %120 = vector.load %arg11[%c0_90, %c0_91] : memref<1152x128xbf16, #tpu.memory_space<vmem>>, vector<1152x128xbf16>
    %cst_92 = arith.constant dense<0.000000e+00> : vector<32x128xf32>
    %121 = tpu.matmul %119, %120, %cst_92 {dimension_numbers = #tpu.dot_dimension_numbers<[1], [0], [0], [1], [0, 0, 1, 1], [], []>} : vector<32x1152xbf16>, vector<1152x128xbf16>, vector<32x128xf32> -> vector<32x128xf32>
    %c0_93 = arith.constant 0 : index
    %c0_94 = arith.constant 0 : index
    %122 = vector.load %arg12[%c0_93, %c0_94] : memref<2x128xf32, #tpu.memory_space<vmem>>, vector<1x128xf32>
    %123 = vector.broadcast %122 : vector<1x128xf32> to vector<32x128xf32>
    %124 = arith.mulf %121, %123 : vector<32x128xf32>
    %c1_95 = arith.constant 1 : index
    %c0_96 = arith.constant 0 : index
    %125 = vector.load %arg12[%c1_95, %c0_96] : memref<2x128xf32, #tpu.memory_space<vmem>>, vector<1x128xf32>
    %126 = vector.broadcast %125 : vector<1x128xf32> to vector<32x128xf32>
    %127 = arith.addf %124, %126 : vector<32x128xf32>
    %cst_97 = arith.constant 0.000000e+00 : f32
    %128 = vector.broadcast %cst_97 : f32 to vector<32x128xf32>
    %129 = arith.maximumf %127, %128 : vector<32x128xf32>
    %130 = arith.truncf %129 : vector<32x128xf32> to vector<32x128xbf16>
    %c0_98 = arith.constant 0 : index
    %c0_99 = arith.constant 0 : index
    %131 = vector.load %arg13[%c0_98, %c0_99] : memref<32x128xbf16, #tpu.memory_space<vmem>>, vector<32x128xbf16>
    %cst_100 = arith.constant dense<0.000000e+00> : vector<32x128xf32>
    %132 = tpu.matmul %131, %91, %cst_100 {dimension_numbers = #tpu.dot_dimension_numbers<[1], [0], [0], [1], [0, 0, 1, 1], [], []>} : vector<32x128xbf16>, vector<128x128xbf16>, vector<32x128xf32> -> vector<32x128xf32>
    %133 = arith.truncf %132 : vector<32x128xf32> to vector<32x128xbf16>
    %c0_101 = arith.constant 0 : index
    %c0_102 = arith.constant 0 : index
    %134 = vector.load %arg14[%c0_101, %c0_102] : memref<128x128xbf16, #tpu.memory_space<vmem>>, vector<128x128xbf16>
    %cst_103 = arith.constant dense<0.000000e+00> : vector<32x128xf32>
    %135 = tpu.matmul %133, %134, %cst_103 {dimension_numbers = #tpu.dot_dimension_numbers<[1], [0], [0], [1], [0, 0, 1, 1], [], []>} : vector<32x128xbf16>, vector<128x128xbf16>, vector<32x128xf32> -> vector<32x128xf32>
    %c0_104 = arith.constant 0 : index
    %c0_105 = arith.constant 0 : index
    %136 = vector.load %arg15[%c0_104, %c0_105] : memref<2x128xf32, #tpu.memory_space<vmem>>, vector<1x128xf32>
    %137 = vector.broadcast %136 : vector<1x128xf32> to vector<32x128xf32>
    %138 = arith.mulf %135, %137 : vector<32x128xf32>
    %c1_106 = arith.constant 1 : index
    %c0_107 = arith.constant 0 : index
    %139 = vector.load %arg15[%c1_106, %c0_107] : memref<2x128xf32, #tpu.memory_space<vmem>>, vector<1x128xf32>
    %140 = vector.broadcast %139 : vector<1x128xf32> to vector<32x128xf32>
    %141 = arith.addf %138, %140 : vector<32x128xf32>
    %c0_108 = arith.constant 0 : index
    %c0_109 = arith.constant 0 : index
    %142 = vector.load %arg16[%c0_108, %c0_109] : memref<288x32xbf16, #tpu.memory_space<vmem>>, vector<32x32xbf16>
    %cst_110 = arith.constant dense<0.000000e+00> : vector<32x128xf32>
    %143 = tpu.matmul %142, %130, %cst_110 {dimension_numbers = #tpu.dot_dimension_numbers<[1], [0], [0], [1], [0, 0, 1, 1], [], []>} : vector<32x32xbf16>, vector<32x128xbf16>, vector<32x128xf32> -> vector<32x128xf32>
    %144 = arith.truncf %143 : vector<32x128xf32> to vector<32x128xbf16>
    %c32_111 = arith.constant 32 : index
    %c0_112 = arith.constant 0 : index
    %145 = vector.load %arg16[%c32_111, %c0_112] : memref<288x32xbf16, #tpu.memory_space<vmem>>, vector<32x32xbf16>
    %cst_113 = arith.constant dense<0.000000e+00> : vector<32x128xf32>
    %146 = tpu.matmul %145, %130, %cst_113 {dimension_numbers = #tpu.dot_dimension_numbers<[1], [0], [0], [1], [0, 0, 1, 1], [], []>} : vector<32x32xbf16>, vector<32x128xbf16>, vector<32x128xf32> -> vector<32x128xf32>
    %147 = arith.truncf %146 : vector<32x128xf32> to vector<32x128xbf16>
    %c64_114 = arith.constant 64 : index
    %c0_115 = arith.constant 0 : index
    %148 = vector.load %arg16[%c64_114, %c0_115] : memref<288x32xbf16, #tpu.memory_space<vmem>>, vector<32x32xbf16>
    %cst_116 = arith.constant dense<0.000000e+00> : vector<32x128xf32>
    %149 = tpu.matmul %148, %130, %cst_116 {dimension_numbers = #tpu.dot_dimension_numbers<[1], [0], [0], [1], [0, 0, 1, 1], [], []>} : vector<32x32xbf16>, vector<32x128xbf16>, vector<32x128xf32> -> vector<32x128xf32>
    %150 = arith.truncf %149 : vector<32x128xf32> to vector<32x128xbf16>
    %c96_117 = arith.constant 96 : index
    %c0_118 = arith.constant 0 : index
    %151 = vector.load %arg16[%c96_117, %c0_118] : memref<288x32xbf16, #tpu.memory_space<vmem>>, vector<32x32xbf16>
    %cst_119 = arith.constant dense<0.000000e+00> : vector<32x128xf32>
    %152 = tpu.matmul %151, %130, %cst_119 {dimension_numbers = #tpu.dot_dimension_numbers<[1], [0], [0], [1], [0, 0, 1, 1], [], []>} : vector<32x32xbf16>, vector<32x128xbf16>, vector<32x128xf32> -> vector<32x128xf32>
    %153 = arith.truncf %152 : vector<32x128xf32> to vector<32x128xbf16>
    %c128_120 = arith.constant 128 : index
    %c0_121 = arith.constant 0 : index
    %154 = vector.load %arg16[%c128_120, %c0_121] : memref<288x32xbf16, #tpu.memory_space<vmem>>, vector<32x32xbf16>
    %cst_122 = arith.constant dense<0.000000e+00> : vector<32x128xf32>
    %155 = tpu.matmul %154, %130, %cst_122 {dimension_numbers = #tpu.dot_dimension_numbers<[1], [0], [0], [1], [0, 0, 1, 1], [], []>} : vector<32x32xbf16>, vector<32x128xbf16>, vector<32x128xf32> -> vector<32x128xf32>
    %156 = arith.truncf %155 : vector<32x128xf32> to vector<32x128xbf16>
    %c160_123 = arith.constant 160 : index
    %c0_124 = arith.constant 0 : index
    %157 = vector.load %arg16[%c160_123, %c0_124] : memref<288x32xbf16, #tpu.memory_space<vmem>>, vector<32x32xbf16>
    %cst_125 = arith.constant dense<0.000000e+00> : vector<32x128xf32>
    %158 = tpu.matmul %157, %130, %cst_125 {dimension_numbers = #tpu.dot_dimension_numbers<[1], [0], [0], [1], [0, 0, 1, 1], [], []>} : vector<32x32xbf16>, vector<32x128xbf16>, vector<32x128xf32> -> vector<32x128xf32>
    %159 = arith.truncf %158 : vector<32x128xf32> to vector<32x128xbf16>
    %c192_126 = arith.constant 192 : index
    %c0_127 = arith.constant 0 : index
    %160 = vector.load %arg16[%c192_126, %c0_127] : memref<288x32xbf16, #tpu.memory_space<vmem>>, vector<32x32xbf16>
    %cst_128 = arith.constant dense<0.000000e+00> : vector<32x128xf32>
    %161 = tpu.matmul %160, %130, %cst_128 {dimension_numbers = #tpu.dot_dimension_numbers<[1], [0], [0], [1], [0, 0, 1, 1], [], []>} : vector<32x32xbf16>, vector<32x128xbf16>, vector<32x128xf32> -> vector<32x128xf32>
    %162 = arith.truncf %161 : vector<32x128xf32> to vector<32x128xbf16>
    %c224_129 = arith.constant 224 : index
    %c0_130 = arith.constant 0 : index
    %163 = vector.load %arg16[%c224_129, %c0_130] : memref<288x32xbf16, #tpu.memory_space<vmem>>, vector<32x32xbf16>
    %cst_131 = arith.constant dense<0.000000e+00> : vector<32x128xf32>
    %164 = tpu.matmul %163, %130, %cst_131 {dimension_numbers = #tpu.dot_dimension_numbers<[1], [0], [0], [1], [0, 0, 1, 1], [], []>} : vector<32x32xbf16>, vector<32x128xbf16>, vector<32x128xf32> -> vector<32x128xf32>
    %165 = arith.truncf %164 : vector<32x128xf32> to vector<32x128xbf16>
    %c256_132 = arith.constant 256 : index
    %c0_133 = arith.constant 0 : index
    %166 = vector.load %arg16[%c256_132, %c0_133] : memref<288x32xbf16, #tpu.memory_space<vmem>>, vector<32x32xbf16>
    %cst_134 = arith.constant dense<0.000000e+00> : vector<32x128xf32>
    %167 = tpu.matmul %166, %130, %cst_134 {dimension_numbers = #tpu.dot_dimension_numbers<[1], [0], [0], [1], [0, 0, 1, 1], [], []>} : vector<32x32xbf16>, vector<32x128xbf16>, vector<32x128xf32> -> vector<32x128xf32>
    %168 = arith.truncf %167 : vector<32x128xf32> to vector<32x128xbf16>
    %169 = tpu.concatenate %144, %147, %150, %153, %156, %159, %162, %165, %168 in 1 : vector<32x128xbf16>, vector<32x128xbf16>, vector<32x128xbf16>, vector<32x128xbf16>, vector<32x128xbf16>, vector<32x128xbf16>, vector<32x128xbf16>, vector<32x128xbf16>, vector<32x128xbf16> -> vector<32x1152xbf16>
    %c0_135 = arith.constant 0 : index
    %c0_136 = arith.constant 0 : index
    %170 = vector.load %arg17[%c0_135, %c0_136] : memref<1152x128xbf16, #tpu.memory_space<vmem>>, vector<1152x128xbf16>
    %cst_137 = arith.constant dense<0.000000e+00> : vector<32x128xf32>
    %171 = tpu.matmul %169, %170, %cst_137 {dimension_numbers = #tpu.dot_dimension_numbers<[1], [0], [0], [1], [0, 0, 1, 1], [], []>} : vector<32x1152xbf16>, vector<1152x128xbf16>, vector<32x128xf32> -> vector<32x128xf32>
    %c0_138 = arith.constant 0 : index
    %c0_139 = arith.constant 0 : index
    %172 = vector.load %arg18[%c0_138, %c0_139] : memref<2x128xf32, #tpu.memory_space<vmem>>, vector<1x128xf32>
    %173 = vector.broadcast %172 : vector<1x128xf32> to vector<32x128xf32>
    %174 = arith.mulf %171, %173 : vector<32x128xf32>
    %c1_140 = arith.constant 1 : index
    %c0_141 = arith.constant 0 : index
    %175 = vector.load %arg18[%c1_140, %c0_141] : memref<2x128xf32, #tpu.memory_space<vmem>>, vector<1x128xf32>
    %176 = vector.broadcast %175 : vector<1x128xf32> to vector<32x128xf32>
    %177 = arith.addf %174, %176 : vector<32x128xf32>
    %178 = arith.addf %177, %141 : vector<32x128xf32>
    %cst_142 = arith.constant 0.000000e+00 : f32
    %179 = vector.broadcast %cst_142 : f32 to vector<32x128xf32>
    %180 = arith.maximumf %178, %179 : vector<32x128xf32>
    %181 = arith.truncf %180 : vector<32x128xf32> to vector<32x128xbf16>
    %c0_143 = arith.constant 0 : index
    %c0_144 = arith.constant 0 : index
    %182 = vector.load %arg19[%c0_143, %c0_144] : memref<72x32xbf16, #tpu.memory_space<vmem>>, vector<8x32xbf16>
    %cst_145 = arith.constant dense<0.000000e+00> : vector<8x128xf32>
    %183 = tpu.matmul %182, %181, %cst_145 {dimension_numbers = #tpu.dot_dimension_numbers<[1], [0], [0], [1], [0, 0, 1, 1], [], []>} : vector<8x32xbf16>, vector<32x128xbf16>, vector<8x128xf32> -> vector<8x128xf32>
    %184 = arith.truncf %183 : vector<8x128xf32> to vector<8x128xbf16>
    %c8 = arith.constant 8 : index
    %c0_146 = arith.constant 0 : index
    %185 = vector.load %arg19[%c8, %c0_146] : memref<72x32xbf16, #tpu.memory_space<vmem>>, vector<8x32xbf16>
    %cst_147 = arith.constant dense<0.000000e+00> : vector<8x128xf32>
    %186 = tpu.matmul %185, %181, %cst_147 {dimension_numbers = #tpu.dot_dimension_numbers<[1], [0], [0], [1], [0, 0, 1, 1], [], []>} : vector<8x32xbf16>, vector<32x128xbf16>, vector<8x128xf32> -> vector<8x128xf32>
    %187 = arith.truncf %186 : vector<8x128xf32> to vector<8x128xbf16>
    %c16 = arith.constant 16 : index
    %c0_148 = arith.constant 0 : index
    %188 = vector.load %arg19[%c16, %c0_148] : memref<72x32xbf16, #tpu.memory_space<vmem>>, vector<8x32xbf16>
    %cst_149 = arith.constant dense<0.000000e+00> : vector<8x128xf32>
    %189 = tpu.matmul %188, %181, %cst_149 {dimension_numbers = #tpu.dot_dimension_numbers<[1], [0], [0], [1], [0, 0, 1, 1], [], []>} : vector<8x32xbf16>, vector<32x128xbf16>, vector<8x128xf32> -> vector<8x128xf32>
    %190 = arith.truncf %189 : vector<8x128xf32> to vector<8x128xbf16>
    %c24 = arith.constant 24 : index
    %c0_150 = arith.constant 0 : index
    %191 = vector.load %arg19[%c24, %c0_150] : memref<72x32xbf16, #tpu.memory_space<vmem>>, vector<8x32xbf16>
    %cst_151 = arith.constant dense<0.000000e+00> : vector<8x128xf32>
    %192 = tpu.matmul %191, %181, %cst_151 {dimension_numbers = #tpu.dot_dimension_numbers<[1], [0], [0], [1], [0, 0, 1, 1], [], []>} : vector<8x32xbf16>, vector<32x128xbf16>, vector<8x128xf32> -> vector<8x128xf32>
    %193 = arith.truncf %192 : vector<8x128xf32> to vector<8x128xbf16>
    %c32_152 = arith.constant 32 : index
    %c0_153 = arith.constant 0 : index
    %194 = vector.load %arg19[%c32_152, %c0_153] : memref<72x32xbf16, #tpu.memory_space<vmem>>, vector<8x32xbf16>
    %cst_154 = arith.constant dense<0.000000e+00> : vector<8x128xf32>
    %195 = tpu.matmul %194, %181, %cst_154 {dimension_numbers = #tpu.dot_dimension_numbers<[1], [0], [0], [1], [0, 0, 1, 1], [], []>} : vector<8x32xbf16>, vector<32x128xbf16>, vector<8x128xf32> -> vector<8x128xf32>
    %196 = arith.truncf %195 : vector<8x128xf32> to vector<8x128xbf16>
    %c40 = arith.constant 40 : index
    %c0_155 = arith.constant 0 : index
    %197 = vector.load %arg19[%c40, %c0_155] : memref<72x32xbf16, #tpu.memory_space<vmem>>, vector<8x32xbf16>
    %cst_156 = arith.constant dense<0.000000e+00> : vector<8x128xf32>
    %198 = tpu.matmul %197, %181, %cst_156 {dimension_numbers = #tpu.dot_dimension_numbers<[1], [0], [0], [1], [0, 0, 1, 1], [], []>} : vector<8x32xbf16>, vector<32x128xbf16>, vector<8x128xf32> -> vector<8x128xf32>
    %199 = arith.truncf %198 : vector<8x128xf32> to vector<8x128xbf16>
    %c48 = arith.constant 48 : index
    %c0_157 = arith.constant 0 : index
    %200 = vector.load %arg19[%c48, %c0_157] : memref<72x32xbf16, #tpu.memory_space<vmem>>, vector<8x32xbf16>
    %cst_158 = arith.constant dense<0.000000e+00> : vector<8x128xf32>
    %201 = tpu.matmul %200, %181, %cst_158 {dimension_numbers = #tpu.dot_dimension_numbers<[1], [0], [0], [1], [0, 0, 1, 1], [], []>} : vector<8x32xbf16>, vector<32x128xbf16>, vector<8x128xf32> -> vector<8x128xf32>
    %202 = arith.truncf %201 : vector<8x128xf32> to vector<8x128xbf16>
    %c56 = arith.constant 56 : index
    %c0_159 = arith.constant 0 : index
    %203 = vector.load %arg19[%c56, %c0_159] : memref<72x32xbf16, #tpu.memory_space<vmem>>, vector<8x32xbf16>
    %cst_160 = arith.constant dense<0.000000e+00> : vector<8x128xf32>
    %204 = tpu.matmul %203, %181, %cst_160 {dimension_numbers = #tpu.dot_dimension_numbers<[1], [0], [0], [1], [0, 0, 1, 1], [], []>} : vector<8x32xbf16>, vector<32x128xbf16>, vector<8x128xf32> -> vector<8x128xf32>
    %205 = arith.truncf %204 : vector<8x128xf32> to vector<8x128xbf16>
    %c64_161 = arith.constant 64 : index
    %c0_162 = arith.constant 0 : index
    %206 = vector.load %arg19[%c64_161, %c0_162] : memref<72x32xbf16, #tpu.memory_space<vmem>>, vector<8x32xbf16>
    %cst_163 = arith.constant dense<0.000000e+00> : vector<8x128xf32>
    %207 = tpu.matmul %206, %181, %cst_163 {dimension_numbers = #tpu.dot_dimension_numbers<[1], [0], [0], [1], [0, 0, 1, 1], [], []>} : vector<8x32xbf16>, vector<32x128xbf16>, vector<8x128xf32> -> vector<8x128xf32>
    %208 = arith.truncf %207 : vector<8x128xf32> to vector<8x128xbf16>
    %209 = tpu.concatenate %184, %187, %190, %193, %196, %199, %202, %205, %208 in 1 : vector<8x128xbf16>, vector<8x128xbf16>, vector<8x128xbf16>, vector<8x128xbf16>, vector<8x128xbf16>, vector<8x128xbf16>, vector<8x128xbf16>, vector<8x128xbf16>, vector<8x128xbf16> -> vector<8x1152xbf16>
    %c0_164 = arith.constant 0 : index
    %c0_165 = arith.constant 0 : index
    %210 = vector.load %arg20[%c0_164, %c0_165] : memref<1152x128xbf16, #tpu.memory_space<vmem>>, vector<1152x128xbf16>
    %cst_166 = arith.constant dense<0.000000e+00> : vector<8x128xf32>
    %211 = tpu.matmul %209, %210, %cst_166 {dimension_numbers = #tpu.dot_dimension_numbers<[1], [0], [0], [1], [0, 0, 1, 1], [], []>} : vector<8x1152xbf16>, vector<1152x128xbf16>, vector<8x128xf32> -> vector<8x128xf32>
    %c0_167 = arith.constant 0 : index
    %c0_168 = arith.constant 0 : index
    %212 = vector.load %arg21[%c0_167, %c0_168] : memref<2x128xf32, #tpu.memory_space<vmem>>, vector<1x128xf32>
    %213 = vector.broadcast %212 : vector<1x128xf32> to vector<8x128xf32>
    %214 = arith.mulf %211, %213 : vector<8x128xf32>
    %c1_169 = arith.constant 1 : index
    %c0_170 = arith.constant 0 : index
    %215 = vector.load %arg21[%c1_169, %c0_170] : memref<2x128xf32, #tpu.memory_space<vmem>>, vector<1x128xf32>
    %216 = vector.broadcast %215 : vector<1x128xf32> to vector<8x128xf32>
    %217 = arith.addf %214, %216 : vector<8x128xf32>
    %cst_171 = arith.constant 0.000000e+00 : f32
    %218 = vector.broadcast %cst_171 : f32 to vector<8x128xf32>
    %219 = arith.maximumf %217, %218 : vector<8x128xf32>
    %220 = arith.truncf %219 : vector<8x128xf32> to vector<8x128xbf16>
    %c0_172 = arith.constant 0 : index
    %c0_173 = arith.constant 0 : index
    %221 = vector.load %arg22[%c0_172, %c0_173] : memref<8x32xbf16, #tpu.memory_space<vmem>>, vector<8x32xbf16>
    %cst_174 = arith.constant dense<0.000000e+00> : vector<8x128xf32>
    %222 = tpu.matmul %221, %181, %cst_174 {dimension_numbers = #tpu.dot_dimension_numbers<[1], [0], [0], [1], [0, 0, 1, 1], [], []>} : vector<8x32xbf16>, vector<32x128xbf16>, vector<8x128xf32> -> vector<8x128xf32>
    %223 = arith.truncf %222 : vector<8x128xf32> to vector<8x128xbf16>
    %c0_175 = arith.constant 0 : index
    %c0_176 = arith.constant 0 : index
    %224 = vector.load %arg23[%c0_175, %c0_176] : memref<128x128xbf16, #tpu.memory_space<vmem>>, vector<128x128xbf16>
    %cst_177 = arith.constant dense<0.000000e+00> : vector<8x128xf32>
    %225 = tpu.matmul %223, %224, %cst_177 {dimension_numbers = #tpu.dot_dimension_numbers<[1], [0], [0], [1], [0, 0, 1, 1], [], []>} : vector<8x128xbf16>, vector<128x128xbf16>, vector<8x128xf32> -> vector<8x128xf32>
    %c0_178 = arith.constant 0 : index
    %c0_179 = arith.constant 0 : index
    %226 = vector.load %arg24[%c0_178, %c0_179] : memref<2x128xf32, #tpu.memory_space<vmem>>, vector<1x128xf32>
    %227 = vector.broadcast %226 : vector<1x128xf32> to vector<8x128xf32>
    %228 = arith.mulf %225, %227 : vector<8x128xf32>
    %c1_180 = arith.constant 1 : index
    %c0_181 = arith.constant 0 : index
    %229 = vector.load %arg24[%c1_180, %c0_181] : memref<2x128xf32, #tpu.memory_space<vmem>>, vector<1x128xf32>
    %230 = vector.broadcast %229 : vector<1x128xf32> to vector<8x128xf32>
    %231 = arith.addf %228, %230 : vector<8x128xf32>
    %c0_182 = arith.constant 0 : index
    %c0_183 = arith.constant 0 : index
    %232 = vector.load %arg25[%c0_182, %c0_183] : memref<72x8xbf16, #tpu.memory_space<vmem>>, vector<8x8xbf16>
    %cst_184 = arith.constant dense<0.000000e+00> : vector<8x128xf32>
    %233 = tpu.matmul %232, %220, %cst_184 {dimension_numbers = #tpu.dot_dimension_numbers<[1], [0], [0], [1], [0, 0, 1, 1], [], []>} : vector<8x8xbf16>, vector<8x128xbf16>, vector<8x128xf32> -> vector<8x128xf32>
    %234 = arith.truncf %233 : vector<8x128xf32> to vector<8x128xbf16>
    %c8_185 = arith.constant 8 : index
    %c0_186 = arith.constant 0 : index
    %235 = vector.load %arg25[%c8_185, %c0_186] : memref<72x8xbf16, #tpu.memory_space<vmem>>, vector<8x8xbf16>
    %cst_187 = arith.constant dense<0.000000e+00> : vector<8x128xf32>
    %236 = tpu.matmul %235, %220, %cst_187 {dimension_numbers = #tpu.dot_dimension_numbers<[1], [0], [0], [1], [0, 0, 1, 1], [], []>} : vector<8x8xbf16>, vector<8x128xbf16>, vector<8x128xf32> -> vector<8x128xf32>
    %237 = arith.truncf %236 : vector<8x128xf32> to vector<8x128xbf16>
    %c16_188 = arith.constant 16 : index
    %c0_189 = arith.constant 0 : index
    %238 = vector.load %arg25[%c16_188, %c0_189] : memref<72x8xbf16, #tpu.memory_space<vmem>>, vector<8x8xbf16>
    %cst_190 = arith.constant dense<0.000000e+00> : vector<8x128xf32>
    %239 = tpu.matmul %238, %220, %cst_190 {dimension_numbers = #tpu.dot_dimension_numbers<[1], [0], [0], [1], [0, 0, 1, 1], [], []>} : vector<8x8xbf16>, vector<8x128xbf16>, vector<8x128xf32> -> vector<8x128xf32>
    %240 = arith.truncf %239 : vector<8x128xf32> to vector<8x128xbf16>
    %c24_191 = arith.constant 24 : index
    %c0_192 = arith.constant 0 : index
    %241 = vector.load %arg25[%c24_191, %c0_192] : memref<72x8xbf16, #tpu.memory_space<vmem>>, vector<8x8xbf16>
    %cst_193 = arith.constant dense<0.000000e+00> : vector<8x128xf32>
    %242 = tpu.matmul %241, %220, %cst_193 {dimension_numbers = #tpu.dot_dimension_numbers<[1], [0], [0], [1], [0, 0, 1, 1], [], []>} : vector<8x8xbf16>, vector<8x128xbf16>, vector<8x128xf32> -> vector<8x128xf32>
    %243 = arith.truncf %242 : vector<8x128xf32> to vector<8x128xbf16>
    %c32_194 = arith.constant 32 : index
    %c0_195 = arith.constant 0 : index
    %244 = vector.load %arg25[%c32_194, %c0_195] : memref<72x8xbf16, #tpu.memory_space<vmem>>, vector<8x8xbf16>
    %cst_196 = arith.constant dense<0.000000e+00> : vector<8x128xf32>
    %245 = tpu.matmul %244, %220, %cst_196 {dimension_numbers = #tpu.dot_dimension_numbers<[1], [0], [0], [1], [0, 0, 1, 1], [], []>} : vector<8x8xbf16>, vector<8x128xbf16>, vector<8x128xf32> -> vector<8x128xf32>
    %246 = arith.truncf %245 : vector<8x128xf32> to vector<8x128xbf16>
    %c40_197 = arith.constant 40 : index
    %c0_198 = arith.constant 0 : index
    %247 = vector.load %arg25[%c40_197, %c0_198] : memref<72x8xbf16, #tpu.memory_space<vmem>>, vector<8x8xbf16>
    %cst_199 = arith.constant dense<0.000000e+00> : vector<8x128xf32>
    %248 = tpu.matmul %247, %220, %cst_199 {dimension_numbers = #tpu.dot_dimension_numbers<[1], [0], [0], [1], [0, 0, 1, 1], [], []>} : vector<8x8xbf16>, vector<8x128xbf16>, vector<8x128xf32> -> vector<8x128xf32>
    %249 = arith.truncf %248 : vector<8x128xf32> to vector<8x128xbf16>
    %c48_200 = arith.constant 48 : index
    %c0_201 = arith.constant 0 : index
    %250 = vector.load %arg25[%c48_200, %c0_201] : memref<72x8xbf16, #tpu.memory_space<vmem>>, vector<8x8xbf16>
    %cst_202 = arith.constant dense<0.000000e+00> : vector<8x128xf32>
    %251 = tpu.matmul %250, %220, %cst_202 {dimension_numbers = #tpu.dot_dimension_numbers<[1], [0], [0], [1], [0, 0, 1, 1], [], []>} : vector<8x8xbf16>, vector<8x128xbf16>, vector<8x128xf32> -> vector<8x128xf32>
    %252 = arith.truncf %251 : vector<8x128xf32> to vector<8x128xbf16>
    %c56_203 = arith.constant 56 : index
    %c0_204 = arith.constant 0 : index
    %253 = vector.load %arg25[%c56_203, %c0_204] : memref<72x8xbf16, #tpu.memory_space<vmem>>, vector<8x8xbf16>
    %cst_205 = arith.constant dense<0.000000e+00> : vector<8x128xf32>
    %254 = tpu.matmul %253, %220, %cst_205 {dimension_numbers = #tpu.dot_dimension_numbers<[1], [0], [0], [1], [0, 0, 1, 1], [], []>} : vector<8x8xbf16>, vector<8x128xbf16>, vector<8x128xf32> -> vector<8x128xf32>
    %255 = arith.truncf %254 : vector<8x128xf32> to vector<8x128xbf16>
    %c64_206 = arith.constant 64 : index
    %c0_207 = arith.constant 0 : index
    %256 = vector.load %arg25[%c64_206, %c0_207] : memref<72x8xbf16, #tpu.memory_space<vmem>>, vector<8x8xbf16>
    %cst_208 = arith.constant dense<0.000000e+00> : vector<8x128xf32>
    %257 = tpu.matmul %256, %220, %cst_208 {dimension_numbers = #tpu.dot_dimension_numbers<[1], [0], [0], [1], [0, 0, 1, 1], [], []>} : vector<8x8xbf16>, vector<8x128xbf16>, vector<8x128xf32> -> vector<8x128xf32>
    %258 = arith.truncf %257 : vector<8x128xf32> to vector<8x128xbf16>
    %259 = tpu.concatenate %234, %237, %240, %243, %246, %249, %252, %255, %258 in 1 : vector<8x128xbf16>, vector<8x128xbf16>, vector<8x128xbf16>, vector<8x128xbf16>, vector<8x128xbf16>, vector<8x128xbf16>, vector<8x128xbf16>, vector<8x128xbf16>, vector<8x128xbf16> -> vector<8x1152xbf16>
    %c0_209 = arith.constant 0 : index
    %c0_210 = arith.constant 0 : index
    %260 = vector.load %arg26[%c0_209, %c0_210] : memref<1152x128xbf16, #tpu.memory_space<vmem>>, vector<1152x128xbf16>
    %cst_211 = arith.constant dense<0.000000e+00> : vector<8x128xf32>
    %261 = tpu.matmul %259, %260, %cst_211 {dimension_numbers = #tpu.dot_dimension_numbers<[1], [0], [0], [1], [0, 0, 1, 1], [], []>} : vector<8x1152xbf16>, vector<1152x128xbf16>, vector<8x128xf32> -> vector<8x128xf32>
    %c0_212 = arith.constant 0 : index
    %c0_213 = arith.constant 0 : index
    %262 = vector.load %arg27[%c0_212, %c0_213] : memref<2x128xf32, #tpu.memory_space<vmem>>, vector<1x128xf32>
    %263 = vector.broadcast %262 : vector<1x128xf32> to vector<8x128xf32>
    %264 = arith.mulf %261, %263 : vector<8x128xf32>
    %c1_214 = arith.constant 1 : index
    %c0_215 = arith.constant 0 : index
    %265 = vector.load %arg27[%c1_214, %c0_215] : memref<2x128xf32, #tpu.memory_space<vmem>>, vector<1x128xf32>
    %266 = vector.broadcast %265 : vector<1x128xf32> to vector<8x128xf32>
    %267 = arith.addf %264, %266 : vector<8x128xf32>
    %268 = arith.addf %267, %231 : vector<8x128xf32>
    %cst_216 = arith.constant 0.000000e+00 : f32
    %269 = vector.broadcast %cst_216 : f32 to vector<8x128xf32>
    %270 = arith.maximumf %268, %269 : vector<8x128xf32>
    %271 = arith.truncf %270 : vector<8x128xf32> to vector<8x128xbf16>
    %c0_217 = arith.constant 0 : index
    %c0_218 = arith.constant 0 : index
    %272 = vector.load %arg28[%c0_217, %c0_218] : memref<2x8xbf16, #tpu.memory_space<vmem>>, vector<2x8xbf16>
    %cst_219 = arith.constant dense<0.000000e+00> : vector<2x128xf32>
    %273 = tpu.matmul %272, %271, %cst_219 {dimension_numbers = #tpu.dot_dimension_numbers<[1], [0], [0], [1], [0, 0, 1, 1], [], []>} : vector<2x8xbf16>, vector<8x128xbf16>, vector<2x128xf32> -> vector<2x128xf32>
    %274 = arith.truncf %273 : vector<2x128xf32> to vector<2x128xbf16>
    %c0_220 = arith.constant 0 : index
    %c0_221 = arith.constant 0 : index
    %275 = vector.load %arg29[%c0_220, %c0_221] : memref<128x128xbf16, #tpu.memory_space<vmem>>, vector<128x128xbf16>
    %cst_222 = arith.constant dense<0.000000e+00> : vector<2x128xf32>
    %276 = tpu.matmul %274, %275, %cst_222 {dimension_numbers = #tpu.dot_dimension_numbers<[1], [0], [0], [1], [0, 0, 1, 1], [], []>} : vector<2x128xbf16>, vector<128x128xbf16>, vector<2x128xf32> -> vector<2x128xf32>
    %c0_223 = arith.constant 0 : index
    %c0_224 = arith.constant 0 : index
    %277 = vector.load %arg30[%c0_223, %c0_224] : memref<1x128xf32, #tpu.memory_space<vmem>>, vector<1x128xf32>
    %278 = vector.broadcast %277 : vector<1x128xf32> to vector<2x128xf32>
    %279 = arith.addf %276, %278 : vector<2x128xf32>
    %c0_225 = arith.constant 0 : index
    %c0_226 = arith.constant 0 : index
    %280 = vector.load %arg31[%c0_225, %c0_226] : memref<2x128xf32, #tpu.memory_space<vmem>>, vector<2x128xf32>
    tpu.vector_store %arg31[%c0_225, %c0_226], %279 {strides = array<i32>} : memref<2x128xf32, #tpu.memory_space<vmem>>, vector<2x128xf32>,
    return
  }
  func.func @transform_0(%arg0: i32) -> (i32, i32) {
    %c0_i32 = arith.constant 0 : i32
    %c0_i32_0 = arith.constant 0 : i32
    %c0_i32_1 = arith.constant 0 : i32
    return %c0_i32, %c0_i32_0 : i32, i32
  }
  func.func @transform_1(%arg0: i32) -> (i32, i32) {
    %c0_i32 = arith.constant 0 : i32
    %c0_i32_0 = arith.constant 0 : i32
    %c0_i32_1 = arith.constant 0 : i32
    return %c0_i32, %c0_i32_0 : i32, i32
  }
  func.func @transform_2(%arg0: i32) -> (i32, i32) {
    %c0_i32 = arith.constant 0 : i32
    %c0_i32_0 = arith.constant 0 : i32
    %c0_i32_1 = arith.constant 0 : i32
    return %c0_i32, %c0_i32_0 : i32, i32
  }
  func.func @transform_3(%arg0: i32) -> (i32, i32) {
    %c0_i32 = arith.constant 0 : i32
    %c0_i32_0 = arith.constant 0 : i32
    %c0_i32_1 = arith.constant 0 : i32
    return %c0_i32, %c0_i32_0 : i32, i32
  }
  func.func @transform_4(%arg0: i32) -> (i32, i32) {
    %c0_i32 = arith.constant 0 : i32
    %c0_i32_0 = arith.constant 0 : i32
    %c0_i32_1 = arith.constant 0 : i32
    return %c0_i32, %c0_i32_0 : i32, i32
  }
  func.func @transform_5(%arg0: i32) -> (i32, i32) {
    %c0_i32 = arith.constant 0 : i32
    %c0_i32_0 = arith.constant 0 : i32
    %c0_i32_1 = arith.constant 0 : i32
    return %c0_i32, %c0_i32_0 : i32, i32
  }
  func.func @transform_6(%arg0: i32) -> (i32, i32) {
    %c0_i32 = arith.constant 0 : i32
    %c0_i32_0 = arith.constant 0 : i32
    %c0_i32_1 = arith.constant 0 : i32
    return %c0_i32, %c0_i32_0 : i32, i32
  }
  func.func @transform_7(%arg0: i32) -> (i32, i32) {
    %c0_i32 = arith.constant 0 : i32
    %c0_i32_0 = arith.constant 0 : i32
    %c0_i32_1 = arith.constant 0 : i32
    return %c0_i32, %c0_i32_0 : i32, i32
  }
  func.func @transform_8(%arg0: i32) -> (i32, i32) {
    %c0_i32 = arith.constant 0 : i32
    %c0_i32_0 = arith.constant 0 : i32
    %c0_i32_1 = arith.constant 0 : i32
    return %c0_i32, %c0_i32_0 : i32, i32
  }
  func.func @transform_9(%arg0: i32) -> (i32, i32) {
    %c0_i32 = arith.constant 0 : i32
    %c0_i32_0 = arith.constant 0 : i32
    %c0_i32_1 = arith.constant 0 : i32
    return %c0_i32, %c0_i32_0 : i32, i32
  }
  func.func @transform_10(%arg0: i32) -> (i32, i32) {
    %c0_i32 = arith.constant 0 : i32
    %c0_i32_0 = arith.constant 0 : i32
    %c0_i32_1 = arith.constant 0 : i32
    return %c0_i32, %c0_i32_0 : i32, i32
  }
  func.func @transform_11(%arg0: i32) -> (i32, i32) {
    %c0_i32 = arith.constant 0 : i32
    %c0_i32_0 = arith.constant 0 : i32
    %c0_i32_1 = arith.constant 0 : i32
    return %c0_i32, %c0_i32_0 : i32, i32
  }
  func.func @transform_12(%arg0: i32) -> (i32, i32) {
    %c0_i32 = arith.constant 0 : i32
    %c0_i32_0 = arith.constant 0 : i32
    %c0_i32_1 = arith.constant 0 : i32
    return %c0_i32, %c0_i32_0 : i32, i32
  }
  func.func @transform_13(%arg0: i32) -> (i32, i32) {
    %c0_i32 = arith.constant 0 : i32
    %c0_i32_0 = arith.constant 0 : i32
    %c0_i32_1 = arith.constant 0 : i32
    return %c0_i32, %c0_i32_0 : i32, i32
  }
  func.func @transform_14(%arg0: i32) -> (i32, i32) {
    %c0_i32 = arith.constant 0 : i32
    %c0_i32_0 = arith.constant 0 : i32
    %c0_i32_1 = arith.constant 0 : i32
    return %c0_i32, %c0_i32_0 : i32, i32
  }
  func.func @transform_15(%arg0: i32) -> (i32, i32) {
    %c0_i32 = arith.constant 0 : i32
    %c0_i32_0 = arith.constant 0 : i32
    %c0_i32_1 = arith.constant 0 : i32
    return %c0_i32, %c0_i32_0 : i32, i32
  }
  func.func @transform_16(%arg0: i32) -> (i32, i32) {
    %c0_i32 = arith.constant 0 : i32
    %c0_i32_0 = arith.constant 0 : i32
    %c0_i32_1 = arith.constant 0 : i32
    return %c0_i32, %c0_i32_0 : i32, i32
  }
  func.func @transform_17(%arg0: i32) -> (i32, i32) {
    %c0_i32 = arith.constant 0 : i32
    %c0_i32_0 = arith.constant 0 : i32
    %c0_i32_1 = arith.constant 0 : i32
    return %c0_i32, %c0_i32_0 : i32, i32
  }
  func.func @transform_18(%arg0: i32) -> (i32, i32) {
    %c0_i32 = arith.constant 0 : i32
    %c0_i32_0 = arith.constant 0 : i32
    %c0_i32_1 = arith.constant 0 : i32
    return %c0_i32, %c0_i32_0 : i32, i32
  }
  func.func @transform_19(%arg0: i32) -> (i32, i32) {
    %c0_i32 = arith.constant 0 : i32
    %c0_i32_0 = arith.constant 0 : i32
    %c0_i32_1 = arith.constant 0 : i32
    return %c0_i32, %c0_i32_0 : i32, i32
  }
  func.func @transform_20(%arg0: i32) -> (i32, i32) {
    %c0_i32 = arith.constant 0 : i32
    %c0_i32_0 = arith.constant 0 : i32
    %c0_i32_1 = arith.constant 0 : i32
    return %c0_i32, %c0_i32_0 : i32, i32
  }
  func.func @transform_21(%arg0: i32) -> (i32, i32) {
    %c0_i32 = arith.constant 0 : i32
    %c0_i32_0 = arith.constant 0 : i32
    %c0_i32_1 = arith.constant 0 : i32
    return %c0_i32, %c0_i32_0 : i32, i32
  }
  func.func @transform_22(%arg0: i32) -> (i32, i32) {
    %c0_i32 = arith.constant 0 : i32
    %c0_i32_0 = arith.constant 0 : i32
    %c0_i32_1 = arith.constant 0 : i32
    return %c0_i32, %c0_i32_0 : i32, i32
  }
  func.func @transform_23(%arg0: i32) -> (i32, i32) {
    %c0_i32 = arith.constant 0 : i32
    %c0_i32_0 = arith.constant 0 : i32
    %c0_i32_1 = arith.constant 0 : i32
    return %c0_i32, %c0_i32_0 : i32, i32
  }
  func.func @transform_24(%arg0: i32) -> (i32, i32) {
    %c0_i32 = arith.constant 0 : i32
    %c0_i32_0 = arith.constant 0 : i32
    %c0_i32_1 = arith.constant 0 : i32
    return %c0_i32, %c0_i32_0 : i32, i32
  }
  func.func @transform_25(%arg0: i32) -> (i32, i32) {
    %c0_i32 = arith.constant 0 : i32
    %c0_i32_0 = arith.constant 0 : i32
    %c0_i32_1 = arith.constant 0 : i32
    return %c0_i32, %c0_i32_0 : i32, i32
  }
  func.func @transform_26(%arg0: i32) -> (i32, i32) {
    %c0_i32 = arith.constant 0 : i32
    %c0_i32_0 = arith.constant 0 : i32
    %c0_i32_1 = arith.constant 0 : i32
    return %c0_i32, %c0_i32_0 : i32, i32
  }
  func.func @transform_27(%arg0: i32) -> (i32, i32) {
    %c0_i32 = arith.constant 0 : i32
    %c0_i32_0 = arith.constant 0 : i32
    %c0_i32_1 = arith.constant 0 : i32
    return %c0_i32, %c0_i32_0 : i32, i32
  }
  func.func @transform_28(%arg0: i32) -> (i32, i32) {
    %c0_i32 = arith.constant 0 : i32
    %c0_i32_0 = arith.constant 0 : i32
    %c0_i32_1 = arith.constant 0 : i32
    return %c0_i32, %c0_i32_0 : i32, i32
  }
  func.func @transform_29(%arg0: i32) -> (i32, i32) {
    %c0_i32 = arith.constant 0 : i32
    %c0_i32_0 = arith.constant 0 : i32
    %c0_i32_1 = arith.constant 0 : i32
    return %c0_i32, %c0_i32_0 : i32, i32
  }
  func.func @transform_30(%arg0: i32) -> (i32, i32) {
    %c0_i32 = arith.constant 0 : i32
    %c0_i32_0 = arith.constant 0 : i32
    %c0_i32_1 = arith.constant 0 : i32
    return %c0_i32, %c0_i32_0 : i32, i32
  }
}

</mosaic_0001>

<bundles_post_ra>
// kernel: forward.1
= control target key start
LH: loop header
LB: loop body
LE: loop exit
PB: predicated region body
PF: predicated region fallthrough
CT: control target
= control target key end

     0   :  { %s13755_s6 = smov 1   ;;  %s13756_s10 = smov 2   ;;  %s16978_s0 = inlined_call_operand.smem [shape: u32[31], index: -1, kind: input, shape index: {}] }
   0x1   :  { %s13794_s5 = sld [smem:[%s16978_s0]]   ;;  %s13757_s14 = smov 3  }
   0x2   :  { %s13799_s9 = sld [smem:[%s16978_s0 + %s13755_s6]]   ;;  %s13758_s18 = smov 4  }
   0x3   :  { %s13804_s13 = sld [smem:[%s16978_s0 + %s13756_s10]]   ;;  %s13759_s22 = smov 5  }
   0x4   :  { %s13809_s17 = sld [smem:[%s16978_s0 + %s13757_s14]]   ;;  %s13760_s26 = smov 6  }
   0x5   :  { %s13814_s21 = sld [smem:[%s16978_s0 + %s13758_s18]]   ;;  %s13761_s30 = smov 7  }
   0x6   :  { %s13819_s25 = sld [smem:[%s16978_s0 + %s13759_s22]]   ;;  %s13762_s4 = smov 8  }
   0x7   :  { %s13824_s29 = sld [smem:[%s16978_s0 + %s13760_s26]]   ;;  %s13763_s10 = smov 9  }
   0x8   :  { %s13829_s3 = sld [smem:[%s16978_s0 + %s13761_s30]]   ;;  %s13764_s15 = smov 10  }
   0x9   :  { %s13834_s8 = sld [smem:[%s16978_s0 + %s13762_s4]]   ;;  %s13765_s20 = smov 11  }
   0xa   :  { %s13839_s14 = sld [smem:[%s16978_s0 + %s13763_s10]]   ;;  %s13766_s26 = smov 12  }
   0xb   :  { %s13844_s19 = sld [smem:[%s16978_s0 + %s13764_s15]]   ;;  %s13767_s1 = smov 13  }
   0xc   :  { %s13849_s24 = sld [smem:[%s16978_s0 + %s13765_s20]]   ;;  %s13768_s7 = smov 14  }
   0xd   :  { %s13854_s30 = sld [smem:[%s16978_s0 + %s13766_s26]]   ;;  %s13769_s15 = smov 15  }
   0xe   :  { %s13859_s6 = sld [smem:[%s16978_s0 + %s13767_s1]]   ;;  %s13770_s22 = smov 16  }
   0xf   :  { %s13864_s12 = sld [smem:[%s16978_s0 + %s13768_s7]]   ;;  %s13771_s28 = smov 17  }
  0x10   :  { %s13869_s20 = sld [smem:[%s16978_s0 + %s13769_s15]]   ;;  %s13772_s7 = smov 18  }
  0x11   :  { %s13874_s27 = sld [smem:[%s16978_s0 + %s13770_s22]]   ;;  %s13773_s15 = smov 19  }
  0x12   :  { %s13879_s4 = sld [smem:[%s16978_s0 + %s13771_s28]]   ;;  %s13774_s22 = smov 20  }
  0x13   :  { %s13775_s28 = smov 21  }
  0x15   :  { %17065 = sst [smem:[#allocation5_spill]] %s13864_s12 }
  0x16   :  { %17066 = sst [smem:[#allocation6_spill]] %s13869_s20 }
  0x17   :  { %17067 = sst [smem:[#allocation7_spill]] %s13874_s27 }
  0x18   :  { %17068 = sst [smem:[#allocation8_spill]] %s13879_s4 }
  0x19   :  { %s13884_s12 = sld [smem:[%s16978_s0 + %s13772_s7]]   ;;  %s13776_s7 = smov 22  }
  0x1a   :  { %s13889_s20 = sld [smem:[%s16978_s0 + %s13773_s15]]   ;;  %s13777_s15 = smov 23  }
  0x1b   :  { %s13894_s27 = sld [smem:[%s16978_s0 + %s13774_s22]]   ;;  %s13778_s22 = smov 24  }
  0x1c   :  { %s13899_s4 = sld [smem:[%s16978_s0 + %s13775_s28]]   ;;  %s13779_s28 = smov 25  }
  0x1f   :  { %17069 = sst [smem:[#allocation9_spill]] %s13884_s12 }
  0x20   :  { %17070 = sst [smem:[#allocation10_spill]] %s13889_s20 }
  0x21   :  { %17071 = sst [smem:[#allocation11_spill]] %s13894_s27 }
  0x22   :  { %17072 = sst [smem:[#allocation12_spill]] %s13899_s4 }
  0x23   :  { %s13904_s12 = sld [smem:[%s16978_s0 + %s13776_s7]]   ;;  %s13780_s7 = smov 26  }
  0x24   :  { %s13909_s20 = sld [smem:[%s16978_s0 + %s13777_s15]]   ;;  %s13781_s15 = smov 27  }
  0x25   :  { %s13914_s27 = sld [smem:[%s16978_s0 + %s13778_s22]]   ;;  %s13782_s22 = smov 28  }
  0x26   :  { %s13919_s4 = sld [smem:[%s16978_s0 + %s13779_s28]]   ;;  %s13783_s28 = smov 29  }
  0x29   :  { %17073 = sst [smem:[#allocation13_spill]] %s13904_s12 }
  0x2a   :  { %17074 = sst [smem:[#allocation14_spill]] %s13909_s20 }
  0x2b   :  { %17075 = sst [smem:[#allocation15_spill]] %s13914_s27 }
  0x2c   :  { %17076 = sst [smem:[#allocation16_spill]] %s13919_s4 }
  0x2d   :  { %s13924_s12 = sld [smem:[%s16978_s0 + %s13780_s7]]   ;;  %s13784_s7 = smov 30  }
  0x2e   :  { %s13929_s20 = sld [smem:[%s16978_s0 + %s13781_s15]]  }
  0x2f   :  { %s13934_s27 = sld [smem:[%s16978_s0 + %s13782_s22]]  }
  0x30   :  { %s13939_s4 = sld [smem:[%s16978_s0 + %s13783_s28]]  }
  0x33   :  { %17077 = sst [smem:[#allocation17_spill]] %s13924_s12 }
  0x34   :  { %s13944_s12 = sld [smem:[%s16978_s0 + %s13784_s7]]  }
  0x35   :  { %v13038_v0 = vld [vmem:[%s13799_s9 + $0x18] sm:$0xff]  ;;  %v13037_v1 = vld [vmem:[%s13799_s9 + $0x10] sm:$0xff]  ;;  %v13036_v2 = vld [vmem:[%s13799_s9 + $0x8] sm:$0xff] }
  0x36   :  { %245 = vmatpush.bf16.msra.mxu0 %v13038_v0 }
  0x3a   :  { %246 = vmatpush.bf16.msra.mxu0 %v13037_v1 }
  0x3b   :  { %66 = vsyncpa [#allocation3], 0  ;;  %v13035_v3 = vld [vmem:[%s13799_s9] sm:$0xff]  ;;  %vm216_vm0 = vcmask 523264   ;;  %v13028_v5 = vld [vmem:[%s13794_s5 + $0x8] sm:$0xff]  ;;  %s17394_s0 = sld [smem:[#allocation6_spill]] }
  0x3c   :  { %v13027_v4 = vld [vmem:[%s13794_s5] sm:$0xff]  ;;  %v13029_v6 = vld [vmem:[%s13794_s5 + $0x10] sm:$0xff]  ;;  %v13030_v7 = vld [vmem:[%s13794_s5 + $0x18] sm:$0xff]  ;;  %vm7148_vm1 = vcmask 261120   ;;  %s17396_s9 = sld [smem:[#allocation5_spill]]  ;;  %vm9368_vm2 = vcmask 1043456  }
  0x3d   :  { %v13031_v8 = vld [vmem:[%s13794_s5 + $0x20] sm:$0xff]  ;;  %v13032_v9 = vld [vmem:[%s13794_s5 + $0x28] sm:$0xff]  ;;  %v13033_v10 = vld [vmem:[%s13794_s5 + $0x30] sm:$0xff]  ;;  %vm9364_vm3 = vcmask 64512   ;;  %s10342_s15 = sshll.u32 %s13944_s12, 4  ;;  %s10343_s15 = int_to_ptr.hbm [resolvable:$true] %s10342_s15 }
  0x3e   :  { %247 = vmatpush.bf16.msra.mxu0 %v13036_v2  ;;  %v13034_v11 = vld [vmem:[%s13794_s5 + $0x38] sm:$0xff]  ;;  %v13965_v26 = vld [vmem:[%s13804_s13] ss:$0 sm:$0xff]  ;;  %v13969_v29 = vld [vmem:[%s13804_s13 + $0x1] ss:$0 sm:$0xff]  ;;  %s17395_s5 = sld [smem:[#allocation7_spill]] }
  0x3f   :  { %s17397_s13 = sld [smem:[#allocation8_spill]] }
  0x42   :  { %248 = vmatpush.bf16.msra.mxu0 %v13035_v3 }
  0x45   :  { %10429 = vmatmul.msk.bf16.vlgmr.msra.gmra.mxu0 %vm216_vm0, %v13027_v4 }
  0x55   :  { %10430 = vmatmul.msk.bf16.gmra.mxu0 %vm216_vm0, %v13028_v5 }
  0x65   :  { %10431 = vmatmul.msk.bf16.gmra.mxu0 %vm216_vm0, %v13029_v6 }
  0x75   :  { %10432 = vmatmul.msk.bf16.gmra.mxu0 %vm216_vm0, %v13030_v7 }
  0x85   :  { %10433 = vmatmul.msk.bf16.gmra.mxu0 %vm216_vm0, %v13031_v8 }
  0x95   :  { %10434 = vmatmul.msk.bf16.gmra.mxu0 %vm216_vm0, %v13032_v9 }
  0xa5   :  { %10435 = vmatmul.msk.bf16.gmra.mxu0 %vm216_vm0, %v13033_v10 }
  0xb5   :  { %10436 = vmatmul.msk.bf16.gmra.mxu0 %vm216_vm0, %v13034_v11 }
  0xc2   :  { %v13958_v12 = vpop.f32.mrf.mxu0 }
  0xca   :  { %v13960_v13 = vpop.f32.mrf.mxu0 }
  0xd2   :  { %v13962_v14 = vpop.f32.mrf.mxu0 }
  0xda   :  { %v257_v15 = vpop.f32.mrf.mxu0 }
  0xdb   :  { %v295_v7 = vmul.f32 %v13965_v26, %v257_v15 }
  0xe2   :  { %v260_v16 = vpop.f32.mrf.mxu0 }
  0xe3   :  { %v296_v2 = vmul.f32 %v13965_v26, %v260_v16 }
  0xea   :  { %v262_v17 = vpop.f32.mrf.mxu0 }
  0xeb   :  { %v297_v60 = vmul.f32 %v13965_v26, %v262_v17  ;;  %v294_v17 = vmul.f32 %v13965_v26, %v13962_v14 }
  0xed   :  { %v315_v8 = vadd.f32 %v13969_v29, %v297_v60  ;;  %v13055_v60 = vld [vmem:[%s13809_s17 + $0x80] sm:$0xff] }
  0xef   :  { %v331_v14 = vmax.f32 %v315_v8, 0.0  ;;  %v13065_v8 = vld [vmem:[%s13809_s17 + $0xd0] sm:$0xff] }
  0xf2   :  { %v265_v18 = vpop.f32.mrf.mxu0 }
  0xf3   :  { %v298_v54 = vmul.f32 %v13965_v26, %v265_v18  ;;  %v314_v18 = vadd.f32 %v13969_v29, %v296_v2  ;;  %v13056_v2 = vld [vmem:[%s13809_s17 + $0x88] sm:$0xff] }
  0xf5   :  { %v316_v3 = vadd.f32 %v13969_v29, %v298_v54 }
  0xfa   :  { %v267_v19 = vpop.f32.mrf.mxu0 }
  0xfb   :  { %v299_v49 = vmul.f32 %v13965_v26, %v267_v19  ;;  %v332_v19 = vmax.f32 %v316_v3, 0.0  ;;  %v13064_v3 = vld [vmem:[%s13809_s17 + $0xc8] sm:$0xff] }
  0xfd   :  { %v317_v61 = vadd.f32 %v13969_v29, %v299_v49 }
  0xff   :  { %v333_v9 = vmax.f32 %v317_v61, 0.0  ;;  %v13063_v61 = vld [vmem:[%s13809_s17 + $0xc0] sm:$0xff] }
 0x102   :  { %v270_v20 = vpop.f32.mrf.mxu0 }
 0x103   :  { %v300_v44 = vmul.f32 %v13965_v26, %v270_v20 }
 0x105   :  { %v318_v55 = vadd.f32 %v13969_v29, %v300_v44 }
 0x107   :  { %v334_v4 = vmax.f32 %v318_v55, 0.0 }
 0x109   :  { %v14024_v15 = vpack.c.bf16 %v334_v4, %v334_v4  ;;  %v13049_v4 = vld [vmem:[%s13809_s17 + $0x50] sm:$0xff] }
 0x10a   :  { %v272_v21 = vpop.f32.mrf.mxu0 }
 0x10b   :  { %v301_v40 = vmul.f32 %v13965_v26, %v272_v21  ;;  %17085 = vst [vmem:[#allocation25_spill] sm:$0xff] %v14024_v15  ;;  %v293_v21 = vmul.f32 %v13965_v26, %v13960_v13  ;;  %v14042_v13 = vpack.c.bf16 %v332_v19, %v332_v19  ;;  %v13059_v19 = vld [vmem:[%s13809_s17 + $0xa0] sm:$0xff] }
 0x10d   :  { %v319_v50 = vadd.f32 %v13969_v29, %v301_v40  ;;  %17087 = vst [vmem:[#allocation27_spill] sm:$0xff] %v14042_v13 }
 0x10f   :  { %v335_v62 = vmax.f32 %v319_v50, 0.0 }
 0x111   :  { %v14016_v10 = vpack.c.bf16 %v335_v62, %v335_v62  ;;  %v13040_v62 = vld [vmem:[%s13809_s17 + $0x8] sm:$0xff] }
 0x112   :  { %v275_v22 = vpop.f32.mrf.mxu0 }
 0x113   :  { %v302_v36 = vmul.f32 %v13965_v26, %v275_v22  ;;  %17084 = vst [vmem:[#allocation24_spill] sm:$0xff] %v14016_v10  ;;  %v313_v22 = vadd.f32 %v13969_v29, %v295_v7  ;;  %v13057_v7 = vld [vmem:[%s13809_s17 + $0x90] sm:$0xff] }
 0x115   :  { %v320_v45 = vadd.f32 %v13969_v29, %v302_v36 }
 0x117   :  { %v336_v56 = vmax.f32 %v320_v45, 0.0 }
 0x119   :  { %v14007_v5 = vpack.c.bf16 %v336_v56, %v336_v56 }
 0x11a   :  { %v277_v23 = vpop.f32.mrf.mxu0 }
 0x11b   :  { %v303_v33 = vmul.f32 %v13965_v26, %v277_v23  ;;  %17083 = vst [vmem:[#allocation23_spill] sm:$0xff] %v14007_v5  ;;  %v448_v20 = vunpack.c.l.b16 %v14007_v5  ;;  %v14034_v23 = vpack.c.bf16 %v333_v9, %v333_v9  ;;  %v13042_v9 = vld [vmem:[%s13809_s17 + $0x18] sm:$0xff] }
 0x11d   :  { %v321_v41 = vadd.f32 %v13969_v29, %v303_v33  ;;  %17086 = vst [vmem:[#allocation26_spill] sm:$0xff] %v14034_v23  ;;  %v329_v33 = vmax.f32 %v313_v22, 0.0  ;;  %v13044_v22 = vld [vmem:[%s13809_s17 + $0x28] sm:$0xff] }
 0x11f   :  { %v337_v51 = vmax.f32 %v321_v41, 0.0  ;;  %v14063_v40 = vpack.c.bf16 %v329_v33, %v329_v33  ;;  %v13062_v33 = vld [vmem:[%s13809_s17 + $0xb8] sm:$0xff] }
 0x121   :  { %v14000_v63 = vpack.c.bf16 %v337_v51, %v337_v51  ;;  %17090 = vst [vmem:[#allocation30_spill] sm:$0xff] %v14063_v40 }
 0x122   :  { %v280_v24 = vpop.f32.mrf.mxu0 }
 0x123   :  { %v304_v31 = vmul.f32 %v13965_v26, %v280_v24  ;;  %17082 = vst [vmem:[#allocation22_spill] sm:$0xff] %v14000_v63  ;;  %v449_v11 = vunpack.c.l.b16 %v14000_v63  ;;  %v447_v24 = vunpack.c.l.b16 %v14016_v10  ;;  %v13100_v63 = vld [vmem:[%s13809_s17 + $0x1e8] sm:$0xff]  ;;  %v13129_v10 = vld [vmem:[%s13814_s21 + $0x90] sm:$0xff] }
 0x125   :  { %v322_v37 = vadd.f32 %v13969_v29, %v304_v31  ;;  %v446_v31 = vunpack.c.l.b16 %v14024_v15 }
 0x127   :  { %v338_v46 = vmax.f32 %v322_v37, 0.0 }
 0x129   :  { %v13994_v57 = vpack.c.bf16 %v338_v46, %v338_v46  ;;  %v441_v46 = vunpack.c.l.b16 %v14063_v40 }
 0x12a   :  { %v282_v25 = vpop.f32.mrf.mxu0 }
 0x12b   :  { %v305_v30 = vmul.f32 %v13965_v26, %v282_v25  ;;  %17081 = vst [vmem:[#allocation21_spill] sm:$0xff] %v13994_v57  ;;  %v450_v6 = vunpack.c.l.b16 %v13994_v57  ;;  %v14037_v25 = vpack.c.b16 %v449_v11, %v448_v20  ;;  %v13058_v11 = vld [vmem:[%s13809_s17 + $0x98] sm:$0xff]  ;;  %v13067_v20 = vld [vmem:[%s13809_s17 + $0xe0] sm:$0xff] }
 0x12c   :  { %v13131_v57 = vld [vmem:[%s13814_s21 + $0xa0] sm:$0xff] }
 0x12d   :  { %v323_v34 = vadd.f32 %v13969_v29, %v305_v30  ;;  %v330_v30 = vmax.f32 %v314_v18, 0.0  ;;  %v13043_v18 = vld [vmem:[%s13809_s17 + $0x20] sm:$0xff] }
 0x12f   :  { %v339_v42 = vmax.f32 %v323_v34, 0.0  ;;  %v14050_v34 = vpack.c.bf16 %v331_v14, %v331_v14  ;;  %v14056_v37 = vpack.c.bf16 %v330_v30, %v330_v30  ;;  %v13060_v14 = vld [vmem:[%s13809_s17 + $0xa8] sm:$0xff]  ;;  %v13069_v30 = vld [vmem:[%s13809_s17 + $0xf0] sm:$0xff] }
 0x131   :  { %v13988_v52 = vpack.c.bf16 %v339_v42, %v339_v42  ;;  %17088 = vst [vmem:[#allocation28_spill] sm:$0xff] %v14050_v34  ;;  %v443_v41 = vunpack.c.l.b16 %v14050_v34  ;;  %v442_v44 = vunpack.c.l.b16 %v14056_v37  ;;  %v13119_v34 = vld [vmem:[%s13814_s21 + $0x40] sm:$0xff] }
 0x132   :  { %v285_v27 = vpop.f32.mrf.mxu0  ;;  %17089 = vst [vmem:[#allocation29_spill] sm:$0xff] %v14056_v37  ;;  %v13127_v37 = vld [vmem:[%s13814_s21 + $0x80] sm:$0xff] }
 0x133   :  { %v306_v28 = vmul.f32 %v13965_v26, %v285_v27  ;;  %17079 = vst [vmem:[#allocation19_spill] sm:$0xff] %v13988_v52  ;;  %v451_v0 = vunpack.c.l.b16 %v13988_v52  ;;  %v292_v27 = vmul.f32 %v13965_v26, %v13958_v12  ;;  %v445_v12 = vunpack.c.l.b16 %v14034_v23  ;;  %v13123_v52 = vld [vmem:[%s13814_s21 + $0x60] sm:$0xff]  ;;  %v13085_v23 = vld [vmem:[%s13809_s17 + $0x170] sm:$0xff] }
 0x135   :  { %v324_v32 = vadd.f32 %v13969_v29, %v306_v28  ;;  %v14019_v16 = vpack.c.b16 %v451_v0, %v450_v6  ;;  %v312_v28 = vadd.f32 %v13969_v29, %v294_v17  ;;  %v13048_v0 = vld [vmem:[%s13809_s17 + $0x48] sm:$0xff]  ;;  %v13041_v6 = vld [vmem:[%s13809_s17 + $0x10] sm:$0xff]  ;;  %v13066_v17 = vld [vmem:[%s13809_s17 + $0xd8] sm:$0xff] }
 0x137   :  { %v340_v38 = vmax.f32 %v324_v32, 0.0  ;;  %v311_v32 = vadd.f32 %v13969_v29, %v293_v21  ;;  %v328_v36 = vmax.f32 %v312_v28, 0.0  ;;  %v13052_v21 = vld [vmem:[%s13809_s17 + $0x68] sm:$0xff]  ;;  %v13061_v28 = vld [vmem:[%s13809_s17 + $0xb0] sm:$0xff] }
 0x139   :  { %v13984_v47 = vpack.c.bf16 %v340_v38, %v340_v38  ;;  %v444_v38 = vunpack.c.l.b16 %v14042_v13  ;;  %v13111_v13 = vld [vmem:[%s13814_s21] sm:$0xff] }
 0x13a   :  { %v287_v35 = vpop.f32.mrf.mxu0 }
 0x13b   :  { %v307_v39 = vmul.f32 %v13965_v26, %v287_v35  ;;  %17078 = vst [vmem:[#allocation18_spill] sm:$0xff] %v13984_v47  ;;  %v452_v58 = vunpack.c.l.b16 %v13984_v47  ;;  %v14053_v26 = vpack.c.b16 %v447_v24, %v446_v31  ;;  %v310_v35 = vadd.f32 %v13969_v29, %v292_v27  ;;  %v13068_v24 = vld [vmem:[%s13809_s17 + $0xe8] sm:$0xff]  ;;  %v13045_v27 = vld [vmem:[%s13809_s17 + $0x30] sm:$0xff]  ;;  %v13054_v31 = vld [vmem:[%s13809_s17 + $0x78] sm:$0xff] }
 0x13c   :  { %v14066_v42 = vpack.c.b16 %v445_v12, %v444_v38  ;;  %v13070_v12 = vld [vmem:[%s13809_s17 + $0xf8] sm:$0xff]  ;;  %v13087_v38 = vld [vmem:[%s13809_s17 + $0x180] sm:$0xff] }
 0x13d   :  { %v325_v43 = vadd.f32 %v13969_v29, %v307_v39  ;;  %v327_v39 = vmax.f32 %v311_v32, 0.0  ;;  %v326_v29 = vmax.f32 %v310_v35, 0.0  ;;  %v13046_v32 = vld [vmem:[%s13809_s17 + $0x38] sm:$0xff]  ;;  %v13115_v47 = vld [vmem:[%s13814_s21 + $0x20] sm:$0xff] }
 0x13f   :  { %v341_v48 = vmax.f32 %v325_v43, 0.0  ;;  %v14068_v43 = vpack.c.bf16 %v328_v36, %v328_v36  ;;  %v14075_v45 = vpack.c.bf16 %v327_v39, %v327_v39  ;;  %v14080_v49 = vpack.c.bf16 %v326_v29, %v326_v29  ;;  %v13071_v36 = vld [vmem:[%s13809_s17 + $0x100] sm:$0xff] }
 0x141   :  { %v13990_v53 = vpack.c.bf16 %v341_v48, %v341_v48  ;;  %17091 = vst [vmem:[#allocation31_spill] sm:$0xff] %v14068_v43  ;;  %v14078_v48 = vpack.c.b16 %v443_v41, %v442_v44  ;;  %v440_v50 = vunpack.c.l.b16 %v14068_v43  ;;  %v439_v51 = vunpack.c.l.b16 %v14075_v45  ;;  %v13095_v41 = vld [vmem:[%s13809_s17 + $0x1c0] sm:$0xff] }
 0x142   :  { %17092 = vst [vmem:[#allocation32_spill] sm:$0xff] %v14075_v45  ;;  %v438_v55 = vunpack.c.l.b16 %v14080_v49 }
 0x143   :  { %17080 = vst [vmem:[#allocation20_spill] sm:$0xff] %v13990_v53  ;;  %v453_v59 = vunpack.c.l.b16 %v13990_v53  ;;  %v14088_v54 = vpack.c.b16 %v441_v46, %v440_v50  ;;  %v13084_v53 = vld [vmem:[%s13809_s17 + $0x168] sm:$0xff] }
 0x144   :  { %17093 = vst [vmem:[#allocation33_spill] sm:$0xff] %v14080_v49  ;;  %v14095_v56 = vpack.c.b16 %v439_v51, %v438_v55 }
 0x145   :  { %v14003_v1 = vpack.c.b16 %v453_v59, %v452_v58  ;;  %v13039_v58 = vld [vmem:[%s13809_s17] sm:$0xff] }
 0x146   :  { %v13047_v59 = vld [vmem:[%s13809_s17 + $0x40] sm:$0xff] }
 0x147   :  { %470 = vmatpush.bf16.msra.mxu1 %v14003_v1  ;;  %599 = vmatpush.bf16.msra.mxu2 %v14003_v1 }
 0x148   :  { %728 = vmatpush.bf16.msra.mxu3 %v14003_v1  ;;  %857 = vmatpush.bf16.msrb.mxu0 %v14003_v1 }
 0x14b   :  { %471 = vmatpush.bf16.msra.mxu1 %v14019_v16  ;;  %600 = vmatpush.bf16.msra.mxu2 %v14019_v16 }
 0x14c   :  { %729 = vmatpush.bf16.msra.mxu3 %v14019_v16  ;;  %858 = vmatpush.bf16.msrb.mxu0 %v14019_v16 }
 0x14f   :  { %472 = vmatpush.bf16.msra.mxu1 %v14037_v25  ;;  %601 = vmatpush.bf16.msra.mxu2 %v14037_v25 }
 0x150   :  { %730 = vmatpush.bf16.msra.mxu3 %v14037_v25  ;;  %859 = vmatpush.bf16.msrb.mxu0 %v14037_v25 }
 0x153   :  { %473 = vmatpush.bf16.msra.mxu1 %v14053_v26  ;;  %602 = vmatpush.bf16.msra.mxu2 %v14053_v26 }
 0x154   :  { %731 = vmatpush.bf16.msra.mxu3 %v14053_v26  ;;  %860 = vmatpush.bf16.msrb.mxu0 %v14053_v26 }
 0x157   :  { %474 = vmatpush.bf16.msra.mxu1 %v14066_v42  ;;  %603 = vmatpush.bf16.msra.mxu2 %v14066_v42 }
 0x158   :  { %732 = vmatpush.bf16.msra.mxu3 %v14066_v42  ;;  %861 = vmatpush.bf16.msrb.mxu0 %v14066_v42 }
 0x15b   :  { %475 = vmatpush.bf16.msra.mxu1 %v14078_v48  ;;  %604 = vmatpush.bf16.msra.mxu2 %v14078_v48 }
 0x15c   :  { %733 = vmatpush.bf16.msra.mxu3 %v14078_v48  ;;  %862 = vmatpush.bf16.msrb.mxu0 %v14078_v48 }
 0x15f   :  { %476 = vmatpush.bf16.msra.mxu1 %v14088_v54  ;;  %605 = vmatpush.bf16.msra.mxu2 %v14088_v54 }
 0x160   :  { %734 = vmatpush.bf16.msra.mxu3 %v14088_v54  ;;  %863 = vmatpush.bf16.msrb.mxu0 %v14088_v54 }
 0x163   :  { %477 = vmatpush.bf16.msra.mxu1 %v14095_v56  ;;  %606 = vmatpush.bf16.msra.mxu2 %v14095_v56 }
 0x164   :  { %735 = vmatpush.bf16.msra.mxu3 %v14095_v56  ;;  %864 = vmatpush.bf16.msrb.mxu0 %v14095_v56 }
 0x166   :  { %478 = vmatmul.bf16.vlgmr.msra.gmra.mxu1 %v13039_v58  ;;  %607 = vmatmul.bf16.vlgmr.msra.gmra.mxu2 %v13047_v59 }
 0x167   :  { %986 = vmatpush.bf16.msrb.mxu1 %v14003_v1  ;;  %1115 = vmatpush.bf16.msrb.mxu2 %v14003_v1 }
 0x168   :  { %1244 = vmatpush.bf16.msrb.mxu3 %v14003_v1  ;;  %1373 = vmatpush.bf16.msra.mxu0 %v14003_v1 }
 0x169   :  { %736 = vmatmul.bf16.vlgmr.msra.gmra.mxu3 %v13055_v60  ;;  %865 = vmatmul.bf16.vlgmr.msrb.gmra.mxu0 %v13063_v61 }
 0x16b   :  { %987 = vmatpush.bf16.msrb.mxu1 %v14019_v16  ;;  %1116 = vmatpush.bf16.msrb.mxu2 %v14019_v16 }
 0x16c   :  { %1245 = vmatpush.bf16.msrb.mxu3 %v14019_v16  ;;  %1374 = vmatpush.bf16.msra.mxu0 %v14019_v16 }
 0x16f   :  { %988 = vmatpush.bf16.msrb.mxu1 %v14037_v25  ;;  %1117 = vmatpush.bf16.msrb.mxu2 %v14037_v25 }
 0x170   :  { %1246 = vmatpush.bf16.msrb.mxu3 %v14037_v25  ;;  %1375 = vmatpush.bf16.msra.mxu0 %v14037_v25 }
 0x173   :  { %989 = vmatpush.bf16.msrb.mxu1 %v14053_v26  ;;  %1118 = vmatpush.bf16.msrb.mxu2 %v14053_v26 }
 0x174   :  { %1247 = vmatpush.bf16.msrb.mxu3 %v14053_v26  ;;  %1376 = vmatpush.bf16.msra.mxu0 %v14053_v26 }
 0x176   :  { %483 = vmatmul.bf16.gmra.mxu1 %v13040_v62  ;;  %612 = vmatmul.bf16.gmra.mxu2 %v13048_v0  ;;  %v13099_v62 = vld [vmem:[%s13809_s17 + $0x1e0] sm:$0xff] }
 0x177   :  { %990 = vmatpush.bf16.msrb.mxu1 %v14066_v42  ;;  %1119 = vmatpush.bf16.msrb.mxu2 %v14066_v42 }
 0x178   :  { %1248 = vmatpush.bf16.msrb.mxu3 %v14066_v42  ;;  %1377 = vmatpush.bf16.msra.mxu0 %v14066_v42 }
 0x179   :  { %741 = vmatmul.bf16.gmra.mxu3 %v13056_v2  ;;  %870 = vmatmul.bf16.gmra.mxu0 %v13064_v3 }
 0x17b   :  { %991 = vmatpush.bf16.msrb.mxu1 %v14078_v48  ;;  %1120 = vmatpush.bf16.msrb.mxu2 %v14078_v48 }
 0x17c   :  { %1249 = vmatpush.bf16.msrb.mxu3 %v14078_v48  ;;  %1378 = vmatpush.bf16.msra.mxu0 %v14078_v48 }
 0x17f   :  { %992 = vmatpush.bf16.msrb.mxu1 %v14088_v54  ;;  %1121 = vmatpush.bf16.msrb.mxu2 %v14088_v54 }
 0x180   :  { %1250 = vmatpush.bf16.msrb.mxu3 %v14088_v54  ;;  %1379 = vmatpush.bf16.msra.mxu0 %v14088_v54 }
 0x183   :  { %993 = vmatpush.bf16.msrb.mxu1 %v14095_v56  ;;  %1122 = vmatpush.bf16.msrb.mxu2 %v14095_v56 }
 0x184   :  { %1251 = vmatpush.bf16.msrb.mxu3 %v14095_v56  ;;  %1380 = vmatpush.bf16.msra.mxu0 %v14095_v56 }
 0x186   :  { %617 = vmatmul.bf16.gmra.mxu2 %v13049_v4  ;;  %488 = vmatmul.bf16.gmra.mxu1 %v13041_v6  ;;  %v13080_v4 = vld [vmem:[%s13809_s17 + $0x148] sm:$0xff] }
 0x187   :  { %1502 = vmatpush.bf16.msra.mxu1 %v14003_v1  ;;  %v13050_v1 = vld [vmem:[%s13809_s17 + $0x58] sm:$0xff] }
 0x189   :  { %746 = vmatmul.bf16.gmra.mxu3 %v13057_v7  ;;  %875 = vmatmul.bf16.gmra.mxu0 %v13065_v8  ;;  %v13072_v7 = vld [vmem:[%s13809_s17 + $0x108] sm:$0xff] }
 0x18a   :  { %v13088_v8 = vld [vmem:[%s13809_s17 + $0x188] sm:$0xff] }
 0x18b   :  { %1503 = vmatpush.bf16.msra.mxu1 %v14019_v16  ;;  %v13051_v16 = vld [vmem:[%s13809_s17 + $0x60] sm:$0xff] }
 0x18f   :  { %1504 = vmatpush.bf16.msra.mxu1 %v14037_v25  ;;  %v13053_v25 = vld [vmem:[%s13809_s17 + $0x70] sm:$0xff] }
 0x193   :  { %1505 = vmatpush.bf16.msra.mxu1 %v14053_v26  ;;  %v13079_v26 = vld [vmem:[%s13809_s17 + $0x140] sm:$0xff] }
 0x196   :  { %622 = vmatmul.bf16.gmra.mxu2 %v13050_v1  ;;  %493 = vmatmul.bf16.gmra.mxu1 %v13042_v9 }
 0x197   :  { %1506 = vmatpush.bf16.msra.mxu1 %v14066_v42 }
 0x199   :  { %751 = vmatmul.bf16.gmra.mxu3 %v13058_v11  ;;  %880 = vmatmul.bf16.gmra.mxu0 %v13066_v17  ;;  %v13096_v17 = vld [vmem:[%s13809_s17 + $0x1c8] sm:$0xff] }
 0x19b   :  { %1507 = vmatpush.bf16.msra.mxu1 %v14078_v48 }
 0x19f   :  { %1508 = vmatpush.bf16.msra.mxu1 %v14088_v54 }
 0x1a3   :  { %1509 = vmatpush.bf16.msra.mxu1 %v14095_v56 }
 0x1a6   :  { %627 = vmatmul.bf16.gmra.mxu2 %v13051_v16  ;;  %498 = vmatmul.bf16.gmra.mxu1 %v13043_v18  ;;  %v13133_v16 = vld [vmem:[%s13814_s21 + $0xb0] sm:$0xff] }
 0x1a9   :  { %756 = vmatmul.bf16.gmra.mxu3 %v13059_v19  ;;  %885 = vmatmul.bf16.gmra.mxu0 %v13067_v20 }
 0x1b6   :  { %632 = vmatmul.bf16.gmra.mxu2 %v13052_v21  ;;  %503 = vmatmul.bf16.gmra.mxu1 %v13044_v22 }
 0x1b9   :  { %761 = vmatmul.bf16.gmra.mxu3 %v13060_v14  ;;  %890 = vmatmul.bf16.gmra.mxu0 %v13068_v24 }
 0x1c6   :  { %637 = vmatmul.bf16.gmra.mxu2 %v13053_v25  ;;  %508 = vmatmul.bf16.gmra.mxu1 %v13045_v27 }
 0x1c9   :  { %766 = vmatmul.bf16.gmra.mxu3 %v13061_v28  ;;  %895 = vmatmul.bf16.gmra.mxu0 %v13069_v30  ;;  %v13125_v28 = vld [vmem:[%s13814_s21 + $0x70] sm:$0xff] }
 0x1d6   :  { %642 = vmatmul.bf16.gmra.mxu2 %v13054_v31  ;;  %513 = vmatmul.bf16.gmra.mxu1 %v13046_v32 }
 0x1d9   :  { %771 = vmatmul.bf16.gmra.mxu3 %v13062_v33  ;;  %900 = vmatmul.bf16.gmra.mxu0 %v13070_v12  ;;  %v13081_v33 = vld [vmem:[%s13809_s17 + $0x150] sm:$0xff] }
 0x1da   :  { %v13073_v12 = vld [vmem:[%s13809_s17 + $0x110] sm:$0xff] }
 0x1e3   :  { %v479_v35 = vpop.f32.mrf.mxu1 }
 0x1e4   :  { %v519_v44 = vpack.c.bf16 %v479_v35, %v479_v35 }
 0x1e6   :  { %v866_v39 = vpop.f32.mrf.mxu0  ;;  %1123 = vmatmul.bf16.vlgmr.msrb.gmra.mxu2 %v13079_v26  ;;  %994 = vmatmul.bf16.vlgmr.msrb.gmra.mxu1 %v13071_v36  ;;  %v14181_v56 = vunpack.c.l.b16 %v519_v44  ;;  %v13089_v26 = vld [vmem:[%s13809_s17 + $0x190] sm:$0xff] }
 0x1e7   :  { %v906_v42 = vpack.c.bf16 %v866_v39, %v866_v39  ;;  %v13097_v39 = vld [vmem:[%s13809_s17 + $0x1d0] sm:$0xff] }
 0x1e9   :  { %1252 = vmatmul.bf16.vlgmr.msrb.gmra.mxu3 %v13087_v38  ;;  %1381 = vmatmul.bf16.vlgmr.msra.gmra.mxu0 %v13095_v41  ;;  %v608_v29 = vpop.f32.mrf.mxu2  ;;  %v14179_v54 = vunpack.c.l.b16 %v906_v42  ;;  %v13117_v42 = vld [vmem:[%s13814_s21 + $0x30] sm:$0xff] }
 0x1ea   :  { %v648_v60 = vpack.c.bf16 %v608_v29, %v608_v29 }
 0x1eb   :  { %v481_v48 = vpop.f32.mrf.mxu1  ;;  %17094 = vst [vmem:[#allocation34_spill] sm:$0xff] %v14179_v54  ;;  %v13078_v54 = vld [vmem:[%s13809_s17 + $0x138] sm:$0xff] }
 0x1ec   :  { %v14177_v46 = vpop.f32.mrf.mxu3  ;;  %v520_v50 = vpack.c.bf16 %v481_v48, %v481_v48  ;;  %v14196_v1 = vunpack.c.l.b16 %v648_v60 }
 0x1ee   :  { %v868_v51 = vpop.f32.mrf.mxu0  ;;  %v14183_v58 = vunpack.c.l.b16 %v520_v50 }
 0x1ef   :  { %v907_v55 = vpack.c.bf16 %v868_v51, %v868_v51 }
 0x1f1   :  { %v14185_v59 = vunpack.c.l.b16 %v907_v55  ;;  %v610_v0 = vpop.f32.mrf.mxu2 }
 0x1f2   :  { %v649_v2 = vpack.c.bf16 %v610_v0, %v610_v0 }
 0x1f3   :  { %17095 = vst [vmem:[#allocation35_spill] sm:$0xff] %v14185_v59  ;;  %v484_v6 = vpop.f32.mrf.mxu1 }
 0x1f4   :  { %v14191_v3 = vpop.f32.mrf.mxu3  ;;  %v14198_v9 = vunpack.c.l.b16 %v649_v2  ;;  %v521_v19 = vpack.c.bf16 %v484_v6, %v484_v6 }
 0x1f6   :  { %v14200_v11 = vpop.f32.mrf.mxu0  ;;  %1128 = vmatmul.bf16.gmra.mxu2 %v13080_v4  ;;  %999 = vmatmul.bf16.gmra.mxu1 %v13072_v7  ;;  %v14209_v24 = vunpack.c.l.b16 %v521_v19  ;;  %v13090_v19 = vld [vmem:[%s13809_s17 + $0x198] sm:$0xff] }
 0x1f9   :  { %1257 = vmatmul.bf16.gmra.mxu3 %v13088_v8  ;;  %1386 = vmatmul.bf16.gmra.mxu0 %v13096_v17  ;;  %v613_v18 = vpop.f32.mrf.mxu2  ;;  %v13082_v17 = vld [vmem:[%s13809_s17 + $0x158] sm:$0xff] }
 0x1fa   :  { %v650_v27 = vpack.c.bf16 %v613_v18, %v613_v18  ;;  %v13074_v18 = vld [vmem:[%s13809_s17 + $0x118] sm:$0xff] }
 0x1fb   :  { %v486_v21 = vpop.f32.mrf.mxu1 }
 0x1fc   :  { %v14205_v20 = vpop.f32.mrf.mxu3  ;;  %v522_v22 = vpack.c.bf16 %v486_v21, %v486_v21  ;;  %v14220_v35 = vunpack.c.l.b16 %v650_v27 }
 0x1fe   :  { %v14207_v14 = vpop.f32.mrf.mxu0  ;;  %v14211_v25 = vunpack.c.l.b16 %v522_v22 }
 0x201   :  { %v615_v30 = vpop.f32.mrf.mxu2 }
 0x202   :  { %v651_v31 = vpack.c.bf16 %v615_v30, %v615_v30  ;;  %v13098_v30 = vld [vmem:[%s13809_s17 + $0x1d8] sm:$0xff] }
 0x203   :  { %v489_v38 = vpop.f32.mrf.mxu1 }
 0x204   :  { %v14215_v32 = vpop.f32.mrf.mxu3  ;;  %v14222_v36 = vunpack.c.l.b16 %v651_v31  ;;  %v523_v48 = vpack.c.bf16 %v489_v38, %v489_v38 }
 0x206   :  { %v14225_v41 = vpop.f32.mrf.mxu0  ;;  %1133 = vmatmul.bf16.gmra.mxu2 %v13081_v33  ;;  %1004 = vmatmul.bf16.gmra.mxu1 %v13073_v12  ;;  %v14233_v60 = vunpack.c.l.b16 %v523_v48  ;;  %v13126_v33 = vld [vmem:[%s13814_s21 + $0x78] sm:$0xff] }
 0x207   :  { %2624 = vmatpush.bf16.msra.mxu3 %v13126_v33 }
 0x209   :  { %1262 = vmatmul.bf16.gmra.mxu3 %v13089_v26  ;;  %1391 = vmatmul.bf16.gmra.mxu0 %v13097_v39  ;;  %v618_v29 = vpop.f32.mrf.mxu2 }
 0x20a   :  { %v652_v2 = vpack.c.bf16 %v618_v29, %v618_v29 }
 0x20b   :  { %v491_v50 = vpop.f32.mrf.mxu1  ;;  %2625 = vmatpush.bf16.msra.mxu3 %v13125_v28 }
 0x20c   :  { %v14229_v44 = vpop.f32.mrf.mxu3  ;;  %v524_v51 = vpack.c.bf16 %v491_v50, %v491_v50  ;;  %v14244_v21 = vunpack.c.l.b16 %v652_v2 }
 0x20e   :  { %v14231_v55 = vpop.f32.mrf.mxu0  ;;  %v14235_v0 = vunpack.c.l.b16 %v524_v51 }
 0x211   :  { %v620_v4 = vpop.f32.mrf.mxu2 }
 0x212   :  { %v653_v7 = vpack.c.bf16 %v620_v4, %v620_v4 }
 0x213   :  { %v494_v27 = vpop.f32.mrf.mxu1 }
 0x214   :  { %v14239_v8 = vpop.f32.mrf.mxu3  ;;  %v14246_v22 = vunpack.c.l.b16 %v653_v7  ;;  %v525_v38 = vpack.c.bf16 %v494_v27, %v494_v27  ;;  %v13075_v27 = vld [vmem:[%s13809_s17 + $0x120] sm:$0xff]  ;;  %v13118_v7 = vld [vmem:[%s13814_s21 + $0x38] sm:$0xff] }
 0x215   :  { %2575 = vmatpush.bf16.msra.mxu2 %v13118_v7  ;;  %v13116_v7 = vld [vmem:[%s13814_s21 + $0x28] sm:$0xff] }
 0x216   :  { %v14249_v31 = vpop.f32.mrf.mxu0  ;;  %1138 = vmatmul.bf16.gmra.mxu2 %v13082_v17  ;;  %1009 = vmatmul.bf16.gmra.mxu1 %v13074_v18  ;;  %v14257_v50 = vunpack.c.l.b16 %v525_v38 }
 0x219   :  { %1267 = vmatmul.bf16.gmra.mxu3 %v13090_v19  ;;  %1396 = vmatmul.bf16.gmra.mxu0 %v13098_v30  ;;  %v623_v12 = vpop.f32.mrf.mxu2  ;;  %v13083_v19 = vld [vmem:[%s13809_s17 + $0x160] sm:$0xff] }
 0x21a   :  { %v654_v2 = vpack.c.bf16 %v623_v12, %v623_v12  ;;  %v13091_v30 = vld [vmem:[%s13809_s17 + $0x1a0] sm:$0xff]  ;;  %2576 = vmatpush.bf16.msra.mxu2 %v13117_v42 }
 0x21b   :  { %v496_v39 = vpop.f32.mrf.mxu1 }
 0x21c   :  { %v14253_v26 = vpop.f32.mrf.mxu3  ;;  %v526_v29 = vpack.c.bf16 %v496_v39, %v496_v39  ;;  %v14268_v39 = vunpack.c.l.b16 %v654_v2  ;;  %v13134_v2 = vld [vmem:[%s13814_s21 + $0xb8] sm:$0xff] }
 0x21d   :  { %2673 = vmatpush.bf16.msrb.mxu0 %v13134_v2  ;;  %v13132_v2 = vld [vmem:[%s13814_s21 + $0xa8] sm:$0xff] }
 0x21e   :  { %v14255_v48 = vpop.f32.mrf.mxu0  ;;  %v14259_v51 = vunpack.c.l.b16 %v526_v29  ;;  %2577 = vmatpush.bf16.msra.mxu2 %v13116_v7 }
 0x221   :  { %v625_v4 = vpop.f32.mrf.mxu2  ;;  %2674 = vmatpush.bf16.msrb.mxu0 %v13133_v16 }
 0x222   :  { %v655_v17 = vpack.c.bf16 %v625_v4, %v625_v4  ;;  %2578 = vmatpush.bf16.msra.mxu2 %v13115_v47 }
 0x223   :  { %v499_v29 = vpop.f32.mrf.mxu1 }
 0x224   :  { %v14263_v18 = vpop.f32.mrf.mxu3  ;;  %v14270_v38 = vunpack.c.l.b16 %v655_v17 }
 0x225   :  { %2675 = vmatpush.bf16.msrb.mxu0 %v13132_v2 }
 0x226   :  { %v14273_v12 = vpop.f32.mrf.mxu0  ;;  %1143 = vmatmul.bf16.gmra.mxu2 %v13083_v19  ;;  %1014 = vmatmul.bf16.gmra.mxu1 %v13075_v27  ;;  %v527_v19 = vpack.c.bf16 %v499_v29, %v499_v29  ;;  %v13124_v29 = vld [vmem:[%s13814_s21 + $0x68] sm:$0xff] }
 0x227   :  { %2626 = vmatpush.bf16.msra.mxu3 %v13124_v29 }
 0x229   :  { %1272 = vmatmul.bf16.gmra.mxu3 %v13091_v30  ;;  %1401 = vmatmul.bf16.gmra.mxu0 %v13099_v62  ;;  %v628_v6 = vpop.f32.mrf.mxu2  ;;  %v14287_v62 = vunpack.c.l.b16 %v527_v19  ;;  %v13076_v19 = vld [vmem:[%s13809_s17 + $0x128] sm:$0xff] }
 0x22a   :  { %v656_v61 = vpack.c.bf16 %v628_v6, %v628_v6  ;;  %2676 = vmatpush.bf16.msrb.mxu0 %v13131_v57  ;;  %v13121_v57 = vld [vmem:[%s13814_s21 + $0x50] sm:$0xff] }
 0x22b   :  { %v501_v4 = vpop.f32.mrf.mxu1  ;;  %2627 = vmatpush.bf16.msra.mxu3 %v13123_v52 }
 0x22c   :  { %v14280_v17 = vpop.f32.mrf.mxu3  ;;  %v528_v27 = vpack.c.bf16 %v501_v4, %v501_v4  ;;  %v14304_v6 = vunpack.c.l.b16 %v656_v61  ;;  %v13114_v61 = vld [vmem:[%s13814_s21 + $0x18] sm:$0xff] }
 0x22d   :  { %2579 = vmatpush.bf16.msra.mxu2 %v13114_v61 }
 0x22e   :  { %v14285_v30 = vpop.f32.mrf.mxu0  ;;  %v14289_v33 = vunpack.c.l.b16 %v528_v27  ;;  %v13092_v27 = vld [vmem:[%s13809_s17 + $0x1a8] sm:$0xff] }
 0x231   :  { %v630_v4 = vpop.f32.mrf.mxu2 }
 0x232   :  { %v657_v42 = vpack.c.bf16 %v630_v4, %v630_v4  ;;  %v13122_v4 = vld [vmem:[%s13814_s21 + $0x58] sm:$0xff] }
 0x233   :  { %v504_v29 = vpop.f32.mrf.mxu1  ;;  %2628 = vmatpush.bf16.msra.mxu3 %v13122_v4  ;;  %v13120_v4 = vld [vmem:[%s13814_s21 + $0x48] sm:$0xff] }
 0x234   :  { %v14296_v16 = vpop.f32.mrf.mxu3  ;;  %v14306_v7 = vunpack.c.l.b16 %v657_v42  ;;  %v13130_v42 = vld [vmem:[%s13814_s21 + $0x98] sm:$0xff]  ;;  %v529_v52 = vpack.c.bf16 %v504_v29, %v504_v29  ;;  %v13112_v29 = vld [vmem:[%s13814_s21 + $0x8] sm:$0xff] }
 0x235   :  { %2677 = vmatpush.bf16.msrb.mxu0 %v13130_v42  ;;  %v13128_v42 = vld [vmem:[%s13814_s21 + $0x88] sm:$0xff] }
 0x236   :  { %v14309_v28 = vpop.f32.mrf.mxu0  ;;  %1148 = vmatmul.bf16.gmra.mxu2 %v13084_v53  ;;  %1019 = vmatmul.bf16.gmra.mxu1 %v13076_v19  ;;  %v13113_v53 = vld [vmem:[%s13814_s21 + $0x10] sm:$0xff] }
 0x237   :  { %2580 = vmatpush.bf16.msra.mxu2 %v13113_v53  ;;  %2629 = vmatpush.bf16.msra.mxu3 %v13121_v57 }
 0x239   :  { %1277 = vmatmul.bf16.gmra.mxu3 %v13092_v27  ;;  %1406 = vmatmul.bf16.gmra.mxu0 %v13100_v63  ;;  %v633_v5 = vpop.f32.mrf.mxu2  ;;  %v14323_v63 = vunpack.c.l.b16 %v529_v52  ;;  %v13077_v52 = vld [vmem:[%s13809_s17 + $0x130] sm:$0xff] }
 0x23a   :  { %2678 = vmatpush.bf16.msrb.mxu0 %v13129_v10  ;;  %v658_v15 = vpack.c.bf16 %v633_v5, %v633_v5 }
 0x23b   :  { %v506_v2 = vpop.f32.mrf.mxu1  ;;  %2581 = vmatpush.bf16.msra.mxu2 %v13112_v29  ;;  %2630 = vmatpush.bf16.msra.mxu3 %v13120_v4  ;;  %v13101_v29 = vld [vmem:[%s13809_s17 + $0x1f0] sm:$0xff] }
 0x23c   :  { %v14316_v47 = vpop.f32.mrf.mxu3  ;;  %v530_v19 = vpack.c.bf16 %v506_v2, %v506_v2  ;;  %v14340_v40 = vunpack.c.l.b16 %v658_v15 }
 0x23e   :  { %v14321_v27 = vpop.f32.mrf.mxu0  ;;  %v14325_v61 = vunpack.c.l.b16 %v530_v19  ;;  %v13093_v19 = vld [vmem:[%s13809_s17 + $0x1b0] sm:$0xff]  ;;  %2679 = vmatpush.bf16.msrb.mxu0 %v13128_v42  ;;  %17096 = vst [vmem:[#allocation36_spill] sm:$0xff] %v14340_v40 }
 0x23f   :  { %2582 = vmatpush.bf16.msra.mxu2 %v13111_v13  ;;  %2631 = vmatpush.bf16.msra.mxu3 %v13119_v34 }
 0x241   :  { %v635_v2 = vpop.f32.mrf.mxu2 }
 0x242   :  { %v659_v57 = vpack.c.bf16 %v635_v2, %v635_v2  ;;  %2680 = vmatpush.bf16.msrb.mxu0 %v13127_v37  ;;  %v13086_v2 = vld [vmem:[%s13809_s17 + $0x178] sm:$0xff] }
 0x243   :  { %v509_v43 = vpop.f32.mrf.mxu1 }
 0x244   :  { %v14332_v10 = vpop.f32.mrf.mxu3  ;;  %v14342_v5 = vunpack.c.l.b16 %v659_v57  ;;  %v531_v57 = vpack.c.bf16 %v509_v43, %v509_v43  ;;  %v13094_v43 = vld [vmem:[%s13809_s17 + $0x1b8] sm:$0xff] }
 0x246   :  { %17097 = vst [vmem:[#allocation37_spill] sm:$0xff] %v14342_v5  ;;  %v14345_v4 = vpop.f32.mrf.mxu0  ;;  %1153 = vmatmul.bf16.gmra.mxu2 %v13085_v23  ;;  %1024 = vmatmul.bf16.gmra.mxu1 %v13077_v52  ;;  %v14353_v23 = vunpack.c.l.b16 %v531_v57  ;;  %v909_v57 = vpack.c.bf16 %v14207_v14, %v14207_v14  ;;  %v13103_v5 = vld [vmem:[%s13809_s17 + $0x200] sm:$0xff] }
 0x248   :  { %17099 = vst [vmem:[#allocation39_spill] sm:$0xff] %v14353_v23  ;;  %v778_v23 = vpack.c.bf16 %v14191_v3, %v14191_v3 }
 0x249   :  { %1282 = vmatmul.bf16.gmra.mxu3 %v13093_v19  ;;  %1411 = vmatmul.bf16.gmra.mxu0 %v13101_v29  ;;  %v638_v15 = vpop.f32.mrf.mxu2 }
 0x24a   :  { %v660_v34 = vpack.c.bf16 %v638_v15, %v638_v15 }
 0x24b   :  { %v511_v53 = vpop.f32.mrf.mxu1 }
 0x24c   :  { %v14349_v42 = vpop.f32.mrf.mxu3  ;;  %v532_v45 = vpack.c.bf16 %v511_v53, %v511_v53  ;;  %v908_v53 = vpack.c.bf16 %v14200_v11, %v14200_v11  ;;  %v14368_v59 = vunpack.c.l.b16 %v660_v34  ;;  %v14379_v11 = vunpack.c.l.b16 %v909_v57 }
 0x24d   :  { %17098 = vst [vmem:[#allocation38_spill] sm:$0xff] %v14349_v42  ;;  %v13102_v42 = vld [vmem:[%s13809_s17 + $0x1f8] sm:$0xff] }
 0x24e   :  { %v14351_v49 = vpop.f32.mrf.mxu0  ;;  %v14355_v13 = vunpack.c.l.b16 %v532_v45  ;;  %17102 = vst [vmem:[#allocation42_spill] sm:$0xff] %v14368_v59  ;;  %v14377_v52 = vunpack.c.l.b16 %v908_v53 }
 0x250   :  { %17100 = vst [vmem:[#allocation40_spill] sm:$0xff] %v14355_v13 }
 0x251   :  { %v640_v37 = vpop.f32.mrf.mxu2  ;;  %17104 = vst [vmem:[#allocation44_spill] sm:$0xff] %v14377_v52 }
 0x252   :  { %v661_v19 = vpack.c.bf16 %v640_v37, %v640_v37 }
 0x253   :  { %v514_v15 = vpop.f32.mrf.mxu1 }
 0x254   :  { %v14359_v29 = vpop.f32.mrf.mxu3  ;;  %v14370_v45 = vunpack.c.l.b16 %v661_v19  ;;  %v777_v19 = vpack.c.bf16 %v14177_v46, %v14177_v46 }
 0x255   :  { %17101 = vst [vmem:[#allocation41_spill] sm:$0xff] %v14359_v29 }
 0x256   :  { %17103 = vst [vmem:[#allocation43_spill] sm:$0xff] %v14370_v45  ;;  %v14373_v40 = vpop.f32.mrf.mxu0  ;;  %1158 = vmatmul.bf16.gmra.mxu2 %v13086_v2  ;;  %1029 = vmatmul.bf16.gmra.mxu1 %v13078_v54  ;;  %v533_v2 = vpack.c.bf16 %v514_v15, %v514_v15  ;;  %v1679_v57 = vunpack.c.l.b16 %v777_v19  ;;  %v17106_v54 = vpack.c.b16 %v14183_v58, %v14181_v56 }
 0x257   :  { %v779_v56 = vpack.c.bf16 %v14205_v20, %v14205_v20  ;;  %v780_v58 = vpack.c.bf16 %v14215_v32, %v14215_v32 }
 0x258   :  { %v14391_v37 = vunpack.c.l.b16 %v533_v2 }
 0x259   :  { %1287 = vmatmul.bf16.gmra.mxu3 %v13094_v43  ;;  %1416 = vmatmul.bf16.gmra.mxu0 %v13102_v42  ;;  %v643_v14 = vpop.f32.mrf.mxu2  ;;  %v1680_v42 = vunpack.c.l.b16 %v778_v23  ;;  %v911_v23 = vpack.c.bf16 %v14231_v55, %v14231_v55 }
 0x25a   :  { %v662_v59 = vpack.c.bf16 %v643_v14, %v643_v14 }
 0x25b   :  { %v516_v13 = vpop.f32.mrf.mxu1  ;;  %v1695_v29 = vpack.c.b16 %v1680_v42, %v1679_v57 }
 0x25c   :  { %v14381_v34 = vpop.f32.mrf.mxu3  ;;  %v534_v43 = vpack.c.bf16 %v516_v13, %v516_v13  ;;  %v910_v13 = vpack.c.bf16 %v14225_v41, %v14225_v41  ;;  %v14404_v19 = vunpack.c.l.b16 %v662_v59  ;;  %v17107_v41 = vpack.c.b16 %v14198_v9, %v14196_v1 }
 0x25d   :  { %17105 = vst [vmem:[#allocation45_spill] sm:$0xff] %v14381_v34  ;;  %v14418_v59 = vunpack.c.l.b16 %v911_v23 }
 0x25e   :  { %v14389_v53 = vpop.f32.mrf.mxu0  ;;  %v14393_v34 = vunpack.c.l.b16 %v534_v43  ;;  %v14416_v42 = vunpack.c.l.b16 %v910_v13 }
 0x261   :  { %v645_v46 = vpop.f32.mrf.mxu2 }
 0x262   :  { %v663_v45 = vpack.c.bf16 %v645_v46, %v645_v46 }
 0x263   :  { %v995_v14 = vpop.f32.mrf.mxu1 }
 0x264   :  { %v14397_v15 = vpop.f32.mrf.mxu3  ;;  %v14406_v2 = vunpack.c.l.b16 %v663_v45  ;;  %v1035_v3 = vpack.c.bf16 %v995_v14, %v995_v14  ;;  %v1681_v14 = vunpack.c.l.b16 %v779_v56  ;;  %v913_v56 = vpack.c.bf16 %v14255_v48, %v14255_v48 }
 0x266   :  { %v1382_v43 = vpop.f32.mrf.mxu0  ;;  %2583 = vmatmul.bf16.vlgmr.msra.gmra.mxu2 %v17106_v54  ;;  %1510 = vmatmul.bf16.vlgmr.msra.gmra.mxu1 %v13103_v5  ;;  %v14430_v23 = vunpack.c.l.b16 %v1035_v3  ;;  %v912_v3 = vpack.c.bf16 %v14249_v31, %v14249_v31  ;;  %v17111_v31 = vpack.c.b16 %v14222_v36, %v14220_v35  ;;  %v914_v35 = vpack.c.bf16 %v14273_v12, %v14273_v12 }
 0x267   :  { %v1422_v45 = vpack.c.bf16 %v1382_v43, %v1382_v43  ;;  %v17114_v12 = vpack.c.b16 %v14246_v22, %v14244_v21  ;;  %v916_v21 = vpack.c.bf16 %v14309_v28, %v14309_v28  ;;  %v17118_v28 = vpack.c.b16 %v14270_v38, %v14268_v39 }
 0x268   :  { %v14461_v48 = vunpack.c.l.b16 %v912_v3 }
 0x269   :  { %2632 = vmatmul.bf16.vlgmr.msra.gmra.mxu3 %v17107_v41  ;;  %2681 = vmatmul.bf16.vlgmr.msrb.gmra.mxu0 %v1695_v29  ;;  %v1124_v55 = vpop.f32.mrf.mxu2  ;;  %v14428_v13 = vunpack.c.l.b16 %v1422_v45  ;;  %v1682_v41 = vunpack.c.l.b16 %v780_v58 }
 0x26a   :  { %v1164_v20 = vpack.c.bf16 %v1124_v55, %v1124_v55  ;;  %17112 = vst [vmem:[#allocation48_spill] sm:$0xff] %v14461_v48 }
 0x26b   :  { %v997_v5 = vpop.f32.mrf.mxu1  ;;  %17108 = vst [vmem:[#allocation46_spill] sm:$0xff] %v14428_v13 }
 0x26c   :  { %v14420_v46 = vpop.f32.mrf.mxu3  ;;  %v1036_v9 = vpack.c.bf16 %v997_v5, %v997_v5  ;;  %v14447_v55 = vunpack.c.l.b16 %v1164_v20  ;;  %v17110_v5 = vpack.c.b16 %v14211_v25, %v14209_v24  ;;  %v782_v24 = vpack.c.bf16 %v14239_v8, %v14239_v8 }
 0x26e   :  { %v1384_v54 = vpop.f32.mrf.mxu0  ;;  %v14432_v43 = vunpack.c.l.b16 %v1036_v9  ;;  %v13104_v9 = vld [vmem:[%s13809_s17 + $0x208] sm:$0xff] }
 0x26f   :  { %v1423_v29 = vpack.c.bf16 %v1384_v54, %v1384_v54 }
 0x271   :  { %v14434_v57 = vunpack.c.l.b16 %v1423_v29  ;;  %v1126_v52 = vpop.f32.mrf.mxu2  ;;  %v1696_v29 = vpack.c.b16 %v1682_v41, %v1681_v14 }
 0x272   :  { %v1165_v1 = vpack.c.bf16 %v1126_v52, %v1126_v52  ;;  %v781_v52 = vpack.c.bf16 %v14229_v44, %v14229_v44 }
 0x273   :  { %17109 = vst [vmem:[#allocation47_spill] sm:$0xff] %v14434_v57  ;;  %v1000_v54 = vpop.f32.mrf.mxu1 }
 0x274   :  { %v14440_v45 = vpop.f32.mrf.mxu3  ;;  %v14449_v58 = vunpack.c.l.b16 %v1165_v1  ;;  %v14463_v1 = vunpack.c.l.b16 %v913_v56  ;;  %v1037_v20 = vpack.c.bf16 %v1000_v54, %v1000_v54  ;;  %v1683_v56 = vunpack.c.l.b16 %v781_v52 }
 0x275   :  { %v1684_v54 = vunpack.c.l.b16 %v782_v24 }
 0x276   :  { %v14451_v32 = vpop.f32.mrf.mxu0  ;;  %2588 = vmatmul.bf16.gmra.mxu2 %v17110_v5  ;;  %1515 = vmatmul.bf16.gmra.mxu1 %v13104_v9  ;;  %v14475_v3 = vunpack.c.l.b16 %v1037_v20  ;;  %v915_v20 = vpack.c.bf16 %v14285_v30, %v14285_v30  ;;  %v14502_v30 = vunpack.c.l.b16 %v914_v35 }
 0x278   :  { %17115 = vst [vmem:[#allocation49_spill] sm:$0xff] %v14502_v30 }
 0x279   :  { %2637 = vmatmul.bf16.gmra.mxu3 %v17111_v31  ;;  %2686 = vmatmul.bf16.gmra.mxu0 %v1696_v29  ;;  %v1129_v14 = vpop.f32.mrf.mxu2 }
 0x27a   :  { %v1166_v29 = vpack.c.bf16 %v1129_v14, %v1129_v14  ;;  %v1697_v14 = vpack.c.b16 %v1684_v54, %v1683_v56 }
 0x27b   :  { %v1002_v25 = vpop.f32.mrf.mxu1 }
 0x27c   :  { %v14465_v41 = vpop.f32.mrf.mxu3  ;;  %v1038_v36 = vpack.c.bf16 %v1002_v25, %v1002_v25  ;;  %v13105_v25 = vld [vmem:[%s13809_s17 + $0x210] sm:$0xff]  ;;  %v14488_v57 = vunpack.c.l.b16 %v1166_v29 }
 0x27e   :  { %v14473_v5 = vpop.f32.mrf.mxu0  ;;  %v14477_v9 = vunpack.c.l.b16 %v1038_v36 }
 0x281   :  { %v1131_v31 = vpop.f32.mrf.mxu2 }
 0x282   :  { %v1167_v13 = vpack.c.bf16 %v1131_v31, %v1131_v31  ;;  %v17113_v31 = vpack.c.b16 %v14235_v0, %v14233_v60  ;;  %v783_v60 = vpack.c.bf16 %v14253_v26, %v14253_v26  ;;  %v784_v0 = vpack.c.bf16 %v14263_v18, %v14263_v18 }
 0x283   :  { %v1005_v52 = vpop.f32.mrf.mxu1 }
 0x284   :  { %v14481_v8 = vpop.f32.mrf.mxu3  ;;  %v14490_v36 = vunpack.c.l.b16 %v1167_v13  ;;  %v14504_v13 = vunpack.c.l.b16 %v915_v20  ;;  %v1039_v29 = vpack.c.bf16 %v1005_v52, %v1005_v52  ;;  %v1686_v52 = vunpack.c.l.b16 %v784_v0 }
 0x286   :  { %v14492_v24 = vpop.f32.mrf.mxu0  ;;  %2593 = vmatmul.bf16.gmra.mxu2 %v17113_v31  ;;  %1520 = vmatmul.bf16.gmra.mxu1 %v13105_v25  ;;  %17116 = vst [vmem:[#allocation50_spill] sm:$0xff] %v14504_v13  ;;  %v14516_v20 = vunpack.c.l.b16 %v1039_v29  ;;  %v1685_v31 = vunpack.c.l.b16 %v783_v60  ;;  %v917_v29 = vpack.c.bf16 %v14321_v27, %v14321_v27  ;;  %v14543_v27 = vunpack.c.l.b16 %v916_v21 }
 0x288   :  { %17119 = vst [vmem:[#allocation51_spill] sm:$0xff] %v14543_v27 }
 0x289   :  { %2642 = vmatmul.bf16.gmra.mxu3 %v17114_v12  ;;  %2691 = vmatmul.bf16.gmra.mxu0 %v1697_v14  ;;  %v1134_v56 = vpop.f32.mrf.mxu2 }
 0x28a   :  { %v1168_v12 = vpack.c.bf16 %v1134_v56, %v1134_v56  ;;  %v1698_v56 = vpack.c.b16 %v1686_v52, %v1685_v31 }
 0x28b   :  { %v1007_v25 = vpop.f32.mrf.mxu1 }
 0x28c   :  { %v14506_v54 = vpop.f32.mrf.mxu3  ;;  %v1040_v22 = vpack.c.bf16 %v1007_v25, %v1007_v25  ;;  %v13106_v25 = vld [vmem:[%s13809_s17 + $0x218] sm:$0xff]  ;;  %v14529_v30 = vunpack.c.l.b16 %v1168_v12 }
 0x28e   :  { %v14514_v35 = vpop.f32.mrf.mxu0  ;;  %v14518_v14 = vunpack.c.l.b16 %v1040_v22 }
 0x291   :  { %v1136_v44 = vpop.f32.mrf.mxu2 }
 0x292   :  { %v1169_v48 = vpack.c.bf16 %v1136_v44, %v1136_v44  ;;  %v17117_v44 = vpack.c.b16 %v14259_v51, %v14257_v50  ;;  %v785_v50 = vpack.c.bf16 %v14280_v17, %v14280_v17  ;;  %v786_v51 = vpack.c.bf16 %v14296_v16, %v14296_v16 }
 0x293   :  { %v1010_v60 = vpop.f32.mrf.mxu1 }
 0x294   :  { %v14522_v18 = vpop.f32.mrf.mxu3  ;;  %v14531_v22 = vunpack.c.l.b16 %v1169_v48  ;;  %v14545_v48 = vunpack.c.l.b16 %v917_v29  ;;  %v1041_v12 = vpack.c.bf16 %v1010_v60, %v1010_v60  ;;  %v1688_v60 = vunpack.c.l.b16 %v786_v51 }
 0x296   :  { %v14533_v0 = vpop.f32.mrf.mxu0  ;;  %2598 = vmatmul.bf16.gmra.mxu2 %v17117_v44  ;;  %1525 = vmatmul.bf16.gmra.mxu1 %v13106_v25  ;;  %17120 = vst [vmem:[#allocation52_spill] sm:$0xff] %v14545_v48  ;;  %v14557_v29 = vunpack.c.l.b16 %v1041_v12  ;;  %v1687_v44 = vunpack.c.l.b16 %v785_v50  ;;  %v13107_v12 = vld [vmem:[%s13809_s17 + $0x220] sm:$0xff]  ;;  %v13156_v48 = vld [vmem:[%s13814_s21 + $0x168] sm:$0xff] }
 0x298   :  { %v1699_v39 = vpack.c.b16 %v1688_v60, %v1687_v44  ;;  %v13158_v44 = vld [vmem:[%s13814_s21 + $0x178] sm:$0xff] }
 0x299   :  { %2647 = vmatmul.bf16.gmra.mxu3 %v17118_v28  ;;  %2696 = vmatmul.bf16.gmra.mxu0 %v1698_v56  ;;  %v1139_v31 = vpop.f32.mrf.mxu2 }
 0x29a   :  { %v1170_v28 = vpack.c.bf16 %v1139_v31, %v1139_v31  ;;  %2820 = vmatpush.bf16.msrb.mxu3 %v13158_v44 }
 0x29b   :  { %v1012_v25 = vpop.f32.mrf.mxu1 }
 0x29c   :  { %v14547_v52 = vpop.f32.mrf.mxu3  ;;  %v1042_v38 = vpack.c.bf16 %v1012_v25, %v1012_v25  ;;  %v918_v25 = vpack.c.bf16 %v14345_v4, %v14345_v4  ;;  %v14570_v50 = vunpack.c.l.b16 %v1170_v28  ;;  %v13142_v28 = vld [vmem:[%s13814_s21 + $0xf8] sm:$0xff]  ;;  %v13140_v4 = vld [vmem:[%s13814_s21 + $0xe8] sm:$0xff] }
 0x29d   :  { %2722 = vmatpush.bf16.msrb.mxu1 %v13142_v28  ;;  %v13165_v28 = vld [vmem:[%s13814_s21 + $0x1b0] sm:$0xff] }
 0x29e   :  { %v14555_v21 = vpop.f32.mrf.mxu0  ;;  %v14559_v56 = vunpack.c.l.b16 %v1042_v38  ;;  %v919_v38 = vpack.c.bf16 %v14351_v49, %v14351_v49  ;;  %v17122_v49 = vpack.c.b16 %v14306_v7, %v14304_v6  ;;  %v14587_v60 = vunpack.c.l.b16 %v918_v25  ;;  %v13141_v7 = vld [vmem:[%s13814_s21 + $0xf0] sm:$0xff] }
 0x29f   :  { %v787_v25 = vpack.c.bf16 %v14316_v47, %v14316_v47 }
 0x2a0   :  { %17123 = vst [vmem:[#allocation53_spill] sm:$0xff] %v14587_v60  ;;  %v14589_v27 = vunpack.c.l.b16 %v919_v38  ;;  %v13164_v60 = vld [vmem:[%s13814_s21 + $0x1a8] sm:$0xff] }
 0x2a1   :  { %v1141_v26 = vpop.f32.mrf.mxu2  ;;  %2723 = vmatpush.bf16.msrb.mxu1 %v13141_v7 }
 0x2a2   :  { %v1171_v16 = vpack.c.bf16 %v1141_v26, %v1141_v26  ;;  %v17121_v26 = vpack.c.b16 %v14289_v33, %v14287_v62  ;;  %17124 = vst [vmem:[#allocation54_spill] sm:$0xff] %v14589_v27  ;;  %v13166_v62 = vld [vmem:[%s13814_s21 + $0x1b8] sm:$0xff] }
 0x2a3   :  { %v1015_v51 = vpop.f32.mrf.mxu1  ;;  %2869 = vmatpush.bf16.msra.mxu0 %v13166_v62 }
 0x2a4   :  { %v14563_v13 = vpop.f32.mrf.mxu3  ;;  %v14572_v31 = vunpack.c.l.b16 %v1171_v16  ;;  %v13150_v16 = vld [vmem:[%s13814_s21 + $0x138] sm:$0xff]  ;;  %v1043_v6 = vpack.c.bf16 %v1015_v51, %v1015_v51 }
 0x2a5   :  { %2771 = vmatpush.bf16.msrb.mxu2 %v13150_v16  ;;  %2724 = vmatpush.bf16.msrb.mxu1 %v13140_v4  ;;  %v921_v4 = vpack.c.bf16 %v14389_v53, %v14389_v53 }
 0x2a6   :  { %v14574_v17 = vpop.f32.mrf.mxu0  ;;  %2603 = vmatmul.bf16.gmra.mxu2 %v17121_v26  ;;  %1530 = vmatmul.bf16.gmra.mxu1 %v13107_v12  ;;  %v13149_v26 = vld [vmem:[%s13814_s21 + $0x130] sm:$0xff]  ;;  %v14606_v62 = vunpack.c.l.b16 %v1043_v6 }
 0x2a7   :  { %2870 = vmatpush.bf16.msra.mxu0 %v13165_v28  ;;  %v13139_v28 = vld [vmem:[%s13814_s21 + $0xe0] sm:$0xff] }
 0x2a8   :  { %17126 = vst [vmem:[#allocation56_spill] sm:$0xff] %v14606_v62 }
 0x2a9   :  { %2652 = vmatmul.bf16.gmra.mxu3 %v17122_v49  ;;  %2701 = vmatmul.bf16.gmra.mxu0 %v1699_v39  ;;  %v1144_v33 = vpop.f32.mrf.mxu2  ;;  %v13157_v49 = vld [vmem:[%s13814_s21 + $0x170] sm:$0xff]  ;;  %v788_v39 = vpack.c.bf16 %v14332_v10, %v14332_v10  ;;  %v13148_v10 = vld [vmem:[%s13814_s21 + $0x128] sm:$0xff] }
 0x2aa   :  { %2772 = vmatpush.bf16.msrb.mxu2 %v13149_v26  ;;  %2821 = vmatpush.bf16.msrb.mxu3 %v13157_v49  ;;  %v13108_v49 = vld [vmem:[%s13809_s17 + $0x228] sm:$0xff] }
 0x2ab   :  { %v1017_v38 = vpop.f32.mrf.mxu1  ;;  %v1690_v16 = vunpack.c.l.b16 %v788_v39  ;;  %2871 = vmatpush.bf16.msra.mxu0 %v13164_v60  ;;  %v13147_v39 = vld [vmem:[%s13814_s21 + $0x120] sm:$0xff]  ;;  %2725 = vmatpush.bf16.msrb.mxu1 %v13139_v28  ;;  %v17131_v60 = vpack.c.b16 %v14325_v61, %v14323_v63  ;;  %v13154_v28 = vld [vmem:[%s13814_s21 + $0x158] sm:$0xff] }
 0x2ac   :  { %v14592_v12 = vpop.f32.mrf.mxu3  ;;  %v1044_v44 = vpack.c.bf16 %v1017_v38, %v1017_v38  ;;  %v1172_v38 = vpack.c.bf16 %v1144_v33, %v1144_v33  ;;  %v13155_v33 = vld [vmem:[%s13814_s21 + $0x160] sm:$0xff]  ;;  %v13162_v61 = vld [vmem:[%s13814_s21 + $0x198] sm:$0xff] }
 0x2ad   :  { %17125 = vst [vmem:[#allocation55_spill] sm:$0xff] %v14592_v12  ;;  %v1689_v12 = vunpack.c.l.b16 %v787_v25  ;;  %v920_v25 = vpack.c.bf16 %v14373_v40, %v14373_v40  ;;  %v13163_v40 = vld [vmem:[%s13814_s21 + $0x1a0] sm:$0xff] }
 0x2ae   :  { %v14604_v51 = vpop.f32.mrf.mxu0  ;;  %v14608_v47 = vunpack.c.l.b16 %v1044_v44  ;;  %2773 = vmatpush.bf16.msrb.mxu2 %v13148_v10  ;;  %2822 = vmatpush.bf16.msrb.mxu3 %v13156_v48  ;;  %v14626_v44 = vunpack.c.l.b16 %v1172_v38  ;;  %v17132_v38 = vld [vmem:[#allocation37_spill] sm:$0xff] }
 0x2af   :  { %v1700_v7 = vpack.c.b16 %v1690_v16, %v1689_v12  ;;  %v13138_v12 = vld [vmem:[%s13814_s21 + $0xd8] sm:$0xff]  ;;  %2872 = vmatpush.bf16.msra.mxu0 %v13163_v40 }
 0x2b0   :  { %17127 = vst [vmem:[#allocation57_spill] sm:$0xff] %v14608_v47  ;;  %v13146_v16 = vld [vmem:[%s13814_s21 + $0x118] sm:$0xff]  ;;  %v14646_v47 = vunpack.c.l.b16 %v921_v4  ;;  %2726 = vmatpush.bf16.msrb.mxu1 %v13138_v12 }
 0x2b1   :  { %v1146_v27 = vpop.f32.mrf.mxu2  ;;  %17129 = vst [vmem:[#allocation59_spill] sm:$0xff] %v14626_v44  ;;  %v13152_v44 = vld [vmem:[%s13814_s21 + $0x148] sm:$0xff] }
 0x2b2   :  { %v1173_v6 = vpack.c.bf16 %v1146_v27, %v1146_v27  ;;  %2774 = vmatpush.bf16.msrb.mxu2 %v13147_v39  ;;  %2823 = vmatpush.bf16.msrb.mxu3 %v13155_v33  ;;  %v14644_v39 = vunpack.c.l.b16 %v920_v25  ;;  %v13137_v33 = vld [vmem:[%s13814_s21 + $0xd0] sm:$0xff]  ;;  %v17138_v25 = vld [vmem:[#allocation38_spill] sm:$0xff] }
 0x2b3   :  { %v1020_v10 = vpop.f32.mrf.mxu1  ;;  %v789_v4 = vpack.c.bf16 %v17138_v25, %v17138_v25  ;;  %2873 = vmatpush.bf16.msra.mxu0 %v13162_v61  ;;  %v13136_v25 = vld [vmem:[%s13814_s21 + $0xc8] sm:$0xff] }
 0x2b4   :  { %v14616_v26 = vpop.f32.mrf.mxu3  ;;  %v14628_v27 = vunpack.c.l.b16 %v1173_v6  ;;  %v17133_v6 = vld [vmem:[#allocation36_spill] sm:$0xff]  ;;  %17135 = vst [vmem:[#allocation37_spill] sm:$0xff] %v14644_v39  ;;  %2727 = vmatpush.bf16.msrb.mxu1 %v13137_v33  ;;  %v13160_v61 = vld [vmem:[%s13814_s21 + $0x188] sm:$0xff] }
 0x2b5   :  { %17128 = vst [vmem:[#allocation58_spill] sm:$0xff] %v14616_v26  ;;  %v17134_v62 = vpack.c.b16 %v17132_v38, %v17133_v6  ;;  %v13153_v38 = vld [vmem:[%s13814_s21 + $0x150] sm:$0xff]  ;;  %v1691_v12 = vunpack.c.l.b16 %v789_v4 }
 0x2b6   :  { %17130 = vst [vmem:[#allocation60_spill] sm:$0xff] %v14628_v27  ;;  %v14630_v48 = vpop.f32.mrf.mxu0  ;;  %2608 = vmatmul.bf16.gmra.mxu2 %v17131_v60  ;;  %1535 = vmatmul.bf16.gmra.mxu1 %v13108_v49  ;;  %v13145_v60 = vld [vmem:[%s13814_s21 + $0x110] sm:$0xff]  ;;  %v13151_v27 = vld [vmem:[%s13814_s21 + $0x140] sm:$0xff] }
 0x2b7   :  { %17136 = vst [vmem:[#allocation36_spill] sm:$0xff] %v14646_v47  ;;  %2775 = vmatpush.bf16.msrb.mxu2 %v13146_v16  ;;  %2824 = vmatpush.bf16.msrb.mxu3 %v13154_v28 }
 0x2b8   :  { %2728 = vmatpush.bf16.msrb.mxu1 %v13136_v25  ;;  %v13143_v25 = vld [vmem:[%s13814_s21 + $0x100] sm:$0xff] }
 0x2b9   :  { %2657 = vmatmul.bf16.gmra.mxu3 %v17134_v62  ;;  %2706 = vmatmul.bf16.gmra.mxu0 %v1700_v7  ;;  %v1149_v63 = vpop.f32.mrf.mxu2  ;;  %v1045_v62 = vpack.c.bf16 %v1020_v10, %v1020_v10  ;;  %v17139_v7 = vld [vmem:[#allocation41_spill] sm:$0xff]  ;;  %v13161_v10 = vld [vmem:[%s13814_s21 + $0x190] sm:$0xff] }
 0x2ba   :  { %v790_v40 = vpack.c.bf16 %v17139_v7, %v17139_v7  ;;  %v13144_v7 = vld [vmem:[%s13814_s21 + $0x108] sm:$0xff]  ;;  %v1174_v39 = vpack.c.bf16 %v1149_v63, %v1149_v63  ;;  %2874 = vmatpush.bf16.msra.mxu0 %v13161_v10 }
 0x2bb   :  { %v1022_v6 = vpop.f32.mrf.mxu1  ;;  %2776 = vmatpush.bf16.msrb.mxu2 %v13145_v60  ;;  %2825 = vmatpush.bf16.msrb.mxu3 %v13153_v38  ;;  %v14663_v28 = vunpack.c.l.b16 %v1045_v62  ;;  %v13109_v60 = vld [vmem:[%s13809_s17 + $0x230] sm:$0xff]  ;;  %v13135_v38 = vld [vmem:[%s13814_s21 + $0xc0] sm:$0xff] }
 0x2bc   :  { %v14649_v49 = vpop.f32.mrf.mxu3  ;;  %v1046_v53 = vpack.c.bf16 %v1022_v6, %v1022_v6  ;;  %v1692_v6 = vunpack.c.l.b16 %v790_v40  ;;  %v14678_v4 = vunpack.c.l.b16 %v1174_v39  ;;  %2729 = vmatpush.bf16.msrb.mxu1 %v13135_v38  ;;  %v13159_v62 = vld [vmem:[%s13814_s21 + $0x180] sm:$0xff]  ;;  %v17145_v39 = vld [vmem:[#allocation43_spill] sm:$0xff] }
 0x2bd   :  { %17137 = vst [vmem:[#allocation61_spill] sm:$0xff] %v14649_v49  ;;  %v17149_v38 = vld [vmem:[#allocation45_spill] sm:$0xff] }
 0x2be   :  { %v14660_v16 = vpop.f32.mrf.mxu0  ;;  %17140 = vst [vmem:[#allocation38_spill] sm:$0xff] %v14663_v28  ;;  %v14665_v49 = vunpack.c.l.b16 %v1046_v53  ;;  %v1701_v10 = vpack.c.b16 %v1692_v6, %v1691_v12  ;;  %2875 = vmatpush.bf16.msra.mxu0 %v13160_v61  ;;  %v17143_v28 = vld [vmem:[#allocation39_spill] sm:$0xff] }
 0x2bf   :  { %2777 = vmatpush.bf16.msrb.mxu2 %v13144_v7  ;;  %2826 = vmatpush.bf16.msrb.mxu3 %v13152_v44  ;;  %v17146_v7 = vld [vmem:[#allocation42_spill] sm:$0xff] }
 0x2c0   :  { %17141 = vst [vmem:[#allocation41_spill] sm:$0xff] %v14665_v49 }
 0x2c1   :  { %v1151_v47 = vpop.f32.mrf.mxu2 }
 0x2c2   :  { %v1175_v53 = vpack.c.bf16 %v1151_v47, %v1151_v47  ;;  %v17142_v47 = vld [vmem:[#allocation40_spill] sm:$0xff]  ;;  %2876 = vmatpush.bf16.msra.mxu0 %v13159_v62 }
 0x2c3   :  { %v1025_v40 = vpop.f32.mrf.mxu1  ;;  %v17144_v49 = vpack.c.b16 %v17142_v47, %v17143_v28  ;;  %2827 = vmatpush.bf16.msrb.mxu3 %v13151_v27  ;;  %2778 = vmatpush.bf16.msrb.mxu2 %v13143_v25  ;;  %v792_v27 = vpack.c.bf16 %v14397_v15, %v14397_v15  ;;  %v1424_v15 = vpack.c.bf16 %v14451_v32, %v14451_v32 }
 0x2c4   :  { %v14673_v33 = vpop.f32.mrf.mxu3  ;;  %v14680_v63 = vunpack.c.l.b16 %v1175_v53  ;;  %v17147_v53 = vpack.c.b16 %v17145_v39, %v17146_v7  ;;  %v1047_v61 = vpack.c.bf16 %v1025_v40, %v1025_v40  ;;  %v17152_v32 = vpack.c.b16 %v14406_v2, %v14404_v19 }
 0x2c5   :  { %v1694_v62 = vunpack.c.l.b16 %v792_v27  ;;  %v17155_v19 = vpack.c.b16 %v14432_v43, %v14430_v23 }
 0x2c6   :  { %v14683_v26 = vpop.f32.mrf.mxu0  ;;  %2613 = vmatmul.bf16.gmra.mxu2 %v17144_v49  ;;  %1540 = vmatmul.bf16.gmra.mxu1 %v13109_v60  ;;  %v791_v49 = vpack.c.bf16 %v17149_v38, %v17149_v38  ;;  %v14702_v39 = vunpack.c.l.b16 %v1047_v61  ;;  %v1425_v61 = vpack.c.bf16 %v14473_v5, %v14473_v5  ;;  %v14729_v5 = vunpack.c.l.b16 %v1424_v15 }
 0x2c8   :  { %v1693_v25 = vunpack.c.l.b16 %v791_v49  ;;  %17153 = vst [vmem:[#allocation43_spill] sm:$0xff] %v14729_v5 }
 0x2c9   :  { %2662 = vmatmul.bf16.gmra.mxu3 %v17147_v53  ;;  %2711 = vmatmul.bf16.gmra.mxu0 %v1701_v10  ;;  %v1154_v12 = vpop.f32.mrf.mxu2 }
 0x2ca   :  { %v1176_v7 = vpack.c.bf16 %v1154_v12, %v1154_v12  ;;  %v1702_v12 = vpack.c.b16 %v1694_v62, %v1693_v25 }
 0x2cb   :  { %v1027_v28 = vpop.f32.mrf.mxu1 }
 0x2cc   :  { %v14694_v6 = vpop.f32.mrf.mxu3  ;;  %v1048_v60 = vpack.c.bf16 %v1027_v28, %v1027_v28  ;;  %v13110_v28 = vld [vmem:[%s13809_s17 + $0x238] sm:$0xff]  ;;  %s17398_s17 = sld [smem:[#allocation9_spill]] }
 0x2cd   :  { %17148 = vst [vmem:[#allocation40_spill] sm:$0xff] %v14694_v6  ;;  %v14715_v6 = vunpack.c.l.b16 %v1176_v7 }
 0x2ce   :  { %v14700_v47 = vpop.f32.mrf.mxu0  ;;  %v14704_v10 = vunpack.c.l.b16 %v1048_v60 }
 0x2cf   :  { %17150 = vst [vmem:[#allocation39_spill] sm:$0xff] %v14715_v6 }
 0x2d1   :  { %v1156_v53 = vpop.f32.mrf.mxu2 }
 0x2d2   :  { %v1177_v44 = vpack.c.bf16 %v1156_v53, %v1156_v53  ;;  %v17151_v53 = vpack.c.b16 %v14393_v34, %v14391_v37  ;;  %v1293_v37 = vpack.c.bf16 %v14420_v46, %v14420_v46  ;;  %v1294_v34 = vpack.c.bf16 %v14440_v45, %v14440_v45 }
 0x2d3   :  { %v1030_v49 = vpop.f32.mrf.mxu1 }
 0x2d4   :  { %v14708_v38 = vpop.f32.mrf.mxu3  ;;  %v14717_v60 = vunpack.c.l.b16 %v1177_v44  ;;  %v14731_v44 = vunpack.c.l.b16 %v1425_v61  ;;  %v1049_v7 = vpack.c.bf16 %v1030_v49, %v1030_v49  ;;  %v1871_v61 = vunpack.c.l.b16 %v1293_v37 }
 0x2d5   :  { %v1427_v37 = vpack.c.bf16 %v14514_v35, %v14514_v35 }
 0x2d6   :  { %v14719_v27 = vpop.f32.mrf.mxu0  ;;  %2618 = vmatmul.bf16.gmra.mxu2 %v17151_v53  ;;  %1545 = vmatmul.bf16.gmra.mxu1 %v13110_v28  ;;  %v1872_v53 = vunpack.c.l.b16 %v1294_v34 }
 0x2d8   :  { %v1887_v6 = vpack.c.b16 %v1872_v53, %v1871_v61  ;;  %v17156_v61 = vld [vmem:[#allocation35_spill] sm:$0xff]  ;;  %v17157_v53 = vld [vmem:[#allocation34_spill] sm:$0xff] }
 0x2d9   :  { %2667 = vmatmul.bf16.gmra.mxu3 %v17152_v32  ;;  %2716 = vmatmul.bf16.gmra.mxu0 %v1702_v12  ;;  %v1159_v25 = vpop.f32.mrf.mxu2  ;;  %v14743_v12 = vunpack.c.l.b16 %v1049_v7  ;;  %v17158_v46 = vpack.c.b16 %v17156_v61, %v17157_v53  ;;  %v1296_v61 = vpack.c.bf16 %v14481_v8, %v14481_v8 }
 0x2da   :  { %v1178_v40 = vpack.c.bf16 %v1159_v25, %v1159_v25 }
 0x2db   :  { %v1032_v28 = vpop.f32.mrf.mxu1 }
 0x2dc   :  { %v14733_v62 = vpop.f32.mrf.mxu3  ;;  %v1050_v2 = vpack.c.bf16 %v1032_v28, %v1032_v28  ;;  %v1426_v28 = vpack.c.bf16 %v14492_v24, %v14492_v24  ;;  %v14755_v34 = vunpack.c.l.b16 %v1178_v40  ;;  %v17159_v24 = vpack.c.b16 %v14449_v58, %v14447_v55 }
 0x2dd   :  { %17154 = vst [vmem:[#allocation42_spill] sm:$0xff] %v14733_v62  ;;  %v14772_v40 = vunpack.c.l.b16 %v1427_v37 }
 0x2de   :  { %v14741_v15 = vpop.f32.mrf.mxu0  ;;  %v14745_v32 = vunpack.c.l.b16 %v1050_v2  ;;  %v14770_v35 = vunpack.c.l.b16 %v1426_v28 }
 0x2e1   :  { %v1161_v62 = vpop.f32.mrf.mxu2 }
 0x2e2   :  { %v1179_v45 = vpack.c.bf16 %v1161_v62, %v1161_v62  ;;  %v1428_v62 = vpack.c.bf16 %v14533_v0, %v14533_v0 }
 0x2e3   :  { %v1511_v2 = vpop.f32.mrf.mxu1 }
 0x2e4   :  { %v14749_v49 = vpop.f32.mrf.mxu3  ;;  %v14757_v7 = vunpack.c.l.b16 %v1179_v45  ;;  %v1551_v23 = vpack.c.bf16 %v1511_v2, %v1511_v2  ;;  %v14803_v0 = vunpack.c.l.b16 %v1428_v62 }
 0x2e6   :  { %v2682_v25 = vpop.f32.mrf.mxu0  ;;  %2779 = vmatmul.bf16.vlgmr.msrb.gmra.mxu2 %v17155_v19  ;;  %2730 = vmatmul.bf16.vlgmr.msrb.gmra.mxu1 %v17158_v46  ;;  %v1295_v19 = vpack.c.bf16 %v14465_v41, %v14465_v41  ;;  %v14782_v37 = vunpack.c.l.b16 %v1551_v23 }
 0x2e8   :  { %v1873_v2 = vunpack.c.l.b16 %v1295_v19  ;;  %v17160_v19 = vpack.c.b16 %v14477_v9, %v14475_v3  ;;  %v1297_v3 = vpack.c.bf16 %v14506_v54, %v14506_v54 }
 0x2e9   :  { %2828 = vmatmul.bf16.vlgmr.msrb.gmra.mxu3 %v17159_v24  ;;  %2877 = vmatmul.bf16.vlgmr.msra.gmra.mxu0 %v1887_v6  ;;  %v2584_v45 = vpop.f32.mrf.mxu2 }
 0x2eb   :  { %v1513_v46 = vpop.f32.mrf.mxu1 }
 0x2ec   :  { %v2633_v5 = vpop.f32.mrf.mxu3  ;;  %v1552_v58 = vpack.c.bf16 %v1513_v46, %v1513_v46  ;;  %v1429_v46 = vpack.c.bf16 %v14555_v21, %v14555_v21 }
 0x2ed   :  { %v2634_v43 = vadd.f32 %v2633_v5, %v2584_v45  ;;  %v1874_v5 = vunpack.c.l.b16 %v1296_v61  ;;  %v17161_v61 = vld [vmem:[#allocation44_spill] sm:$0xff] }
 0x2ee   :  { %v2684_v28 = vpop.f32.mrf.mxu0  ;;  %v14784_v6 = vunpack.c.l.b16 %v1552_v58  ;;  %v17162_v58 = vpack.c.b16 %v14379_v11, %v17161_v61  ;;  %v14805_v21 = vunpack.c.l.b16 %v1429_v46  ;;  %v1298_v11 = vpack.c.bf16 %v14522_v18, %v14522_v18 }
 0x2ef   :  { %v14780_v53 = vadd.f32 %v2682_v25, %v2634_v43  ;;  %v1888_v43 = vpack.c.b16 %v1874_v5, %v1873_v2 }
 0x2f1   :  { %v2586_v24 = vpop.f32.mrf.mxu2 }
 0x2f3   :  { %v1516_v25 = vpop.f32.mrf.mxu1 }
 0x2f4   :  { %v2635_v45 = vpop.f32.mrf.mxu3  ;;  %v1553_v5 = vpack.c.bf16 %v1516_v25, %v1516_v25  ;;  %v1875_v25 = vunpack.c.l.b16 %v1297_v3  ;;  %v17164_v3 = vpack.c.b16 %v14518_v14, %v14516_v20  ;;  %v1299_v20 = vpack.c.bf16 %v14547_v52, %v14547_v52  ;;  %v13178_v52 = vld [vmem:[%s13814_s21 + $0x218] sm:$0xff] }
 0x2f5   :  { %v2636_v8 = vadd.f32 %v2635_v45, %v2586_v24  ;;  %v17163_v24 = vpack.c.b16 %v14490_v36, %v14488_v57  ;;  %v17187_v57 = vld [vmem:[#allocation51_spill] sm:$0xff] }
 0x2f6   :  { %v2687_v23 = vpop.f32.mrf.mxu0  ;;  %2784 = vmatmul.bf16.gmra.mxu2 %v17160_v19  ;;  %2735 = vmatmul.bf16.gmra.mxu1 %v17162_v58  ;;  %v14815_v46 = vunpack.c.l.b16 %v1553_v5  ;;  %v1876_v19 = vunpack.c.l.b16 %v1298_v11  ;;  %v17165_v11 = vpack.c.b16 %v14418_v59, %v14416_v42  ;;  %v1300_v42 = vpack.c.bf16 %v14563_v13, %v14563_v13 }
 0x2f7   :  { %v14792_v55 = vadd.f32 %v2684_v28, %v2636_v8 }
 0x2f9   :  { %2833 = vmatmul.bf16.gmra.mxu3 %v17163_v24  ;;  %2882 = vmatmul.bf16.gmra.mxu0 %v1888_v43  ;;  %v2589_v2 = vpop.f32.mrf.mxu2  ;;  %v1430_v24 = vpack.c.bf16 %v14574_v17, %v14574_v17 }
 0x2fb   :  { %v1518_v9 = vpop.f32.mrf.mxu1  ;;  %v14836_v17 = vunpack.c.l.b16 %v1430_v24  ;;  %v1877_v24 = vunpack.c.l.b16 %v1299_v20 }
 0x2fc   :  { %v2638_v28 = vpop.f32.mrf.mxu3  ;;  %v1554_v36 = vpack.c.bf16 %v1518_v9, %v1518_v9  ;;  %v17166_v9 = vpack.c.b16 %v14531_v22, %v14529_v30  ;;  %v13182_v30 = vld [vmem:[%s13814_s21 + $0x238] sm:$0xff] }
 0x2fd   :  { %v2639_v45 = vadd.f32 %v2638_v28, %v2589_v2  ;;  %v1431_v2 = vpack.c.bf16 %v14604_v51, %v14604_v51  ;;  %v1889_v28 = vpack.c.b16 %v1876_v19, %v1875_v25  ;;  %2967 = vmatpush.bf16.msra.mxu2 %v13182_v30 }
 0x2fe   :  { %v2689_v62 = vpop.f32.mrf.mxu0  ;;  %v14817_v43 = vunpack.c.l.b16 %v1554_v36 }
 0x2ff   :  { %v14813_v8 = vadd.f32 %v2687_v23, %v2639_v45  ;;  %v14838_v51 = vunpack.c.l.b16 %v1431_v2  ;;  %v1878_v2 = vunpack.c.l.b16 %v1300_v42  ;;  %v17170_v42 = vpack.c.b16 %v14572_v31, %v14570_v50 }
 0x301   :  { %v2591_v61 = vpop.f32.mrf.mxu2 }
 0x303   :  { %v1521_v23 = vpop.f32.mrf.mxu1 }
 0x304   :  { %v2640_v58 = vpop.f32.mrf.mxu3  ;;  %v1555_v25 = vpack.c.bf16 %v1521_v23, %v1521_v23 }
 0x305   :  { %v2641_v18 = vadd.f32 %v2640_v58, %v2591_v61 }
 0x306   :  { %v2692_v5 = vpop.f32.mrf.mxu0  ;;  %2789 = vmatmul.bf16.gmra.mxu2 %v17164_v3  ;;  %2740 = vmatmul.bf16.gmra.mxu1 %v17165_v11  ;;  %v14848_v58 = vunpack.c.l.b16 %v1555_v25  ;;  %v1432_v3 = vpack.c.bf16 %v14630_v48, %v14630_v48  ;;  %v1433_v11 = vpack.c.bf16 %v14660_v16, %v14660_v16  ;;  %v17167_v25 = vpack.c.b16 %v14559_v56, %v14557_v29  ;;  %v17172_v56 = vld [vmem:[#allocation58_spill] sm:$0xff] }
 0x307   :  { %v14825_v45 = vadd.f32 %v2689_v62, %v2641_v18 }
 0x308   :  { %v14869_v48 = vunpack.c.l.b16 %v1432_v3  ;;  %v14871_v16 = vunpack.c.l.b16 %v1433_v11 }
 0x309   :  { %2838 = vmatmul.bf16.gmra.mxu3 %v17166_v9  ;;  %2887 = vmatmul.bf16.gmra.mxu0 %v1889_v28  ;;  %v2594_v36 = vpop.f32.mrf.mxu2  ;;  %v1890_v9 = vpack.c.b16 %v1878_v2, %v1877_v24  ;;  %v17171_v2 = vld [vmem:[#allocation55_spill] sm:$0xff] }
 0x30a   :  { %v1301_v29 = vpack.c.bf16 %v17171_v2, %v17171_v2 }
 0x30b   :  { %v1523_v59 = vpop.f32.mrf.mxu1 }
 0x30c   :  { %v2643_v62 = vpop.f32.mrf.mxu3  ;;  %v1556_v14 = vpack.c.bf16 %v1523_v59, %v1523_v59 }
 0x30d   :  { %v2644_v19 = vadd.f32 %v2643_v62, %v2594_v36 }
 0x30e   :  { %v2694_v22 = vpop.f32.mrf.mxu0  ;;  %v14850_v18 = vunpack.c.l.b16 %v1556_v14 }
 0x30f   :  { %v14846_v61 = vadd.f32 %v2692_v5, %v2644_v19  ;;  %v17168_v19 = vld [vmem:[#allocation48_spill] sm:$0xff] }
 0x310   :  { %v17169_v20 = vpack.c.b16 %v14463_v1, %v17168_v19  ;;  %v1302_v1 = vpack.c.bf16 %v17172_v56, %v17172_v56  ;;  %v17174_v56 = vld [vmem:[#allocation56_spill] sm:$0xff] }
 0x311   :  { %v2596_v23 = vpop.f32.mrf.mxu2 }
 0x313   :  { %v1526_v5 = vpop.f32.mrf.mxu1 }
 0x314   :  { %v2645_v28 = vpop.f32.mrf.mxu3 }
 0x315   :  { %v2646_v13 = vadd.f32 %v2645_v28, %v2596_v23 }
 0x316   :  { %v2697_v36 = vpop.f32.mrf.mxu0  ;;  %2794 = vmatmul.bf16.gmra.mxu2 %v17167_v25  ;;  %2745 = vmatmul.bf16.gmra.mxu1 %v17169_v20 }
 0x317   :  { %v14858_v62 = vadd.f32 %v2694_v22, %v2646_v13  ;;  %v1557_v22 = vpack.c.bf16 %v1526_v5, %v1526_v5  ;;  %v1879_v5 = vunpack.c.l.b16 %v1301_v29  ;;  %v17173_v29 = vld [vmem:[#allocation57_spill] sm:$0xff] }
 0x319   :  { %2843 = vmatmul.bf16.gmra.mxu3 %v17170_v42  ;;  %2892 = vmatmul.bf16.gmra.mxu0 %v1890_v9  ;;  %v2599_v59 = vpop.f32.mrf.mxu2  ;;  %v14881_v3 = vunpack.c.l.b16 %v1557_v22  ;;  %v1880_v9 = vunpack.c.l.b16 %v1302_v1  ;;  %v17175_v1 = vpack.c.b16 %v17173_v29, %v17174_v56 }
 0x31b   :  { %v1528_v23 = vpop.f32.mrf.mxu1  ;;  %v1891_v22 = vpack.c.b16 %v1880_v9, %v1879_v5 }
 0x31c   :  { %v2648_v14 = vpop.f32.mrf.mxu3  ;;  %v1558_v31 = vpack.c.bf16 %v1528_v23, %v1528_v23  ;;  %v17176_v23 = vld [vmem:[#allocation50_spill] sm:$0xff] }
 0x31d   :  { %v2649_v24 = vadd.f32 %v2648_v14, %v2599_v59  ;;  %v1434_v59 = vpack.c.bf16 %v14683_v26, %v14683_v26  ;;  %v17180_v26 = vld [vmem:[#allocation59_spill] sm:$0xff] }
 0x31e   :  { %v2699_v28 = vpop.f32.mrf.mxu0  ;;  %v14883_v11 = vunpack.c.l.b16 %v1558_v31  ;;  %v17177_v31 = vld [vmem:[#allocation49_spill] sm:$0xff] }
 0x31f   :  { %v14879_v13 = vadd.f32 %v2697_v36, %v2649_v24  ;;  %v1435_v36 = vpack.c.bf16 %v14700_v47, %v14700_v47  ;;  %v13174_v47 = vld [vmem:[%s13814_s21 + $0x1f8] sm:$0xff]  ;;  %v14904_v5 = vunpack.c.l.b16 %v1434_v59  ;;  %v1304_v59 = vpack.c.bf16 %v14673_v33, %v14673_v33 }
 0x320   :  { %2918 = vmatpush.bf16.msra.mxu1 %v13174_v47  ;;  %v13172_v47 = vld [vmem:[%s13814_s21 + $0x1e8] sm:$0xff] }
 0x321   :  { %v2601_v25 = vpop.f32.mrf.mxu2  ;;  %v14906_v9 = vunpack.c.l.b16 %v1435_v36 }
 0x323   :  { %v1531_v14 = vpop.f32.mrf.mxu1 }
 0x324   :  { %v2650_v20 = vpop.f32.mrf.mxu3  ;;  %v1559_v29 = vpack.c.bf16 %v1531_v14, %v1531_v14 }
 0x325   :  { %v2651_v42 = vadd.f32 %v2650_v20, %v2601_v25  ;;  %v17178_v25 = vpack.c.b16 %v17176_v23, %v17177_v31  ;;  %v17179_v20 = vld [vmem:[#allocation60_spill] sm:$0xff]  ;;  %v17182_v31 = vld [vmem:[#allocation61_spill] sm:$0xff] }
 0x326   :  { %v2702_v24 = vpop.f32.mrf.mxu0  ;;  %2799 = vmatmul.bf16.gmra.mxu2 %v17175_v1  ;;  %v17181_v50 = vpack.c.b16 %v17179_v20, %v17180_v26  ;;  %v13173_v1 = vld [vmem:[%s13814_s21 + $0x1f0] sm:$0xff]  ;;  %v14920_v20 = vunpack.c.l.b16 %v1559_v29  ;;  %v13179_v29 = vld [vmem:[%s13814_s21 + $0x220] sm:$0xff] }
 0x327   :  { %v14891_v2 = vadd.f32 %v2699_v28, %v2651_v42  ;;  %2750 = vmatmul.bf16.gmra.mxu1 %v17178_v25  ;;  %v13181_v23 = vld [vmem:[%s13814_s21 + $0x230] sm:$0xff] }
 0x328   :  { %2919 = vmatpush.bf16.msra.mxu1 %v13173_v1  ;;  %2968 = vmatpush.bf16.msra.mxu2 %v13181_v23  ;;  %v17186_v1 = vld [vmem:[#allocation52_spill] sm:$0xff] }
 0x329   :  { %2848 = vmatmul.bf16.gmra.mxu3 %v17181_v50  ;;  %2897 = vmatmul.bf16.gmra.mxu0 %v1891_v22  ;;  %v2604_v28 = vpop.f32.mrf.mxu2  ;;  %v1303_v50 = vpack.c.bf16 %v17182_v31, %v17182_v31  ;;  %v17188_v19 = vpack.c.b16 %v17186_v1, %v17187_v57  ;;  %v13177_v1 = vld [vmem:[%s13814_s21 + $0x210] sm:$0xff] }
 0x32b   :  { %v1533_v25 = vpop.f32.mrf.mxu1  ;;  %v1881_v33 = vunpack.c.l.b16 %v1303_v50  ;;  %v1437_v50 = vpack.c.bf16 %v14741_v15, %v14741_v15  ;;  %v13170_v15 = vld [vmem:[%s13814_s21 + $0x1d8] sm:$0xff] }
 0x32c   :  { %v2653_v42 = vpop.f32.mrf.mxu3  ;;  %v1560_v22 = vpack.c.bf16 %v1533_v25, %v1533_v25  ;;  %2920 = vmatpush.bf16.msra.mxu1 %v13172_v47  ;;  %v17183_v47 = vld [vmem:[#allocation41_spill] sm:$0xff] }
 0x32d   :  { %v2654_v56 = vadd.f32 %v2653_v42, %v2604_v28  ;;  %v13180_v28 = vld [vmem:[%s13814_s21 + $0x228] sm:$0xff]  ;;  %v1882_v42 = vunpack.c.l.b16 %v1304_v59 }
 0x32e   :  { %v14916_v30 = vpop.f32.mrf.mxu0  ;;  %v14922_v26 = vunpack.c.l.b16 %v1560_v22  ;;  %2969 = vmatpush.bf16.msra.mxu2 %v13180_v28  ;;  %v17184_v28 = vld [vmem:[#allocation38_spill] sm:$0xff] }
 0x32f   :  { %v14918_v14 = vadd.f32 %v2702_v24, %v2654_v56  ;;  %v13171_v24 = vld [vmem:[%s13814_s21 + $0x1e0] sm:$0xff]  ;;  %v1436_v56 = vpack.c.bf16 %v14719_v27, %v14719_v27  ;;  %v1892_v25 = vpack.c.b16 %v1882_v42, %v1881_v33  ;;  %v17185_v36 = vpack.c.b16 %v17183_v47, %v17184_v28  ;;  %v17190_v47 = vld [vmem:[#allocation40_spill] sm:$0xff] }
 0x330   :  { %2921 = vmatpush.bf16.msra.mxu1 %v13171_v24  ;;  %v17189_v27 = vpack.c.b16 %v14680_v63, %v14678_v4  ;;  %v14951_v42 = vunpack.c.l.b16 %v1437_v50  ;;  %v1305_v4 = vpack.c.bf16 %v17190_v47, %v17190_v47  ;;  %v1306_v63 = vpack.c.bf16 %v14708_v38, %v14708_v38 }
 0x331   :  { %v14926_v31 = vpop.f32.mrf.mxu2  ;;  %v14949_v33 = vunpack.c.l.b16 %v1436_v56 }
 0x332   :  { %2970 = vmatpush.bf16.msra.mxu2 %v13179_v29  ;;  %v1883_v38 = vunpack.c.l.b16 %v1305_v4  ;;  %v17192_v4 = vpack.c.b16 %v14704_v10, %v14702_v39  ;;  %v1308_v39 = vpack.c.bf16 %v14749_v49, %v14749_v49 }
 0x333   :  { %v1536_v59 = vpop.f32.mrf.mxu1 }
 0x334   :  { %v14930_v23 = vpop.f32.mrf.mxu3  ;;  %2922 = vmatpush.bf16.msra.mxu1 %v13170_v15  ;;  %v13168_v15 = vld [vmem:[%s13814_s21 + $0x1c8] sm:$0xff] }
 0x336   :  { %v2707_v22 = vpop.f32.mrf.mxu0  ;;  %2804 = vmatmul.bf16.gmra.mxu2 %v17185_v36  ;;  %v1561_v36 = vpack.c.bf16 %v1536_v59, %v1536_v59 }
 0x337   :  { %2755 = vmatmul.bf16.gmra.mxu1 %v17188_v19  ;;  %2971 = vmatpush.bf16.msra.mxu2 %v13178_v52  ;;  %v13169_v19 = vld [vmem:[%s13814_s21 + $0x1d0] sm:$0xff] }
 0x338   :  { %2923 = vmatpush.bf16.msra.mxu1 %v13169_v19  ;;  %v14965_v28 = vunpack.c.l.b16 %v1561_v36  ;;  %v13167_v19 = vld [vmem:[%s13814_s21 + $0x1c0] sm:$0xff] }
 0x339   :  { %2853 = vmatmul.bf16.gmra.mxu3 %v17189_v27  ;;  %2902 = vmatmul.bf16.gmra.mxu0 %v1892_v25  ;;  %v2609_v24 = vpop.f32.mrf.mxu2 }
 0x33b   :  { %v1538_v56 = vpop.f32.mrf.mxu1  ;;  %2972 = vmatpush.bf16.msra.mxu2 %v13177_v1 }
 0x33c   :  { %v2658_v29 = vpop.f32.mrf.mxu3  ;;  %v1562_v25 = vpack.c.bf16 %v1538_v56, %v1538_v56  ;;  %2924 = vmatpush.bf16.msra.mxu1 %v13168_v15 }
 0x33d   :  { %v2659_v57 = vadd.f32 %v2658_v29, %v2609_v24  ;;  %v13176_v24 = vld [vmem:[%s13814_s21 + $0x208] sm:$0xff]  ;;  %v1884_v29 = vunpack.c.l.b16 %v1306_v63 }
 0x33e   :  { %v14961_v52 = vpop.f32.mrf.mxu0  ;;  %v14967_v27 = vunpack.c.l.b16 %v1562_v25  ;;  %v17193_v63 = vld [vmem:[#allocation54_spill] sm:$0xff]  ;;  %v17194_v25 = vld [vmem:[#allocation53_spill] sm:$0xff] }
 0x33f   :  { %17191 = vst [vmem:[#allocation45_spill] sm:$0xff] %v14961_v52  ;;  %v14963_v59 = vadd.f32 %v2707_v22, %v2659_v57  ;;  %2973 = vmatpush.bf16.msra.mxu2 %v13176_v24  ;;  %v13175_v22 = vld [vmem:[%s13814_s21 + $0x200] sm:$0xff]  ;;  %v1893_v36 = vpack.c.b16 %v1884_v29, %v1883_v38  ;;  %v17195_v15 = vpack.c.b16 %v17193_v63, %v17194_v25  ;;  %v17196_v24 = vld [vmem:[#allocation39_spill] sm:$0xff]  ;;  %s17399_s21 = sld [smem:[#allocation10_spill]] }
 0x340   :  { %2925 = vmatpush.bf16.msra.mxu1 %v13167_v19  ;;  %v17197_v56 = vpack.c.b16 %v14717_v60, %v17196_v24  ;;  %v17198_v29 = vld [vmem:[#allocation42_spill] sm:$0xff] }
 0x341   :  { %v14971_v47 = vpop.f32.mrf.mxu2  ;;  %v1307_v19 = vpack.c.bf16 %v17198_v29, %v17198_v29 }
 0x343   :  { %v1541_v57 = vpop.f32.mrf.mxu1  ;;  %2974 = vmatpush.bf16.msra.mxu2 %v13175_v22 }
 0x344   :  { %v14975_v50 = vpop.f32.mrf.mxu3  ;;  %v1563_v52 = vpack.c.bf16 %v1541_v57, %v1541_v57 }
 0x346   :  { %v2712_v1 = vpop.f32.mrf.mxu0  ;;  %2809 = vmatmul.bf16.gmra.mxu2 %v17192_v4  ;;  %v14996_v25 = vunpack.c.l.b16 %v1563_v52  ;;  %v17202_v52 = vld [vmem:[#allocation36_spill] sm:$0xff] }
 0x347   :  { %2760 = vmatmul.bf16.gmra.mxu1 %v17195_v15 }
 0x349   :  { %2858 = vmatmul.bf16.gmra.mxu3 %v17197_v56  ;;  %2907 = vmatmul.bf16.gmra.mxu0 %v1893_v36  ;;  %v2614_v54 = vpop.f32.mrf.mxu2  ;;  %v1885_v56 = vunpack.c.l.b16 %v1307_v19  ;;  %v1886_v36 = vunpack.c.l.b16 %v1308_v39  ;;  %v17205_v19 = vpack.c.b16 %v14757_v7, %v14755_v34 }
 0x34b   :  { %v1543_v10 = vpop.f32.mrf.mxu1  ;;  %v1894_v15 = vpack.c.b16 %v1886_v36, %v1885_v56 }
 0x34c   :  { %v2663_v41 = vpop.f32.mrf.mxu3  ;;  %v1564_v22 = vpack.c.bf16 %v1543_v10, %v1543_v10 }
 0x34d   :  { %v2664_v38 = vadd.f32 %v2663_v41, %v2614_v54 }
 0x34e   :  { %v14992_v4 = vpop.f32.mrf.mxu0  ;;  %v14998_v60 = vunpack.c.l.b16 %v1564_v22 }
 0x34f   :  { %17199 = vst [vmem:[#allocation35_spill] sm:$0xff] %v14992_v4  ;;  %v14994_v63 = vadd.f32 %v2712_v1, %v2664_v38  ;;  %v17201_v1 = vpack.c.b16 %v14745_v32, %v14743_v12  ;;  %v17203_v38 = vld [vmem:[#allocation37_spill] sm:$0xff] }
 0x350   :  { %v17204_v29 = vpack.c.b16 %v17202_v52, %v17203_v38 }
 0x351   :  { %v15000_v57 = vpop.f32.mrf.mxu2 }
 0x353   :  { %v1546_v49 = vpop.f32.mrf.mxu1 }
 0x354   :  { %v15004_v54 = vpop.f32.mrf.mxu3  ;;  %v1565_v22 = vpack.c.bf16 %v1546_v49, %v1546_v49 }
 0x355   :  { %17200 = vst [vmem:[#allocation34_spill] sm:$0xff] %v15004_v54 }
 0x356   :  { %v2717_v24 = vpop.f32.mrf.mxu0  ;;  %2814 = vmatmul.bf16.gmra.mxu2 %v17201_v1  ;;  %v15019_v12 = vunpack.c.l.b16 %v1565_v22 }
 0x357   :  { %2765 = vmatmul.bf16.gmra.mxu1 %v17204_v29 }
 0x359   :  { %2863 = vmatmul.bf16.gmra.mxu3 %v17205_v19  ;;  %2912 = vmatmul.bf16.gmra.mxu0 %v1894_v15  ;;  %v2619_v39 = vpop.f32.mrf.mxu2 }
 0x35b   :  { %v1548_v4 = vpop.f32.mrf.mxu1 }
 0x35c   :  { %v2668_v10 = vpop.f32.mrf.mxu3  ;;  %v1566_v56 = vpack.c.bf16 %v1548_v4, %v1548_v4  ;;  %v17207_v4 = vpack.c.b16 %v14784_v6, %v14782_v37 }
 0x35d   :  { %v2669_v41 = vadd.f32 %v2668_v10, %v2619_v39 }
 0x35e   :  { %v15015_v36 = vpop.f32.mrf.mxu0  ;;  %v15021_v32 = vunpack.c.l.b16 %v1566_v56 }
 0x35f   :  { %17206 = vst [vmem:[#allocation44_spill] sm:$0xff] %v15015_v36  ;;  %v15017_v54 = vadd.f32 %v2717_v24, %v2669_v41  ;;  %v17208_v41 = vld [vmem:[#allocation47_spill] sm:$0xff]  ;;  %v17209_v24 = vld [vmem:[#allocation46_spill] sm:$0xff] }
 0x360   :  { %v17210_v38 = vpack.c.b16 %v17208_v41, %v17209_v24  ;;  %v17212_v24 = vld [vmem:[#allocation43_spill] sm:$0xff] }
 0x361   :  { %v15023_v1 = vpop.f32.mrf.mxu2 }
 0x363   :  { %v2731_v15 = vpop.f32.mrf.mxu1 }
 0x364   :  { %v15027_v7 = vpop.f32.mrf.mxu3  ;;  %v2732_v49 = vadd.f32 %v2731_v15, %v14780_v53 }
 0x366   :  { %v2878_v52 = vpop.f32.mrf.mxu0  ;;  %2975 = vmatmul.bf16.vlgmr.msra.gmra.mxu2 %v17207_v4 }
 0x367   :  { %2926 = vmatmul.bf16.vlgmr.msra.gmra.mxu1 %v17210_v38 }
 0x369   :  { %v2780_v29 = vpop.f32.mrf.mxu2 }
 0x36a   :  { %v2781_v19 = vadd.f32 %v2780_v29, %v2732_v49  ;;  %v17211_v49 = vpack.c.b16 %v14817_v43, %v14815_v46 }
 0x36b   :  { %v2733_v22 = vpop.f32.mrf.mxu1 }
 0x36c   :  { %v2829_v39 = vpop.f32.mrf.mxu3  ;;  %v2734_v56 = vadd.f32 %v2733_v22, %v14792_v55  ;;  %v17213_v55 = vpack.c.b16 %v14731_v44, %v17212_v24 }
 0x36d   :  { %v2830_v10 = vadd.f32 %v2829_v39, %v2781_v19 }
 0x36e   :  { %v15037_v34 = vpop.f32.mrf.mxu0 }
 0x36f   :  { %v15039_v36 = vadd.f32 %v2878_v52, %v2830_v10 }
 0x371   :  { %v2782_v53 = vpop.f32.mrf.mxu2 }
 0x372   :  { %v15041_v15 = vadd.f32 %v2782_v53, %v2734_v56 }
 0x373   :  { %v2736_v6 = vpop.f32.mrf.mxu1 }
 0x374   :  { %v15043_v37 = vpop.f32.mrf.mxu3  ;;  %v2737_v4 = vadd.f32 %v2736_v6, %v14813_v8 }
 0x376   :  { %v2883_v41 = vpop.f32.mrf.mxu0  ;;  %2980 = vmatmul.bf16.gmra.mxu2 %v17211_v49 }
 0x377   :  { %2931 = vmatmul.bf16.gmra.mxu1 %v17213_v55 }
 0x379   :  { %v2785_v38 = vpop.f32.mrf.mxu2 }
 0x37a   :  { %v2786_v52 = vadd.f32 %v2785_v38, %v2737_v4  ;;  %v17214_v4 = vpack.c.b16 %v14850_v18, %v14848_v58 }
 0x37b   :  { %v2738_v39 = vpop.f32.mrf.mxu1 }
 0x37c   :  { %v2834_v29 = vpop.f32.mrf.mxu3  ;;  %v2739_v10 = vadd.f32 %v2738_v39, %v14825_v45  ;;  %v17215_v45 = vpack.c.b16 %v14772_v40, %v14770_v35  ;;  %v17216_v40 = vpack.c.b16 %v14883_v11, %v14881_v3 }
 0x37d   :  { %v2835_v19 = vadd.f32 %v2834_v29, %v2786_v52 }
 0x37e   :  { %v15053_v22 = vpop.f32.mrf.mxu0 }
 0x37f   :  { %v15055_v56 = vadd.f32 %v2883_v41, %v2835_v19 }
 0x381   :  { %v2787_v8 = vpop.f32.mrf.mxu2 }
 0x382   :  { %v15057_v53 = vadd.f32 %v2787_v8, %v2739_v10  ;;  %v17217_v10 = vpack.c.b16 %v14805_v21, %v14803_v0  ;;  %v17218_v21 = vpack.c.b16 %v14922_v26, %v14920_v20  ;;  %v17220_v20 = vpack.c.b16 %v14967_v27, %v14965_v28 }
 0x383   :  { %v2741_v43 = vpop.f32.mrf.mxu1  ;;  %v17223_v28 = vpack.c.b16 %v14906_v9, %v14904_v5  ;;  %v17225_v5 = vpack.c.b16 %v14951_v42, %v14949_v33 }
 0x384   :  { %v15059_v46 = vpop.f32.mrf.mxu3  ;;  %v2742_v44 = vadd.f32 %v2741_v43, %v14846_v61 }
 0x386   :  { %v2888_v6 = vpop.f32.mrf.mxu0  ;;  %2985 = vmatmul.bf16.gmra.mxu2 %v17214_v4 }
 0x387   :  { %2936 = vmatmul.bf16.gmra.mxu1 %v17215_v45 }
 0x389   :  { %v2790_v49 = vpop.f32.mrf.mxu2 }
 0x38a   :  { %v2791_v41 = vadd.f32 %v2790_v49, %v2742_v44 }
 0x38b   :  { %v2743_v38 = vpop.f32.mrf.mxu1 }
 0x38c   :  { %v2839_v24 = vpop.f32.mrf.mxu3  ;;  %v2744_v52 = vadd.f32 %v2743_v38, %v14858_v62 }
 0x38d   :  { %v2840_v55 = vadd.f32 %v2839_v24, %v2791_v41 }
 0x38e   :  { %v15071_v19 = vpop.f32.mrf.mxu0 }
 0x38f   :  { %v15069_v29 = vadd.f32 %v2888_v6, %v2840_v55  ;;  %v17219_v55 = vpack.c.b16 %v14838_v51, %v14836_v17  ;;  %v17221_v17 = vpack.c.b16 %v14871_v16, %v14869_v48 }
 0x391   :  { %v2792_v61 = vpop.f32.mrf.mxu2 }
 0x392   :  { %v15073_v39 = vadd.f32 %v2792_v61, %v2744_v52 }
 0x393   :  { %v2746_v18 = vpop.f32.mrf.mxu1 }
 0x394   :  { %v15075_v58 = vpop.f32.mrf.mxu3  ;;  %v2747_v35 = vadd.f32 %v2746_v18, %v14879_v13 }
 0x396   :  { %2990 = vmatmul.bf16.gmra.mxu2 %v17216_v40  ;;  %v2893_v62 = vpop.f32.mrf.mxu0 }
 0x397   :  { %2941 = vmatmul.bf16.gmra.mxu1 %v17217_v10 }
 0x399   :  { %v2795_v8 = vpop.f32.mrf.mxu2 }
 0x39a   :  { %v2796_v43 = vadd.f32 %v2795_v8, %v2747_v35 }
 0x39b   :  { %v2748_v4 = vpop.f32.mrf.mxu1 }
 0x39c   :  { %v2844_v44 = vpop.f32.mrf.mxu3  ;;  %v2749_v45 = vadd.f32 %v2748_v4, %v14891_v2 }
 0x39d   :  { %v2845_v6 = vadd.f32 %v2844_v44, %v2796_v43 }
 0x39e   :  { %v15091_v3 = vpop.f32.mrf.mxu0 }
 0x39f   :  { %v15085_v49 = vadd.f32 %v2893_v62, %v2845_v6 }
 0x3a1   :  { %v2797_v41 = vpop.f32.mrf.mxu2 }
 0x3a2   :  { %v15087_v13 = vadd.f32 %v2797_v41, %v2749_v45 }
 0x3a4   :  { %v15089_v24 = vpop.f32.mrf.mxu3  ;;  %v2751_v11 = vpop.f32.mrf.mxu1 }
 0x3a5   :  { %v2752_v0 = vadd.f32 %v2751_v11, %v14918_v14 }
 0x3a6   :  { %2995 = vmatmul.bf16.gmra.mxu2 %v17218_v21  ;;  %v2898_v35 = vpop.f32.mrf.mxu0 }
 0x3a7   :  { %2946 = vmatmul.bf16.gmra.mxu1 %v17219_v55  ;;  %v15149_v55 = vld [vmem:[%s13819_s25] ss:$0 sm:$0xff] }
 0x3a9   :  { %v2800_v2 = vpop.f32.mrf.mxu2 }
 0x3aa   :  { %v2801_v38 = vadd.f32 %v2800_v2, %v2752_v0 }
 0x3ac   :  { %v2849_v52 = vpop.f32.mrf.mxu3  ;;  %v15100_v18 = vpop.f32.mrf.mxu1 }
 0x3ad   :  { %v2850_v61 = vadd.f32 %v2849_v52, %v2801_v38  ;;  %v15154_v38 = vld [vmem:[%s13819_s25 + $0x1] ss:$0 sm:$0xff]  ;;  %s17400_s25 = sld [smem:[#allocation12_spill]] }
 0x3af   :  { %v15102_v40 = vadd.f32 %v2898_v35, %v2850_v61 }
 0x3b1   :  { %v15104_v10 = vpop.f32.mrf.mxu2 }
 0x3b4   :  { %v2756_v14 = vpop.f32.mrf.mxu1 }
 0x3b5   :  { %v2757_v62 = vadd.f32 %v2756_v14, %v14963_v59  ;;  %v17222_v59 = vpack.c.b16 %v14998_v60, %v14996_v25 }
 0x3b6   :  { %3000 = vmatmul.bf16.gmra.mxu2 %v17220_v20 }
 0x3b7   :  { %2951 = vmatmul.bf16.gmra.mxu1 %v17221_v17 }
 0x3b9   :  { %v2805_v51 = vpop.f32.mrf.mxu2 }
 0x3ba   :  { %v15113_v26 = vadd.f32 %v2805_v51, %v2757_v62 }
 0x3bc   :  { %v15115_v8 = vpop.f32.mrf.mxu1 }
 0x3c1   :  { %v15117_v43 = vpop.f32.mrf.mxu2 }
 0x3c4   :  { %v2761_v44 = vpop.f32.mrf.mxu1 }
 0x3c5   :  { %v2762_v6 = vadd.f32 %v2761_v44, %v14994_v63  ;;  %v17224_v63 = vpack.c.b16 %v15021_v32, %v15019_v12  ;;  %v2832_v12 = vadd.f32 %v15043_v37, %v15041_v15 }
 0x3c6   :  { %3005 = vmatmul.bf16.gmra.mxu2 %v17222_v59 }
 0x3c7   :  { %2956 = vmatmul.bf16.gmra.mxu1 %v17223_v28  ;;  %v2881_v33 = vadd.f32 %v15037_v34, %v2832_v12  ;;  %v2837_v34 = vadd.f32 %v15059_v46, %v15057_v53 }
 0x3c9   :  { %v2810_v48 = vpop.f32.mrf.mxu2  ;;  %v2886_v28 = vadd.f32 %v15053_v22, %v2837_v34  ;;  %v2842_v22 = vadd.f32 %v15075_v58, %v15073_v39  ;;  %v2851_v34 = vpop.f32.mrf.mxu3 }
 0x3ca   :  { %v15126_v16 = vadd.f32 %v2810_v48, %v2762_v6 }
 0x3cc   :  { %v15128_v27 = vpop.f32.mrf.mxu1 }
 0x3d1   :  { %v15130_v4 = vpop.f32.mrf.mxu2 }
 0x3d4   :  { %v2766_v45 = vpop.f32.mrf.mxu1 }
 0x3d5   :  { %v2767_v41 = vadd.f32 %v2766_v45, %v15017_v54 }
 0x3d6   :  { %3010 = vmatmul.bf16.gmra.mxu2 %v17224_v63 }
 0x3d7   :  { %2961 = vmatmul.bf16.gmra.mxu1 %v17225_v5 }
 0x3d9   :  { %v2815_v9 = vpop.f32.mrf.mxu2 }
 0x3da   :  { %v15139_v25 = vadd.f32 %v2815_v9, %v2767_v41 }
 0x3dc   :  { %v15141_v60 = vpop.f32.mrf.mxu1 }
 0x3e1   :  { %v15143_v11 = vpop.f32.mrf.mxu2 }
 0x3e4   :  { %v2927_v0 = vpop.f32.mrf.mxu1 }
 0x3e5   :  { %v2928_v21 = vadd.f32 %v2927_v0, %v15039_v36 }
 0x3e9   :  { %v2976_v54 = vpop.f32.mrf.mxu2 }
 0x3ea   :  { %v2977_v32 = vadd.f32 %v2976_v54, %v2928_v21 }
 0x3ec   :  { %v2929_v2 = vpop.f32.mrf.mxu1  ;;  %v3018_v42 = vmul.f32 %v15149_v55, %v2977_v32 }
 0x3ed   :  { %v2930_v52 = vadd.f32 %v2929_v2, %v2881_v33  ;;  %v2891_v33 = vadd.f32 %v15071_v19, %v2842_v22  ;;  %v2847_v19 = vadd.f32 %v15089_v24, %v15087_v13 }
 0x3ee   :  { %v3036_v14 = vadd.f32 %v15154_v38, %v3018_v42 }
 0x3f0   :  { %v3052_v20 = vmax.f32 %v3036_v14, 0.0 }
 0x3f1   :  { %v2978_v61 = vpop.f32.mrf.mxu2 }
 0x3f2   :  { %v2979_v35 = vadd.f32 %v2978_v61, %v2930_v52 }
 0x3f4   :  { %v3019_v36 = vmul.f32 %v15149_v55, %v2979_v35  ;;  %v2932_v62 = vpop.f32.mrf.mxu1 }
 0x3f5   :  { %v2933_v15 = vadd.f32 %v2932_v62, %v15055_v56 }
 0x3f6   :  { %v3037_v37 = vadd.f32 %v15154_v38, %v3019_v36 }
 0x3f8   :  { %v3053_v17 = vmax.f32 %v3037_v37, 0.0 }
 0x3f9   :  { %v2981_v51 = vpop.f32.mrf.mxu2 }
 0x3fa   :  { %v15162_v44 = vpack.c.bf16 %v3053_v17, %v3052_v20  ;;  %v2982_v6 = vadd.f32 %v2981_v51, %v2933_v15 }
 0x3fc   :  { %v2934_v59 = vpop.f32.mrf.mxu1  ;;  %v3020_v48 = vmul.f32 %v15149_v55, %v2982_v6  ;;  %v2656_v6 = vadd.f32 %v14930_v23, %v14926_v31 }
 0x3fd   :  { %v2935_v45 = vadd.f32 %v2934_v59, %v2886_v28  ;;  %v2896_v59 = vadd.f32 %v15091_v3, %v2847_v19  ;;  %v2854_v3 = vpop.f32.mrf.mxu3 }
 0x3fe   :  { %v3038_v56 = vadd.f32 %v15154_v38, %v3020_v48  ;;  %v2900_v48 = vpop.f32.mrf.mxu0 }
 0x400   :  { %v3054_v46 = vmax.f32 %v3038_v56, 0.0 }
 0x401   :  { %v2983_v41 = vpop.f32.mrf.mxu2 }
 0x402   :  { %v2984_v63 = vadd.f32 %v2983_v41, %v2935_v45  ;;  %v2705_v41 = vadd.f32 %v14916_v30, %v2656_v6 }
 0x404   :  { %v3021_v5 = vmul.f32 %v15149_v55, %v2984_v63  ;;  %v2937_v9 = vpop.f32.mrf.mxu1  ;;  %v2754_v13 = vadd.f32 %v15100_v18, %v2705_v41 }
 0x405   :  { %v2938_v0 = vadd.f32 %v2937_v9, %v15069_v29 }
 0x406   :  { %v3039_v53 = vadd.f32 %v15154_v38, %v3021_v5  ;;  %v2803_v31 = vadd.f32 %v15104_v10, %v2754_v13  ;;  %v2903_v18 = vpop.f32.mrf.mxu0  ;;  %v2856_v10 = vpop.f32.mrf.mxu3  ;;  %v17228_v13 = vld [vmem:[#allocation35_spill] sm:$0xff] }
 0x408   :  { %v3055_v21 = vmax.f32 %v3039_v53, 0.0 }
 0x409   :  { %v2986_v54 = vpop.f32.mrf.mxu2 }
 0x40a   :  { %v15172_v12 = vpack.c.bf16 %v3055_v21, %v3054_v46  ;;  %v2987_v32 = vadd.f32 %v2986_v54, %v2938_v0  ;;  %v2852_v21 = vadd.f32 %v2851_v34, %v2803_v31 }
 0x40c   :  { %v2939_v2 = vpop.f32.mrf.mxu1  ;;  %v3022_v42 = vmul.f32 %v15149_v55, %v2987_v32  ;;  %v2661_v32 = vadd.f32 %v14975_v50, %v14971_v47 }
 0x40d   :  { %v2940_v52 = vadd.f32 %v2939_v2, %v2891_v33  ;;  %v2901_v2 = vadd.f32 %v2900_v48, %v2852_v21 }
 0x40e   :  { %v3040_v29 = vadd.f32 %v15154_v38, %v3022_v42  ;;  %v2859_v6 = vpop.f32.mrf.mxu3 }
 0x410   :  { %v3056_v58 = vmax.f32 %v3040_v29, 0.0  ;;  %v2855_v29 = vadd.f32 %v2854_v3, %v15113_v26 }
 0x411   :  { %v2988_v61 = vpop.f32.mrf.mxu2 }
 0x412   :  { %v2989_v35 = vadd.f32 %v2988_v61, %v2940_v52  ;;  %v17226_v52 = vld [vmem:[#allocation45_spill] sm:$0xff]  ;;  %v2904_v19 = vadd.f32 %v2903_v18, %v2855_v29 }
 0x413   :  { %v2710_v61 = vadd.f32 %v17226_v52, %v2661_v32 }
 0x414   :  { %v3023_v14 = vmul.f32 %v15149_v55, %v2989_v35  ;;  %v2942_v36 = vpop.f32.mrf.mxu1 }
 0x415   :  { %v2943_v62 = vadd.f32 %v2942_v36, %v15085_v49 }
 0x416   :  { %v3041_v39 = vadd.f32 %v15154_v38, %v3023_v14  ;;  %v2759_v14 = vadd.f32 %v15115_v8, %v2710_v61 }
 0x418   :  { %v3057_v15 = vmax.f32 %v3041_v39, 0.0  ;;  %v2808_v50 = vadd.f32 %v15117_v43, %v2759_v14 }
 0x419   :  { %v2991_v37 = vpop.f32.mrf.mxu2 }
 0x41a   :  { %v15182_v20 = vpack.c.bf16 %v3057_v15, %v3056_v58  ;;  %v2992_v17 = vadd.f32 %v2991_v37, %v2943_v62  ;;  %v2905_v58 = vpop.f32.mrf.mxu0 }
 0x41c   :  { %v2944_v51 = vpop.f32.mrf.mxu1  ;;  %v3024_v49 = vmul.f32 %v15149_v55, %v2992_v17 }
 0x41d   :  { %v2945_v28 = vadd.f32 %v2944_v51, %v2896_v59  ;;  %v2857_v51 = vadd.f32 %v2856_v10, %v2808_v50 }
 0x41e   :  { %v3042_v24 = vadd.f32 %v15154_v38, %v3024_v49  ;;  %v17227_v49 = vld [vmem:[#allocation34_spill] sm:$0xff] }
 0x41f   :  { %v2906_v48 = vadd.f32 %v2905_v58, %v2857_v51 }
 0x420   :  { %v3058_v0 = vmax.f32 %v3042_v24, 0.0 }
 0x421   :  { %v2993_v45 = vpop.f32.mrf.mxu2 }
 0x422   :  { %v2994_v63 = vadd.f32 %v2993_v45, %v2945_v28  ;;  %v2666_v28 = vadd.f32 %v17227_v49, %v15000_v57  ;;  %v2908_v45 = vpop.f32.mrf.mxu0 }
 0x424   :  { %v3025_v56 = vmul.f32 %v15149_v55, %v2994_v63  ;;  %v2947_v5 = vpop.f32.mrf.mxu1  ;;  %v2715_v24 = vadd.f32 %v17228_v13, %v2666_v28 }
 0x425   :  { %v2948_v9 = vadd.f32 %v2947_v5, %v15102_v40  ;;  %v2860_v5 = vadd.f32 %v2859_v6, %v15126_v16 }
 0x426   :  { %v3043_v23 = vadd.f32 %v15154_v38, %v3025_v56 }
 0x428   :  { %v3059_v53 = vmax.f32 %v3043_v23, 0.0 }
 0x429   :  { %v2996_v46 = vpop.f32.mrf.mxu2 }
 0x42a   :  { %v15195_v30 = vpack.c.bf16 %v3059_v53, %v3058_v0  ;;  %v2997_v54 = vadd.f32 %v2996_v46, %v2948_v9  ;;  %v2764_v9 = vadd.f32 %v15128_v27, %v2715_v24  ;;  %v2861_v0 = vpop.f32.mrf.mxu3  ;;  %v2910_v18 = vpop.f32.mrf.mxu0 }
 0x42c   :  { %v2949_v22 = vpop.f32.mrf.mxu1  ;;  %v3026_v40 = vmul.f32 %v15149_v55, %v2997_v54  ;;  %v2813_v57 = vadd.f32 %v15130_v4, %v2764_v9  ;;  %v2909_v54 = vadd.f32 %v2908_v45, %v2860_v5  ;;  %v13199_v5 = vld [vmem:[%s13824_s29 + $0x80] sm:$0xff] }
 0x42d   :  { %v2950_v33 = vadd.f32 %v2949_v22, %v2901_v2  ;;  %v13207_v9 = vld [vmem:[%s13824_s29 + $0xc0] sm:$0xff] }
 0x42e   :  { %v3044_v36 = vadd.f32 %v15154_v38, %v3026_v40  ;;  %v2862_v32 = vadd.f32 %v2861_v0, %v2813_v57  ;;  %v13208_v0 = vld [vmem:[%s13824_s29 + $0xc8] sm:$0xff]  ;;  %v13193_v57 = vld [vmem:[%s13824_s29 + $0x50] sm:$0xff] }
 0x430   :  { %v3060_v15 = vmax.f32 %v3044_v36, 0.0  ;;  %v2911_v10 = vadd.f32 %v2910_v18, %v2862_v32  ;;  %v13186_v18 = vld [vmem:[%s13824_s29 + $0x18] sm:$0xff] }
 0x431   :  { %v2998_v42 = vpop.f32.mrf.mxu2  ;;  %v13210_v32 = vld [vmem:[%s13824_s29 + $0xd8] sm:$0xff] }
 0x432   :  { %v2999_v35 = vadd.f32 %v2998_v42, %v2950_v33  ;;  %v2671_v33 = vadd.f32 %v15027_v7, %v15023_v1  ;;  %v2864_v42 = vpop.f32.mrf.mxu3  ;;  %v2913_v36 = vpop.f32.mrf.mxu0 }
 0x434   :  { %v3027_v62 = vmul.f32 %v15149_v55, %v2999_v35  ;;  %v2952_v39 = vpop.f32.mrf.mxu1  ;;  %v17229_v35 = vld [vmem:[#allocation44_spill] sm:$0xff] }
 0x435   :  { %v2953_v26 = vadd.f32 %v2952_v39, %v2904_v19  ;;  %v2720_v29 = vadd.f32 %v17229_v35, %v2671_v33  ;;  %v13189_v33 = vld [vmem:[%s13824_s29 + $0x30] sm:$0xff]  ;;  %v13214_v35 = vld [vmem:[%s13824_s29 + $0xf8] sm:$0xff] }
 0x436   :  { %v3045_v47 = vadd.f32 %v15154_v38, %v3027_v62  ;;  %v2865_v62 = vadd.f32 %v2864_v42, %v15139_v25  ;;  %v13213_v42 = vld [vmem:[%s13824_s29 + $0xf0] sm:$0xff] }
 0x437   :  { %v2769_v39 = vadd.f32 %v15141_v60, %v2720_v29  ;;  %v13223_v29 = vld [vmem:[%s13824_s29 + $0x140] sm:$0xff] }
 0x438   :  { %v3061_v37 = vmax.f32 %v3045_v47, 0.0  ;;  %v2914_v19 = vadd.f32 %v2913_v36, %v2865_v62  ;;  %v13215_v36 = vld [vmem:[%s13824_s29 + $0x100] sm:$0xff] }
 0x439   :  { %v3001_v17 = vpop.f32.mrf.mxu2  ;;  %v2818_v1 = vadd.f32 %v15143_v11, %v2769_v39  ;;  %v13231_v62 = vld [vmem:[%s13824_s29 + $0x180] sm:$0xff] }
 0x43a   :  { %v15207_v34 = vpack.c.bf16 %v3061_v37, %v3060_v15  ;;  %v3002_v8 = vadd.f32 %v3001_v17, %v2953_v26  ;;  %v2866_v17 = vpop.f32.mrf.mxu3  ;;  %v2915_v60 = vpop.f32.mrf.mxu0 }
 0x43b   :  { %v2867_v26 = vadd.f32 %v2866_v17, %v2818_v1 }
 0x43c   :  { %v2954_v59 = vpop.f32.mrf.mxu1  ;;  %v3028_v43 = vmul.f32 %v15149_v55, %v3002_v8 }
 0x43d   :  { %v2955_v41 = vadd.f32 %v2954_v59, %v2906_v48  ;;  %v2916_v49 = vadd.f32 %v2915_v60, %v2867_v26 }
 0x43e   :  { %v3046_v31 = vadd.f32 %v15154_v38, %v3028_v43 }
 0x440   :  { %v3062_v46 = vmax.f32 %v3046_v31, 0.0  ;;  %v13184_v31 = vld [vmem:[%s13824_s29 + $0x8] sm:$0xff] }
 0x441   :  { %v3003_v63 = vpop.f32.mrf.mxu2 }
 0x442   :  { %v3004_v56 = vadd.f32 %v3003_v63, %v2955_v41 }
 0x444   :  { %v3029_v23 = vmul.f32 %v15149_v55, %v3004_v56  ;;  %v2957_v3 = vpop.f32.mrf.mxu1 }
 0x445   :  { %v2958_v16 = vadd.f32 %v2957_v3, %v2909_v54  ;;  %v13200_v3 = vld [vmem:[%s13824_s29 + $0x88] sm:$0xff]  ;;  %v13194_v54 = vld [vmem:[%s13824_s29 + $0x58] sm:$0xff] }
 0x446   :  { %v3047_v53 = vadd.f32 %v15154_v38, %v3029_v23  ;;  %v13192_v23 = vld [vmem:[%s13824_s29 + $0x48] sm:$0xff] }
 0x448   :  { %v3063_v21 = vmax.f32 %v3047_v53, 0.0  ;;  %v13185_v53 = vld [vmem:[%s13824_s29 + $0x10] sm:$0xff] }
 0x449   :  { %v3006_v22 = vpop.f32.mrf.mxu2 }
 0x44a   :  { %v15219_v2 = vpack.c.bf16 %v3063_v21, %v3062_v46  ;;  %v3007_v27 = vadd.f32 %v3006_v22, %v2958_v16  ;;  %v13201_v46 = vld [vmem:[%s13824_s29 + $0x90] sm:$0xff]  ;;  %v13202_v22 = vld [vmem:[%s13824_s29 + $0x98] sm:$0xff]  ;;  %v13211_v16 = vld [vmem:[%s13824_s29 + $0xe0] sm:$0xff] }
 0x44b   :  { %v13209_v21 = vld [vmem:[%s13824_s29 + $0xd0] sm:$0xff] }
 0x44c   :  { %v2959_v40 = vpop.f32.mrf.mxu1  ;;  %v3030_v4 = vmul.f32 %v15149_v55, %v3007_v27  ;;  %v13188_v27 = vld [vmem:[%s13824_s29 + $0x28] sm:$0xff] }
 0x44d   :  { %v2960_v52 = vadd.f32 %v2959_v40, %v2911_v10  ;;  %v13204_v40 = vld [vmem:[%s13824_s29 + $0xa8] sm:$0xff]  ;;  %v13205_v10 = vld [vmem:[%s13824_s29 + $0xb0] sm:$0xff] }
 0x44e   :  { %v3048_v58 = vadd.f32 %v15154_v38, %v3030_v4  ;;  %v13198_v4 = vld [vmem:[%s13824_s29 + $0x78] sm:$0xff] }
 0x450   :  { %v3064_v15 = vmax.f32 %v3048_v58, 0.0  ;;  %v13239_v58 = vld [vmem:[%s13824_s29 + $0x1c0] sm:$0xff] }
 0x451   :  { %v3008_v61 = vpop.f32.mrf.mxu2 }
 0x452   :  { %v3009_v14 = vadd.f32 %v3008_v61, %v2960_v52  ;;  %v13190_v52 = vld [vmem:[%s13824_s29 + $0x38] sm:$0xff] }
 0x453   :  { %v13206_v61 = vld [vmem:[%s13824_s29 + $0xb8] sm:$0xff] }
 0x454   :  { %v3031_v50 = vmul.f32 %v15149_v55, %v3009_v14  ;;  %v2962_v47 = vpop.f32.mrf.mxu1 }
 0x455   :  { %v2963_v25 = vadd.f32 %v2962_v47, %v2914_v19 }
 0x456   :  { %v3049_v7 = vadd.f32 %v15154_v38, %v3031_v50 }
 0x458   :  { %v3065_v37 = vmax.f32 %v3049_v7, 0.0 }
 0x459   :  { %v3011_v51 = vpop.f32.mrf.mxu2 }
 0x45a   :  { %v15231_v6 = vpack.c.bf16 %v3065_v37, %v3064_v15  ;;  %v3012_v8 = vadd.f32 %v3011_v51, %v2963_v25 }
 0x45c   :  { %v2964_v59 = vpop.f32.mrf.mxu1  ;;  %v3032_v28 = vmul.f32 %v15149_v55, %v3012_v8 }
 0x45d   :  { %v2965_v48 = vadd.f32 %v2964_v59, %v2916_v49  ;;  %v13224_v59 = vld [vmem:[%s13824_s29 + $0x148] sm:$0xff] }
 0x45e   :  { %v3050_v43 = vadd.f32 %v15154_v38, %v3032_v28 }
 0x460   :  { %v3066_v13 = vmax.f32 %v3050_v43, 0.0 }
 0x461   :  { %v3013_v45 = vpop.f32.mrf.mxu2 }
 0x462   :  { %v3014_v11 = vadd.f32 %v3013_v45, %v2965_v48  ;;  %v13216_v45 = vld [vmem:[%s13824_s29 + $0x108] sm:$0xff] }
 0x464   :  { %v3033_v41 = vmul.f32 %v15149_v55, %v3014_v11  ;;  %v13183_v55 = vld [vmem:[%s13824_s29] sm:$0xff]  ;;  %v13232_v11 = vld [vmem:[%s13824_s29 + $0x188] sm:$0xff] }
 0x466   :  { %v3051_v63 = vadd.f32 %v15154_v38, %v3033_v41  ;;  %v13191_v38 = vld [vmem:[%s13824_s29 + $0x40] sm:$0xff] }
 0x468   :  { %v3067_v24 = vmax.f32 %v3051_v63, 0.0 }
 0x46a   :  { %v15237_v56 = vpack.c.bf16 %v3067_v24, %v3066_v13  ;;  %v13240_v13 = vld [vmem:[%s13824_s29 + $0x1c8] sm:$0xff] }
 0x46c   :  { %3156 = vmatpush.bf16.msra.mxu3 %v15237_v56  ;;  %3285 = vmatpush.bf16.msrb.mxu0 %v15237_v56 }
 0x46d   :  { %3414 = vmatpush.bf16.msrb.mxu1 %v15237_v56  ;;  %3543 = vmatpush.bf16.msrb.mxu2 %v15237_v56 }
 0x470   :  { %3157 = vmatpush.bf16.msra.mxu3 %v15231_v6  ;;  %3286 = vmatpush.bf16.msrb.mxu0 %v15231_v6 }
 0x471   :  { %3415 = vmatpush.bf16.msrb.mxu1 %v15231_v6  ;;  %3544 = vmatpush.bf16.msrb.mxu2 %v15231_v6 }
 0x474   :  { %3158 = vmatpush.bf16.msra.mxu3 %v15219_v2  ;;  %3287 = vmatpush.bf16.msrb.mxu0 %v15219_v2 }
 0x475   :  { %3416 = vmatpush.bf16.msrb.mxu1 %v15219_v2  ;;  %3545 = vmatpush.bf16.msrb.mxu2 %v15219_v2 }
 0x478   :  { %3159 = vmatpush.bf16.msra.mxu3 %v15207_v34  ;;  %3288 = vmatpush.bf16.msrb.mxu0 %v15207_v34 }
 0x479   :  { %3417 = vmatpush.bf16.msrb.mxu1 %v15207_v34  ;;  %3546 = vmatpush.bf16.msrb.mxu2 %v15207_v34 }
 0x47c   :  { %3160 = vmatpush.bf16.msra.mxu3 %v15195_v30  ;;  %3289 = vmatpush.bf16.msrb.mxu0 %v15195_v30 }
 0x47d   :  { %3418 = vmatpush.bf16.msrb.mxu1 %v15195_v30  ;;  %3547 = vmatpush.bf16.msrb.mxu2 %v15195_v30 }
 0x480   :  { %3161 = vmatpush.bf16.msra.mxu3 %v15182_v20  ;;  %3290 = vmatpush.bf16.msrb.mxu0 %v15182_v20 }
 0x481   :  { %3419 = vmatpush.bf16.msrb.mxu1 %v15182_v20  ;;  %3548 = vmatpush.bf16.msrb.mxu2 %v15182_v20 }
 0x484   :  { %3162 = vmatpush.bf16.msra.mxu3 %v15172_v12  ;;  %3291 = vmatpush.bf16.msrb.mxu0 %v15172_v12 }
 0x485   :  { %3420 = vmatpush.bf16.msrb.mxu1 %v15172_v12  ;;  %3549 = vmatpush.bf16.msrb.mxu2 %v15172_v12 }
 0x488   :  { %3163 = vmatpush.bf16.msra.mxu3 %v15162_v44  ;;  %3292 = vmatpush.bf16.msrb.mxu0 %v15162_v44 }
 0x489   :  { %3421 = vmatpush.bf16.msrb.mxu1 %v15162_v44  ;;  %3550 = vmatpush.bf16.msrb.mxu2 %v15162_v44 }
 0x48b   :  { %3164 = vmatmul.bf16.vlgmr.msra.gmra.mxu3 %v13183_v55  ;;  %3293 = vmatmul.bf16.vlgmr.msrb.gmra.mxu0 %v13191_v38 }
 0x48c   :  { %3672 = vmatpush.bf16.msrb.mxu3 %v15237_v56  ;;  %3801 = vmatpush.bf16.msra.mxu0 %v15237_v56 }
 0x48d   :  { %3930 = vmatpush.bf16.msra.mxu1 %v15237_v56  ;;  %4059 = vmatpush.bf16.msra.mxu2 %v15237_v56 }
 0x48e   :  { %3422 = vmatmul.bf16.vlgmr.msrb.gmra.mxu1 %v13199_v5  ;;  %3551 = vmatmul.bf16.vlgmr.msrb.gmra.mxu2 %v13207_v9 }
 0x490   :  { %3673 = vmatpush.bf16.msrb.mxu3 %v15231_v6  ;;  %3802 = vmatpush.bf16.msra.mxu0 %v15231_v6 }
 0x491   :  { %3931 = vmatpush.bf16.msra.mxu1 %v15231_v6  ;;  %4060 = vmatpush.bf16.msra.mxu2 %v15231_v6 }
 0x494   :  { %3674 = vmatpush.bf16.msrb.mxu3 %v15219_v2  ;;  %3803 = vmatpush.bf16.msra.mxu0 %v15219_v2 }
 0x495   :  { %3932 = vmatpush.bf16.msra.mxu1 %v15219_v2  ;;  %4061 = vmatpush.bf16.msra.mxu2 %v15219_v2 }
 0x498   :  { %3675 = vmatpush.bf16.msrb.mxu3 %v15207_v34  ;;  %3804 = vmatpush.bf16.msra.mxu0 %v15207_v34 }
 0x499   :  { %3933 = vmatpush.bf16.msra.mxu1 %v15207_v34  ;;  %4062 = vmatpush.bf16.msra.mxu2 %v15207_v34 }
 0x49b   :  { %3169 = vmatmul.bf16.gmra.mxu3 %v13184_v31  ;;  %3298 = vmatmul.bf16.gmra.mxu0 %v13192_v23 }
 0x49c   :  { %3676 = vmatpush.bf16.msrb.mxu3 %v15195_v30  ;;  %3805 = vmatpush.bf16.msra.mxu0 %v15195_v30 }
 0x49d   :  { %3934 = vmatpush.bf16.msra.mxu1 %v15195_v30  ;;  %4063 = vmatpush.bf16.msra.mxu2 %v15195_v30 }
 0x49e   :  { %3427 = vmatmul.bf16.gmra.mxu1 %v13200_v3  ;;  %3556 = vmatmul.bf16.gmra.mxu2 %v13208_v0 }
 0x4a0   :  { %3677 = vmatpush.bf16.msrb.mxu3 %v15182_v20  ;;  %3806 = vmatpush.bf16.msra.mxu0 %v15182_v20 }
 0x4a1   :  { %3935 = vmatpush.bf16.msra.mxu1 %v15182_v20  ;;  %4064 = vmatpush.bf16.msra.mxu2 %v15182_v20 }
 0x4a4   :  { %3678 = vmatpush.bf16.msrb.mxu3 %v15172_v12  ;;  %3807 = vmatpush.bf16.msra.mxu0 %v15172_v12 }
 0x4a5   :  { %3936 = vmatpush.bf16.msra.mxu1 %v15172_v12  ;;  %4065 = vmatpush.bf16.msra.mxu2 %v15172_v12 }
 0x4a8   :  { %3679 = vmatpush.bf16.msrb.mxu3 %v15162_v44  ;;  %3808 = vmatpush.bf16.msra.mxu0 %v15162_v44 }
 0x4a9   :  { %3937 = vmatpush.bf16.msra.mxu1 %v15162_v44  ;;  %4066 = vmatpush.bf16.msra.mxu2 %v15162_v44 }
 0x4ab   :  { %3303 = vmatmul.bf16.gmra.mxu0 %v13193_v57  ;;  %3174 = vmatmul.bf16.gmra.mxu3 %v13185_v53 }
 0x4ac   :  { %4188 = vmatpush.bf16.msra.mxu3 %v15237_v56 }
 0x4ae   :  { %3432 = vmatmul.bf16.gmra.mxu1 %v13201_v46  ;;  %3561 = vmatmul.bf16.gmra.mxu2 %v13209_v21  ;;  %v13271_v46 = vld [vmem:[%s13829_s3 + $0x80] sm:$0xff] }
 0x4b0   :  { %4189 = vmatpush.bf16.msra.mxu3 %v15231_v6  ;;  %v13245_v6 = vld [vmem:[%s13824_s29 + $0x1f0] sm:$0xff] }
 0x4b4   :  { %4190 = vmatpush.bf16.msra.mxu3 %v15219_v2  ;;  %v13203_v2 = vld [vmem:[%s13824_s29 + $0xa0] sm:$0xff] }
 0x4b8   :  { %4191 = vmatpush.bf16.msra.mxu3 %v15207_v34  ;;  %v13195_v34 = vld [vmem:[%s13824_s29 + $0x60] sm:$0xff] }
 0x4bb   :  { %3308 = vmatmul.bf16.gmra.mxu0 %v13194_v54  ;;  %3179 = vmatmul.bf16.gmra.mxu3 %v13186_v18 }
 0x4bc   :  { %4192 = vmatpush.bf16.msra.mxu3 %v15195_v30  ;;  %v13187_v30 = vld [vmem:[%s13824_s29 + $0x20] sm:$0xff] }
 0x4be   :  { %3437 = vmatmul.bf16.gmra.mxu1 %v13202_v22  ;;  %3566 = vmatmul.bf16.gmra.mxu2 %v13210_v32  ;;  %v13225_v22 = vld [vmem:[%s13824_s29 + $0x150] sm:$0xff] }
 0x4c0   :  { %4193 = vmatpush.bf16.msra.mxu3 %v15182_v20  ;;  %v13196_v20 = vld [vmem:[%s13824_s29 + $0x68] sm:$0xff] }
 0x4c4   :  { %4194 = vmatpush.bf16.msra.mxu3 %v15172_v12  ;;  %v13212_v12 = vld [vmem:[%s13824_s29 + $0xe8] sm:$0xff] }
 0x4c8   :  { %4195 = vmatpush.bf16.msra.mxu3 %v15162_v44  ;;  %v13197_v44 = vld [vmem:[%s13824_s29 + $0x70] sm:$0xff] }
 0x4cb   :  { %3313 = vmatmul.bf16.gmra.mxu0 %v13195_v34  ;;  %3184 = vmatmul.bf16.gmra.mxu3 %v13187_v30  ;;  %v13217_v34 = vld [vmem:[%s13824_s29 + $0x110] sm:$0xff] }
 0x4cc   :  { %v13233_v30 = vld [vmem:[%s13824_s29 + $0x190] sm:$0xff] }
 0x4ce   :  { %3442 = vmatmul.bf16.gmra.mxu1 %v13203_v2  ;;  %3571 = vmatmul.bf16.gmra.mxu2 %v13211_v16 }
 0x4db   :  { %3318 = vmatmul.bf16.gmra.mxu0 %v13196_v20  ;;  %3189 = vmatmul.bf16.gmra.mxu3 %v13188_v27  ;;  %v13241_v27 = vld [vmem:[%s13824_s29 + $0x1d0] sm:$0xff] }
 0x4de   :  { %3447 = vmatmul.bf16.gmra.mxu1 %v13204_v40  ;;  %3576 = vmatmul.bf16.gmra.mxu2 %v13212_v12 }
 0x4eb   :  { %3323 = vmatmul.bf16.gmra.mxu0 %v13197_v44  ;;  %3194 = vmatmul.bf16.gmra.mxu3 %v13189_v33 }
 0x4ee   :  { %3452 = vmatmul.bf16.gmra.mxu1 %v13205_v10  ;;  %3581 = vmatmul.bf16.gmra.mxu2 %v13213_v42 }
 0x4fb   :  { %3328 = vmatmul.bf16.gmra.mxu0 %v13198_v4  ;;  %3199 = vmatmul.bf16.gmra.mxu3 %v13190_v52 }
 0x4fe   :  { %3457 = vmatmul.bf16.gmra.mxu1 %v13206_v61  ;;  %3586 = vmatmul.bf16.gmra.mxu2 %v13214_v35  ;;  %v13255_v35 = vld [vmem:[%s13829_s3] sm:$0xff] }
 0x508   :  { %v3294_v14 = vpop.f32.mrf.mxu0 }
 0x509   :  { %v3334_v50 = vpack.c.bf16 %v3294_v14, %v3294_v14 }
 0x50b   :  { %v15346_v39 = vpop.f32.mrf.mxu1  ;;  %3809 = vmatmul.bf16.vlgmr.msra.gmra.mxu0 %v13223_v29  ;;  %3680 = vmatmul.bf16.vlgmr.msrb.gmra.mxu3 %v13215_v36  ;;  %v15349_v15 = vunpack.c.l.b16 %v3334_v50  ;;  %v13226_v36 = vld [vmem:[%s13824_s29 + $0x158] sm:$0xff] }
 0x50e   :  { %3938 = vmatmul.bf16.vlgmr.msra.gmra.mxu1 %v13231_v62  ;;  %4067 = vmatmul.bf16.vlgmr.msra.gmra.mxu2 %v13239_v58  ;;  %v3165_v47 = vpop.f32.mrf.mxu3 }
 0x50f   :  { %v3205_v26 = vpack.c.bf16 %v3165_v47, %v3165_v47  ;;  %v13218_v47 = vld [vmem:[%s13824_s29 + $0x118] sm:$0xff] }
 0x510   :  { %v3296_v7 = vpop.f32.mrf.mxu0 }
 0x511   :  { %v3552_v1 = vpop.f32.mrf.mxu2  ;;  %v3335_v37 = vpack.c.bf16 %v3296_v7, %v3296_v7  ;;  %v15362_v43 = vunpack.c.l.b16 %v3205_v26 }
 0x512   :  { %v3592_v51 = vpack.c.bf16 %v3552_v1, %v3552_v1  ;;  %v13234_v1 = vld [vmem:[%s13824_s29 + $0x198] sm:$0xff] }
 0x513   :  { %v15351_v19 = vpop.f32.mrf.mxu1  ;;  %v15353_v17 = vunpack.c.l.b16 %v3335_v37  ;;  %v13242_v37 = vld [vmem:[%s13824_s29 + $0x1d8] sm:$0xff] }
 0x514   :  { %v15358_v49 = vunpack.c.l.b16 %v3592_v51 }
 0x516   :  { %v3167_v25 = vpop.f32.mrf.mxu3  ;;  %17230 = vst [vmem:[#allocation48_spill] sm:$0xff] %v15358_v49  ;;  %v13222_v49 = vld [vmem:[%s13824_s29 + $0x138] sm:$0xff] }
 0x517   :  { %v3206_v8 = vpack.c.bf16 %v3167_v25, %v3167_v25  ;;  %v13263_v25 = vld [vmem:[%s13829_s3 + $0x40] sm:$0xff] }
 0x518   :  { %v3299_v48 = vpop.f32.mrf.mxu0 }
 0x519   :  { %v3554_v60 = vpop.f32.mrf.mxu2  ;;  %v15364_v41 = vunpack.c.l.b16 %v3206_v8  ;;  %v3336_v38 = vpack.c.bf16 %v3299_v48, %v3299_v48 }
 0x51a   :  { %v3593_v28 = vpack.c.bf16 %v3554_v60, %v3554_v60 }
 0x51b   :  { %v15366_v63 = vpop.f32.mrf.mxu1  ;;  %3814 = vmatmul.bf16.gmra.mxu0 %v13224_v59  ;;  %3685 = vmatmul.bf16.gmra.mxu3 %v13216_v45  ;;  %v15377_v23 = vunpack.c.l.b16 %v3336_v38  ;;  %v13221_v38 = vld [vmem:[%s13824_s29 + $0x130] sm:$0xff] }
 0x51c   :  { %v15369_v24 = vunpack.c.l.b16 %v3593_v28 }
 0x51e   :  { %17231 = vst [vmem:[#allocation55_spill] sm:$0xff] %v15369_v24  ;;  %3943 = vmatmul.bf16.gmra.mxu1 %v13232_v11  ;;  %4072 = vmatmul.bf16.gmra.mxu2 %v13240_v13  ;;  %v3170_v5 = vpop.f32.mrf.mxu3  ;;  %v13238_v24 = vld [vmem:[%s13824_s29 + $0x1b8] sm:$0xff] }
 0x51f   :  { %v3207_v53 = vpack.c.bf16 %v3170_v5, %v3170_v5 }
 0x520   :  { %v3301_v31 = vpop.f32.mrf.mxu0 }
 0x521   :  { %v15375_v9 = vpop.f32.mrf.mxu2  ;;  %v3337_v3 = vpack.c.bf16 %v3301_v31, %v3301_v31  ;;  %v15390_v2 = vunpack.c.l.b16 %v3207_v53 }
 0x523   :  { %v15379_v0 = vpop.f32.mrf.mxu1  ;;  %v15381_v57 = vunpack.c.l.b16 %v3337_v3  ;;  %v13227_v3 = vld [vmem:[%s13824_s29 + $0x160] sm:$0xff] }
 0x526   :  { %v3172_v21 = vpop.f32.mrf.mxu3 }
 0x527   :  { %v3208_v54 = vpack.c.bf16 %v3172_v21, %v3172_v21 }
 0x528   :  { %v3304_v32 = vpop.f32.mrf.mxu0 }
 0x529   :  { %v15385_v18 = vpop.f32.mrf.mxu2  ;;  %v15392_v16 = vunpack.c.l.b16 %v3208_v54  ;;  %v3338_v12 = vpack.c.bf16 %v3304_v32, %v3304_v32  ;;  %v13235_v32 = vld [vmem:[%s13824_s29 + $0x1a0] sm:$0xff] }
 0x52b   :  { %v15394_v20 = vpop.f32.mrf.mxu1  ;;  %3819 = vmatmul.bf16.gmra.mxu0 %v13225_v22  ;;  %3690 = vmatmul.bf16.gmra.mxu3 %v13217_v34  ;;  %v15401_v42 = vunpack.c.l.b16 %v3338_v12  ;;  %v13219_v22 = vld [vmem:[%s13824_s29 + $0x120] sm:$0xff] }
 0x52e   :  { %3948 = vmatmul.bf16.gmra.mxu1 %v13233_v30  ;;  %4077 = vmatmul.bf16.gmra.mxu2 %v13241_v27  ;;  %v3175_v44 = vpop.f32.mrf.mxu3  ;;  %v13243_v30 = vld [vmem:[%s13824_s29 + $0x1e0] sm:$0xff] }
 0x52f   :  { %v3209_v29 = vpack.c.bf16 %v3175_v44, %v3175_v44  ;;  %v13262_v44 = vld [vmem:[%s13829_s3 + $0x38] sm:$0xff] }
 0x530   :  { %v3306_v10 = vpop.f32.mrf.mxu0  ;;  %5261 = vmatpush.bf16.msrb.mxu0 %v13262_v44  ;;  %v13236_v44 = vld [vmem:[%s13824_s29 + $0x1a8] sm:$0xff] }
 0x531   :  { %v15399_v33 = vpop.f32.mrf.mxu2  ;;  %v3339_v4 = vpack.c.bf16 %v3306_v10, %v3306_v10  ;;  %v15417_v51 = vunpack.c.l.b16 %v3209_v29  ;;  %v13270_v10 = vld [vmem:[%s13829_s3 + $0x78] sm:$0xff] }
 0x532   :  { %5310 = vmatpush.bf16.msrb.mxu1 %v13270_v10 }
 0x533   :  { %v15403_v52 = vpop.f32.mrf.mxu1  ;;  %v15405_v61 = vunpack.c.l.b16 %v3339_v4 }
 0x536   :  { %v3177_v14 = vpop.f32.mrf.mxu3 }
 0x537   :  { %v3210_v62 = vpack.c.bf16 %v3177_v14, %v3177_v14  ;;  %v13278_v14 = vld [vmem:[%s13829_s3 + $0xb8] sm:$0xff] }
 0x538   :  { %v3309_v50 = vpop.f32.mrf.mxu0  ;;  %5359 = vmatpush.bf16.msrb.mxu2 %v13278_v14 }
 0x539   :  { %v15410_v58 = vpop.f32.mrf.mxu2  ;;  %v15419_v26 = vunpack.c.l.b16 %v3210_v62  ;;  %v3340_v8 = vpack.c.bf16 %v3309_v50, %v3309_v50 }
 0x53b   :  { %v15414_v7 = vpop.f32.mrf.mxu1  ;;  %3824 = vmatmul.bf16.gmra.mxu0 %v13226_v36  ;;  %3695 = vmatmul.bf16.gmra.mxu3 %v13218_v47  ;;  %v15425_v48 = vunpack.c.l.b16 %v3340_v8  ;;  %v13261_v47 = vld [vmem:[%s13829_s3 + $0x30] sm:$0xff] }
 0x53c   :  { %5262 = vmatpush.bf16.msrb.mxu0 %v13261_v47  ;;  %v13267_v47 = vld [vmem:[%s13829_s3 + $0x60] sm:$0xff] }
 0x53e   :  { %3953 = vmatmul.bf16.gmra.mxu1 %v13234_v1  ;;  %4082 = vmatmul.bf16.gmra.mxu2 %v13242_v37  ;;  %v3180_v60 = vpop.f32.mrf.mxu3  ;;  %v13269_v1 = vld [vmem:[%s13829_s3 + $0x70] sm:$0xff] }
 0x53f   :  { %v3211_v5 = vpack.c.bf16 %v3180_v60, %v3180_v60  ;;  %v13277_v37 = vld [vmem:[%s13829_s3 + $0xb0] sm:$0xff]  ;;  %5311 = vmatpush.bf16.msrb.mxu1 %v13269_v1  ;;  %v13275_v1 = vld [vmem:[%s13829_s3 + $0xa0] sm:$0xff] }
 0x540   :  { %v3311_v28 = vpop.f32.mrf.mxu0  ;;  %5360 = vmatpush.bf16.msrb.mxu2 %v13277_v37 }
 0x541   :  { %v15423_v59 = vpop.f32.mrf.mxu2  ;;  %v3341_v45 = vpack.c.bf16 %v3311_v28, %v3311_v28  ;;  %v15441_v27 = vunpack.c.l.b16 %v3211_v5  ;;  %v13260_v5 = vld [vmem:[%s13829_s3 + $0x28] sm:$0xff] }
 0x542   :  { %5263 = vmatpush.bf16.msrb.mxu0 %v13260_v5 }
 0x543   :  { %v15427_v11 = vpop.f32.mrf.mxu1  ;;  %v15429_v13 = vunpack.c.l.b16 %v3341_v45 }
 0x546   :  { %v3182_v31 = vpop.f32.mrf.mxu3 }
 0x547   :  { %v3212_v53 = vpack.c.bf16 %v3182_v31, %v3182_v31  ;;  %v13268_v31 = vld [vmem:[%s13829_s3 + $0x68] sm:$0xff] }
 0x548   :  { %v3314_v54 = vpop.f32.mrf.mxu0  ;;  %5312 = vmatpush.bf16.msrb.mxu1 %v13268_v31  ;;  %v13258_v31 = vld [vmem:[%s13829_s3 + $0x18] sm:$0xff] }
 0x549   :  { %v15434_v21 = vpop.f32.mrf.mxu2  ;;  %v15443_v12 = vunpack.c.l.b16 %v3212_v53  ;;  %v3342_v29 = vpack.c.bf16 %v3314_v54, %v3314_v54  ;;  %v13272_v53 = vld [vmem:[%s13829_s3 + $0x88] sm:$0xff] }
 0x54b   :  { %v15438_v34 = vpop.f32.mrf.mxu1  ;;  %3829 = vmatmul.bf16.gmra.mxu0 %v13227_v3  ;;  %3700 = vmatmul.bf16.gmra.mxu3 %v13219_v22  ;;  %v15455_v8 = vunpack.c.l.b16 %v3342_v29  ;;  %v13276_v3 = vld [vmem:[%s13829_s3 + $0xa8] sm:$0xff] }
 0x54c   :  { %5361 = vmatpush.bf16.msrb.mxu2 %v13276_v3  ;;  %5313 = vmatpush.bf16.msrb.mxu1 %v13267_v47  ;;  %v13266_v3 = vld [vmem:[%s13829_s3 + $0x58] sm:$0xff]  ;;  %v13273_v47 = vld [vmem:[%s13829_s3 + $0x90] sm:$0xff] }
 0x54e   :  { %3958 = vmatmul.bf16.gmra.mxu1 %v13235_v32  ;;  %4087 = vmatmul.bf16.gmra.mxu2 %v13243_v30  ;;  %v3185_v36 = vpop.f32.mrf.mxu3  ;;  %v13220_v32 = vld [vmem:[%s13824_s29 + $0x128] sm:$0xff] }
 0x54f   :  { %v3213_v54 = vpack.c.bf16 %v3185_v36, %v3185_v36  ;;  %v13228_v30 = vld [vmem:[%s13824_s29 + $0x168] sm:$0xff] }
 0x550   :  { %v3316_v50 = vpop.f32.mrf.mxu0  ;;  %v13244_v36 = vld [vmem:[%s13824_s29 + $0x1e8] sm:$0xff]  ;;  %5362 = vmatpush.bf16.msrb.mxu2 %v13275_v1  ;;  %5314 = vmatpush.bf16.msrb.mxu1 %v13266_v3 }
 0x551   :  { %v15450_v62 = vpop.f32.mrf.mxu2  ;;  %v3343_v60 = vpack.c.bf16 %v3316_v50, %v3316_v50  ;;  %v13259_v50 = vld [vmem:[%s13829_s3 + $0x20] sm:$0xff]  ;;  %v13256_v3 = vld [vmem:[%s13829_s3 + $0x8] sm:$0xff] }
 0x552   :  { %5264 = vmatpush.bf16.msrb.mxu0 %v13259_v50  ;;  %v13257_v50 = vld [vmem:[%s13829_s3 + $0x10] sm:$0xff] }
 0x553   :  { %v15457_v28 = vpop.f32.mrf.mxu1  ;;  %v15459_v45 = vunpack.c.l.b16 %v3343_v60  ;;  %v15477_v60 = vunpack.c.l.b16 %v3213_v54  ;;  %v13274_v54 = vld [vmem:[%s13829_s3 + $0x98] sm:$0xff] }
 0x554   :  { %5363 = vmatpush.bf16.msrb.mxu2 %v13274_v54  ;;  %v13264_v54 = vld [vmem:[%s13829_s3 + $0x48] sm:$0xff] }
 0x556   :  { %v3187_v22 = vpop.f32.mrf.mxu3  ;;  %5265 = vmatpush.bf16.msrb.mxu0 %v13258_v31 }
 0x557   :  { %v3214_v10 = vpack.c.bf16 %v3187_v22, %v3187_v22 }
 0x558   :  { %v3319_v14 = vpop.f32.mrf.mxu0  ;;  %5364 = vmatpush.bf16.msrb.mxu2 %v13273_v47 }
 0x559   :  { %v15469_v29 = vpop.f32.mrf.mxu2  ;;  %v15479_v5 = vunpack.c.l.b16 %v3214_v10  ;;  %v3344_v55 = vpack.c.bf16 %v3319_v14, %v3319_v14 }
 0x55a   :  { %5266 = vmatpush.bf16.msrb.mxu0 %v13257_v50  ;;  %v13229_v50 = vld [vmem:[%s13824_s29 + $0x170] sm:$0xff] }
 0x55b   :  { %v15474_v37 = vpop.f32.mrf.mxu1  ;;  %3834 = vmatmul.bf16.gmra.mxu0 %v13228_v30  ;;  %3705 = vmatmul.bf16.gmra.mxu3 %v13220_v32  ;;  %v15491_v1 = vunpack.c.l.b16 %v3344_v55 }
 0x55c   :  { %5365 = vmatpush.bf16.msrb.mxu2 %v13272_v53 }
 0x55d   :  { %17232 = vst [vmem:[#allocation58_spill] sm:$0xff] %v15491_v1 }
 0x55e   :  { %3963 = vmatmul.bf16.gmra.mxu1 %v13236_v44  ;;  %4092 = vmatmul.bf16.gmra.mxu2 %v13244_v36  ;;  %v3190_v10 = vpop.f32.mrf.mxu3  ;;  %v13265_v44 = vld [vmem:[%s13829_s3 + $0x50] sm:$0xff] }
 0x55f   :  { %5315 = vmatpush.bf16.msrb.mxu1 %v13265_v44  ;;  %v3215_v22 = vpack.c.bf16 %v3190_v10, %v3190_v10  ;;  %5267 = vmatpush.bf16.msrb.mxu0 %v13256_v3  ;;  %v13237_v44 = vld [vmem:[%s13824_s29 + $0x1b0] sm:$0xff] }
 0x560   :  { %v3321_v32 = vpop.f32.mrf.mxu0  ;;  %5366 = vmatpush.bf16.msrb.mxu2 %v13271_v46 }
 0x561   :  { %v15486_v30 = vpop.f32.mrf.mxu2  ;;  %v3345_v14 = vpack.c.bf16 %v3321_v32, %v3321_v32  ;;  %v15513_v55 = vunpack.c.l.b16 %v3215_v22 }
 0x563   :  { %v15493_v36 = vpop.f32.mrf.mxu1  ;;  %v15495_v31 = vunpack.c.l.b16 %v3345_v14  ;;  %5316 = vmatpush.bf16.msrb.mxu1 %v13264_v54  ;;  %5268 = vmatpush.bf16.msrb.mxu0 %v13255_v35 }
 0x565   :  { %17233 = vst [vmem:[#allocation57_spill] sm:$0xff] %v15495_v31 }
 0x566   :  { %v3192_v32 = vpop.f32.mrf.mxu3 }
 0x567   :  { %v3216_v14 = vpack.c.bf16 %v3192_v32, %v3192_v32  ;;  %5317 = vmatpush.bf16.msrb.mxu1 %v13263_v25 }
 0x568   :  { %v3324_v4 = vpop.f32.mrf.mxu0 }
 0x569   :  { %v15505_v47 = vpop.f32.mrf.mxu2  ;;  %v15515_v10 = vunpack.c.l.b16 %v3216_v14  ;;  %v3346_v3 = vpack.c.bf16 %v3324_v4, %v3324_v4 }
 0x56b   :  { %v15510_v40 = vpop.f32.mrf.mxu1  ;;  %3839 = vmatmul.bf16.gmra.mxu0 %v13229_v50  ;;  %3710 = vmatmul.bf16.gmra.mxu3 %v13221_v38  ;;  %v15521_v14 = vunpack.c.l.b16 %v3346_v3  ;;  %v13246_v3 = vld [vmem:[%s13824_s29 + $0x1f8] sm:$0xff] }
 0x56c   :  { %17234 = vst [vmem:[#allocation56_spill] sm:$0xff] %v15510_v40 }
 0x56d   :  { %17235 = vst [vmem:[#allocation50_spill] sm:$0xff] %v15521_v14 }
 0x56e   :  { %3968 = vmatmul.bf16.gmra.mxu1 %v13237_v44  ;;  %4097 = vmatmul.bf16.gmra.mxu2 %v13245_v6  ;;  %v3195_v54 = vpop.f32.mrf.mxu3  ;;  %v13230_v44 = vld [vmem:[%s13824_s29 + $0x178] sm:$0xff] }
 0x56f   :  { %v3217_v50 = vpack.c.bf16 %v3195_v54, %v3195_v54  ;;  %v3595_v54 = vpack.c.bf16 %v15385_v18, %v15385_v18 }
 0x570   :  { %v3326_v22 = vpop.f32.mrf.mxu0 }
 0x571   :  { %v15519_v32 = vpop.f32.mrf.mxu2  ;;  %v3347_v35 = vpack.c.bf16 %v3326_v22, %v3326_v22  ;;  %v15537_v22 = vunpack.c.l.b16 %v3217_v50  ;;  %v15549_v50 = vunpack.c.l.b16 %v3595_v54 }
 0x573   :  { %v15523_v25 = vpop.f32.mrf.mxu1  ;;  %v15525_v46 = vunpack.c.l.b16 %v3347_v35  ;;  %17239 = vst [vmem:[#allocation61_spill] sm:$0xff] %v15537_v22  ;;  %v3594_v35 = vpack.c.bf16 %v15375_v9, %v15375_v9  ;;  %v3463_v9 = vpack.c.bf16 %v15346_v39, %v15346_v39 }
 0x574   :  { %17236 = vst [vmem:[#allocation49_spill] sm:$0xff] %v15523_v25 }
 0x575   :  { %17237 = vst [vmem:[#allocation60_spill] sm:$0xff] %v15525_v46 }
 0x576   :  { %v3197_v4 = vpop.f32.mrf.mxu3  ;;  %17242 = vst [vmem:[#allocation52_spill] sm:$0xff] %v15549_v50 }
 0x577   :  { %v3218_v6 = vpack.c.bf16 %v3197_v4, %v3197_v4 }
 0x578   :  { %v3329_v56 = vpop.f32.mrf.mxu0 }
 0x579   :  { %v15530_v53 = vpop.f32.mrf.mxu2  ;;  %v15539_v25 = vunpack.c.l.b16 %v3218_v6  ;;  %v3348_v38 = vpack.c.bf16 %v3329_v56, %v3329_v56 }
 0x57b   :  { %v15534_v40 = vpop.f32.mrf.mxu1  ;;  %17240 = vst [vmem:[#allocation41_spill] sm:$0xff] %v15539_v25  ;;  %3844 = vmatmul.bf16.gmra.mxu0 %v13230_v44  ;;  %3715 = vmatmul.bf16.gmra.mxu3 %v13222_v49  ;;  %v3464_v49 = vpack.c.bf16 %v15351_v19, %v15351_v19 }
 0x57c   :  { %17238 = vst [vmem:[#allocation59_spill] sm:$0xff] %v15534_v40  ;;  %v15547_v40 = vunpack.c.l.b16 %v3594_v35  ;;  %v4365_v35 = vunpack.c.l.b16 %v3463_v9  ;;  %v3596_v9 = vpack.c.bf16 %v15399_v33, %v15399_v33 }
 0x57d   :  { %v4366_v54 = vunpack.c.l.b16 %v3464_v49  ;;  %v3597_v49 = vpack.c.bf16 %v15410_v58, %v15410_v58 }
 0x57e   :  { %3973 = vmatmul.bf16.gmra.mxu1 %v13238_v24  ;;  %4102 = vmatmul.bf16.gmra.mxu2 %v13246_v3  ;;  %17241 = vst [vmem:[#allocation38_spill] sm:$0xff] %v15547_v40  ;;  %v3200_v6 = vpop.f32.mrf.mxu3  ;;  %v15557_v24 = vunpack.c.l.b16 %v3348_v38  ;;  %v13247_v38 = vld [vmem:[%s13824_s29 + $0x200] sm:$0xff]  ;;  %v13248_v40 = vld [vmem:[%s13824_s29 + $0x208] sm:$0xff] }
 0x57f   :  { %v3219_v22 = vpack.c.bf16 %v3200_v6, %v3200_v6  ;;  %v17245_v6 = vpack.c.b16 %v15364_v41, %v15362_v43  ;;  %v15590_v33 = vunpack.c.l.b16 %v3597_v49  ;;  %v3465_v43 = vpack.c.bf16 %v15366_v63, %v15366_v63 }
 0x580   :  { %v3331_v46 = vpop.f32.mrf.mxu0 }
 0x581   :  { %v15551_v14 = vpop.f32.mrf.mxu2  ;;  %v3349_v18 = vpack.c.bf16 %v3331_v46, %v3331_v46  ;;  %v4381_v46 = vpack.c.b16 %v4366_v54, %v4365_v35  ;;  %v17246_v35 = vpack.c.b16 %v15353_v17, %v15349_v15  ;;  %v15588_v54 = vunpack.c.l.b16 %v3596_v9 }
 0x582   :  { %v3466_v15 = vpack.c.bf16 %v15379_v0, %v15379_v0  ;;  %v4367_v9 = vunpack.c.l.b16 %v3465_v43 }
 0x583   :  { %v15559_v56 = vpop.f32.mrf.mxu1  ;;  %v15561_v44 = vunpack.c.l.b16 %v3349_v18  ;;  %v15572_v18 = vunpack.c.l.b16 %v3219_v22 }
 0x584   :  { %17243 = vst [vmem:[#allocation51_spill] sm:$0xff] %v15559_v56  ;;  %v4368_v49 = vunpack.c.l.b16 %v3466_v15  ;;  %v17250_v15 = vpack.c.b16 %v15392_v16, %v15390_v2 }
 0x586   :  { %v3202_v39 = vpop.f32.mrf.mxu3 }
 0x587   :  { %v3220_v25 = vpack.c.bf16 %v3202_v39, %v3202_v39 }
 0x588   :  { %v3810_v19 = vpop.f32.mrf.mxu0 }
 0x589   :  { %v15567_v1 = vpop.f32.mrf.mxu2  ;;  %v15574_v56 = vunpack.c.l.b16 %v3220_v25  ;;  %v3850_v25 = vpack.c.bf16 %v3810_v19, %v3810_v19 }
 0x58b   :  { %v15570_v31 = vpop.f32.mrf.mxu1  ;;  %5269 = vmatmul.bf16.vlgmr.msrb.gmra.mxu0 %v17245_v6  ;;  %4196 = vmatmul.bf16.vlgmr.msra.gmra.mxu3 %v13247_v38  ;;  %v15596_v17 = vunpack.c.l.b16 %v3850_v25 }
 0x58c   :  { %17244 = vst [vmem:[#allocation40_spill] sm:$0xff] %v15570_v31 }
 0x58e   :  { %5318 = vmatmul.bf16.vlgmr.msrb.gmra.mxu1 %v17246_v35  ;;  %5367 = vmatmul.bf16.vlgmr.msrb.gmra.mxu2 %v4381_v46  ;;  %v3681_v39 = vpop.f32.mrf.mxu3 }
 0x58f   :  { %v3721_v35 = vpack.c.bf16 %v3681_v39, %v3681_v39  ;;  %v3599_v39 = vpack.c.bf16 %v15434_v21, %v15434_v21 }
 0x590   :  { %v3812_v3 = vpop.f32.mrf.mxu0 }
 0x591   :  { %v4068_v58 = vpop.f32.mrf.mxu2  ;;  %v3851_v41 = vpack.c.bf16 %v3812_v3, %v3812_v3  ;;  %v15611_v31 = vunpack.c.l.b16 %v3721_v35 }
 0x592   :  { %v4108_v6 = vpack.c.bf16 %v4068_v58, %v4068_v58  ;;  %v3598_v58 = vpack.c.bf16 %v15423_v59, %v15423_v59 }
 0x593   :  { %v15598_v38 = vpop.f32.mrf.mxu1  ;;  %v15600_v19 = vunpack.c.l.b16 %v3851_v41 }
 0x594   :  { %17247 = vst [vmem:[#allocation54_spill] sm:$0xff] %v15598_v38  ;;  %v15607_v3 = vunpack.c.l.b16 %v4108_v6  ;;  %v4382_v38 = vpack.c.b16 %v4368_v49, %v4367_v9  ;;  %v15631_v21 = vunpack.c.l.b16 %v3598_v58 }
 0x596   :  { %v3683_v4 = vpop.f32.mrf.mxu3  ;;  %17248 = vst [vmem:[#allocation53_spill] sm:$0xff] %v15607_v3 }
 0x597   :  { %v3722_v22 = vpack.c.bf16 %v3683_v4, %v3683_v4 }
 0x598   :  { %v3815_v25 = vpop.f32.mrf.mxu0 }
 0x599   :  { %v4070_v0 = vpop.f32.mrf.mxu2  ;;  %v15613_v43 = vunpack.c.l.b16 %v3722_v22  ;;  %v17251_v22 = vpack.c.b16 %v15381_v57, %v15377_v23  ;;  %v3852_v9 = vpack.c.bf16 %v3815_v25, %v3815_v25  ;;  %v3468_v23 = vpack.c.bf16 %v15403_v52, %v15403_v52 }
 0x59a   :  { %v4109_v50 = vpack.c.bf16 %v4070_v0, %v4070_v0 }
 0x59b   :  { %v15609_v41 = vpop.f32.mrf.mxu1  ;;  %5274 = vmatmul.bf16.gmra.mxu0 %v17250_v15  ;;  %4201 = vmatmul.bf16.gmra.mxu3 %v13248_v40  ;;  %v3467_v40 = vpack.c.bf16 %v15394_v20, %v15394_v20  ;;  %v15641_v57 = vunpack.c.l.b16 %v3852_v9  ;;  %v13249_v9 = vld [vmem:[%s13824_s29 + $0x210] sm:$0xff] }
 0x59c   :  { %v15619_v4 = vunpack.c.l.b16 %v4109_v50  ;;  %v15633_v50 = vunpack.c.l.b16 %v3599_v39  ;;  %v4370_v39 = vunpack.c.l.b16 %v3468_v23  ;;  %v3601_v23 = vpack.c.bf16 %v15469_v29, %v15469_v29 }
 0x59d   :  { %v4369_v58 = vunpack.c.l.b16 %v3467_v40  ;;  %v3600_v40 = vpack.c.bf16 %v15450_v62, %v15450_v62 }
 0x59e   :  { %17249 = vst [vmem:[#allocation39_spill] sm:$0xff] %v15619_v4  ;;  %5323 = vmatmul.bf16.gmra.mxu1 %v17251_v22  ;;  %5372 = vmatmul.bf16.gmra.mxu2 %v4382_v38  ;;  %v3686_v49 = vpop.f32.mrf.mxu3  ;;  %v15674_v62 = vunpack.c.l.b16 %v3601_v23 }
 0x59f   :  { %v3723_v22 = vpack.c.bf16 %v3686_v49, %v3686_v49  ;;  %v4383_v63 = vpack.c.b16 %v4370_v39, %v4369_v58  ;;  %v17252_v49 = vpack.c.b16 %v15419_v26, %v15417_v51  ;;  %v15672_v39 = vunpack.c.l.b16 %v3600_v40 }
 0x5a0   :  { %v3817_v16 = vpop.f32.mrf.mxu0  ;;  %17255 = vst [vmem:[#allocation36_spill] sm:$0xff] %v15674_v62  ;;  %v3469_v51 = vpack.c.bf16 %v15414_v7, %v15414_v7 }
 0x5a1   :  { %v15635_v2 = vpop.f32.mrf.mxu2  ;;  %v3853_v35 = vpack.c.bf16 %v3817_v16, %v3817_v16  ;;  %17254 = vst [vmem:[#allocation42_spill] sm:$0xff] %v15672_v39 }
 0x5a2   :  { %v4371_v40 = vunpack.c.l.b16 %v3469_v51  ;;  %v3602_v51 = vpack.c.bf16 %v15486_v30, %v15486_v30 }
 0x5a3   :  { %v15643_v0 = vpop.f32.mrf.mxu1  ;;  %v15645_v38 = vunpack.c.l.b16 %v3853_v35  ;;  %v15656_v35 = vunpack.c.l.b16 %v3723_v22 }
 0x5a6   :  { %v3688_v20 = vpop.f32.mrf.mxu3 }
 0x5a7   :  { %v3724_v59 = vpack.c.bf16 %v3688_v20, %v3688_v20  ;;  %v17253_v20 = vpack.c.b16 %v15405_v61, %v15401_v42  ;;  %v3470_v42 = vpack.c.bf16 %v15427_v11, %v15427_v11 }
 0x5a8   :  { %v3820_v52 = vpop.f32.mrf.mxu0 }
 0x5a9   :  { %v15651_v46 = vpop.f32.mrf.mxu2  ;;  %v15658_v6 = vunpack.c.l.b16 %v3724_v59  ;;  %v3854_v59 = vpack.c.bf16 %v3820_v52, %v3820_v52  ;;  %v4372_v23 = vunpack.c.l.b16 %v3470_v42  ;;  %v3603_v42 = vpack.c.bf16 %v15505_v47, %v15505_v47 }
 0x5ab   :  { %v15654_v16 = vpop.f32.mrf.mxu1  ;;  %5279 = vmatmul.bf16.gmra.mxu0 %v17252_v49  ;;  %4206 = vmatmul.bf16.gmra.mxu3 %v13249_v9  ;;  %v15682_v61 = vunpack.c.l.b16 %v3854_v59  ;;  %v13250_v59 = vld [vmem:[%s13824_s29 + $0x218] sm:$0xff]  ;;  %v4384_v3 = vpack.c.b16 %v4372_v23, %v4371_v40  ;;  %v15713_v23 = vunpack.c.l.b16 %v3602_v51  ;;  %v15715_v30 = vunpack.c.l.b16 %v3603_v42  ;;  %v13251_v49 = vld [vmem:[%s13824_s29 + $0x220] sm:$0xff] }
 0x5ad   :  { %17258 = vst [vmem:[#allocation37_spill] sm:$0xff] %v15713_v23  ;;  %v13292_v23 = vld [vmem:[%s13829_s3 + $0x128] sm:$0xff] }
 0x5ae   :  { %5328 = vmatmul.bf16.gmra.mxu1 %v17253_v20  ;;  %5377 = vmatmul.bf16.gmra.mxu2 %v4383_v63  ;;  %v3691_v22 = vpop.f32.mrf.mxu3  ;;  %17259 = vst [vmem:[#allocation47_spill] sm:$0xff] %v15715_v30  ;;  %v13308_v30 = vld [vmem:[%s13829_s3 + $0x1a8] sm:$0xff] }
 0x5af   :  { %v3725_v20 = vpack.c.bf16 %v3691_v22, %v3691_v22  ;;  %v17256_v22 = vpack.c.b16 %v15443_v12, %v15441_v27  ;;  %v3471_v27 = vpack.c.bf16 %v15438_v34, %v15438_v34 }
 0x5b0   :  { %v3822_v25 = vpop.f32.mrf.mxu0 }
 0x5b1   :  { %v15676_v29 = vpop.f32.mrf.mxu2  ;;  %v3855_v26 = vpack.c.bf16 %v3822_v25, %v3822_v25  ;;  %v4373_v51 = vunpack.c.l.b16 %v3471_v27 }
 0x5b3   :  { %v15684_v52 = vpop.f32.mrf.mxu1  ;;  %v15686_v63 = vunpack.c.l.b16 %v3855_v26  ;;  %v15697_v26 = vunpack.c.l.b16 %v3725_v20 }
 0x5b6   :  { %v3693_v7 = vpop.f32.mrf.mxu3 }
 0x5b7   :  { %v3726_v15 = vpack.c.bf16 %v3693_v7, %v3693_v7  ;;  %v17257_v7 = vpack.c.b16 %v15429_v13, %v15425_v48  ;;  %v3472_v48 = vpack.c.bf16 %v15457_v28, %v15457_v28 }
 0x5b8   :  { %v3825_v11 = vpop.f32.mrf.mxu0 }
 0x5b9   :  { %v15692_v58 = vpop.f32.mrf.mxu2  ;;  %v15699_v4 = vunpack.c.l.b16 %v3726_v15  ;;  %v3856_v15 = vpack.c.bf16 %v3825_v11, %v3825_v11  ;;  %v4374_v42 = vunpack.c.l.b16 %v3472_v48  ;;  %v3604_v48 = vpack.c.bf16 %v15519_v32, %v15519_v32  ;;  %v13284_v32 = vld [vmem:[%s13829_s3 + $0xe8] sm:$0xff] }
 0x5bb   :  { %v15695_v25 = vpop.f32.mrf.mxu1  ;;  %5284 = vmatmul.bf16.gmra.mxu0 %v17256_v22  ;;  %4211 = vmatmul.bf16.gmra.mxu3 %v13250_v59  ;;  %v15723_v13 = vunpack.c.l.b16 %v3856_v15  ;;  %v4385_v40 = vpack.c.b16 %v4374_v42, %v4373_v51  ;;  %v17261_v22 = vpack.c.b16 %v15459_v45, %v15455_v8  ;;  %v13286_v51 = vld [vmem:[%s13829_s3 + $0xf8] sm:$0xff] }
 0x5bc   :  { %v13294_v42 = vld [vmem:[%s13829_s3 + $0x138] sm:$0xff]  ;;  %5408 = vmatpush.bf16.msrb.mxu3 %v13286_v51 }
 0x5bd   :  { %5457 = vmatpush.bf16.msra.mxu0 %v13294_v42 }
 0x5be   :  { %5333 = vmatmul.bf16.gmra.mxu1 %v17257_v7  ;;  %5382 = vmatmul.bf16.gmra.mxu2 %v4384_v3  ;;  %v3696_v20 = vpop.f32.mrf.mxu3 }
 0x5bf   :  { %v3727_v34 = vpack.c.bf16 %v3696_v20, %v3696_v20  ;;  %v3605_v20 = vpack.c.bf16 %v15530_v53, %v15530_v53  ;;  %v13310_v53 = vld [vmem:[%s13829_s3 + $0x1b8] sm:$0xff] }
 0x5c0   :  { %v3827_v9 = vpop.f32.mrf.mxu0  ;;  %5555 = vmatpush.bf16.msra.mxu2 %v13310_v53 }
 0x5c1   :  { %v15717_v47 = vpop.f32.mrf.mxu2  ;;  %v3857_v12 = vpack.c.bf16 %v3827_v9, %v3827_v9  ;;  %v15738_v59 = vunpack.c.l.b16 %v3727_v34  ;;  %v13302_v34 = vld [vmem:[%s13829_s3 + $0x178] sm:$0xff] }
 0x5c2   :  { %5506 = vmatpush.bf16.msra.mxu1 %v13302_v34  ;;  %v13309_v34 = vld [vmem:[%s13829_s3 + $0x1b0] sm:$0xff] }
 0x5c3   :  { %v15725_v11 = vpop.f32.mrf.mxu1  ;;  %v15727_v3 = vunpack.c.l.b16 %v3857_v12 }
 0x5c4   :  { %5556 = vmatpush.bf16.msra.mxu2 %v13309_v34 }
 0x5c6   :  { %v3698_v7 = vpop.f32.mrf.mxu3 }
 0x5c7   :  { %v3728_v28 = vpack.c.bf16 %v3698_v7, %v3698_v7  ;;  %v17260_v7 = vpack.c.b16 %v15479_v5, %v15477_v60  ;;  %v15758_v60 = vunpack.c.l.b16 %v3604_v48  ;;  %v15760_v5 = vunpack.c.l.b16 %v3605_v20 }
 0x5c8   :  { %v3830_v9 = vpop.f32.mrf.mxu0  ;;  %v3474_v48 = vpack.c.bf16 %v15493_v36, %v15493_v36  ;;  %v13300_v36 = vld [vmem:[%s13829_s3 + $0x168] sm:$0xff]  ;;  %5557 = vmatpush.bf16.msra.mxu2 %v13308_v30  ;;  %v13307_v30 = vld [vmem:[%s13829_s3 + $0x1a0] sm:$0xff] }
 0x5c9   :  { %v15733_v15 = vpop.f32.mrf.mxu2  ;;  %v15740_v27 = vunpack.c.l.b16 %v3728_v28  ;;  %v3858_v28 = vpack.c.bf16 %v3830_v9, %v3830_v9  ;;  %17262 = vst [vmem:[#allocation46_spill] sm:$0xff] %v15758_v60  ;;  %v3473_v9 = vpack.c.bf16 %v15474_v37, %v15474_v37 }
 0x5ca   :  { %17263 = vst [vmem:[#allocation43_spill] sm:$0xff] %v15760_v5  ;;  %v13283_v5 = vld [vmem:[%s13829_s3 + $0xe0] sm:$0xff] }
 0x5cb   :  { %v15736_v12 = vpop.f32.mrf.mxu1  ;;  %5289 = vmatmul.bf16.gmra.mxu0 %v17260_v7  ;;  %4216 = vmatmul.bf16.gmra.mxu3 %v13251_v49  ;;  %v13293_v7 = vld [vmem:[%s13829_s3 + $0x130] sm:$0xff]  ;;  %v15771_v20 = vunpack.c.l.b16 %v3858_v28  ;;  %v4375_v28 = vunpack.c.l.b16 %v3473_v9  ;;  %v13291_v9 = vld [vmem:[%s13829_s3 + $0x120] sm:$0xff] }
 0x5cc   :  { %5458 = vmatpush.bf16.msra.mxu0 %v13293_v7  ;;  %5558 = vmatpush.bf16.msra.mxu2 %v13307_v30 }
 0x5cd   :  { %17264 = vst [vmem:[#allocation45_spill] sm:$0xff] %v15771_v20 }
 0x5ce   :  { %5338 = vmatmul.bf16.gmra.mxu1 %v17261_v22  ;;  %5387 = vmatmul.bf16.gmra.mxu2 %v4385_v40  ;;  %v3701_v8 = vpop.f32.mrf.mxu3  ;;  %v13285_v22 = vld [vmem:[%s13829_s3 + $0xf0] sm:$0xff] }
 0x5cf   :  { %v13301_v40 = vld [vmem:[%s13829_s3 + $0x170] sm:$0xff]  ;;  %5409 = vmatpush.bf16.msrb.mxu3 %v13285_v22  ;;  %v3729_v7 = vpack.c.bf16 %v3701_v8, %v3701_v8  ;;  %v17268_v22 = vpack.c.b16 %v15515_v10, %v15513_v55  ;;  %v13306_v55 = vld [vmem:[%s13829_s3 + $0x198] sm:$0xff] }
 0x5d0   :  { %v3832_v49 = vpop.f32.mrf.mxu0  ;;  %5507 = vmatpush.bf16.msra.mxu1 %v13301_v40  ;;  %5459 = vmatpush.bf16.msra.mxu0 %v13292_v23 }
 0x5d1   :  { %v15762_v45 = vpop.f32.mrf.mxu2  ;;  %v3859_v51 = vpack.c.bf16 %v3832_v49, %v3832_v49  ;;  %v4376_v49 = vunpack.c.l.b16 %v3474_v48  ;;  %v13299_v48 = vld [vmem:[%s13829_s3 + $0x160] sm:$0xff]  ;;  %5559 = vmatpush.bf16.msra.mxu2 %v13306_v55 }
 0x5d2   :  { %v13287_v55 = vld [vmem:[%s13829_s3 + $0x100] sm:$0xff] }
 0x5d3   :  { %v15773_v42 = vpop.f32.mrf.mxu1  ;;  %v15776_v53 = vunpack.c.l.b16 %v3859_v51  ;;  %5410 = vmatpush.bf16.msrb.mxu3 %v13284_v32  ;;  %v13252_v51 = vld [vmem:[%s13824_s29 + $0x228] sm:$0xff]  ;;  %v4386_v8 = vpack.c.b16 %v4376_v49, %v4375_v28  ;;  %v15794_v32 = vunpack.c.l.b16 %v3729_v7  ;;  %v17269_v28 = vld [vmem:[#allocation57_spill] sm:$0xff] }
 0x5d4   :  { %5508 = vmatpush.bf16.msra.mxu1 %v13300_v36  ;;  %5460 = vmatpush.bf16.msra.mxu0 %v13291_v9  ;;  %v3606_v36 = vpack.c.bf16 %v15551_v14, %v15551_v14  ;;  %v17270_v49 = vld [vmem:[#allocation58_spill] sm:$0xff]  ;;  %v13298_v9 = vld [vmem:[%s13829_s3 + $0x158] sm:$0xff] }
 0x5d5   :  { %17265 = vst [vmem:[#allocation34_spill] sm:$0xff] %v15776_v53  ;;  %v17271_v7 = vpack.c.b16 %v17269_v28, %v17270_v49  ;;  %v13281_v49 = vld [vmem:[%s13829_s3 + $0xd0] sm:$0xff]  ;;  %v13288_v53 = vld [vmem:[%s13829_s3 + $0x108] sm:$0xff] }
 0x5d6   :  { %v3703_v40 = vpop.f32.mrf.mxu3  ;;  %17267 = vst [vmem:[#allocation44_spill] sm:$0xff] %v15794_v32  ;;  %v15815_v10 = vunpack.c.l.b16 %v3606_v36  ;;  %v17275_v36 = vld [vmem:[#allocation49_spill] sm:$0xff] }
 0x5d7   :  { %v3730_v34 = vpack.c.bf16 %v3703_v40, %v3703_v40  ;;  %5411 = vmatpush.bf16.msrb.mxu3 %v13283_v5  ;;  %v3607_v40 = vpack.c.bf16 %v15567_v1, %v15567_v1  ;;  %v13282_v5 = vld [vmem:[%s13829_s3 + $0xd8] sm:$0xff] }
 0x5d8   :  { %v3835_v60 = vpop.f32.mrf.mxu0  ;;  %5509 = vmatpush.bf16.msra.mxu1 %v13299_v48  ;;  %17272 = vst [vmem:[#allocation57_spill] sm:$0xff] %v15815_v10 }
 0x5d9   :  { %v15787_v37 = vpop.f32.mrf.mxu2  ;;  %v15796_v23 = vunpack.c.l.b16 %v3730_v34  ;;  %v13290_v34 = vld [vmem:[%s13829_s3 + $0x118] sm:$0xff]  ;;  %v3860_v1 = vpack.c.bf16 %v3835_v60, %v3835_v60  ;;  %v13297_v60 = vld [vmem:[%s13829_s3 + $0x150] sm:$0xff] }
 0x5da   :  { %5461 = vmatpush.bf16.msra.mxu0 %v13290_v34 }
 0x5db   :  { %v15792_v39 = vpop.f32.mrf.mxu1  ;;  %5294 = vmatmul.bf16.gmra.mxu0 %v17268_v22  ;;  %4221 = vmatmul.bf16.gmra.mxu3 %v13252_v51  ;;  %v15817_v22 = vunpack.c.l.b16 %v3607_v40  ;;  %v3476_v40 = vpack.c.bf16 %v17275_v36, %v17275_v36 }
 0x5dc   :  { %17266 = vst [vmem:[#allocation35_spill] sm:$0xff] %v15792_v39  ;;  %5412 = vmatpush.bf16.msrb.mxu3 %v13282_v5  ;;  %5510 = vmatpush.bf16.msra.mxu1 %v13298_v9  ;;  %v15828_v5 = vunpack.c.l.b16 %v3860_v1  ;;  %v13305_v9 = vld [vmem:[%s13829_s3 + $0x190] sm:$0xff]  ;;  %v13296_v1 = vld [vmem:[%s13829_s3 + $0x148] sm:$0xff] }
 0x5dd   :  { %17273 = vst [vmem:[#allocation58_spill] sm:$0xff] %v15817_v22  ;;  %v4378_v36 = vunpack.c.l.b16 %v3476_v40  ;;  %5560 = vmatpush.bf16.msra.mxu2 %v13305_v9  ;;  %v13253_v22 = vld [vmem:[%s13824_s29 + $0x230] sm:$0xff]  ;;  %v13303_v9 = vld [vmem:[%s13829_s3 + $0x180] sm:$0xff] }
 0x5de   :  { %5343 = vmatmul.bf16.gmra.mxu1 %v17271_v7  ;;  %5392 = vmatmul.bf16.gmra.mxu2 %v4386_v8  ;;  %v3706_v51 = vpop.f32.mrf.mxu3  ;;  %v13289_v7 = vld [vmem:[%s13829_s3 + $0x110] sm:$0xff] }
 0x5df   :  { %v17274_v8 = vld [vmem:[#allocation56_spill] sm:$0xff]  ;;  %5462 = vmatpush.bf16.msra.mxu0 %v13289_v7 }
 0x5e0   :  { %v3837_v28 = vpop.f32.mrf.mxu0  ;;  %v3475_v30 = vpack.c.bf16 %v17274_v8, %v17274_v8  ;;  %17276 = vst [vmem:[#allocation56_spill] sm:$0xff] %v15828_v5  ;;  %5413 = vmatpush.bf16.msrb.mxu3 %v13281_v49  ;;  %5511 = vmatpush.bf16.msra.mxu1 %v13297_v60  ;;  %v13280_v8 = vld [vmem:[%s13829_s3 + $0xc8] sm:$0xff]  ;;  %v3731_v49 = vpack.c.bf16 %v3706_v51, %v3706_v51 }
 0x5e1   :  { %v15819_v48 = vpop.f32.mrf.mxu2  ;;  %v3861_v14 = vpack.c.bf16 %v3837_v28, %v3837_v28 }
 0x5e2   :  { %v4377_v28 = vunpack.c.l.b16 %v3475_v30  ;;  %v13295_v30 = vld [vmem:[%s13829_s3 + $0x140] sm:$0xff]  ;;  %v15851_v5 = vunpack.c.l.b16 %v3731_v49 }
 0x5e3   :  { %v15830_v34 = vpop.f32.mrf.mxu1  ;;  %v15833_v39 = vunpack.c.l.b16 %v3861_v14  ;;  %v13304_v14 = vld [vmem:[%s13829_s3 + $0x188] sm:$0xff]  ;;  %5463 = vmatpush.bf16.msra.mxu0 %v13288_v53  ;;  %v17281_v53 = vld [vmem:[#allocation41_spill] sm:$0xff] }
 0x5e4   :  { %17277 = vst [vmem:[#allocation49_spill] sm:$0xff] %v15830_v34  ;;  %5414 = vmatpush.bf16.msrb.mxu3 %v13280_v8  ;;  %5512 = vmatpush.bf16.msra.mxu1 %v13296_v1  ;;  %v13279_v34 = vld [vmem:[%s13829_s3 + $0xc0] sm:$0xff]  ;;  %v4387_v62 = vpack.c.b16 %v4378_v36, %v4377_v28 }
 0x5e5   :  { %17278 = vst [vmem:[#allocation62_spill] sm:$0xff] %v15833_v39  ;;  %5561 = vmatpush.bf16.msra.mxu2 %v13304_v14  ;;  %v17282_v8 = vld [vmem:[#allocation61_spill] sm:$0xff]  ;;  %v17285_v39 = vld [vmem:[#allocation50_spill] sm:$0xff] }
 0x5e6   :  { %v3708_v7 = vpop.f32.mrf.mxu3  ;;  %17280 = vst [vmem:[#allocation64_spill] sm:$0xff] %v15851_v5  ;;  %v17283_v1 = vpack.c.b16 %v17281_v53, %v17282_v8  ;;  %v13254_v5 = vld [vmem:[%s13824_s29 + $0x238] sm:$0xff]  ;;  %s17401_s29 = sld [smem:[#allocation13_spill]] }
 0x5e7   :  { %v3732_v60 = vpack.c.bf16 %v3708_v7, %v3708_v7  ;;  %v17284_v7 = vld [vmem:[#allocation60_spill] sm:$0xff]  ;;  %5464 = vmatpush.bf16.msra.mxu0 %v13287_v55 }
 0x5e8   :  { %v3840_v10 = vpop.f32.mrf.mxu0  ;;  %5415 = vmatpush.bf16.msrb.mxu3 %v13279_v34  ;;  %5513 = vmatpush.bf16.msra.mxu1 %v13295_v30  ;;  %v17286_v32 = vpack.c.b16 %v17284_v7, %v17285_v39 }
 0x5e9   :  { %v15843_v20 = vpop.f32.mrf.mxu2  ;;  %v15853_v51 = vunpack.c.l.b16 %v3732_v60  ;;  %v3862_v36 = vpack.c.bf16 %v3840_v10, %v3840_v10  ;;  %5562 = vmatpush.bf16.msra.mxu2 %v13303_v9  ;;  %v17287_v60 = vld [vmem:[#allocation59_spill] sm:$0xff] }
 0x5ea   :  { %v3477_v30 = vpack.c.bf16 %v17287_v60, %v17287_v60 }
 0x5eb   :  { %v15848_v40 = vpop.f32.mrf.mxu1  ;;  %5299 = vmatmul.bf16.gmra.mxu0 %v17283_v1  ;;  %4226 = vmatmul.bf16.gmra.mxu3 %v13253_v22  ;;  %v17288_v22 = vld [vmem:[#allocation51_spill] sm:$0xff]  ;;  %v15870_v39 = vunpack.c.l.b16 %v3862_v36 }
 0x5ec   :  { %17279 = vst [vmem:[#allocation63_spill] sm:$0xff] %v15848_v40  ;;  %v3478_v53 = vpack.c.bf16 %v17288_v22, %v17288_v22 }
 0x5ed   :  { %17289 = vst [vmem:[#allocation41_spill] sm:$0xff] %v15870_v39 }
 0x5ee   :  { %5348 = vmatmul.bf16.gmra.mxu1 %v17286_v32  ;;  %5397 = vmatmul.bf16.gmra.mxu2 %v4387_v62  ;;  %v3711_v49 = vpop.f32.mrf.mxu3  ;;  %v4379_v62 = vunpack.c.l.b16 %v3477_v30  ;;  %v4380_v55 = vunpack.c.l.b16 %v3478_v53  ;;  %v4110_v30 = vpack.c.bf16 %v15635_v2, %v15635_v2  ;;  %v4111_v53 = vpack.c.bf16 %v15651_v46, %v15651_v46 }
 0x5ef   :  { %v3733_v1 = vpack.c.bf16 %v3711_v49, %v3711_v49  ;;  %v17293_v49 = vpack.c.b16 %v15574_v56, %v15572_v18  ;;  %v17297_v56 = vld [vmem:[#allocation40_spill] sm:$0xff] }
 0x5f0   :  { %v3842_v14 = vpop.f32.mrf.mxu0  ;;  %v4388_v36 = vpack.c.b16 %v4380_v55, %v4379_v62  ;;  %v15899_v55 = vunpack.c.l.b16 %v4110_v30  ;;  %v15901_v2 = vunpack.c.l.b16 %v4111_v53  ;;  %v3979_v18 = vpack.c.bf16 %v17297_v56, %v17297_v56 }
 0x5f1   :  { %v15864_v34 = vpop.f32.mrf.mxu2  ;;  %v3863_v32 = vpack.c.bf16 %v3842_v14, %v3842_v14  ;;  %v15883_v14 = vunpack.c.l.b16 %v3733_v1 }
 0x5f2   :  { %17295 = vst [vmem:[#allocation59_spill] sm:$0xff] %v15899_v55  ;;  %v4557_v30 = vunpack.c.l.b16 %v3979_v18  ;;  %v4112_v18 = vpack.c.bf16 %v15676_v29, %v15676_v29 }
 0x5f3   :  { %v15872_v8 = vpop.f32.mrf.mxu1  ;;  %v15874_v10 = vunpack.c.l.b16 %v3863_v32  ;;  %v17294_v32 = vpack.c.b16 %v15561_v44, %v15557_v24  ;;  %17296 = vst [vmem:[#allocation51_spill] sm:$0xff] %v15901_v2 }
 0x5f4   :  { %17290 = vst [vmem:[#allocation61_spill] sm:$0xff] %v15872_v8  ;;  %v15940_v29 = vunpack.c.l.b16 %v4112_v18 }
 0x5f5   :  { %17291 = vst [vmem:[#allocation60_spill] sm:$0xff] %v15874_v10 }
 0x5f6   :  { %v3713_v7 = vpop.f32.mrf.mxu3 }
 0x5f7   :  { %v3734_v28 = vpack.c.bf16 %v3713_v7, %v3713_v7 }
 0x5f8   :  { %v3845_v60 = vpop.f32.mrf.mxu0 }
 0x5f9   :  { %v15878_v40 = vpop.f32.mrf.mxu2  ;;  %v15885_v8 = vunpack.c.l.b16 %v3734_v28  ;;  %v3864_v28 = vpack.c.bf16 %v3845_v60, %v3845_v60 }
 0x5fb   :  { %v15881_v22 = vpop.f32.mrf.mxu1  ;;  %5304 = vmatmul.bf16.gmra.mxu0 %v17293_v49  ;;  %4231 = vmatmul.bf16.gmra.mxu3 %v13254_v5  ;;  %v17298_v5 = vld [vmem:[#allocation54_spill] sm:$0xff]  ;;  %v15909_v44 = vunpack.c.l.b16 %v3864_v28 }
 0x5fc   :  { %17292 = vst [vmem:[#allocation50_spill] sm:$0xff] %v15881_v22  ;;  %v3980_v24 = vpack.c.bf16 %v17298_v5, %v17298_v5 }
 0x5fe   :  { %5353 = vmatmul.bf16.gmra.mxu1 %v17294_v32  ;;  %5402 = vmatmul.bf16.gmra.mxu2 %v4388_v36  ;;  %v3716_v1 = vpop.f32.mrf.mxu3  ;;  %v4558_v53 = vunpack.c.l.b16 %v3980_v24  ;;  %v4113_v24 = vpack.c.bf16 %v15692_v58, %v15692_v58  ;;  %v17302_v36 = vld [vmem:[#allocation48_spill] sm:$0xff] }
 0x5ff   :  { %v3735_v62 = vpack.c.bf16 %v3716_v1, %v3716_v1  ;;  %v17300_v1 = vpack.c.b16 %v15613_v43, %v15611_v31  ;;  %v3981_v43 = vpack.c.bf16 %v15609_v41, %v15609_v41 }
 0x600   :  { %v3847_v7 = vpop.f32.mrf.mxu0  ;;  %v4573_v5 = vpack.c.b16 %v4558_v53, %v4557_v30  ;;  %v15942_v30 = vunpack.c.l.b16 %v4113_v24 }
 0x601   :  { %v15903_v46 = vpop.f32.mrf.mxu2  ;;  %v3865_v49 = vpack.c.bf16 %v3847_v7, %v3847_v7  ;;  %v15921_v10 = vunpack.c.l.b16 %v3735_v62  ;;  %v17304_v62 = vpack.c.b16 %v15600_v19, %v15596_v17 }
 0x603   :  { %v15911_v32 = vpop.f32.mrf.mxu1  ;;  %v15913_v60 = vunpack.c.l.b16 %v3865_v49 }
 0x604   :  { %17299 = vst [vmem:[#allocation40_spill] sm:$0xff] %v15911_v32 }
 0x606   :  { %v3718_v56 = vpop.f32.mrf.mxu3 }
 0x607   :  { %v3736_v22 = vpack.c.bf16 %v3718_v56, %v3718_v56  ;;  %v17301_v56 = vld [vmem:[#allocation55_spill] sm:$0xff] }
 0x608   :  { %v5270_v28 = vpop.f32.mrf.mxu0  ;;  %v17303_v9 = vpack.c.b16 %v17301_v56, %v17302_v36 }
 0x609   :  { %v15919_v39 = vpop.f32.mrf.mxu2  ;;  %v15923_v49 = vunpack.c.l.b16 %v3736_v22 }
 0x60b   :  { %v5319_v7 = vpop.f32.mrf.mxu1  ;;  %5465 = vmatmul.bf16.vlgmr.msra.gmra.mxu0 %v17300_v1  ;;  %5416 = vmatmul.bf16.vlgmr.msrb.gmra.mxu3 %v17303_v9  ;;  %v3982_v9 = vpack.c.bf16 %v15643_v0, %v15643_v0 }
 0x60c   :  { %v5320_v32 = vadd.f32 %v5319_v7, %v5270_v28 }
 0x60d   :  { %v4560_v7 = vunpack.c.l.b16 %v3982_v9  ;;  %v17306_v9 = vld [vmem:[#allocation52_spill] sm:$0xff] }
 0x60e   :  { %5514 = vmatmul.bf16.vlgmr.msra.gmra.mxu1 %v17304_v62  ;;  %5563 = vmatmul.bf16.vlgmr.msra.gmra.mxu2 %v4573_v5  ;;  %v4197_v58 = vpop.f32.mrf.mxu3  ;;  %v4559_v5 = vunpack.c.l.b16 %v3981_v43 }
 0x60f   :  { %v4237_v18 = vpack.c.bf16 %v4197_v58, %v4197_v58  ;;  %v17305_v58 = vpack.c.b16 %v15658_v6, %v15656_v35  ;;  %v3983_v35 = vpack.c.bf16 %v15654_v16, %v15654_v16 }
 0x610   :  { %v5272_v31 = vpop.f32.mrf.mxu0  ;;  %v4574_v55 = vpack.c.b16 %v4560_v7, %v4559_v5  ;;  %v17309_v5 = vpack.c.b16 %v15645_v38, %v15641_v57  ;;  %v13311_v57 = vld [vmem:[%s13829_s3 + $0x1c0] sm:$0xff] }
 0x611   :  { %v5368_v53 = vpop.f32.mrf.mxu2  ;;  %v15954_v2 = vunpack.c.l.b16 %v4237_v18  ;;  %v4561_v38 = vunpack.c.l.b16 %v3983_v35  ;;  %v17311_v35 = vpack.c.b16 %v15590_v33, %v15588_v54  ;;  %v3986_v54 = vpack.c.bf16 %v15725_v11, %v15725_v11 }
 0x612   :  { %v15948_v36 = vadd.f32 %v5368_v53, %v5320_v32  ;;  %v4114_v53 = vpack.c.bf16 %v15717_v47, %v15717_v47 }
 0x613   :  { %v5321_v17 = vpop.f32.mrf.mxu1 }
 0x614   :  { %v5322_v19 = vadd.f32 %v5321_v17, %v5272_v31  ;;  %v4115_v31 = vpack.c.bf16 %v15733_v15, %v15733_v15  ;;  %v17307_v17 = vld [vmem:[#allocation38_spill] sm:$0xff]  ;;  %v15973_v47 = vunpack.c.l.b16 %v4114_v53 }
 0x616   :  { %v4199_v24 = vpop.f32.mrf.mxu3  ;;  %v15975_v7 = vunpack.c.l.b16 %v4115_v31 }
 0x617   :  { %v4238_v1 = vpack.c.bf16 %v4199_v24, %v4199_v24  ;;  %v3984_v24 = vpack.c.bf16 %v15684_v52, %v15684_v52 }
 0x618   :  { %v5275_v62 = vpop.f32.mrf.mxu0 }
 0x619   :  { %v5370_v56 = vpop.f32.mrf.mxu2  ;;  %v15956_v0 = vunpack.c.l.b16 %v4238_v1 }
 0x61a   :  { %v15952_v22 = vadd.f32 %v5370_v56, %v5322_v19  ;;  %v17308_v19 = vpack.c.b16 %v17306_v9, %v17307_v17 }
 0x61b   :  { %v5324_v41 = vpop.f32.mrf.mxu1  ;;  %5470 = vmatmul.bf16.gmra.mxu0 %v17305_v58 }
 0x61c   :  { %v5325_v32 = vadd.f32 %v5324_v41, %v5275_v62  ;;  %5421 = vmatmul.bf16.gmra.mxu3 %v17308_v19 }
 0x61e   :  { %5519 = vmatmul.bf16.gmra.mxu1 %v17309_v5  ;;  %5568 = vmatmul.bf16.gmra.mxu2 %v4574_v55  ;;  %v4202_v15 = vpop.f32.mrf.mxu3  ;;  %v4562_v55 = vunpack.c.l.b16 %v3984_v24  ;;  %v17312_v24 = vpack.c.b16 %v15686_v63, %v15682_v61 }
 0x61f   :  { %v4239_v41 = vpack.c.bf16 %v4202_v15, %v4202_v15  ;;  %v17310_v15 = vpack.c.b16 %v15699_v4, %v15697_v26  ;;  %v3985_v26 = vpack.c.bf16 %v15695_v25, %v15695_v25 }
 0x620   :  { %v5277_v6 = vpop.f32.mrf.mxu0  ;;  %v4575_v19 = vpack.c.b16 %v4562_v55, %v4561_v38 }
 0x621   :  { %v5373_v18 = vpop.f32.mrf.mxu2  ;;  %v15987_v5 = vunpack.c.l.b16 %v4239_v41  ;;  %v4563_v41 = vunpack.c.l.b16 %v3985_v26 }
 0x622   :  { %v15981_v1 = vadd.f32 %v5373_v18, %v5325_v32  ;;  %v4116_v18 = vpack.c.bf16 %v15762_v45, %v15762_v45 }
 0x623   :  { %v5326_v56 = vpop.f32.mrf.mxu1 }
 0x624   :  { %v5327_v62 = vadd.f32 %v5326_v56, %v5277_v6  ;;  %v4117_v6 = vpack.c.bf16 %v15787_v37, %v15787_v37  ;;  %v16006_v45 = vunpack.c.l.b16 %v4116_v18 }
 0x626   :  { %v4204_v53 = vpop.f32.mrf.mxu3 }
 0x627   :  { %v4240_v31 = vpack.c.bf16 %v4204_v53, %v4204_v53  ;;  %v4564_v53 = vunpack.c.l.b16 %v3986_v54 }
 0x628   :  { %v5280_v9 = vpop.f32.mrf.mxu0 }
 0x629   :  { %v5375_v58 = vpop.f32.mrf.mxu2  ;;  %v15989_v52 = vunpack.c.l.b16 %v4240_v31 }
 0x62a   :  { %v15985_v17 = vadd.f32 %v5375_v58, %v5327_v62  ;;  %v16008_v62 = vunpack.c.l.b16 %v4117_v6  ;;  %v4576_v6 = vpack.c.b16 %v4564_v53, %v4563_v41 }
 0x62b   :  { %v5329_v16 = vpop.f32.mrf.mxu1  ;;  %5475 = vmatmul.bf16.gmra.mxu0 %v17310_v15 }
 0x62c   :  { %v5330_v32 = vadd.f32 %v5329_v16, %v5280_v9  ;;  %5426 = vmatmul.bf16.gmra.mxu3 %v17311_v35  ;;  %v4118_v35 = vpack.c.bf16 %v15819_v48, %v15819_v48 }
 0x62e   :  { %5524 = vmatmul.bf16.gmra.mxu1 %v17312_v24  ;;  %5573 = vmatmul.bf16.gmra.mxu2 %v4575_v19  ;;  %v4207_v37 = vpop.f32.mrf.mxu3  ;;  %v4119_v24 = vpack.c.bf16 %v15843_v20, %v15843_v20  ;;  %v16039_v48 = vunpack.c.l.b16 %v4118_v35 }
 0x62f   :  { %v4241_v31 = vpack.c.bf16 %v4207_v37, %v4207_v37  ;;  %v17313_v37 = vpack.c.b16 %v15740_v27, %v15738_v59  ;;  %v3987_v27 = vpack.c.bf16 %v15736_v12, %v15736_v12 }
 0x630   :  { %v5282_v4 = vpop.f32.mrf.mxu0  ;;  %v16041_v54 = vunpack.c.l.b16 %v4119_v24  ;;  %v4120_v24 = vpack.c.bf16 %v15864_v34, %v15864_v34  ;;  %v13319_v34 = vld [vmem:[%s13829_s3 + $0x200] sm:$0xff] }
 0x631   :  { %v5378_v38 = vpop.f32.mrf.mxu2  ;;  %v16020_v15 = vunpack.c.l.b16 %v4241_v31  ;;  %v4565_v41 = vunpack.c.l.b16 %v3987_v27  ;;  %v17321_v27 = vld [vmem:[#allocation34_spill] sm:$0xff] }
 0x632   :  { %v16014_v33 = vadd.f32 %v5378_v38, %v5330_v32  ;;  %v17314_v38 = vpack.c.b16 %v15633_v50, %v15631_v21  ;;  %v3988_v21 = vpack.c.bf16 %v15773_v42, %v15773_v42 }
 0x633   :  { %v5331_v61 = vpop.f32.mrf.mxu1 }
 0x634   :  { %v5332_v63 = vadd.f32 %v5331_v61, %v5282_v4  ;;  %v17315_v4 = vpack.c.b16 %v15727_v3, %v15723_v13  ;;  %v4566_v53 = vunpack.c.l.b16 %v3988_v21  ;;  %v17322_v21 = vld [vmem:[#allocation45_spill] sm:$0xff] }
 0x636   :  { %v4209_v58 = vpop.f32.mrf.mxu3  ;;  %v4577_v42 = vpack.c.b16 %v4566_v53, %v4565_v41  ;;  %v13326_v41 = vld [vmem:[%s13829_s3 + $0x238] sm:$0xff] }
 0x637   :  { %v4242_v9 = vpack.c.bf16 %v4209_v58, %v4209_v58  ;;  %5653 = vmatpush.bf16.msrb.mxu0 %v13326_v41 }
 0x638   :  { %v5285_v19 = vpop.f32.mrf.mxu0 }
 0x639   :  { %v5380_v16 = vpop.f32.mrf.mxu2  ;;  %v16022_v11 = vunpack.c.l.b16 %v4242_v9 }
 0x63a   :  { %v16018_v18 = vadd.f32 %v5380_v16, %v5332_v63 }
 0x63b   :  { %v5334_v25 = vpop.f32.mrf.mxu1  ;;  %5480 = vmatmul.bf16.gmra.mxu0 %v17313_v37  ;;  %v4121_v37 = vpack.c.bf16 %v15878_v40, %v15878_v40 }
 0x63c   :  { %v5335_v32 = vadd.f32 %v5334_v25, %v5285_v19  ;;  %5431 = vmatmul.bf16.gmra.mxu3 %v17314_v38  ;;  %v17316_v38 = vld [vmem:[#allocation44_spill] sm:$0xff] }
 0x63d   :  { %v16076_v40 = vunpack.c.l.b16 %v4121_v37  ;;  %v13324_v37 = vld [vmem:[%s13829_s3 + $0x228] sm:$0xff] }
 0x63e   :  { %5529 = vmatmul.bf16.gmra.mxu1 %v17315_v4  ;;  %5578 = vmatmul.bf16.gmra.mxu2 %v4576_v6  ;;  %v4212_v20 = vpop.f32.mrf.mxu3  ;;  %v17317_v4 = vpack.c.b16 %v15796_v23, %v17316_v38  ;;  %v16074_v23 = vunpack.c.l.b16 %v4120_v24  ;;  %v17325_v38 = vld [vmem:[#allocation49_spill] sm:$0xff]  ;;  %v13316_v24 = vld [vmem:[%s13829_s3 + $0x1e8] sm:$0xff] }
 0x63f   :  { %v4243_v31 = vpack.c.bf16 %v4212_v20, %v4212_v20  ;;  %v17318_v20 = vld [vmem:[#allocation36_spill] sm:$0xff] }
 0x640   :  { %v5287_v59 = vpop.f32.mrf.mxu0 }
 0x641   :  { %v5383_v61 = vpop.f32.mrf.mxu2  ;;  %v16053_v6 = vunpack.c.l.b16 %v4243_v31 }
 0x642   :  { %v16047_v50 = vadd.f32 %v5383_v61, %v5335_v32  ;;  %v17319_v61 = vld [vmem:[#allocation42_spill] sm:$0xff] }
 0x643   :  { %v5336_v13 = vpop.f32.mrf.mxu1 }
 0x644   :  { %v5337_v3 = vadd.f32 %v5336_v13, %v5287_v59  ;;  %v17320_v59 = vpack.c.b16 %v17318_v20, %v17319_v61  ;;  %v17323_v13 = vpack.c.b16 %v17321_v27, %v17322_v21 }
 0x646   :  { %v4214_v58 = vpop.f32.mrf.mxu3 }
 0x647   :  { %v4244_v9 = vpack.c.bf16 %v4214_v58, %v4214_v58 }
 0x648   :  { %v5290_v19 = vpop.f32.mrf.mxu0 }
 0x649   :  { %v5385_v16 = vpop.f32.mrf.mxu2  ;;  %v16055_v32 = vunpack.c.l.b16 %v4244_v9  ;;  %v13317_v9 = vld [vmem:[%s13829_s3 + $0x1f0] sm:$0xff] }
 0x64a   :  { %v16051_v12 = vadd.f32 %v5385_v16, %v5337_v3  ;;  %v13318_v3 = vld [vmem:[%s13829_s3 + $0x1f8] sm:$0xff]  ;;  %v13325_v16 = vld [vmem:[%s13829_s3 + $0x230] sm:$0xff] }
 0x64b   :  { %v5339_v25 = vpop.f32.mrf.mxu1  ;;  %5485 = vmatmul.bf16.gmra.mxu0 %v17317_v4  ;;  %5604 = vmatpush.bf16.msra.mxu3 %v13318_v3 }
 0x64c   :  { %v5340_v35 = vadd.f32 %v5339_v25, %v5290_v19  ;;  %5436 = vmatmul.bf16.gmra.mxu3 %v17320_v59  ;;  %v17324_v19 = vld [vmem:[#allocation35_spill] sm:$0xff]  ;;  %5654 = vmatpush.bf16.msrb.mxu0 %v13325_v16 }
 0x64d   :  { %v3989_v25 = vpack.c.bf16 %v17324_v19, %v17324_v19 }
 0x64e   :  { %5534 = vmatmul.bf16.gmra.mxu1 %v17323_v13  ;;  %5583 = vmatmul.bf16.gmra.mxu2 %v4577_v42  ;;  %v4217_v53 = vpop.f32.mrf.mxu3  ;;  %v3990_v42 = vpack.c.bf16 %v17325_v38, %v17325_v38 }
 0x64f   :  { %5605 = vmatpush.bf16.msra.mxu3 %v13317_v9  ;;  %v4567_v59 = vunpack.c.l.b16 %v3989_v25  ;;  %v4245_v21 = vpack.c.bf16 %v4217_v53, %v4217_v53  ;;  %v13323_v9 = vld [vmem:[%s13829_s3 + $0x220] sm:$0xff]  ;;  %v4122_v53 = vpack.c.bf16 %v15903_v46, %v15903_v46 }
 0x650   :  { %v16078_v58 = vpop.f32.mrf.mxu0  ;;  %v4568_v27 = vunpack.c.l.b16 %v3990_v42  ;;  %5655 = vmatpush.bf16.msrb.mxu0 %v13324_v37  ;;  %v4123_v42 = vpack.c.bf16 %v15919_v39, %v15919_v39 }
 0x651   :  { %v5388_v31 = vpop.f32.mrf.mxu2  ;;  %v16098_v38 = vunpack.c.l.b16 %v4245_v21 }
 0x652   :  { %v16086_v4 = vadd.f32 %v5388_v31, %v5340_v35  ;;  %v13315_v31 = vld [vmem:[%s13829_s3 + $0x1e0] sm:$0xff]  ;;  %v4578_v19 = vpack.c.b16 %v4568_v27, %v4567_v59  ;;  %v17328_v59 = vld [vmem:[#allocation47_spill] sm:$0xff]  ;;  %v16121_v39 = vunpack.c.l.b16 %v4123_v42 }
 0x653   :  { %v16088_v20 = vpop.f32.mrf.mxu1  ;;  %5606 = vmatpush.bf16.msra.mxu3 %v13316_v24  ;;  %v17326_v24 = vld [vmem:[#allocation64_spill] sm:$0xff]  ;;  %v17329_v27 = vld [vmem:[#allocation37_spill] sm:$0xff]  ;;  %v13320_v42 = vld [vmem:[%s13829_s3 + $0x208] sm:$0xff] }
 0x654   :  { %5656 = vmatpush.bf16.msrb.mxu0 %v13323_v9  ;;  %v17327_v37 = vpack.c.b16 %v15853_v51, %v17326_v24  ;;  %v17330_v21 = vpack.c.b16 %v17328_v59, %v17329_v27  ;;  %v13322_v9 = vld [vmem:[%s13829_s3 + $0x218] sm:$0xff]  ;;  %v16119_v51 = vunpack.c.l.b16 %v4122_v53  ;;  %v13313_v59 = vld [vmem:[%s13829_s3 + $0x1d0] sm:$0xff]  ;;  %v13312_v53 = vld [vmem:[%s13829_s3 + $0x1c8] sm:$0xff] }
 0x655   :  { %v13321_v27 = vld [vmem:[%s13829_s3 + $0x210] sm:$0xff] }
 0x656   :  { %v4219_v13 = vpop.f32.mrf.mxu3 }
 0x657   :  { %v4246_v3 = vpack.c.bf16 %v4219_v13, %v4219_v13  ;;  %5607 = vmatpush.bf16.msra.mxu3 %v13315_v31  ;;  %v17331_v13 = vld [vmem:[#allocation62_spill] sm:$0xff]  ;;  %v13314_v31 = vld [vmem:[%s13829_s3 + $0x1d8] sm:$0xff]  ;;  %s17402_s3 = sld [smem:[#allocation11_spill]] }
 0x658   :  { %v5295_v41 = vpop.f32.mrf.mxu0  ;;  %5657 = vmatpush.bf16.msrb.mxu0 %v13322_v9 }
 0x659   :  { %v16094_v35 = vpop.f32.mrf.mxu2  ;;  %v16100_v63 = vunpack.c.l.b16 %v4246_v3  ;;  %v17332_v3 = vld [vmem:[#allocation56_spill] sm:$0xff] }
 0x65b   :  { %v5344_v16 = vpop.f32.mrf.mxu1  ;;  %5490 = vmatmul.bf16.gmra.mxu0 %v17327_v37  ;;  %5608 = vmatpush.bf16.msra.mxu3 %v13314_v31 }
 0x65c   :  { %v5345_v25 = vadd.f32 %v5344_v16, %v5295_v41  ;;  %5441 = vmatmul.bf16.gmra.mxu3 %v17330_v21  ;;  %v17333_v41 = vpack.c.b16 %v17331_v13, %v17332_v3  ;;  %v17334_v21 = vld [vmem:[#allocation63_spill] sm:$0xff]  ;;  %v17335_v3 = vld [vmem:[#allocation61_spill] sm:$0xff]  ;;  %5658 = vmatpush.bf16.msrb.mxu0 %v13321_v27 }
 0x65d   :  { %v3991_v13 = vpack.c.bf16 %v17334_v21, %v17334_v21 }
 0x65e   :  { %5539 = vmatmul.bf16.gmra.mxu1 %v17333_v41  ;;  %5588 = vmatmul.bf16.gmra.mxu2 %v4578_v19  ;;  %v4222_v16 = vpop.f32.mrf.mxu3  ;;  %v3992_v19 = vpack.c.bf16 %v17335_v3, %v17335_v3 }
 0x65f   :  { %5609 = vmatpush.bf16.msra.mxu3 %v13313_v59  ;;  %v4569_v61 = vunpack.c.l.b16 %v3991_v13  ;;  %v4247_v46 = vpack.c.bf16 %v4222_v16, %v4222_v16  ;;  %v17336_v16 = vpack.c.b16 %v15885_v8, %v15883_v14  ;;  %v17337_v13 = vld [vmem:[#allocation43_spill] sm:$0xff]  ;;  %v17345_v14 = vld [vmem:[#allocation40_spill] sm:$0xff] }
 0x660   :  { %v16123_v37 = vpop.f32.mrf.mxu0  ;;  %v4570_v55 = vunpack.c.l.b16 %v3992_v19  ;;  %5659 = vmatpush.bf16.msrb.mxu0 %v13320_v42  ;;  %v17338_v19 = vld [vmem:[#allocation46_spill] sm:$0xff]  ;;  %v17340_v42 = vld [vmem:[#allocation60_spill] sm:$0xff] }
 0x661   :  { %v5393_v24 = vpop.f32.mrf.mxu2  ;;  %v16143_v27 = vunpack.c.l.b16 %v4247_v46  ;;  %v3994_v46 = vpack.c.bf16 %v17345_v14, %v17345_v14 }
 0x662   :  { %v16131_v41 = vadd.f32 %v5393_v24, %v5345_v25  ;;  %v4579_v59 = vpack.c.b16 %v4570_v55, %v4569_v61 }
 0x663   :  { %v16133_v31 = vpop.f32.mrf.mxu1  ;;  %5610 = vmatpush.bf16.msra.mxu3 %v13312_v53  ;;  %v17339_v53 = vpack.c.b16 %v17337_v13, %v17338_v19 }
 0x664   :  { %5660 = vmatpush.bf16.msrb.mxu0 %v13319_v34  ;;  %v17344_v34 = vld [vmem:[#allocation50_spill] sm:$0xff] }
 0x665   :  { %v3993_v8 = vpack.c.bf16 %v17344_v34, %v17344_v34 }
 0x666   :  { %v4224_v21 = vpop.f32.mrf.mxu3 }
 0x667   :  { %v4248_v3 = vpack.c.bf16 %v4224_v21, %v4224_v21  ;;  %5611 = vmatpush.bf16.msra.mxu3 %v13311_v57  ;;  %v17341_v21 = vld [vmem:[#allocation41_spill] sm:$0xff] }
 0x668   :  { %v5300_v24 = vpop.f32.mrf.mxu0  ;;  %v17342_v9 = vpack.c.b16 %v17340_v42, %v17341_v21 }
 0x669   :  { %v16139_v25 = vpop.f32.mrf.mxu2  ;;  %v16145_v26 = vunpack.c.l.b16 %v4248_v3 }
 0x66b   :  { %v5349_v28 = vpop.f32.mrf.mxu1  ;;  %5495 = vmatmul.bf16.gmra.mxu0 %v17336_v16  ;;  %v4571_v16 = vunpack.c.l.b16 %v3993_v8  ;;  %v17348_v8 = vld [vmem:[#allocation57_spill] sm:$0xff] }
 0x66c   :  { %v5350_v56 = vadd.f32 %v5349_v28, %v5300_v24  ;;  %5446 = vmatmul.bf16.gmra.mxu3 %v17339_v53 }
 0x66e   :  { %5544 = vmatmul.bf16.gmra.mxu1 %v17342_v9  ;;  %5593 = vmatmul.bf16.gmra.mxu2 %v4579_v59  ;;  %v4227_v61 = vpop.f32.mrf.mxu3  ;;  %v4572_v9 = vunpack.c.l.b16 %v3994_v46 }
 0x66f   :  { %v4249_v13 = vpack.c.bf16 %v4227_v61, %v4227_v61  ;;  %v17350_v61 = vpack.c.b16 %v15913_v60, %v15909_v44 }
 0x670   :  { %v16158_v57 = vpop.f32.mrf.mxu0  ;;  %v4580_v55 = vpack.c.b16 %v4572_v9, %v4571_v16 }
 0x671   :  { %v5398_v28 = vpop.f32.mrf.mxu2  ;;  %17343 = vst [vmem:[#allocation54_spill] sm:$0xff] %v16158_v57  ;;  %v16170_v43 = vunpack.c.l.b16 %v4249_v13 }
 0x672   :  { %v16164_v3 = vadd.f32 %v5398_v28, %v5350_v56  ;;  %v17346_v56 = vpack.c.b16 %v15923_v49, %v15921_v10  ;;  %v17347_v28 = vld [vmem:[#allocation58_spill] sm:$0xff] }
 0x673   :  { %v16166_v24 = vpop.f32.mrf.mxu1  ;;  %v17349_v14 = vpack.c.b16 %v17347_v28, %v17348_v8  ;;  %v17355_v8 = vld [vmem:[#allocation39_spill] sm:$0xff] }
 0x676   :  { %v4229_v19 = vpop.f32.mrf.mxu3 }
 0x677   :  { %v4250_v53 = vpack.c.bf16 %v4229_v19, %v4229_v19 }
 0x678   :  { %v5305_v42 = vpop.f32.mrf.mxu0 }
 0x679   :  { %v16168_v59 = vpop.f32.mrf.mxu2  ;;  %v16172_v34 = vunpack.c.l.b16 %v4250_v53 }
 0x67b   :  { %v5354_v21 = vpop.f32.mrf.mxu1  ;;  %5500 = vmatmul.bf16.gmra.mxu0 %v17346_v56 }
 0x67c   :  { %v5355_v57 = vadd.f32 %v5354_v21, %v5305_v42  ;;  %5451 = vmatmul.bf16.gmra.mxu3 %v17349_v14 }
 0x67e   :  { %5549 = vmatmul.bf16.gmra.mxu1 %v17350_v61  ;;  %5598 = vmatmul.bf16.gmra.mxu2 %v4580_v55  ;;  %v4232_v16 = vpop.f32.mrf.mxu3  ;;  %v17354_v55 = vpack.c.b16 %v15956_v0, %v15954_v2  ;;  %v17360_v61 = vld [vmem:[#allocation59_spill] sm:$0xff] }
 0x67f   :  { %v4251_v49 = vpack.c.bf16 %v4232_v16, %v4232_v16 }
 0x680   :  { %v16185_v13 = vpop.f32.mrf.mxu0 }
 0x681   :  { %v5403_v9 = vpop.f32.mrf.mxu2  ;;  %17351 = vst [vmem:[#allocation55_spill] sm:$0xff] %v16185_v13  ;;  %v16193_v60 = vunpack.c.l.b16 %v4251_v49 }
 0x682   :  { %v16187_v19 = vadd.f32 %v5403_v9, %v5355_v57  ;;  %v17356_v57 = vld [vmem:[#allocation53_spill] sm:$0xff] }
 0x683   :  { %v16189_v10 = vpop.f32.mrf.mxu1  ;;  %v17357_v14 = vpack.c.b16 %v17355_v8, %v17356_v57 }
 0x684   :  { %17352 = vst [vmem:[#allocation48_spill] sm:$0xff] %v16189_v10 }
 0x686   :  { %v4234_v53 = vpop.f32.mrf.mxu3 }
 0x687   :  { %v4252_v42 = vpack.c.bf16 %v4234_v53, %v4234_v53 }
 0x688   :  { %v5466_v56 = vpop.f32.mrf.mxu0 }
 0x689   :  { %v16191_v21 = vpop.f32.mrf.mxu2  ;;  %v16195_v28 = vunpack.c.l.b16 %v4252_v42 }
 0x68a   :  { %17353 = vst [vmem:[#allocation52_spill] sm:$0xff] %v16191_v21 }
 0x68b   :  { %v5515_v44 = vpop.f32.mrf.mxu1  ;;  %5661 = vmatmul.bf16.vlgmr.msrb.gmra.mxu0 %v17354_v55 }
 0x68c   :  { %5612 = vmatmul.bf16.vlgmr.msra.gmra.mxu3 %v17357_v14 }
 0x68e   :  { %v5417_v16 = vpop.f32.mrf.mxu3 }
 0x68f   :  { %v5418_v9 = vadd.f32 %v5417_v16, %v15948_v36  ;;  %v17358_v36 = vpack.c.b16 %v15989_v52, %v15987_v5  ;;  %v17359_v16 = vld [vmem:[#allocation51_spill] sm:$0xff] }
 0x690   :  { %v5468_v46 = vpop.f32.mrf.mxu0  ;;  %v17361_v13 = vpack.c.b16 %v17359_v16, %v17360_v61  ;;  %v17363_v61 = vpack.c.b16 %v15942_v30, %v15940_v29  ;;  %v17364_v29 = vpack.c.b16 %v16055_v32, %v16053_v6  ;;  %v17365_v30 = vpack.c.b16 %v15975_v7, %v15973_v47 }
 0x691   :  { %v5564_v53 = vpop.f32.mrf.mxu2  ;;  %v5467_v42 = vadd.f32 %v5466_v56, %v5418_v9  ;;  %v17366_v7 = vpack.c.b16 %v16100_v63, %v16098_v38  ;;  %v17368_v63 = vpack.c.b16 %v16145_v26, %v16143_v27  ;;  %v17371_v26 = vpack.c.b16 %v16076_v40, %v16074_v23 }
 0x692   :  { %v17373_v23 = vpack.c.b16 %v16121_v39, %v16119_v51 }
 0x693   :  { %v16206_v49 = vpop.f32.mrf.mxu1  ;;  %v5516_v21 = vadd.f32 %v5515_v44, %v5467_v42 }
 0x695   :  { %v16208_v10 = vadd.f32 %v5564_v53, %v5516_v21 }
 0x696   :  { %v5419_v2 = vpop.f32.mrf.mxu3 }
 0x697   :  { %v5420_v0 = vadd.f32 %v5419_v2, %v15952_v22 }
 0x698   :  { %v5471_v8 = vpop.f32.mrf.mxu0 }
 0x699   :  { %v16211_v55 = vpop.f32.mrf.mxu2  ;;  %v16213_v14 = vadd.f32 %v5468_v46, %v5420_v0 }
 0x69b   :  { %v5520_v57 = vpop.f32.mrf.mxu1  ;;  %5666 = vmatmul.bf16.gmra.mxu0 %v17358_v36  ;;  %v5518_v51 = vadd.f32 %v16206_v49, %v16213_v14 }
 0x69c   :  { %5617 = vmatmul.bf16.gmra.mxu3 %v17361_v13 }
 0x69f   :  { %v5422_v56 = vpop.f32.mrf.mxu3 }
 0x6a0   :  { %v5423_v21 = vadd.f32 %v5422_v56, %v15981_v1  ;;  %v5473_v9 = vpop.f32.mrf.mxu0  ;;  %v17362_v1 = vpack.c.b16 %v16022_v11, %v16020_v15 }
 0x6a1   :  { %v5569_v44 = vpop.f32.mrf.mxu2 }
 0x6a2   :  { %v5472_v53 = vadd.f32 %v5471_v8, %v5423_v21 }
 0x6a3   :  { %v16222_v22 = vpop.f32.mrf.mxu1 }
 0x6a4   :  { %v5521_v42 = vadd.f32 %v5520_v57, %v5472_v53 }
 0x6a6   :  { %v16224_v2 = vadd.f32 %v5569_v44, %v5521_v42 }
 0x6a7   :  { %v5424_v46 = vpop.f32.mrf.mxu3 }
 0x6a8   :  { %v5425_v0 = vadd.f32 %v5424_v46, %v15985_v17  ;;  %v5476_v52 = vpop.f32.mrf.mxu0 }
 0x6a9   :  { %v16227_v5 = vpop.f32.mrf.mxu2 }
 0x6aa   :  { %v16229_v36 = vadd.f32 %v5473_v9, %v5425_v0 }
 0x6ab   :  { %v5525_v13 = vpop.f32.mrf.mxu1  ;;  %5671 = vmatmul.bf16.gmra.mxu0 %v17362_v1 }
 0x6ac   :  { %5622 = vmatmul.bf16.gmra.mxu3 %v17363_v61 }
 0x6af   :  { %v5427_v8 = vpop.f32.mrf.mxu3 }
 0x6b0   :  { %v5428_v57 = vadd.f32 %v5427_v8, %v16014_v33  ;;  %v5478_v56 = vpop.f32.mrf.mxu0 }
 0x6b1   :  { %v5574_v16 = vpop.f32.mrf.mxu2 }
 0x6b2   :  { %v5477_v17 = vadd.f32 %v5476_v52, %v5428_v57 }
 0x6b3   :  { %v16238_v44 = vpop.f32.mrf.mxu1 }
 0x6b4   :  { %v5526_v21 = vadd.f32 %v5525_v13, %v5477_v17 }
 0x6b6   :  { %v16240_v9 = vadd.f32 %v5574_v16, %v5526_v21 }
 0x6b7   :  { %v5429_v53 = vpop.f32.mrf.mxu3 }
 0x6b8   :  { %v5430_v42 = vadd.f32 %v5429_v53, %v16018_v18  ;;  %v5481_v11 = vpop.f32.mrf.mxu0 }
 0x6b9   :  { %v16243_v15 = vpop.f32.mrf.mxu2 }
 0x6ba   :  { %v16245_v46 = vadd.f32 %v5478_v56, %v5430_v42 }
 0x6bb   :  { %5676 = vmatmul.bf16.gmra.mxu0 %v17364_v29  ;;  %v5530_v33 = vpop.f32.mrf.mxu1 }
 0x6bc   :  { %5627 = vmatmul.bf16.gmra.mxu3 %v17365_v30 }
 0x6bf   :  { %v5432_v0 = vpop.f32.mrf.mxu3 }
 0x6c0   :  { %v5433_v52 = vadd.f32 %v5432_v0, %v16047_v50  ;;  %v5483_v13 = vpop.f32.mrf.mxu0  ;;  %v17367_v50 = vpack.c.b16 %v16008_v62, %v16006_v45  ;;  %v17369_v45 = vpack.c.b16 %v16041_v54, %v16039_v48 }
 0x6c1   :  { %v5579_v1 = vpop.f32.mrf.mxu2 }
 0x6c2   :  { %v5482_v18 = vadd.f32 %v5481_v11, %v5433_v52 }
 0x6c3   :  { %v16257_v6 = vpop.f32.mrf.mxu1 }
 0x6c4   :  { %v5531_v61 = vadd.f32 %v5530_v33, %v5482_v18  ;;  %v17370_v18 = vpack.c.b16 %v16172_v34, %v16170_v43  ;;  %v17372_v43 = vpack.c.b16 %v16195_v28, %v16193_v60  ;;  %v16322_v28 = vld [vmem:[%s13834_s8 + $0x1] ss:$0 sm:$0xff] }
 0x6c6   :  { %v16254_v8 = vadd.f32 %v5579_v1, %v5531_v61 }
 0x6c7   :  { %v5434_v57 = vpop.f32.mrf.mxu3 }
 0x6c8   :  { %v5435_v16 = vadd.f32 %v5434_v57, %v16051_v12  ;;  %v5486_v56 = vpop.f32.mrf.mxu0 }
 0x6c9   :  { %v16261_v47 = vpop.f32.mrf.mxu2 }
 0x6ca   :  { %v16259_v32 = vadd.f32 %v5483_v13, %v5435_v16 }
 0x6cb   :  { %5681 = vmatmul.bf16.gmra.mxu0 %v17366_v7  ;;  %v5535_v42 = vpop.f32.mrf.mxu1 }
 0x6cc   :  { %5632 = vmatmul.bf16.gmra.mxu3 %v17367_v50 }
 0x6cf   :  { %v5437_v17 = vpop.f32.mrf.mxu3 }
 0x6d0   :  { %v5438_v21 = vadd.f32 %v5437_v17, %v16086_v4  ;;  %v16270_v53 = vpop.f32.mrf.mxu0 }
 0x6d1   :  { %v5584_v29 = vpop.f32.mrf.mxu2 }
 0x6d2   :  { %v5487_v12 = vadd.f32 %v5486_v56, %v5438_v21  ;;  %v16317_v21 = vld [vmem:[%s13834_s8] ss:$0 sm:$0xff]  ;;  %s17403_s8 = sld [smem:[#allocation15_spill]] }
 0x6d4   :  { %v5536_v11 = vadd.f32 %v5535_v42, %v5487_v12  ;;  %v17374_v12 = vld [vmem:[#allocation33_spill] sm:$0xff] }
 0x6d5   :  { %v3076_v42 = vunpack.c.l.bf16 %v17374_v12 }
 0x6d6   :  { %v16272_v30 = vadd.f32 %v5584_v29, %v5536_v11  ;;  %v5567_v11 = vadd.f32 %v16211_v55, %v5518_v51  ;;  %v5523_v55 = vadd.f32 %v16222_v22, %v16229_v36  ;;  %v17377_v36 = vld [vmem:[#allocation30_spill] sm:$0xff] }
 0x6d7   :  { %v16274_v33 = vpop.f32.mrf.mxu3 }
 0x6d8   :  { %v5491_v0 = vpop.f32.mrf.mxu0 }
 0x6db   :  { %5686 = vmatmul.bf16.gmra.mxu0 %v17368_v63 }
 0x6dc   :  { %5637 = vmatmul.bf16.gmra.mxu3 %v17369_v45 }
 0x6df   :  { %v5442_v62 = vpop.f32.mrf.mxu3 }
 0x6e0   :  { %v5443_v4 = vadd.f32 %v5442_v62, %v16131_v41  ;;  %v16283_v38 = vpop.f32.mrf.mxu0 }
 0x6e2   :  { %v16285_v52 = vadd.f32 %v5491_v0, %v5443_v4 }
 0x6e7   :  { %v16287_v13 = vpop.f32.mrf.mxu3 }
 0x6e8   :  { %v5496_v1 = vpop.f32.mrf.mxu0 }
 0x6eb   :  { %5691 = vmatmul.bf16.gmra.mxu0 %v17370_v18 }
 0x6ec   :  { %5642 = vmatmul.bf16.gmra.mxu3 %v17371_v26 }
 0x6ef   :  { %v5447_v48 = vpop.f32.mrf.mxu3 }
 0x6f0   :  { %v5448_v54 = vadd.f32 %v5447_v48, %v16164_v3  ;;  %v16296_v41 = vpop.f32.mrf.mxu0 }
 0x6f2   :  { %v16298_v27 = vadd.f32 %v5496_v1, %v5448_v54  ;;  %v17375_v1 = vld [vmem:[#allocation32_spill] sm:$0xff] }
 0x6f3   :  { %v3077_v49 = vunpack.c.l.bf16 %v17375_v1 }
 0x6f7   :  { %v16300_v61 = vpop.f32.mrf.mxu3 }
 0x6f8   :  { %v5501_v57 = vpop.f32.mrf.mxu0 }
 0x6fb   :  { %5696 = vmatmul.bf16.gmra.mxu0 %v17372_v43 }
 0x6fc   :  { %5647 = vmatmul.bf16.gmra.mxu3 %v17373_v23 }
 0x6ff   :  { %v5452_v40 = vpop.f32.mrf.mxu3 }
 0x700   :  { %v5453_v34 = vadd.f32 %v5452_v40, %v16187_v19  ;;  %v16309_v3 = vpop.f32.mrf.mxu0 }
 0x702   :  { %v16311_v16 = vadd.f32 %v5501_v57, %v5453_v34 }
 0x707   :  { %v16313_v56 = vpop.f32.mrf.mxu3 }
 0x708   :  { %v5662_v7 = vpop.f32.mrf.mxu0 }
 0x70f   :  { %v5613_v50 = vpop.f32.mrf.mxu3 }
 0x710   :  { %v5614_v17 = vadd.f32 %v5613_v50, %v16208_v10  ;;  %v5664_v60 = vpop.f32.mrf.mxu0 }
 0x712   :  { %v5663_v39 = vadd.f32 %v5662_v7, %v5614_v17  ;;  %v17376_v7 = vld [vmem:[#allocation31_spill] sm:$0xff]  ;;  %v5572_v17 = vadd.f32 %v16227_v5, %v5523_v55  ;;  %v5528_v5 = vadd.f32 %v16238_v44, %v16245_v46  ;;  %v17379_v46 = vld [vmem:[#allocation28_spill] sm:$0xff] }
 0x713   :  { %v3078_v50 = vunpack.c.l.bf16 %v17376_v7 }
 0x714   :  { %v5704_v19 = vmul.f32 %v16317_v21, %v5663_v39 }
 0x716   :  { %v5722_v29 = vadd.f32 %v16322_v28, %v5704_v19 }
 0x717   :  { %v5615_v0 = vpop.f32.mrf.mxu3 }
 0x718   :  { %v5738_v63 = vadd.f32 %v5722_v29, %v3076_v42  ;;  %v5616_v10 = vadd.f32 %v5615_v0, %v5567_v11  ;;  %v5667_v45 = vpop.f32.mrf.mxu0  ;;  %v3079_v42 = vunpack.c.l.bf16 %v17377_v36  ;;  %v17380_v36 = vld [vmem:[#allocation27_spill] sm:$0xff] }
 0x71a   :  { %v5665_v62 = vadd.f32 %v5664_v60, %v5616_v10  ;;  %v5754_v57 = vmax.f32 %v5738_v63, 0.0 }
 0x71c   :  { %v5705_v4 = vmul.f32 %v16317_v21, %v5665_v62 }
 0x71e   :  { %v5723_v14 = vadd.f32 %v16322_v28, %v5705_v4 }
 0x71f   :  { %v5618_v18 = vpop.f32.mrf.mxu3 }
 0x720   :  { %v5739_v26 = vadd.f32 %v5723_v14, %v3077_v49  ;;  %v5619_v48 = vadd.f32 %v5618_v18, %v16224_v2  ;;  %v5669_v54 = vpop.f32.mrf.mxu0  ;;  %v17378_v14 = vld [vmem:[#allocation29_spill] sm:$0xff] }
 0x721   :  { %v3080_v18 = vunpack.c.l.bf16 %v17378_v14 }
 0x722   :  { %v5755_v43 = vmax.f32 %v5739_v26, 0.0  ;;  %v5668_v23 = vadd.f32 %v5667_v45, %v5619_v48  ;;  %v5577_v26 = vadd.f32 %v16243_v15, %v5528_v5  ;;  %v5533_v15 = vadd.f32 %v16257_v6, %v16259_v32  ;;  %v5586_v5 = vpop.f32.mrf.mxu2 }
 0x724   :  { %v16334_v40 = vpack.c.bf16 %v5755_v43, %v5754_v57  ;;  %v5706_v34 = vmul.f32 %v16317_v21, %v5668_v23  ;;  %v3081_v23 = vunpack.c.l.bf16 %v17379_v46  ;;  %v17382_v46 = vld [vmem:[#allocation25_spill] sm:$0xff] }
 0x726   :  { %v5724_v60 = vadd.f32 %v16322_v28, %v5706_v34 }
 0x727   :  { %v5620_v51 = vpop.f32.mrf.mxu3 }
 0x728   :  { %v5740_v39 = vadd.f32 %v5724_v60, %v3078_v50  ;;  %v5621_v2 = vadd.f32 %v5620_v51, %v5572_v17  ;;  %v5672_v19 = vpop.f32.mrf.mxu0 }
 0x72a   :  { %v5670_v12 = vadd.f32 %v5669_v54, %v5621_v2  ;;  %v5756_v45 = vmax.f32 %v5740_v39, 0.0 }
 0x72c   :  { %v5707_v22 = vmul.f32 %v16317_v21, %v5670_v12 }
 0x72e   :  { %v5725_v11 = vadd.f32 %v16322_v28, %v5707_v22  ;;  %v5537_v22 = vpop.f32.mrf.mxu1 }
 0x72f   :  { %v5623_v29 = vpop.f32.mrf.mxu3 }
 0x730   :  { %v5741_v0 = vadd.f32 %v5725_v11, %v3079_v42  ;;  %v5624_v63 = vadd.f32 %v5623_v29, %v16240_v9  ;;  %v5674_v10 = vpop.f32.mrf.mxu0  ;;  %v3082_v42 = vunpack.c.l.bf16 %v17380_v36  ;;  %v5342_v11 = vadd.f32 %v16088_v20, %v16078_v58 }
 0x731   :  { %v5582_v29 = vadd.f32 %v16261_v47, %v5533_v15 }
 0x732   :  { %v5757_v62 = vmax.f32 %v5741_v0, 0.0  ;;  %v5673_v4 = vadd.f32 %v5672_v19, %v5624_v63  ;;  %v5391_v6 = vadd.f32 %v16094_v35, %v5342_v11 }
 0x734   :  { %v16346_v1 = vpack.c.bf16 %v5757_v62, %v5756_v45  ;;  %v5708_v49 = vmul.f32 %v16317_v21, %v5673_v4  ;;  %v5440_v45 = vadd.f32 %v16274_v33, %v5391_v6  ;;  %v5589_v33 = vpop.f32.mrf.mxu2 }
 0x736   :  { %v5726_v48 = vadd.f32 %v16322_v28, %v5708_v49  ;;  %v17381_v49 = vld [vmem:[#allocation26_spill] sm:$0xff]  ;;  %v5489_v58 = vadd.f32 %v16270_v53, %v5440_v45  ;;  %v5540_v47 = vpop.f32.mrf.mxu1  ;;  %v5347_v53 = vadd.f32 %v16133_v31, %v16123_v37 }
 0x737   :  { %v5625_v54 = vpop.f32.mrf.mxu3  ;;  %v3083_v14 = vunpack.c.l.bf16 %v17381_v49  ;;  %v17385_v49 = vld [vmem:[#allocation54_spill] sm:$0xff] }
 0x738   :  { %v5742_v55 = vadd.f32 %v5726_v48, %v3080_v18  ;;  %v5626_v9 = vadd.f32 %v5625_v54, %v5577_v26  ;;  %v5677_v57 = vpop.f32.mrf.mxu0  ;;  %v5538_v54 = vadd.f32 %v5537_v22, %v5489_v58 }
 0x73a   :  { %v5675_v43 = vadd.f32 %v5674_v10, %v5626_v9  ;;  %v5758_v51 = vmax.f32 %v5742_v55, 0.0 }
 0x73c   :  { %v5709_v44 = vmul.f32 %v16317_v21, %v5675_v43  ;;  %v5591_v36 = vpop.f32.mrf.mxu2 }
 0x73e   :  { %v5727_v34 = vadd.f32 %v16322_v28, %v5709_v44 }
 0x73f   :  { %v5628_v7 = vpop.f32.mrf.mxu3 }
 0x740   :  { %v5743_v50 = vadd.f32 %v5727_v34, %v3081_v23  ;;  %v5629_v17 = vadd.f32 %v5628_v7, %v16254_v8  ;;  %v5679_v60 = vpop.f32.mrf.mxu0  ;;  %v3084_v23 = vunpack.c.l.bf16 %v17382_v46  ;;  %v5587_v34 = vadd.f32 %v5586_v5, %v5538_v54 }
 0x742   :  { %v5759_v39 = vmax.f32 %v5743_v50, 0.0  ;;  %v5678_v2 = vadd.f32 %v5677_v57, %v5629_v17 }
 0x744   :  { %v16358_v19 = vpack.c.bf16 %v5759_v39, %v5758_v51  ;;  %v5710_v12 = vmul.f32 %v16317_v21, %v5678_v2  ;;  %v5542_v51 = vpop.f32.mrf.mxu1  ;;  %v5541_v39 = vadd.f32 %v5540_v47, %v16285_v52 }
 0x746   :  { %v5728_v8 = vadd.f32 %v16322_v28, %v5710_v12  ;;  %v5590_v31 = vadd.f32 %v5589_v33, %v5541_v39  ;;  %v17387_v39 = vld [vmem:[#allocation21_spill] sm:$0xff] }
 0x747   :  { %v5630_v0 = vpop.f32.mrf.mxu3 }
 0x748   :  { %v5744_v32 = vadd.f32 %v5728_v8, %v3082_v42  ;;  %v5631_v63 = vadd.f32 %v5630_v0, %v5582_v29  ;;  %v5682_v10 = vpop.f32.mrf.mxu0  ;;  %v17383_v42 = vld [vmem:[#allocation24_spill] sm:$0xff] }
 0x749   :  { %v3085_v37 = vunpack.c.l.bf16 %v17383_v42 }
 0x74a   :  { %v5680_v62 = vadd.f32 %v5679_v60, %v5631_v63  ;;  %v5760_v55 = vmax.f32 %v5744_v32, 0.0 }
 0x74c   :  { %v5711_v4 = vmul.f32 %v16317_v21, %v5680_v62  ;;  %v17384_v62 = vld [vmem:[#allocation23_spill] sm:$0xff] }
 0x74e   :  { %v5729_v20 = vadd.f32 %v16322_v28, %v5711_v4  ;;  %v3086_v4 = vunpack.c.l.bf16 %v17384_v62 }
 0x74f   :  { %v5633_v18 = vpop.f32.mrf.mxu3 }
 0x750   :  { %v5745_v26 = vadd.f32 %v5729_v20, %v3083_v14  ;;  %v5634_v35 = vadd.f32 %v5633_v18, %v16272_v30  ;;  %v5684_v48 = vpop.f32.mrf.mxu0  ;;  %v5396_v30 = vadd.f32 %v16139_v25, %v5347_v53  ;;  %v5594_v20 = vpop.f32.mrf.mxu2 }
 0x752   :  { %v5761_v9 = vmax.f32 %v5745_v26, 0.0  ;;  %v5683_v57 = vadd.f32 %v5682_v10, %v5634_v35  ;;  %v5445_v2 = vadd.f32 %v16287_v13, %v5396_v30  ;;  %v5545_v13 = vpop.f32.mrf.mxu1 }
 0x754   :  { %v16373_v43 = vpack.c.bf16 %v5761_v9, %v5760_v55  ;;  %v5712_v44 = vmul.f32 %v16317_v21, %v5683_v57  ;;  %v5494_v11 = vadd.f32 %v16283_v38, %v5445_v2  ;;  %v5352_v38 = vadd.f32 %v16166_v24, %v17385_v49 }
 0x755   :  { %v3088_v2 = vunpack.c.l.bf16 %v17387_v39  ;;  %v13333_v39 = vld [vmem:[%s13839_s14 + $0x30] sm:$0xff] }
 0x756   :  { %v5730_v7 = vadd.f32 %v16322_v28, %v5712_v44  ;;  %v5543_v32 = vadd.f32 %v5542_v51, %v5494_v11  ;;  %v5401_v18 = vadd.f32 %v16168_v59, %v5352_v38  ;;  %v17386_v44 = vld [vmem:[#allocation22_spill] sm:$0xff]  ;;  %v17390_v11 = vld [vmem:[#allocation52_spill] sm:$0xff] }
 0x757   :  { %v5635_v50 = vpop.f32.mrf.mxu3  ;;  %v3087_v24 = vunpack.c.l.bf16 %v17386_v44 }
 0x758   :  { %v5746_v17 = vadd.f32 %v5730_v7, %v3084_v23  ;;  %v5636_v60 = vadd.f32 %v5635_v50, %v5587_v34  ;;  %v5687_v15 = vpop.f32.mrf.mxu0  ;;  %v5592_v14 = vadd.f32 %v5591_v36, %v5543_v32  ;;  %v5450_v54 = vadd.f32 %v16300_v61, %v5401_v18  ;;  %v5596_v50 = vpop.f32.mrf.mxu2 }
 0x75a   :  { %v5685_v12 = vadd.f32 %v5684_v48, %v5636_v60  ;;  %v5762_v63 = vmax.f32 %v5746_v17, 0.0  ;;  %v5546_v48 = vadd.f32 %v5545_v13, %v16298_v27  ;;  %v5547_v33 = vpop.f32.mrf.mxu1  ;;  %v5499_v23 = vadd.f32 %v16296_v41, %v5450_v54  ;;  %v17392_v54 = vld [vmem:[#allocation18_spill] sm:$0xff] }
 0x75c   :  { %v5713_v22 = vmul.f32 %v16317_v21, %v5685_v12  ;;  %v5595_v46 = vadd.f32 %v5594_v20, %v5546_v48  ;;  %v5548_v30 = vadd.f32 %v5547_v33, %v5499_v23  ;;  %v17388_v12 = vld [vmem:[#allocation55_spill] sm:$0xff] }
 0x75e   :  { %v5731_v29 = vadd.f32 %v16322_v28, %v5713_v22  ;;  %v17389_v22 = vld [vmem:[#allocation48_spill] sm:$0xff]  ;;  %v5597_v36 = vadd.f32 %v5596_v50, %v5548_v30 }
 0x75f   :  { %v5638_v25 = vpop.f32.mrf.mxu3  ;;  %v5357_v41 = vadd.f32 %v17389_v22, %v17388_v12  ;;  %v13337_v12 = vld [vmem:[%s13839_s14 + $0x50] sm:$0xff]  ;;  %v13334_v22 = vld [vmem:[%s13839_s14 + $0x38] sm:$0xff] }
 0x760   :  { %v5747_v8 = vadd.f32 %v5731_v29, %v3085_v37  ;;  %v5639_v0 = vadd.f32 %v5638_v25, %v5590_v31  ;;  %v5689_v6 = vpop.f32.mrf.mxu0 }
 0x761   :  { %v5406_v29 = vadd.f32 %v17390_v11, %v5357_v41  ;;  %v13336_v41 = vld [vmem:[%s13839_s14 + $0x48] sm:$0xff]  ;;  %v13351_v11 = vld [vmem:[%s13844_s19 + $0x30] sm:$0xff] }
 0x762   :  { %v5763_v52 = vmax.f32 %v5747_v8, 0.0  ;;  %v5688_v10 = vadd.f32 %v5687_v15, %v5639_v0  ;;  %v5550_v37 = vpop.f32.mrf.mxu1 }
 0x763   :  { %v5551_v0 = vadd.f32 %v5550_v37, %v16311_v16  ;;  %v13352_v37 = vld [vmem:[%s13844_s19 + $0x38] sm:$0xff] }
 0x764   :  { %v16387_v5 = vpack.c.bf16 %v5763_v52, %v5762_v63  ;;  %v5714_v45 = vmul.f32 %v16317_v21, %v5688_v10  ;;  %v5599_v63 = vpop.f32.mrf.mxu2  ;;  %v17391_v10 = vld [vmem:[#allocation19_spill] sm:$0xff] }
 0x765   :  { %v3089_v13 = vunpack.c.l.bf16 %v17391_v10  ;;  %v13354_v10 = vld [vmem:[%s13844_s19 + $0x48] sm:$0xff] }
 0x766   :  { %v5732_v58 = vadd.f32 %v16322_v28, %v5714_v45  ;;  %v5600_v45 = vadd.f32 %v5599_v63, %v5551_v0  ;;  %v13343_v0 = vld [vmem:[%s13839_s14 + $0x80] sm:$0xff]  ;;  %v13355_v63 = vld [vmem:[%s13844_s19 + $0x50] sm:$0xff] }
 0x767   :  { %v5640_v47 = vpop.f32.mrf.mxu3 }
 0x768   :  { %v5748_v26 = vadd.f32 %v5732_v58, %v3086_v4  ;;  %v5641_v35 = vadd.f32 %v5640_v47, %v5592_v14  ;;  %v5692_v9 = vpop.f32.mrf.mxu0 }
 0x76a   :  { %v5690_v55 = vadd.f32 %v5689_v6, %v5641_v35  ;;  %v5764_v27 = vmax.f32 %v5748_v26, 0.0  ;;  %v5455_v6 = vadd.f32 %v16313_v56, %v5406_v29  ;;  %v5552_v20 = vpop.f32.mrf.mxu1  ;;  %v13339_v29 = vld [vmem:[%s13839_s14 + $0x60] sm:$0xff] }
 0x76c   :  { %v5715_v57 = vmul.f32 %v16317_v21, %v5690_v55  ;;  %v5504_v62 = vadd.f32 %v16309_v3, %v5455_v6  ;;  %v5601_v48 = vpop.f32.mrf.mxu2  ;;  %v3090_v55 = vunpack.c.l.bf16 %v17392_v54  ;;  %v13357_v6 = vld [vmem:[%s13844_s19 + $0x60] sm:$0xff]  ;;  %v13364_v54 = vld [vmem:[%s13844_s19 + $0x98] sm:$0xff] }
 0x76e   :  { %v5733_v53 = vadd.f32 %v16322_v28, %v5715_v57  ;;  %v5553_v47 = vadd.f32 %v5552_v20, %v5504_v62  ;;  %v13353_v62 = vld [vmem:[%s13844_s19 + $0x40] sm:$0xff] }
 0x76f   :  { %v5643_v34 = vpop.f32.mrf.mxu3  ;;  %v13349_v20 = vld [vmem:[%s13844_s19 + $0x20] sm:$0xff] }
 0x770   :  { %v5749_v59 = vadd.f32 %v5733_v53, %v3087_v24  ;;  %v5644_v7 = vadd.f32 %v5643_v34, %v5595_v46  ;;  %v5694_v51 = vpop.f32.mrf.mxu0  ;;  %v17393_v53 = vld [vmem:[#allocation20_spill] sm:$0xff] }
 0x771   :  { %v3091_v34 = vunpack.c.l.bf16 %v17393_v53  ;;  %v13385_v53 = vld [vmem:[%s13844_s19 + $0x140] sm:$0xff] }
 0x772   :  { %v5765_v17 = vmax.f32 %v5749_v59, 0.0  ;;  %v5693_v61 = vadd.f32 %v5692_v9, %v5644_v7  ;;  %v5602_v9 = vadd.f32 %v5601_v48, %v5553_v47  ;;  %v13366_v47 = vld [vmem:[%s13844_s19 + $0xa8] sm:$0xff]  ;;  %v13347_v48 = vld [vmem:[%s13844_s19 + $0x10] sm:$0xff] }
 0x774   :  { %v16401_v60 = vpack.c.bf16 %v5765_v17, %v5764_v27  ;;  %v5716_v15 = vmul.f32 %v16317_v21, %v5693_v61  ;;  %v13331_v17 = vld [vmem:[%s13839_s14 + $0x20] sm:$0xff]  ;;  %v13328_v61 = vld [vmem:[%s13839_s14 + $0x8] sm:$0xff] }
 0x776   :  { %v5734_v42 = vadd.f32 %v16322_v28, %v5716_v15  ;;  %v13330_v15 = vld [vmem:[%s13839_s14 + $0x18] sm:$0xff] }
 0x777   :  { %v5645_v31 = vpop.f32.mrf.mxu3 }
 0x778   :  { %v5750_v25 = vadd.f32 %v5734_v42, %v3088_v2  ;;  %v5646_v8 = vadd.f32 %v5645_v31, %v5597_v36  ;;  %v5697_v49 = vpop.f32.mrf.mxu0  ;;  %v13335_v2 = vld [vmem:[%s13839_s14 + $0x40] sm:$0xff]  ;;  %v13338_v36 = vld [vmem:[%s13839_s14 + $0x58] sm:$0xff]  ;;  %v13359_v31 = vld [vmem:[%s13844_s19 + $0x70] sm:$0xff] }
 0x779   :  { %v13360_v42 = vld [vmem:[%s13844_s19 + $0x78] sm:$0xff] }
 0x77a   :  { %v5695_v32 = vadd.f32 %v5694_v51, %v5646_v8  ;;  %v5766_v16 = vmax.f32 %v5750_v25, 0.0  ;;  %v13332_v51 = vld [vmem:[%s13839_s14 + $0x28] sm:$0xff]  ;;  %v13341_v8 = vld [vmem:[%s13839_s14 + $0x70] sm:$0xff] }
 0x77b   :  { %v13358_v25 = vld [vmem:[%s13844_s19 + $0x68] sm:$0xff] }
 0x77c   :  { %v5717_v52 = vmul.f32 %v16317_v21, %v5695_v32  ;;  %v13356_v32 = vld [vmem:[%s13844_s19 + $0x58] sm:$0xff] }
 0x77e   :  { %v5735_v4 = vadd.f32 %v16322_v28, %v5717_v52  ;;  %v13340_v52 = vld [vmem:[%s13839_s14 + $0x68] sm:$0xff] }
 0x77f   :  { %v5648_v38 = vpop.f32.mrf.mxu3 }
 0x780   :  { %v5751_v14 = vadd.f32 %v5735_v4, %v3089_v13  ;;  %v5649_v58 = vadd.f32 %v5648_v38, %v5600_v45  ;;  %v5699_v24 = vpop.f32.mrf.mxu0  ;;  %v13342_v13 = vld [vmem:[%s13839_s14 + $0x78] sm:$0xff]  ;;  %v13344_v45 = vld [vmem:[%s13839_s14 + $0x88] sm:$0xff] }
 0x781   :  { %v13392_v4 = vld [vmem:[%s13844_s19 + $0x178] sm:$0xff]  ;;  %v13350_v38 = vld [vmem:[%s13844_s19 + $0x28] sm:$0xff] }
 0x782   :  { %v5767_v18 = vmax.f32 %v5751_v14, 0.0  ;;  %v5698_v56 = vadd.f32 %v5697_v49, %v5649_v58  ;;  %v13368_v49 = vld [vmem:[%s13844_s19 + $0xb8] sm:$0xff]  ;;  %v13391_v14 = vld [vmem:[%s13844_s19 + $0x170] sm:$0xff] }
 0x783   :  { %v13367_v58 = vld [vmem:[%s13844_s19 + $0xb0] sm:$0xff] }
 0x784   :  { %v16415_v26 = vpack.c.bf16 %v5767_v18, %v5766_v16  ;;  %v5718_v35 = vmul.f32 %v16317_v21, %v5698_v56  ;;  %v13390_v16 = vld [vmem:[%s13844_s19 + $0x168] sm:$0xff]  ;;  %v13348_v18 = vld [vmem:[%s13844_s19 + $0x18] sm:$0xff]  ;;  %v13365_v56 = vld [vmem:[%s13844_s19 + $0xa0] sm:$0xff] }
 0x786   :  { %v5736_v3 = vadd.f32 %v16322_v28, %v5718_v35  ;;  %v13389_v35 = vld [vmem:[%s13844_s19 + $0x160] sm:$0xff] }
 0x787   :  { %v5650_v57 = vpop.f32.mrf.mxu3 }
 0x788   :  { %v5752_v33 = vadd.f32 %v5736_v3, %v3090_v55  ;;  %v5651_v44 = vadd.f32 %v5650_v57, %v5602_v9  ;;  %v13388_v55 = vld [vmem:[%s13844_s19 + $0x158] sm:$0xff]  ;;  %v13346_v9 = vld [vmem:[%s13844_s19 + $0x8] sm:$0xff]  ;;  %v13363_v3 = vld [vmem:[%s13844_s19 + $0x90] sm:$0xff] }
 0x789   :  { %v13387_v57 = vld [vmem:[%s13844_s19 + $0x150] sm:$0xff] }
 0x78a   :  { %v5700_v46 = vadd.f32 %v5699_v24, %v5651_v44  ;;  %v5768_v50 = vmax.f32 %v5752_v33, 0.0  ;;  %v13345_v33 = vld [vmem:[%s13844_s19] sm:$0xff]  ;;  %v13362_v44 = vld [vmem:[%s13844_s19 + $0x88] sm:$0xff] }
 0x78b   :  { %v13386_v24 = vld [vmem:[%s13844_s19 + $0x148] sm:$0xff] }
 0x78c   :  { %v5719_v23 = vmul.f32 %v16317_v21, %v5700_v46  ;;  %v13327_v21 = vld [vmem:[%s13839_s14] sm:$0xff]  ;;  %v13376_v46 = vld [vmem:[%s13844_s19 + $0xf8] sm:$0xff] }
 0x78d   :  { %6870 = vmatpush.bf16.msra.mxu0 %v13376_v46 }
 0x78e   :  { %v5737_v59 = vadd.f32 %v16322_v28, %v5719_v23  ;;  %v13329_v28 = vld [vmem:[%s13839_s14 + $0x10] sm:$0xff]  ;;  %v13361_v23 = vld [vmem:[%s13844_s19 + $0x80] sm:$0xff]  ;;  %s17404_s14 = sld [smem:[#allocation16_spill]] }
 0x790   :  { %v5753_v7 = vadd.f32 %v5737_v59, %v3091_v34  ;;  %v13375_v34 = vld [vmem:[%s13844_s19 + $0xf0] sm:$0xff]  ;;  %v13384_v59 = vld [vmem:[%s13844_s19 + $0x138] sm:$0xff] }
 0x791   :  { %6871 = vmatpush.bf16.msra.mxu0 %v13375_v34  ;;  %v13414_v34 = vld [vmem:[%s13844_s19 + $0x228] sm:$0xff] }
 0x792   :  { %v5769_v30 = vmax.f32 %v5753_v7, 0.0  ;;  %v13374_v7 = vld [vmem:[%s13844_s19 + $0xe8] sm:$0xff] }
 0x794   :  { %v16423_v27 = vpack.c.bf16 %v5769_v30, %v5768_v50  ;;  %v13383_v50 = vld [vmem:[%s13844_s19 + $0x130] sm:$0xff]  ;;  %v13373_v30 = vld [vmem:[%s13844_s19 + $0xe0] sm:$0xff] }
 0x795   :  { %6872 = vmatpush.bf16.msra.mxu0 %v13374_v7 }
 0x796   :  { %5794 = vmatpush.bf16.msrb.mxu1 %v16423_v27  ;;  %5833 = vmatpush.bf16.msrb.mxu2 %v16423_v27 }
 0x797   :  { %5872 = vmatpush.bf16.msrb.mxu3 %v16423_v27 }
 0x799   :  { %6873 = vmatpush.bf16.msra.mxu0 %v13373_v30 }
 0x79a   :  { %5795 = vmatpush.bf16.msrb.mxu1 %v16415_v26  ;;  %5834 = vmatpush.bf16.msrb.mxu2 %v16415_v26 }
 0x79b   :  { %5873 = vmatpush.bf16.msrb.mxu3 %v16415_v26 }
 0x79e   :  { %5796 = vmatpush.bf16.msrb.mxu1 %v16401_v60  ;;  %5835 = vmatpush.bf16.msrb.mxu2 %v16401_v60 }
 0x79f   :  { %5874 = vmatpush.bf16.msrb.mxu3 %v16401_v60 }
 0x7a2   :  { %5797 = vmatpush.bf16.msrb.mxu1 %v16387_v5  ;;  %5836 = vmatpush.bf16.msrb.mxu2 %v16387_v5 }
 0x7a3   :  { %5875 = vmatpush.bf16.msrb.mxu3 %v16387_v5 }
 0x7a6   :  { %5798 = vmatpush.bf16.msrb.mxu1 %v16373_v43  ;;  %5837 = vmatpush.bf16.msrb.mxu2 %v16373_v43 }
 0x7a7   :  { %5876 = vmatpush.bf16.msrb.mxu3 %v16373_v43 }
 0x7aa   :  { %5799 = vmatpush.bf16.msrb.mxu1 %v16358_v19  ;;  %5838 = vmatpush.bf16.msrb.mxu2 %v16358_v19 }
 0x7ab   :  { %5877 = vmatpush.bf16.msrb.mxu3 %v16358_v19 }
 0x7ae   :  { %5800 = vmatpush.bf16.msrb.mxu1 %v16346_v1  ;;  %5839 = vmatpush.bf16.msrb.mxu2 %v16346_v1 }
 0x7af   :  { %5878 = vmatpush.bf16.msrb.mxu3 %v16346_v1 }
 0x7b2   :  { %5801 = vmatpush.bf16.msrb.mxu1 %v16334_v40  ;;  %5840 = vmatpush.bf16.msrb.mxu2 %v16334_v40 }
 0x7b3   :  { %5879 = vmatpush.bf16.msrb.mxu3 %v16334_v40 }
 0x7b5   :  { %5802 = vmatmul.bf16.vlgmr.msrb.gmra.mxu1 %v13327_v21  ;;  %5841 = vmatmul.bf16.vlgmr.msrb.gmra.mxu2 %v13329_v28  ;;  %v13382_v21 = vld [vmem:[%s13844_s19 + $0x128] sm:$0xff] }
 0x7b6   :  { %5911 = vmatpush.bf16.msra.mxu1 %v16423_v27  ;;  %5950 = vmatpush.bf16.msra.mxu2 %v16423_v27 }
 0x7b7   :  { %5989 = vmatpush.bf16.msra.mxu3 %v16423_v27 }
 0x7b8   :  { %5880 = vmatmul.bf16.vlgmr.msrb.gmra.mxu3 %v13331_v17  ;;  %v13372_v17 = vld [vmem:[%s13844_s19 + $0xd8] sm:$0xff] }
 0x7b9   :  { %6874 = vmatpush.bf16.msra.mxu0 %v13372_v17 }
 0x7ba   :  { %5912 = vmatpush.bf16.msra.mxu1 %v16415_v26  ;;  %5951 = vmatpush.bf16.msra.mxu2 %v16415_v26 }
 0x7bb   :  { %5990 = vmatpush.bf16.msra.mxu3 %v16415_v26 }
 0x7be   :  { %5913 = vmatpush.bf16.msra.mxu1 %v16401_v60  ;;  %5952 = vmatpush.bf16.msra.mxu2 %v16401_v60 }
 0x7bf   :  { %5991 = vmatpush.bf16.msra.mxu3 %v16401_v60 }
 0x7c2   :  { %5914 = vmatpush.bf16.msra.mxu1 %v16387_v5  ;;  %5953 = vmatpush.bf16.msra.mxu2 %v16387_v5 }
 0x7c3   :  { %5992 = vmatpush.bf16.msra.mxu3 %v16387_v5 }
 0x7c5   :  { %5807 = vmatmul.bf16.gmra.mxu1 %v13328_v61  ;;  %5846 = vmatmul.bf16.gmra.mxu2 %v13330_v15  ;;  %v13381_v61 = vld [vmem:[%s13844_s19 + $0x120] sm:$0xff]  ;;  %v13371_v15 = vld [vmem:[%s13844_s19 + $0xd0] sm:$0xff] }
 0x7c6   :  { %5915 = vmatpush.bf16.msra.mxu1 %v16373_v43  ;;  %5954 = vmatpush.bf16.msra.mxu2 %v16373_v43 }
 0x7c7   :  { %5993 = vmatpush.bf16.msra.mxu3 %v16373_v43  ;;  %6875 = vmatpush.bf16.msra.mxu0 %v13371_v15  ;;  %v13413_v15 = vld [vmem:[%s13844_s19 + $0x220] sm:$0xff] }
 0x7c8   :  { %5885 = vmatmul.bf16.gmra.mxu3 %v13332_v51 }
 0x7ca   :  { %5916 = vmatpush.bf16.msra.mxu1 %v16358_v19  ;;  %5955 = vmatpush.bf16.msra.mxu2 %v16358_v19 }
 0x7cb   :  { %5994 = vmatpush.bf16.msra.mxu3 %v16358_v19 }
 0x7ce   :  { %5917 = vmatpush.bf16.msra.mxu1 %v16346_v1  ;;  %5956 = vmatpush.bf16.msra.mxu2 %v16346_v1 }
 0x7cf   :  { %5995 = vmatpush.bf16.msra.mxu3 %v16346_v1 }
 0x7d2   :  { %5918 = vmatpush.bf16.msra.mxu1 %v16334_v40  ;;  %5957 = vmatpush.bf16.msra.mxu2 %v16334_v40 }
 0x7d3   :  { %5996 = vmatpush.bf16.msra.mxu3 %v16334_v40 }
 0x7d5   :  { %5919 = vmatmul.bf16.vlgmr.msra.gmra.mxu1 %v13333_v39  ;;  %5958 = vmatmul.bf16.vlgmr.msra.gmra.mxu2 %v13335_v2  ;;  %v13380_v39 = vld [vmem:[%s13844_s19 + $0x118] sm:$0xff] }
 0x7d6   :  { %6028 = vmatpush.bf16.msrb.mxu1 %v16423_v27  ;;  %6067 = vmatpush.bf16.msrb.mxu2 %v16423_v27 }
 0x7d7   :  { %6106 = vmatpush.bf16.msrb.mxu3 %v16423_v27 }
 0x7d8   :  { %5997 = vmatmul.bf16.vlgmr.msra.gmra.mxu3 %v13337_v12 }
 0x7da   :  { %6029 = vmatpush.bf16.msrb.mxu1 %v16415_v26  ;;  %6068 = vmatpush.bf16.msrb.mxu2 %v16415_v26 }
 0x7db   :  { %6107 = vmatpush.bf16.msrb.mxu3 %v16415_v26 }
 0x7de   :  { %6030 = vmatpush.bf16.msrb.mxu1 %v16401_v60  ;;  %6069 = vmatpush.bf16.msrb.mxu2 %v16401_v60 }
 0x7df   :  { %6108 = vmatpush.bf16.msrb.mxu3 %v16401_v60 }
 0x7e2   :  { %6031 = vmatpush.bf16.msrb.mxu1 %v16387_v5  ;;  %6070 = vmatpush.bf16.msrb.mxu2 %v16387_v5 }
 0x7e3   :  { %6109 = vmatpush.bf16.msrb.mxu3 %v16387_v5 }
 0x7e5   :  { %5924 = vmatmul.bf16.gmra.mxu1 %v13334_v22  ;;  %5963 = vmatmul.bf16.gmra.mxu2 %v13336_v41  ;;  %v13370_v41 = vld [vmem:[%s13844_s19 + $0xc8] sm:$0xff] }
 0x7e6   :  { %6032 = vmatpush.bf16.msrb.mxu1 %v16373_v43  ;;  %6071 = vmatpush.bf16.msrb.mxu2 %v16373_v43 }
 0x7e7   :  { %6110 = vmatpush.bf16.msrb.mxu3 %v16373_v43  ;;  %6876 = vmatpush.bf16.msra.mxu0 %v13370_v41 }
 0x7e8   :  { %6002 = vmatmul.bf16.gmra.mxu3 %v13338_v36 }
 0x7ea   :  { %6033 = vmatpush.bf16.msrb.mxu1 %v16358_v19  ;;  %6072 = vmatpush.bf16.msrb.mxu2 %v16358_v19 }
 0x7eb   :  { %6111 = vmatpush.bf16.msrb.mxu3 %v16358_v19 }
 0x7ee   :  { %6034 = vmatpush.bf16.msrb.mxu1 %v16346_v1  ;;  %6073 = vmatpush.bf16.msrb.mxu2 %v16346_v1 }
 0x7ef   :  { %6112 = vmatpush.bf16.msrb.mxu3 %v16346_v1 }
 0x7f2   :  { %6035 = vmatpush.bf16.msrb.mxu1 %v16334_v40  ;;  %6074 = vmatpush.bf16.msrb.mxu2 %v16334_v40 }
 0x7f3   :  { %6113 = vmatpush.bf16.msrb.mxu3 %v16334_v40 }
 0x7f5   :  { %6036 = vmatmul.bf16.vlgmr.msrb.gmra.mxu1 %v13339_v29  ;;  %6075 = vmatmul.bf16.vlgmr.msrb.gmra.mxu2 %v13341_v8 }
 0x7f6   :  { %6832 = vmatpush.bf16.msra.mxu2 %v13360_v42  ;;  %6813 = vmatpush.bf16.msra.mxu1 %v13352_v37  ;;  %v13379_v42 = vld [vmem:[%s13844_s19 + $0x110] sm:$0xff] }
 0x7f7   :  { %6851 = vmatpush.bf16.msra.mxu3 %v13368_v49 }
 0x7f8   :  { %6114 = vmatmul.bf16.vlgmr.msrb.gmra.mxu3 %v13343_v0 }
 0x7fa   :  { %6833 = vmatpush.bf16.msra.mxu2 %v13359_v31  ;;  %6814 = vmatpush.bf16.msra.mxu1 %v13351_v11  ;;  %v13369_v11 = vld [vmem:[%s13844_s19 + $0xc0] sm:$0xff] }
 0x7fb   :  { %6852 = vmatpush.bf16.msra.mxu3 %v13367_v58  ;;  %6877 = vmatpush.bf16.msra.mxu0 %v13369_v11  ;;  %v13403_v11 = vld [vmem:[%s13844_s19 + $0x1d0] sm:$0xff] }
 0x7fe   :  { %6834 = vmatpush.bf16.msra.mxu2 %v13358_v25  ;;  %6815 = vmatpush.bf16.msra.mxu1 %v13350_v38  ;;  %v13377_v38 = vld [vmem:[%s13844_s19 + $0x100] sm:$0xff] }
 0x7ff   :  { %6853 = vmatpush.bf16.msra.mxu3 %v13366_v47 }
 0x802   :  { %6835 = vmatpush.bf16.msra.mxu2 %v13357_v6  ;;  %6816 = vmatpush.bf16.msra.mxu1 %v13349_v20  ;;  %v13378_v6 = vld [vmem:[%s13844_s19 + $0x108] sm:$0xff]  ;;  %v13399_v20 = vld [vmem:[%s13844_s19 + $0x1b0] sm:$0xff] }
 0x803   :  { %6854 = vmatpush.bf16.msra.mxu3 %v13365_v56 }
 0x805   :  { %6041 = vmatmul.bf16.gmra.mxu1 %v13340_v52  ;;  %6080 = vmatmul.bf16.gmra.mxu2 %v13342_v13  ;;  %v13400_v13 = vld [vmem:[%s13844_s19 + $0x1b8] sm:$0xff] }
 0x806   :  { %6836 = vmatpush.bf16.msra.mxu2 %v13356_v32  ;;  %6817 = vmatpush.bf16.msra.mxu1 %v13348_v18  ;;  %v13416_v18 = vld [vmem:[%s13844_s19 + $0x238] sm:$0xff] }
 0x807   :  { %6855 = vmatpush.bf16.msra.mxu3 %v13364_v54  ;;  %v13398_v54 = vld [vmem:[%s13844_s19 + $0x1a8] sm:$0xff] }
 0x808   :  { %6119 = vmatmul.bf16.gmra.mxu3 %v13344_v45 }
 0x80a   :  { %6837 = vmatpush.bf16.msra.mxu2 %v13355_v63  ;;  %6818 = vmatpush.bf16.msra.mxu1 %v13347_v48 }
 0x80b   :  { %6856 = vmatpush.bf16.msra.mxu3 %v13363_v3  ;;  %v13415_v3 = vld [vmem:[%s13844_s19 + $0x230] sm:$0xff] }
 0x80e   :  { %6838 = vmatpush.bf16.msra.mxu2 %v13354_v10  ;;  %6819 = vmatpush.bf16.msra.mxu1 %v13346_v9  ;;  %v13407_v9 = vld [vmem:[%s13844_s19 + $0x1f0] sm:$0xff] }
 0x80f   :  { %6857 = vmatpush.bf16.msra.mxu3 %v13362_v44 }
 0x812   :  { %6839 = vmatpush.bf16.msra.mxu2 %v13353_v62  ;;  %6820 = vmatpush.bf16.msra.mxu1 %v13345_v33  ;;  %v13397_v33 = vld [vmem:[%s13844_s19 + $0x1a0] sm:$0xff] }
 0x813   :  { %6858 = vmatpush.bf16.msra.mxu3 %v13361_v23 }
 0x816   :  { %6908 = vmatpush.bf16.msrb.mxu2 %v13392_v4  ;;  %6889 = vmatpush.bf16.msrb.mxu1 %v13384_v59 }
 0x817   :  { %6927 = vmatpush.bf16.msrb.mxu3 %v13400_v13 }
 0x81a   :  { %6909 = vmatpush.bf16.msrb.mxu2 %v13391_v14  ;;  %6890 = vmatpush.bf16.msrb.mxu1 %v13383_v50  ;;  %v13396_v50 = vld [vmem:[%s13844_s19 + $0x198] sm:$0xff] }
 0x81b   :  { %6928 = vmatpush.bf16.msrb.mxu3 %v13399_v20 }
 0x81e   :  { %6910 = vmatpush.bf16.msrb.mxu2 %v13390_v16  ;;  %6891 = vmatpush.bf16.msrb.mxu1 %v13382_v21  ;;  %v13408_v16 = vld [vmem:[%s13844_s19 + $0x1f8] sm:$0xff] }
 0x81f   :  { %6946 = vmatpush.bf16.msrb.mxu0 %v13408_v16  ;;  %6929 = vmatpush.bf16.msrb.mxu3 %v13398_v54 }
 0x822   :  { %6911 = vmatpush.bf16.msrb.mxu2 %v13389_v35  ;;  %6892 = vmatpush.bf16.msrb.mxu1 %v13381_v61  ;;  %v13405_v61 = vld [vmem:[%s13844_s19 + $0x1e0] sm:$0xff] }
 0x823   :  { %6947 = vmatpush.bf16.msrb.mxu0 %v13407_v9  ;;  %6930 = vmatpush.bf16.msrb.mxu3 %v13397_v33 }
 0x826   :  { %6912 = vmatpush.bf16.msrb.mxu2 %v13388_v55  ;;  %6893 = vmatpush.bf16.msrb.mxu1 %v13380_v39 }
 0x827   :  { %6931 = vmatpush.bf16.msrb.mxu3 %v13396_v50 }
 0x82a   :  { %6913 = vmatpush.bf16.msrb.mxu2 %v13387_v57  ;;  %6894 = vmatpush.bf16.msrb.mxu1 %v13379_v42  ;;  %v13394_v42 = vld [vmem:[%s13844_s19 + $0x188] sm:$0xff] }
 0x82e   :  { %6914 = vmatpush.bf16.msrb.mxu2 %v13386_v24  ;;  %6895 = vmatpush.bf16.msrb.mxu1 %v13378_v6  ;;  %v13402_v6 = vld [vmem:[%s13844_s19 + $0x1c8] sm:$0xff] }
 0x832   :  { %6915 = vmatpush.bf16.msrb.mxu2 %v13385_v53  ;;  %v5803_v28 = vpop.f32.mrf.mxu1  ;;  %6896 = vmatpush.bf16.msrb.mxu1 %v13377_v38  ;;  %v13406_v53 = vld [vmem:[%s13844_s19 + $0x1e8] sm:$0xff] }
 0x833   :  { %v5813_v2 = vpack.c.bf16 %v5803_v28, %v5803_v28  ;;  %6948 = vmatpush.bf16.msrb.mxu0 %v13406_v53 }
 0x835   :  { %v6133_v37 = vunpack.c.l.b16 %v5813_v2  ;;  %v13395_v2 = vld [vmem:[%s13844_s19 + $0x190] sm:$0xff] }
 0x836   :  { %6932 = vmatpush.bf16.msrb.mxu3 %v13395_v2 }
 0x837   :  { %6949 = vmatpush.bf16.msrb.mxu0 %v13405_v61 }
 0x838   :  { %v5842_v51 = vpop.f32.mrf.mxu2 }
 0x839   :  { %v5852_v29 = vpack.c.bf16 %v5842_v51, %v5842_v51 }
 0x83a   :  { %v5805_v22 = vpop.f32.mrf.mxu1  ;;  %6933 = vmatpush.bf16.msrb.mxu3 %v13394_v42 }
 0x83b   :  { %v5881_v12 = vpop.f32.mrf.mxu3  ;;  %v5814_v36 = vpack.c.bf16 %v5805_v22, %v5805_v22  ;;  %v6145_v45 = vunpack.c.l.b16 %v5852_v29  ;;  %v13412_v22 = vld [vmem:[%s13844_s19 + $0x218] sm:$0xff]  ;;  %v13411_v29 = vld [vmem:[%s13844_s19 + $0x210] sm:$0xff] }
 0x83c   :  { %v5891_v8 = vpack.c.bf16 %v5881_v12, %v5881_v12  ;;  %v13404_v12 = vld [vmem:[%s13844_s19 + $0x1d8] sm:$0xff] }
 0x83d   :  { %v6134_v31 = vunpack.c.l.b16 %v5814_v36  ;;  %6950 = vmatpush.bf16.msrb.mxu0 %v13404_v12 }
 0x83e   :  { %v6157_v4 = vunpack.c.l.b16 %v5891_v8  ;;  %v13393_v8 = vld [vmem:[%s13844_s19 + $0x180] sm:$0xff] }
 0x83f   :  { %v6137_v25 = vpack.c.b16 %v6134_v31, %v6133_v37  ;;  %6934 = vmatpush.bf16.msrb.mxu3 %v13393_v8 }
 0x840   :  { %v5844_v0 = vpop.f32.mrf.mxu2 }
 0x841   :  { %v5853_v32 = vpack.c.bf16 %v5844_v0, %v5844_v0  ;;  %6821 = vmatmul.bf16.vlgmr.msra.gmra.mxu1 %v6137_v25  ;;  %6951 = vmatpush.bf16.msrb.mxu0 %v13403_v11 }
 0x842   :  { %v5808_v52 = vpop.f32.mrf.mxu1  ;;  %6965 = vmatpush.bf16.msra.mxu1 %v13416_v18 }
 0x843   :  { %v5883_v63 = vpop.f32.mrf.mxu3  ;;  %v6146_v62 = vunpack.c.l.b16 %v5853_v32  ;;  %v5815_v56 = vpack.c.bf16 %v5808_v52, %v5808_v52  ;;  %v13410_v32 = vld [vmem:[%s13844_s19 + $0x208] sm:$0xff] }
 0x844   :  { %v5892_v10 = vpack.c.bf16 %v5883_v63, %v5883_v63 }
 0x845   :  { %v6149_v14 = vpack.c.b16 %v6146_v62, %v6145_v45  ;;  %6952 = vmatpush.bf16.msrb.mxu0 %v13402_v6 }
 0x846   :  { %v6158_v49 = vunpack.c.l.b16 %v5892_v10  ;;  %6966 = vmatpush.bf16.msra.mxu1 %v13415_v3 }
 0x847   :  { %6840 = vmatmul.bf16.vlgmr.msra.gmra.mxu2 %v6149_v14 }
 0x848   :  { %v6161_v58 = vpack.c.b16 %v6158_v49, %v6157_v4  ;;  %7018 = vmatpush.bf16.msra.mxu2 %v16423_v27  ;;  %v5847_v47 = vpop.f32.mrf.mxu2  ;;  %v6135_v27 = vunpack.c.l.b16 %v5815_v56  ;;  %v13401_v4 = vld [vmem:[%s13844_s19 + $0x1c0] sm:$0xff] }
 0x849   :  { %v5854_v44 = vpack.c.bf16 %v5847_v47, %v5847_v47  ;;  %v13409_v49 = vld [vmem:[%s13844_s19 + $0x200] sm:$0xff]  ;;  %6953 = vmatpush.bf16.msrb.mxu0 %v13401_v4  ;;  %s17405_s19 = sld [smem:[#allocation14_spill]] }
 0x84a   :  { %6859 = vmatmul.bf16.vlgmr.msra.gmra.mxu3 %v6161_v58  ;;  %v5810_v48 = vpop.f32.mrf.mxu1  ;;  %6967 = vmatpush.bf16.msra.mxu1 %v13414_v34 }
 0x84b   :  { %v5886_v35 = vpop.f32.mrf.mxu3  ;;  %v5816_v55 = vpack.c.bf16 %v5810_v48, %v5810_v48  ;;  %v6147_v30 = vunpack.c.l.b16 %v5854_v44 }
 0x84c   :  { %7019 = vmatpush.bf16.msra.mxu2 %v16415_v26  ;;  %v5893_v46 = vpack.c.bf16 %v5886_v35, %v5886_v35 }
 0x84d   :  { %v6136_v57 = vunpack.c.l.b16 %v5816_v55 }
 0x84e   :  { %6968 = vmatpush.bf16.msra.mxu1 %v13413_v15 }
 0x84f   :  { %v6138_v24 = vpack.c.b16 %v6136_v57, %v6135_v27 }
 0x850   :  { %7020 = vmatpush.bf16.msra.mxu2 %v16401_v60  ;;  %v5849_v23 = vpop.f32.mrf.mxu2  ;;  %v6159_v60 = vunpack.c.l.b16 %v5893_v46 }
 0x851   :  { %v5855_v26 = vpack.c.bf16 %v5849_v23, %v5849_v23  ;;  %6826 = vmatmul.bf16.gmra.mxu1 %v6138_v24 }
 0x852   :  { %v5920_v28 = vpop.f32.mrf.mxu1  ;;  %6969 = vmatpush.bf16.msra.mxu1 %v13412_v22 }
 0x853   :  { %v5888_v59 = vpop.f32.mrf.mxu3  ;;  %v6148_v21 = vunpack.c.l.b16 %v5855_v26 }
 0x854   :  { %v5894_v7 = vpack.c.bf16 %v5888_v59, %v5888_v59  ;;  %7021 = vmatpush.bf16.msra.mxu2 %v16387_v5  ;;  %v5930_v5 = vpack.c.bf16 %v5920_v28, %v5920_v28 }
 0x855   :  { %v6150_v51 = vpack.c.b16 %v6148_v21, %v6147_v30 }
 0x856   :  { %v6160_v17 = vunpack.c.l.b16 %v5894_v7  ;;  %6970 = vmatpush.bf16.msra.mxu1 %v13411_v29 }
 0x857   :  { %6845 = vmatmul.bf16.gmra.mxu2 %v6150_v51 }
 0x858   :  { %v6162_v39 = vpack.c.b16 %v6160_v17, %v6159_v60  ;;  %7022 = vmatpush.bf16.msra.mxu2 %v16373_v43  ;;  %v5959_v41 = vpop.f32.mrf.mxu2  ;;  %v6169_v43 = vunpack.c.l.b16 %v5930_v5 }
 0x859   :  { %v5969_v63 = vpack.c.bf16 %v5959_v41, %v5959_v41 }
 0x85a   :  { %6864 = vmatmul.bf16.gmra.mxu3 %v6162_v39  ;;  %v5922_v37 = vpop.f32.mrf.mxu1  ;;  %6971 = vmatpush.bf16.msra.mxu1 %v13410_v32 }
 0x85b   :  { %v5998_v36 = vpop.f32.mrf.mxu3  ;;  %v5931_v31 = vpack.c.bf16 %v5922_v37, %v5922_v37  ;;  %v6181_v38 = vunpack.c.l.b16 %v5969_v63 }
 0x85c   :  { %7023 = vmatpush.bf16.msra.mxu2 %v16358_v19  ;;  %v6008_v52 = vpack.c.bf16 %v5998_v36, %v5998_v36 }
 0x85d   :  { %v6170_v25 = vunpack.c.l.b16 %v5931_v31  ;;  %v13417_v31 = vld [vmem:[%s13854_s30] sm:$0xff] }
 0x85e   :  { %6972 = vmatpush.bf16.msra.mxu1 %v13409_v49 }
 0x85f   :  { %v6173_v0 = vpack.c.b16 %v6170_v25, %v6169_v43 }
 0x860   :  { %7024 = vmatpush.bf16.msra.mxu2 %v16346_v1  ;;  %v5961_v10 = vpop.f32.mrf.mxu2  ;;  %v6193_v1 = vunpack.c.l.b16 %v6008_v52 }
 0x861   :  { %6878 = vmatmul.bf16.vlgmr.msra.gmra.mxu0 %v6173_v0  ;;  %v5970_v45 = vpack.c.bf16 %v5961_v10, %v5961_v10 }
 0x862   :  { %v5925_v13 = vpop.f32.mrf.mxu1 }
 0x863   :  { %v6000_v19 = vpop.f32.mrf.mxu3  ;;  %v6182_v14 = vunpack.c.l.b16 %v5970_v45  ;;  %v5932_v16 = vpack.c.bf16 %v5925_v13, %v5925_v13 }
 0x864   :  { %v6009_v62 = vpack.c.bf16 %v6000_v19, %v6000_v19  ;;  %7025 = vmatpush.bf16.msra.mxu2 %v16334_v40 }
 0x865   :  { %v6185_v20 = vpack.c.b16 %v6182_v14, %v6181_v38  ;;  %v6171_v54 = vunpack.c.l.b16 %v5932_v16 }
 0x866   :  { %v6194_v58 = vunpack.c.l.b16 %v6009_v62 }
 0x867   :  { %6897 = vmatmul.bf16.vlgmr.msrb.gmra.mxu1 %v6185_v20 }
 0x868   :  { %v6197_v47 = vpack.c.b16 %v6194_v58, %v6193_v1  ;;  %v5964_v18 = vpop.f32.mrf.mxu2  ;;  %v13418_v58 = vld [vmem:[%s13854_s30 + $0x8] sm:$0xff]  ;;  %s13785_s30 = smov [#allocation2]  }
 0x869   :  { %v5971_v9 = vpack.c.bf16 %v5964_v18, %v5964_v18 }
 0x86a   :  { %6916 = vmatmul.bf16.vlgmr.msrb.gmra.mxu2 %v6197_v47  ;;  %v5927_v35 = vpop.f32.mrf.mxu1 }
 0x86b   :  { %v6003_v56 = vpop.f32.mrf.mxu3  ;;  %v5933_v48 = vpack.c.bf16 %v5927_v35, %v5927_v35  ;;  %v6183_v46 = vunpack.c.l.b16 %v5971_v9 }
 0x86c   :  { %v6010_v3 = vpack.c.bf16 %v6003_v56, %v6003_v56 }
 0x86d   :  { %v6172_v55 = vunpack.c.l.b16 %v5933_v48 }
 0x86e   :  { %v6195_v23 = vunpack.c.l.b16 %v6010_v3 }
 0x86f   :  { %v6174_v40 = vpack.c.b16 %v6172_v55, %v6171_v54 }
 0x870   :  { %v5966_v27 = vpop.f32.mrf.mxu2 }
 0x871   :  { %6883 = vmatmul.bf16.gmra.mxu0 %v6174_v40  ;;  %v5972_v33 = vpack.c.bf16 %v5966_v27, %v5966_v27  ;;  %v13426_v40 = vld [vmem:[%s13859_s6 + $0x38] sm:$0xff]  ;;  %v13425_v27 = vld [vmem:[%s13859_s6 + $0x30] sm:$0xff] }
 0x872   :  { %v6037_v44 = vpop.f32.mrf.mxu1  ;;  %7103 = vmatpush.bf16.msra.mxu3 %v13426_v40 }
 0x873   :  { %v6005_v57 = vpop.f32.mrf.mxu3  ;;  %v6184_v53 = vunpack.c.l.b16 %v5972_v33  ;;  %v6047_v7 = vpack.c.bf16 %v6037_v44, %v6037_v44  ;;  %v13424_v44 = vld [vmem:[%s13859_s6 + $0x28] sm:$0xff] }
 0x874   :  { %v6011_v24 = vpack.c.bf16 %v6005_v57, %v6005_v57 }
 0x875   :  { %v6186_v26 = vpack.c.b16 %v6184_v53, %v6183_v46  ;;  %v6205_v60 = vunpack.c.l.b16 %v6047_v7  ;;  %v13423_v46 = vld [vmem:[%s13859_s6 + $0x20] sm:$0xff]  ;;  %v13421_v7 = vld [vmem:[%s13859_s6 + $0x10] sm:$0xff] }
 0x876   :  { %v6196_v34 = vunpack.c.l.b16 %v6011_v24  ;;  %7104 = vmatpush.bf16.msra.mxu3 %v13425_v27 }
 0x877   :  { %6902 = vmatmul.bf16.gmra.mxu1 %v6186_v26 }
 0x878   :  { %v6198_v59 = vpack.c.b16 %v6196_v34, %v6195_v23  ;;  %v6076_v50 = vpop.f32.mrf.mxu2  ;;  %v13422_v34 = vld [vmem:[%s13859_s6 + $0x18] sm:$0xff] }
 0x879   :  { %v6086_v15 = vpack.c.bf16 %v6076_v50, %v6076_v50 }
 0x87a   :  { %6921 = vmatmul.bf16.gmra.mxu2 %v6198_v59  ;;  %v6039_v21 = vpop.f32.mrf.mxu1  ;;  %7105 = vmatpush.bf16.msra.mxu3 %v13424_v44 }
 0x87b   :  { %v6115_v30 = vpop.f32.mrf.mxu3  ;;  %v6048_v28 = vpack.c.bf16 %v6039_v21, %v6039_v21  ;;  %v6217_v41 = vunpack.c.l.b16 %v6086_v15 }
 0x87c   :  { %v6125_v51 = vpack.c.bf16 %v6115_v30, %v6115_v30  ;;  %v13420_v30 = vld [vmem:[%s13859_s6 + $0x8] sm:$0xff] }
 0x87d   :  { %v6206_v17 = vunpack.c.l.b16 %v6048_v28 }
 0x87e   :  { %v6229_v36 = vunpack.c.l.b16 %v6125_v51  ;;  %7106 = vmatpush.bf16.msra.mxu3 %v13423_v46 }
 0x87f   :  { %v6209_v61 = vpack.c.b16 %v6206_v17, %v6205_v60  ;;  %v13419_v17 = vld [vmem:[%s13859_s6] sm:$0xff]  ;;  %s10340_s6 = sshll.u32 %s13785_s30, 4  ;;  %s10341_s6 = int_to_ptr.vmem [resolvable:$true] %s10340_s6 }
 0x880   :  { %v6078_v39 = vpop.f32.mrf.mxu2 }
 0x881   :  { %6935 = vmatmul.bf16.vlgmr.msrb.gmra.mxu3 %v6209_v61  ;;  %v6087_v22 = vpack.c.bf16 %v6078_v39, %v6078_v39 }
 0x882   :  { %v6042_v12 = vpop.f32.mrf.mxu1  ;;  %7107 = vmatpush.bf16.msra.mxu3 %v13422_v34 }
 0x883   :  { %v6117_v2 = vpop.f32.mrf.mxu3  ;;  %v6218_v42 = vunpack.c.l.b16 %v6087_v22  ;;  %v6049_v43 = vpack.c.bf16 %v6042_v12, %v6042_v12 }
 0x884   :  { %v6126_v5 = vpack.c.bf16 %v6117_v2, %v6117_v2 }
 0x885   :  { %v6221_v11 = vpack.c.b16 %v6218_v42, %v6217_v41  ;;  %v6207_v32 = vunpack.c.l.b16 %v6049_v43 }
 0x886   :  { %v6230_v37 = vunpack.c.l.b16 %v6126_v5  ;;  %7108 = vmatpush.bf16.msra.mxu3 %v13421_v7 }
 0x887   :  { %6954 = vmatmul.bf16.vlgmr.msrb.gmra.mxu0 %v6221_v11 }
 0x888   :  { %v6233_v29 = vpack.c.b16 %v6230_v37, %v6229_v36  ;;  %v6081_v25 = vpop.f32.mrf.mxu2 }
 0x889   :  { %v6088_v10 = vpack.c.bf16 %v6081_v25, %v6081_v25 }
 0x88a   :  { %6973 = vmatmul.bf16.vlgmr.msra.gmra.mxu1 %v6233_v29  ;;  %7026 = vmatmul.bf16.vlgmr.msra.gmra.mxu2 %v13417_v31  ;;  %v6044_v0 = vpop.f32.mrf.mxu1 }
 0x88b   :  { %v6120_v8 = vpop.f32.mrf.mxu3  ;;  %v6050_v6 = vpack.c.bf16 %v6044_v0, %v6044_v0  ;;  %v6219_v49 = vunpack.c.l.b16 %v6088_v10  ;;  %7109 = vmatpush.bf16.msra.mxu3 %v13420_v30 }
 0x88c   :  { %v6127_v19 = vpack.c.bf16 %v6120_v8, %v6120_v8 }
 0x88d   :  { %v6208_v63 = vunpack.c.l.b16 %v6050_v6 }
 0x88e   :  { %v6231_v38 = vunpack.c.l.b16 %v6127_v19 }
 0x88f   :  { %v6210_v52 = vpack.c.b16 %v6208_v63, %v6207_v32  ;;  %7110 = vmatpush.bf16.msra.mxu3 %v13419_v17 }
 0x890   :  { %v6083_v13 = vpop.f32.mrf.mxu2 }
 0x891   :  { %6940 = vmatmul.bf16.gmra.mxu3 %v6210_v52  ;;  %v6089_v62 = vpack.c.bf16 %v6083_v13, %v6083_v13 }
 0x893   :  { %v6122_v45 = vpop.f32.mrf.mxu3  ;;  %v6220_v1 = vunpack.c.l.b16 %v6089_v62 }
 0x894   :  { %v6128_v4 = vpack.c.bf16 %v6122_v45, %v6122_v45 }
 0x895   :  { %v6222_v20 = vpack.c.b16 %v6220_v1, %v6219_v49 }
 0x896   :  { %v6232_v14 = vunpack.c.l.b16 %v6128_v4 }
 0x897   :  { %6959 = vmatmul.bf16.gmra.mxu0 %v6222_v20 }
 0x898   :  { %v6234_v47 = vpack.c.b16 %v6232_v14, %v6231_v38 }
 0x89a   :  { %6978 = vmatmul.bf16.gmra.mxu1 %v6234_v47  ;;  %7031 = vmatmul.bf16.gmra.mxu2 %v13418_v58 }
 0x8be   :  { %v6822_v16 = vpop.f32.mrf.mxu1 }
 0x8c6   :  { %v6824_v18 = vpop.f32.mrf.mxu1 }
 0x8ca   :  { %v6841_v56 = vpop.f32.mrf.mxu2 }
 0x8cb   :  { %v6842_v35 = vadd.f32 %v6841_v56, %v6822_v16 }
 0x8cd   :  { %v6860_v3 = vpop.f32.mrf.mxu3 }
 0x8ce   :  { %v6827_v54 = vpop.f32.mrf.mxu1  ;;  %v6861_v25 = vadd.f32 %v6860_v3, %v6842_v35  ;;  %v13716_v3 = vld [vmem:[%s13849_s24] ss:$0 sm:$0xff] }
 0x8d2   :  { %v6843_v48 = vpop.f32.mrf.mxu2 }
 0x8d3   :  { %v6844_v41 = vadd.f32 %v6843_v48, %v6824_v18 }
 0x8d5   :  { %v6862_v23 = vpop.f32.mrf.mxu3 }
 0x8d6   :  { %v6829_v9 = vpop.f32.mrf.mxu1  ;;  %v6863_v31 = vadd.f32 %v6862_v23, %v6844_v41  ;;  %v13431_v41 = vld [vmem:[%s17394_s0 + $0x20] sm:$0xff] }
 0x8da   :  { %v6846_v55 = vpop.f32.mrf.mxu2 }
 0x8db   :  { %v6847_v36 = vadd.f32 %v6846_v55, %v6827_v54 }
 0x8dd   :  { %v6865_v50 = vpop.f32.mrf.mxu3 }
 0x8de   :  { %v6879_v57 = vpop.f32.mrf.mxu0  ;;  %v6866_v11 = vadd.f32 %v6865_v50, %v6847_v36  ;;  %v13433_v36 = vld [vmem:[%s17394_s0 + $0x30] sm:$0xff] }
 0x8df   :  { %v6880_v32 = vadd.f32 %v6879_v57, %v6861_v25  ;;  %v13439_v25 = vld [vmem:[%s17394_s0 + $0x60] sm:$0xff] }
 0x8e2   :  { %v6848_v33 = vpop.f32.mrf.mxu2 }
 0x8e3   :  { %v6849_v6 = vadd.f32 %v6848_v33, %v6829_v9 }
 0x8e4   :  { %v6898_v24 = vpop.f32.mrf.mxu1 }
 0x8e5   :  { %v6867_v15 = vpop.f32.mrf.mxu3  ;;  %v6899_v10 = vadd.f32 %v6898_v24, %v6880_v32  ;;  %v13450_v32 = vld [vmem:[%s17395_s5 + $0x28] sm:$0xff] }
 0x8e6   :  { %v6881_v53 = vpop.f32.mrf.mxu0  ;;  %v6868_v45 = vadd.f32 %v6867_v15, %v6849_v6  ;;  %v13451_v6 = vld [vmem:[%s17395_s5 + $0x30] sm:$0xff] }
 0x8e7   :  { %v6882_v8 = vadd.f32 %v6881_v53, %v6863_v31  ;;  %v13717_v53 = vld [vmem:[%s13849_s24 + $0x1] ss:$0 sm:$0xff]  ;;  %v13432_v31 = vld [vmem:[%s17394_s0 + $0x28] sm:$0xff]  ;;  %s17406_s24 = sld [smem:[#allocation17_spill]] }
 0x8ec   :  { %v6900_v59 = vpop.f32.mrf.mxu1 }
 0x8ed   :  { %v6917_v26 = vpop.f32.mrf.mxu2  ;;  %v6901_v63 = vadd.f32 %v6900_v59, %v6882_v8  ;;  %v13452_v8 = vld [vmem:[%s17395_s5 + $0x38] sm:$0xff] }
 0x8ee   :  { %v6884_v21 = vpop.f32.mrf.mxu0  ;;  %v6918_v49 = vadd.f32 %v6917_v26, %v6899_v10  ;;  %v13440_v10 = vld [vmem:[%s17394_s0 + $0x68] sm:$0xff] }
 0x8ef   :  { %v6885_v0 = vadd.f32 %v6884_v21, %v6866_v11  ;;  %v13434_v11 = vld [vmem:[%s17394_s0 + $0x38] sm:$0xff] }
 0x8f4   :  { %v6903_v60 = vpop.f32.mrf.mxu1 }
 0x8f5   :  { %v6919_v28 = vpop.f32.mrf.mxu2  ;;  %v6904_v52 = vadd.f32 %v6903_v60, %v6885_v0  ;;  %v13441_v0 = vld [vmem:[%s17394_s0 + $0x70] sm:$0xff] }
 0x8f6   :  { %v6886_v51 = vpop.f32.mrf.mxu0  ;;  %v6920_v19 = vadd.f32 %v6919_v28, %v6901_v63  ;;  %v13437_v63 = vld [vmem:[%s17394_s0 + $0x50] sm:$0xff] }
 0x8f7   :  { %v6887_v47 = vadd.f32 %v6886_v51, %v6868_v45  ;;  %v13444_v45 = vld [vmem:[%s17394_s0 + $0x88] sm:$0xff] }
 0x8fc   :  { %v6905_v39 = vpop.f32.mrf.mxu1 }
 0x8fd   :  { %v6922_v61 = vpop.f32.mrf.mxu2  ;;  %v6906_v56 = vadd.f32 %v6905_v39, %v6887_v47  ;;  %v13475_v47 = vld [vmem:[%s17395_s5 + $0xf0] sm:$0xff] }
 0x8fe   :  { %v6923_v13 = vadd.f32 %v6922_v61, %v6904_v52  ;;  %v13443_v52 = vld [vmem:[%s17394_s0 + $0x80] sm:$0xff] }
 0x904   :  { %v6936_v2 = vpop.f32.mrf.mxu3  ;;  %v6955_v22 = vpop.f32.mrf.mxu0 }
 0x905   :  { %v6924_v12 = vpop.f32.mrf.mxu2  ;;  %v6937_v16 = vadd.f32 %v6936_v2, %v6918_v49  ;;  %v13467_v49 = vld [vmem:[%s17395_s5 + $0xb0] sm:$0xff] }
 0x906   :  { %v6925_v54 = vadd.f32 %v6924_v12, %v6906_v56  ;;  %v13464_v56 = vld [vmem:[%s17395_s5 + $0x98] sm:$0xff] }
 0x907   :  { %v6974_v5 = vpop.f32.mrf.mxu1  ;;  %v6956_v48 = vadd.f32 %v6955_v22, %v6937_v16  ;;  %v13427_v22 = vld [vmem:[%s17394_s0] sm:$0xff]  ;;  %v13447_v16 = vld [vmem:[%s17395_s5 + $0x10] sm:$0xff] }
 0x909   :  { %v6975_v44 = vadd.f32 %v6974_v5, %v6956_v48  ;;  %v13428_v5 = vld [vmem:[%s17394_s0 + $0x8] sm:$0xff] }
 0x90a   :  { %v13446_v48 = vld [vmem:[%s17395_s5 + $0x8] sm:$0xff] }
 0x90b   :  { %v6986_v59 = vmul.f32 %v13716_v3, %v6975_v44  ;;  %v13456_v44 = vld [vmem:[%s17395_s5 + $0x58] sm:$0xff] }
 0x90c   :  { %v6938_v42 = vpop.f32.mrf.mxu3  ;;  %v6957_v29 = vpop.f32.mrf.mxu0 }
 0x90d   :  { %v7027_v37 = vpop.f32.mrf.mxu2  ;;  %v6939_v38 = vadd.f32 %v6938_v42, %v6920_v19  ;;  %v6992_v17 = vadd.f32 %v13717_v53, %v6986_v59  ;;  %v13429_v42 = vld [vmem:[%s17394_s0 + $0x10] sm:$0xff]  ;;  %v13442_v19 = vld [vmem:[%s17394_s0 + $0x78] sm:$0xff]  ;;  %v13470_v59 = vld [vmem:[%s17395_s5 + $0xc8] sm:$0xff] }
 0x90f   :  { %v6976_v43 = vpop.f32.mrf.mxu1  ;;  %v6958_v35 = vadd.f32 %v6957_v29, %v6939_v38  ;;  %v6996_v2 = vmax.f32 %v6992_v17, 0.0  ;;  %v13430_v29 = vld [vmem:[%s17394_s0 + $0x18] sm:$0xff]  ;;  %v13466_v38 = vld [vmem:[%s17395_s5 + $0xa8] sm:$0xff]  ;;  %v13453_v17 = vld [vmem:[%s17395_s5 + $0x40] sm:$0xff] }
 0x911   :  { %v6977_v27 = vadd.f32 %v6976_v43, %v6958_v35  ;;  %v13436_v43 = vld [vmem:[%s17394_s0 + $0x48] sm:$0xff] }
 0x912   :  { %v13474_v35 = vld [vmem:[%s17395_s5 + $0xe8] sm:$0xff] }
 0x913   :  { %v6987_v34 = vmul.f32 %v13716_v3, %v6977_v27  ;;  %v13457_v27 = vld [vmem:[%s17395_s5 + $0x60] sm:$0xff] }
 0x914   :  { %v6941_v62 = vpop.f32.mrf.mxu3  ;;  %v6960_v14 = vpop.f32.mrf.mxu0 }
 0x915   :  { %v7029_v4 = vpop.f32.mrf.mxu2  ;;  %v6942_v1 = vadd.f32 %v6941_v62, %v6923_v13  ;;  %v6993_v21 = vadd.f32 %v13717_v53, %v6987_v34  ;;  %v13438_v13 = vld [vmem:[%s17394_s0 + $0x58] sm:$0xff]  ;;  %v13449_v62 = vld [vmem:[%s17395_s5 + $0x20] sm:$0xff]  ;;  %v13455_v34 = vld [vmem:[%s17395_s5 + $0x50] sm:$0xff] }
 0x916   :  { %v7037_v58 = vpack.c.bf16 %v7029_v4, %v7027_v37  ;;  %v13435_v37 = vld [vmem:[%s17394_s0 + $0x40] sm:$0xff]  ;;  %v13468_v4 = vld [vmem:[%s17395_s5 + $0xb8] sm:$0xff] }
 0x917   :  { %v6979_v20 = vpop.f32.mrf.mxu1  ;;  %v6961_v18 = vadd.f32 %v6960_v14, %v6942_v1  ;;  %v6997_v51 = vmax.f32 %v6993_v21, 0.0  ;;  %v13476_v1 = vld [vmem:[%s17395_s5 + $0xf8] sm:$0xff]  ;;  %v13469_v21 = vld [vmem:[%s17395_s5 + $0xc0] sm:$0xff] }
 0x918   :  { %7111 = vmatmul.bf16.vlgmr.msra.gmra.mxu3 %v7037_v58  ;;  %v13448_v14 = vld [vmem:[%s17395_s5 + $0x18] sm:$0xff] }
 0x919   :  { %v6980_v55 = vadd.f32 %v6979_v20, %v6961_v18  ;;  %v7000_v12 = vpack.c.bf16 %v6997_v51, %v6996_v2  ;;  %v13460_v58 = vld [vmem:[%s17395_s5 + $0x78] sm:$0xff]  ;;  %v13465_v20 = vld [vmem:[%s17395_s5 + $0xa0] sm:$0xff]  ;;  %v13459_v18 = vld [vmem:[%s17395_s5 + $0x70] sm:$0xff] }
 0x91a   :  { %v13508_v51 = vld [vmem:[%s17395_s5 + $0x1f8] sm:$0xff] }
 0x91b   :  { %v6988_v24 = vmul.f32 %v13716_v3, %v6980_v55  ;;  %v13463_v55 = vld [vmem:[%s17395_s5 + $0x90] sm:$0xff]  ;;  %v13492_v2 = vld [vmem:[%s17395_s5 + $0x178] sm:$0xff] }
 0x91c   :  { %v6943_v40 = vpop.f32.mrf.mxu3  ;;  %v6962_v33 = vpop.f32.mrf.mxu0 }
 0x91d   :  { %v7032_v9 = vpop.f32.mrf.mxu2  ;;  %v6944_v57 = vadd.f32 %v6943_v40, %v6925_v54  ;;  %v6994_v7 = vadd.f32 %v13717_v53, %v6988_v24  ;;  %v13458_v54 = vld [vmem:[%s17395_s5 + $0x68] sm:$0xff]  ;;  %v13473_v40 = vld [vmem:[%s17395_s5 + $0xe0] sm:$0xff]  ;;  %v13484_v24 = vld [vmem:[%s17395_s5 + $0x138] sm:$0xff] }
 0x91f   :  { %v6963_v46 = vadd.f32 %v6962_v33, %v6944_v57  ;;  %v6981_v23 = vpop.f32.mrf.mxu1  ;;  %v6998_v61 = vmax.f32 %v6994_v7, 0.0  ;;  %v13462_v57 = vld [vmem:[%s17395_s5 + $0x88] sm:$0xff]  ;;  %v13472_v33 = vld [vmem:[%s17395_s5 + $0xd8] sm:$0xff] }
 0x920   :  { %v13500_v7 = vld [vmem:[%s17395_s5 + $0x1b8] sm:$0xff] }
 0x921   :  { %v6982_v26 = vadd.f32 %v6981_v23, %v6963_v46  ;;  %v13461_v46 = vld [vmem:[%s17395_s5 + $0x80] sm:$0xff]  ;;  %v13471_v23 = vld [vmem:[%s17395_s5 + $0xd0] sm:$0xff] }
 0x923   :  { %v6989_v50 = vmul.f32 %v13716_v3, %v6982_v26  ;;  %v13445_v3 = vld [vmem:[%s17395_s5] sm:$0xff]  ;;  %v13483_v26 = vld [vmem:[%s17395_s5 + $0x130] sm:$0xff] }
 0x925   :  { %v7034_v30 = vpop.f32.mrf.mxu2  ;;  %v6995_v28 = vadd.f32 %v13717_v53, %v6989_v50  ;;  %v13454_v50 = vld [vmem:[%s17395_s5 + $0x48] sm:$0xff] }
 0x926   :  { %v7038_v60 = vpack.c.bf16 %v7034_v30, %v7032_v9  ;;  %v13482_v30 = vld [vmem:[%s17395_s5 + $0x128] sm:$0xff] }
 0x927   :  { %v6999_v15 = vmax.f32 %v6995_v28, 0.0  ;;  %v13499_v28 = vld [vmem:[%s17395_s5 + $0x1b0] sm:$0xff] }
 0x928   :  { %7116 = vmatmul.bf16.gmra.mxu3 %v7038_v60 }
 0x929   :  { %v7001_v39 = vpack.c.bf16 %v6999_v15, %v6998_v61  ;;  %v13481_v61 = vld [vmem:[%s17395_s5 + $0x120] sm:$0xff]  ;;  %v13498_v15 = vld [vmem:[%s17395_s5 + $0x1a8] sm:$0xff] }
 0x92b   :  { %7161 = vmatpush.bf16.msra.mxu0 %v7001_v39  ;;  %13677 = vmatpush.bf16.msrb.mxu1 %v7001_v39 }
 0x92c   :  { %7247 = vmatpush.bf16.msrb.mxu2 %v7001_v39  ;;  %7290 = vmatpush.bf16.msrb.mxu3 %v7001_v39 }
 0x92f   :  { %7162 = vmatpush.bf16.msra.mxu0 %v7000_v12  ;;  %13678 = vmatpush.bf16.msrb.mxu1 %v7000_v12 }
 0x930   :  { %7248 = vmatpush.bf16.msrb.mxu2 %v7000_v12  ;;  %7291 = vmatpush.bf16.msrb.mxu3 %v7000_v12 }
 0x932   :  { %11997 = vmatmul.msk.bf16.vlgmr.msra.gmra.mxu0 %vm7148_vm1, %v13427_v22  ;;  %11998 = vmatmul.msk.bf16.vlgmr.msrb.gmra.mxu1 %vm7148_vm1, %v13428_v5  ;;  %v13497_v5 = vld [vmem:[%s17395_s5 + $0x1a0] sm:$0xff] }
 0x933   :  { %7204 = vmatpush.bf16.msra.mxu1 %v7001_v39  ;;  %7333 = vmatpush.bf16.msrb.mxu0 %v7001_v39 }
 0x934   :  { %7419 = vmatpush.bf16.msra.mxu2 %v7001_v39  ;;  %7462 = vmatpush.bf16.msra.mxu3 %v7001_v39 }
 0x935   :  { %12017 = vmatmul.msk.bf16.vlgmr.msrb.gmra.mxu2 %vm7148_vm1, %v13431_v41  ;;  %v13507_v41 = vld [vmem:[%s17395_s5 + $0x1f0] sm:$0xff] }
 0x937   :  { %7205 = vmatpush.bf16.msra.mxu1 %v7000_v12  ;;  %7334 = vmatpush.bf16.msrb.mxu0 %v7000_v12 }
 0x938   :  { %7420 = vmatpush.bf16.msra.mxu2 %v7000_v12  ;;  %7463 = vmatpush.bf16.msra.mxu3 %v7000_v12 }
 0x939   :  { %12027 = vmatmul.msk.bf16.vlgmr.msrb.gmra.mxu3 %vm7148_vm1, %v13433_v36 }
 0x93b   :  { %7376 = vmatpush.bf16.msrb.mxu1 %v7001_v39  ;;  %7505 = vmatpush.bf16.msra.mxu0 %v7001_v39  ;;  %v13480_v39 = vld [vmem:[%s17395_s5 + $0x118] sm:$0xff] }
 0x93c   :  { %8244 = vmatpush.bf16.msrb.mxu3 %v13468_v4  ;;  %8225 = vmatpush.bf16.msrb.mxu2 %v13460_v58  ;;  %v13488_v58 = vld [vmem:[%s17395_s5 + $0x158] sm:$0xff] }
 0x93f   :  { %7377 = vmatpush.bf16.msrb.mxu1 %v7000_v12  ;;  %7506 = vmatpush.bf16.msra.mxu0 %v7000_v12 }
 0x940   :  { %8245 = vmatpush.bf16.msrb.mxu3 %v13467_v49  ;;  %8226 = vmatpush.bf16.msrb.mxu2 %v13459_v18 }
 0x942   :  { %12007 = vmatmul.msk.bf16.vlgmr.msra.gmra.mxu1 %vm7148_vm1, %v13429_v42  ;;  %12037 = vmatmul.msk.bf16.vlgmr.msrb.gmra.mxu0 %vm7148_vm1, %v13435_v37  ;;  %v13479_v42 = vld [vmem:[%s17395_s5 + $0x110] sm:$0xff] }
 0x943   :  { %8206 = vmatpush.bf16.msra.mxu1 %v13452_v8  ;;  %8263 = vmatpush.bf16.msrb.mxu0 %v13476_v1  ;;  %v13491_v37 = vld [vmem:[%s17395_s5 + $0x170] sm:$0xff]  ;;  %v13490_v8 = vld [vmem:[%s17395_s5 + $0x168] sm:$0xff]  ;;  %v13504_v1 = vld [vmem:[%s17395_s5 + $0x1d8] sm:$0xff] }
 0x944   :  { %8246 = vmatpush.bf16.msrb.mxu3 %v13466_v38  ;;  %8227 = vmatpush.bf16.msrb.mxu2 %v13458_v54  ;;  %v13494_v38 = vld [vmem:[%s17395_s5 + $0x188] sm:$0xff]  ;;  %v13503_v54 = vld [vmem:[%s17395_s5 + $0x1d0] sm:$0xff] }
 0x945   :  { %12018 = vmatmul.msk.bf16.gmra.mxu2 %vm7148_vm1, %v13432_v31  ;;  %v13496_v31 = vld [vmem:[%s17395_s5 + $0x198] sm:$0xff] }
 0x947   :  { %8207 = vmatpush.bf16.msra.mxu1 %v13451_v6  ;;  %8264 = vmatpush.bf16.msrb.mxu0 %v13475_v47 }
 0x948   :  { %8247 = vmatpush.bf16.msrb.mxu3 %v13465_v20  ;;  %8228 = vmatpush.bf16.msrb.mxu2 %v13457_v27  ;;  %v13516_v20 = vld [vmem:[%s17395_s5 + $0x238] sm:$0xff]  ;;  %v13515_v27 = vld [vmem:[%s17395_s5 + $0x230] sm:$0xff] }
 0x949   :  { %12028 = vmatmul.msk.bf16.gmra.mxu3 %vm7148_vm1, %v13434_v11  ;;  %v13506_v11 = vld [vmem:[%s17395_s5 + $0x1e8] sm:$0xff] }
 0x94b   :  { %8208 = vmatpush.bf16.msra.mxu1 %v13450_v32  ;;  %8265 = vmatpush.bf16.msrb.mxu0 %v13474_v35 }
 0x94c   :  { %8248 = vmatpush.bf16.msrb.mxu3 %v13464_v56  ;;  %8229 = vmatpush.bf16.msrb.mxu2 %v13456_v44 }
 0x94f   :  { %8209 = vmatpush.bf16.msra.mxu1 %v13449_v62  ;;  %8266 = vmatpush.bf16.msrb.mxu0 %v13473_v40  ;;  %v13489_v62 = vld [vmem:[%s17395_s5 + $0x160] sm:$0xff] }
 0x950   :  { %8249 = vmatpush.bf16.msrb.mxu3 %v13463_v55  ;;  %8230 = vmatpush.bf16.msrb.mxu2 %v13455_v34 }
 0x952   :  { %12008 = vmatmul.msk.bf16.gmra.mxu1 %vm7148_vm1, %v13430_v29  ;;  %12038 = vmatmul.msk.bf16.gmra.mxu0 %vm7148_vm1, %v13436_v43 }
 0x953   :  { %8210 = vmatpush.bf16.msra.mxu1 %v13448_v14  ;;  %8267 = vmatpush.bf16.msrb.mxu0 %v13472_v33 }
 0x954   :  { %8250 = vmatpush.bf16.msrb.mxu3 %v13462_v57  ;;  %8231 = vmatpush.bf16.msrb.mxu2 %v13454_v50  ;;  %v13514_v50 = vld [vmem:[%s17395_s5 + $0x228] sm:$0xff] }
 0x955   :  { %12057 = vmatmul.msk.bf16.vlgmr.msra.gmra.mxu2 %vm7148_vm1, %v13439_v25  ;;  %v13478_v25 = vld [vmem:[%s17395_s5 + $0x108] sm:$0xff] }
 0x957   :  { %8211 = vmatpush.bf16.msra.mxu1 %v13447_v16  ;;  %8268 = vmatpush.bf16.msrb.mxu0 %v13471_v23 }
 0x958   :  { %8251 = vmatpush.bf16.msrb.mxu3 %v13461_v46  ;;  %8232 = vmatpush.bf16.msrb.mxu2 %v13453_v17  ;;  %v13502_v46 = vld [vmem:[%s17395_s5 + $0x1c8] sm:$0xff] }
 0x959   :  { %12067 = vmatmul.msk.bf16.vlgmr.msra.gmra.mxu3 %vm7148_vm1, %v13441_v0 }
 0x95b   :  { %8212 = vmatpush.bf16.msra.mxu1 %v13446_v48  ;;  %8269 = vmatpush.bf16.msrb.mxu0 %v13470_v59  ;;  %v13493_v48 = vld [vmem:[%s17395_s5 + $0x180] sm:$0xff] }
 0x95c   :  { %8320 = vmatpush.bf16.msra.mxu3 %v13500_v7  ;;  %8301 = vmatpush.bf16.msra.mxu2 %v13492_v2  ;;  %v13486_v7 = vld [vmem:[%s17395_s5 + $0x148] sm:$0xff] }
 0x95f   :  { %8213 = vmatpush.bf16.msra.mxu1 %v13445_v3  ;;  %8270 = vmatpush.bf16.msrb.mxu0 %v13469_v21  ;;  %v13487_v3 = vld [vmem:[%s17395_s5 + $0x150] sm:$0xff] }
 0x960   :  { %8321 = vmatpush.bf16.msra.mxu3 %v13499_v28  ;;  %8302 = vmatpush.bf16.msra.mxu2 %v13491_v37 }
 0x962   :  { %12047 = vmatmul.msk.bf16.vlgmr.msrb.gmra.mxu1 %vm7148_vm1, %v13437_v63  ;;  %12077 = vmatmul.msk.bf16.vlgmr.msra.gmra.mxu0 %vm7148_vm1, %v13443_v52  ;;  %v13495_v63 = vld [vmem:[%s17395_s5 + $0x190] sm:$0xff]  ;;  %v13505_v52 = vld [vmem:[%s17395_s5 + $0x1e0] sm:$0xff] }
 0x963   :  { %8282 = vmatpush.bf16.msrb.mxu1 %v13484_v24  ;;  %8339 = vmatpush.bf16.msra.mxu0 %v13508_v51 }
 0x964   :  { %8322 = vmatpush.bf16.msra.mxu3 %v13498_v15  ;;  %8303 = vmatpush.bf16.msra.mxu2 %v13490_v8  ;;  %v13501_v15 = vld [vmem:[%s17395_s5 + $0x1c0] sm:$0xff] }
 0x965   :  { %12058 = vmatmul.msk.bf16.gmra.mxu2 %vm7148_vm1, %v13440_v10 }
 0x967   :  { %8283 = vmatpush.bf16.msrb.mxu1 %v13483_v26  ;;  %8340 = vmatpush.bf16.msra.mxu0 %v13507_v41 }
 0x968   :  { %8323 = vmatpush.bf16.msra.mxu3 %v13497_v5  ;;  %8304 = vmatpush.bf16.msra.mxu2 %v13489_v62  ;;  %v13513_v5 = vld [vmem:[%s17395_s5 + $0x220] sm:$0xff] }
 0x969   :  { %12068 = vmatmul.msk.bf16.gmra.mxu3 %vm7148_vm1, %v13442_v19 }
 0x96b   :  { %8284 = vmatpush.bf16.msrb.mxu1 %v13482_v30  ;;  %8341 = vmatpush.bf16.msra.mxu0 %v13506_v11  ;;  %v13512_v11 = vld [vmem:[%s17395_s5 + $0x218] sm:$0xff] }
 0x96c   :  { %8324 = vmatpush.bf16.msra.mxu3 %v13496_v31  ;;  %8305 = vmatpush.bf16.msra.mxu2 %v13488_v58 }
 0x96f   :  { %8285 = vmatpush.bf16.msrb.mxu1 %v13481_v61  ;;  %8342 = vmatpush.bf16.msra.mxu0 %v13505_v52 }
 0x970   :  { %8325 = vmatpush.bf16.msra.mxu3 %v13495_v63  ;;  %8306 = vmatpush.bf16.msra.mxu2 %v13487_v3  ;;  %v13511_v63 = vld [vmem:[%s17395_s5 + $0x210] sm:$0xff] }
 0x972   :  { %12048 = vmatmul.msk.bf16.gmra.mxu1 %vm7148_vm1, %v13438_v13  ;;  %12078 = vmatmul.msk.bf16.gmra.mxu0 %vm7148_vm1, %v13444_v45  ;;  %v13477_v45 = vld [vmem:[%s17395_s5 + $0x100] sm:$0xff] }
 0x973   :  { %8286 = vmatpush.bf16.msrb.mxu1 %v13480_v39  ;;  %8343 = vmatpush.bf16.msra.mxu0 %v13504_v1 }
 0x974   :  { %8326 = vmatpush.bf16.msra.mxu3 %v13494_v38  ;;  %8307 = vmatpush.bf16.msra.mxu2 %v13486_v7  ;;  %v13510_v38 = vld [vmem:[%s17395_s5 + $0x208] sm:$0xff] }
 0x977   :  { %8287 = vmatpush.bf16.msrb.mxu1 %v13479_v42  ;;  %8344 = vmatpush.bf16.msra.mxu0 %v13503_v54 }
 0x978   :  { %8327 = vmatpush.bf16.msra.mxu3 %v13493_v48 }
 0x97b   :  { %8288 = vmatpush.bf16.msrb.mxu1 %v13478_v25  ;;  %8345 = vmatpush.bf16.msra.mxu0 %v13502_v46 }
 0x97f   :  { %8289 = vmatpush.bf16.msrb.mxu1 %v13477_v45  ;;  %8346 = vmatpush.bf16.msra.mxu0 %v13501_v15 }
 0x99b   :  { %v16663_v9 = vpop.f32.mrf.mxu3 }
 0x9a3   :  { %v16673_v53 = vpop.f32.mrf.mxu3 }
 0x9ab   :  { %v16683_v60 = vpop.f32.mrf.mxu3 }
 0x9af   :  { %v7164_v12 = vpop.f32.mrf.mxu0  ;;  %v16691_v22 = vpop.f32.mrf.mxu1 }
 0x9b0   :  { %v7174_v29 = vpack.c.bf16 %v7164_v12, %v7164_v12  ;;  %v7176_v34 = vpack.c.bf16 %v16691_v22, %v16691_v22  ;;  %v13485_v22 = vld [vmem:[%s17395_s5 + $0x140] sm:$0xff] }
 0x9b1   :  { %8308 = vmatpush.bf16.msra.mxu2 %v13485_v22 }
 0x9b2   :  { %v7526_v10 = vunpack.c.l.b16 %v7174_v29  ;;  %v7528_v51 = vunpack.c.l.b16 %v7176_v34 }
 0x9b3   :  { %v16695_v36 = vpop.f32.mrf.mxu3 }
 0x9b7   :  { %v7166_v0 = vpop.f32.mrf.mxu0  ;;  %v7171_v6 = vpop.f32.mrf.mxu1 }
 0x9b8   :  { %v7250_v43 = vpop.f32.mrf.mxu2  ;;  %v7175_v32 = vpack.c.bf16 %v7166_v0, %v7166_v0  ;;  %v7177_v24 = vpack.c.bf16 %v7171_v6, %v7171_v6 }
 0x9b9   :  { %v7260_v4 = vpack.c.bf16 %v7250_v43, %v7250_v43 }
 0x9ba   :  { %v7527_v19 = vunpack.c.l.b16 %v7175_v32  ;;  %v7529_v17 = vunpack.c.l.b16 %v7177_v24 }
 0x9bb   :  { %v7550_v16 = vunpack.c.l.b16 %v7260_v4 }
 0x9bc   :  { %v7293_v13 = vpop.f32.mrf.mxu3  ;;  %v7530_v49 = vpack.c.b16 %v7527_v19, %v7526_v10  ;;  %v7531_v37 = vpack.c.b16 %v7529_v17, %v7528_v51 }
 0x9bd   :  { %v7303_v56 = vpack.c.bf16 %v7293_v13, %v7293_v13 }
 0x9be   :  { %8214 = vmatmul.bf16.vlgmr.msra.gmra.mxu1 %v7530_v49 }
 0x9bf   :  { %v7207_v47 = vpop.f32.mrf.mxu1  ;;  %v16711_v35 = vpop.f32.mrf.mxu0  ;;  %8358 = vmatpush.bf16.msra.mxu1 %v13516_v20  ;;  %v7562_v33 = vunpack.c.l.b16 %v7303_v56 }
 0x9c0   :  { %v7252_v14 = vpop.f32.mrf.mxu2  ;;  %v7217_v26 = vpack.c.bf16 %v7207_v47, %v7207_v47  ;;  %v7346_v13 = vpack.c.bf16 %v16711_v35, %v16711_v35  ;;  %v13509_v35 = vld [vmem:[%s17395_s5 + $0x200] sm:$0xff] }
 0x9c1   :  { %v7261_v18 = vpack.c.bf16 %v7252_v14, %v7252_v14 }
 0x9c2   :  { %v7538_v39 = vunpack.c.l.b16 %v7217_v26  ;;  %v7574_v58 = vunpack.c.l.b16 %v7346_v13 }
 0x9c3   :  { %v7551_v55 = vunpack.c.l.b16 %v7261_v18  ;;  %8359 = vmatpush.bf16.msra.mxu1 %v13515_v27 }
 0x9c4   :  { %v7295_v40 = vpop.f32.mrf.mxu3 }
 0x9c5   :  { %v7554_v57 = vpack.c.b16 %v7551_v55, %v7550_v16  ;;  %v7304_v44 = vpack.c.bf16 %v7295_v40, %v7295_v40 }
 0x9c7   :  { %8252 = vmatmul.bf16.vlgmr.msrb.gmra.mxu3 %v7554_v57  ;;  %v7563_v23 = vunpack.c.l.b16 %v7304_v44  ;;  %v7209_v30 = vpop.f32.mrf.mxu1  ;;  %v7338_v28 = vpop.f32.mrf.mxu0  ;;  %8360 = vmatpush.bf16.msra.mxu1 %v13514_v50 }
 0x9c8   :  { %v7255_v59 = vpop.f32.mrf.mxu2  ;;  %v7218_v61 = vpack.c.bf16 %v7209_v30, %v7209_v30  ;;  %v7347_v45 = vpack.c.bf16 %v7338_v28, %v7338_v28 }
 0x9c9   :  { %v7566_v21 = vpack.c.b16 %v7563_v23, %v7562_v33  ;;  %v7262_v41 = vpack.c.bf16 %v7255_v59, %v7255_v59 }
 0x9ca   :  { %v7539_v2 = vunpack.c.l.b16 %v7218_v61  ;;  %v7575_v47 = vunpack.c.l.b16 %v7347_v45 }
 0x9cb   :  { %8271 = vmatmul.bf16.vlgmr.msrb.gmra.mxu0 %v7566_v21  ;;  %8361 = vmatpush.bf16.msra.mxu1 %v13513_v5  ;;  %v7552_v43 = vunpack.c.l.b16 %v7262_v41 }
 0x9cc   :  { %v7298_v12 = vpop.f32.mrf.mxu3  ;;  %v7542_v42 = vpack.c.b16 %v7539_v2, %v7538_v39  ;;  %v7578_v55 = vpack.c.b16 %v7575_v47, %v7574_v58 }
 0x9cd   :  { %v7305_v8 = vpack.c.bf16 %v7298_v12, %v7298_v12 }
 0x9ce   :  { %8219 = vmatmul.bf16.gmra.mxu1 %v7531_v37  ;;  %8233 = vmatmul.bf16.vlgmr.msrb.gmra.mxu2 %v7542_v42 }
 0x9cf   :  { %v7212_v29 = vpop.f32.mrf.mxu1  ;;  %v7341_v0 = vpop.f32.mrf.mxu0  ;;  %8362 = vmatpush.bf16.msra.mxu1 %v13512_v11  ;;  %v7564_v52 = vunpack.c.l.b16 %v7305_v8 }
 0x9d0   :  { %v7257_v31 = vpop.f32.mrf.mxu2  ;;  %v7219_v4 = vpack.c.bf16 %v7212_v29, %v7212_v29  ;;  %v7348_v7 = vpack.c.bf16 %v7341_v0, %v7341_v0 }
 0x9d1   :  { %v7263_v25 = vpack.c.bf16 %v7257_v31, %v7257_v31 }
 0x9d2   :  { %v7540_v18 = vunpack.c.l.b16 %v7219_v4  ;;  %v7576_v15 = vunpack.c.l.b16 %v7348_v7 }
 0x9d3   :  { %v7553_v6 = vunpack.c.l.b16 %v7263_v25  ;;  %8363 = vmatpush.bf16.msra.mxu1 %v13511_v63 }
 0x9d4   :  { %v7300_v32 = vpop.f32.mrf.mxu3 }
 0x9d5   :  { %v7555_v10 = vpack.c.b16 %v7553_v6, %v7552_v43  ;;  %v7306_v19 = vpack.c.bf16 %v7300_v32, %v7300_v32 }
 0x9d7   :  { %8257 = vmatmul.bf16.gmra.mxu3 %v7555_v10  ;;  %v7565_v62 = vunpack.c.l.b16 %v7306_v19  ;;  %v7214_v1 = vpop.f32.mrf.mxu1  ;;  %8364 = vmatpush.bf16.msra.mxu1 %v13510_v38  ;;  %v7343_v16 = vpop.f32.mrf.mxu0 }
 0x9d8   :  { %v7422_v49 = vpop.f32.mrf.mxu2  ;;  %v7220_v20 = vpack.c.bf16 %v7214_v1, %v7214_v1  ;;  %v7349_v50 = vpack.c.bf16 %v7343_v16, %v7343_v16 }
 0x9d9   :  { %v7567_v14 = vpack.c.b16 %v7565_v62, %v7564_v52  ;;  %v7432_v54 = vpack.c.bf16 %v7422_v49, %v7422_v49 }
 0x9da   :  { %v7541_v56 = vunpack.c.l.b16 %v7220_v20  ;;  %v7577_v51 = vunpack.c.l.b16 %v7349_v50 }
 0x9db   :  { %8276 = vmatmul.bf16.gmra.mxu0 %v7567_v14  ;;  %8365 = vmatpush.bf16.msra.mxu1 %v13509_v35  ;;  %v7598_v57 = vunpack.c.l.b16 %v7432_v54 }
 0x9dc   :  { %v7465_v48 = vpop.f32.mrf.mxu3  ;;  %v7543_v40 = vpack.c.b16 %v7541_v56, %v7540_v18  ;;  %v7579_v42 = vpack.c.b16 %v7577_v51, %v7576_v15 }
 0x9dd   :  { %v7475_v44 = vpack.c.bf16 %v7465_v48, %v7465_v48 }
 0x9de   :  { %8238 = vmatmul.bf16.gmra.mxu2 %v7543_v40  ;;  %8290 = vmatmul.bf16.vlgmr.msrb.gmra.mxu1 %v7578_v55 }
 0x9df   :  { %v7379_v27 = vpop.f32.mrf.mxu1  ;;  %v7610_v34 = vunpack.c.l.b16 %v7475_v44  ;;  %v7508_v26 = vpop.f32.mrf.mxu0 }
 0x9e0   :  { %v7424_v3 = vpop.f32.mrf.mxu2  ;;  %v7389_v21 = vpack.c.bf16 %v7379_v27, %v7379_v27  ;;  %v7518_v52 = vpack.c.bf16 %v7508_v26, %v7508_v26 }
 0x9e1   :  { %v7433_v33 = vpack.c.bf16 %v7424_v3, %v7424_v3 }
 0x9e2   :  { %v7586_v2 = vunpack.c.l.b16 %v7389_v21  ;;  %v7622_v49 = vunpack.c.l.b16 %v7518_v52 }
 0x9e3   :  { %v7599_v24 = vunpack.c.l.b16 %v7433_v33 }
 0x9e4   :  { %v7467_v46 = vpop.f32.mrf.mxu3 }
 0x9e5   :  { %v7602_v23 = vpack.c.b16 %v7599_v24, %v7598_v57  ;;  %v7476_v59 = vpack.c.bf16 %v7467_v46, %v7467_v46 }
 0x9e7   :  { %8328 = vmatmul.bf16.vlgmr.msra.gmra.mxu3 %v7602_v23  ;;  %v7611_v30 = vunpack.c.l.b16 %v7476_v59  ;;  %v7381_v17 = vpop.f32.mrf.mxu1  ;;  %v7510_v37 = vpop.f32.mrf.mxu0 }
 0x9e8   :  { %v7427_v28 = vpop.f32.mrf.mxu2  ;;  %v7390_v39 = vpack.c.bf16 %v7381_v17, %v7381_v17  ;;  %v7519_v10 = vpack.c.bf16 %v7510_v37, %v7510_v37 }
 0x9e9   :  { %v7614_v61 = vpack.c.b16 %v7611_v30, %v7610_v34  ;;  %v7434_v5 = vpack.c.bf16 %v7427_v28, %v7427_v28 }
 0x9ea   :  { %v7587_v12 = vunpack.c.l.b16 %v7390_v39  ;;  %v7623_v1 = vunpack.c.l.b16 %v7519_v10 }
 0x9eb   :  { %8347 = vmatmul.bf16.vlgmr.msra.gmra.mxu0 %v7614_v61  ;;  %v7600_v29 = vunpack.c.l.b16 %v7434_v5 }
 0x9ec   :  { %v7470_v22 = vpop.f32.mrf.mxu3  ;;  %v7590_v41 = vpack.c.b16 %v7587_v12, %v7586_v2  ;;  %v7626_v20 = vpack.c.b16 %v7623_v1, %v7622_v49 }
 0x9ed   :  { %v7477_v25 = vpack.c.bf16 %v7470_v22, %v7470_v22 }
 0x9ee   :  { %8295 = vmatmul.bf16.gmra.mxu1 %v7579_v42  ;;  %8309 = vmatmul.bf16.vlgmr.msra.gmra.mxu2 %v7590_v41 }
 0x9ef   :  { %v7384_v11 = vpop.f32.mrf.mxu1  ;;  %v7612_v6 = vunpack.c.l.b16 %v7477_v25  ;;  %v7513_v62 = vpop.f32.mrf.mxu0 }
 0x9f0   :  { %v7429_v31 = vpop.f32.mrf.mxu2  ;;  %v7391_v13 = vpack.c.bf16 %v7384_v11, %v7384_v11  ;;  %v7520_v18 = vpack.c.bf16 %v7513_v62, %v7513_v62 }
 0x9f1   :  { %v7435_v43 = vpack.c.bf16 %v7429_v31, %v7429_v31  ;;  %v13718_v31 = vld [vmem:[%s17396_s9] ss:$0 sm:$0xff] }
 0x9f2   :  { %v7588_v14 = vunpack.c.l.b16 %v7391_v13  ;;  %v7624_v48 = vunpack.c.l.b16 %v7520_v18 }
 0x9f3   :  { %v7601_v8 = vunpack.c.l.b16 %v7435_v43 }
 0x9f4   :  { %v7472_v0 = vpop.f32.mrf.mxu3 }
 0x9f5   :  { %v7603_v32 = vpack.c.b16 %v7601_v8, %v7600_v29  ;;  %v7478_v63 = vpack.c.bf16 %v7472_v0, %v7472_v0  ;;  %v13720_v0 = vld [vmem:[%s17397_s13] ss:$0 sm:$0xff] }
 0x9f7   :  { %8333 = vmatmul.bf16.gmra.mxu3 %v7603_v32  ;;  %v7613_v19 = vunpack.c.l.b16 %v7478_v63  ;;  %v7386_v45 = vpop.f32.mrf.mxu1  ;;  %v7515_v16 = vpop.f32.mrf.mxu0  ;;  %v7124_v32 = vmul.f32 %v13718_v31, %v16663_v9  ;;  %v13719_v63 = vld [vmem:[%s17396_s9 + $0x1] ss:$0 sm:$0xff] }
 0x9f8   :  { %v7392_v38 = vpack.c.bf16 %v7386_v45, %v7386_v45  ;;  %v7521_v56 = vpack.c.bf16 %v7515_v16, %v7515_v16 }
 0x9f9   :  { %v7615_v4 = vpack.c.b16 %v7613_v19, %v7612_v6  ;;  %v13721_v19 = vld [vmem:[%s17397_s13 + $0x1] ss:$0 sm:$0xff]  ;;  %v7130_v49 = vadd.f32 %v13719_v63, %v7124_v32  ;;  %v13532_v32 = vld [vmem:[%s17399_s21 + $0x78] sm:$0xff] }
 0x9fa   :  { %v7589_v58 = vunpack.c.l.b16 %v7392_v38  ;;  %v7625_v35 = vunpack.c.l.b16 %v7521_v56 }
 0x9fb   :  { %8352 = vmatmul.bf16.gmra.mxu0 %v7615_v4 }
 0x9fc   :  { %v7591_v47 = vpack.c.b16 %v7589_v58, %v7588_v14  ;;  %v7627_v54 = vpack.c.b16 %v7625_v35, %v7624_v48 }
 0x9fe   :  { %8314 = vmatmul.bf16.gmra.mxu2 %v7591_v47  ;;  %8366 = vmatmul.bf16.vlgmr.msra.gmra.mxu1 %v7626_v20 }
 0xa0e   :  { %8371 = vmatmul.bf16.gmra.mxu1 %v7627_v54 }
 0xa3b   :  { %v8215_v55 = vpop.f32.mrf.mxu1 }
 0xa43   :  { %v8217_v40 = vpop.f32.mrf.mxu1 }
 0xa48   :  { %v8272_v57 = vpop.f32.mrf.mxu0 }
 0xa4a   :  { %v8253_v3 = vpop.f32.mrf.mxu3 }
 0xa4b   :  { %v8220_v27 = vpop.f32.mrf.mxu1 }
 0xa50   :  { %v8274_v46 = vpop.f32.mrf.mxu0 }
 0xa51   :  { %v8234_v33 = vpop.f32.mrf.mxu2 }
 0xa52   :  { %v8255_v44 = vpop.f32.mrf.mxu3  ;;  %v8235_v21 = vadd.f32 %v8234_v33, %v8215_v55 }
 0xa53   :  { %v8222_v24 = vpop.f32.mrf.mxu1 }
 0xa54   :  { %v8254_v61 = vadd.f32 %v8253_v3, %v8235_v21 }
 0xa56   :  { %v8273_v51 = vadd.f32 %v8272_v57, %v8254_v61  ;;  %v7127_v61 = vmul.f32 %v13718_v31, %v16695_v36 }
 0xa58   :  { %v8277_v59 = vpop.f32.mrf.mxu0 }
 0xa59   :  { %v8236_v23 = vpop.f32.mrf.mxu2 }
 0xa5a   :  { %v8258_v26 = vpop.f32.mrf.mxu3  ;;  %v8237_v11 = vadd.f32 %v8236_v23, %v8217_v40 }
 0xa5b   :  { %v8291_v34 = vpop.f32.mrf.mxu1 }
 0xa5c   :  { %v8292_v2 = vadd.f32 %v8291_v34, %v8273_v51  ;;  %v8256_v52 = vadd.f32 %v8255_v44, %v8237_v11 }
 0xa5e   :  { %v8275_v38 = vadd.f32 %v8274_v46, %v8256_v52  ;;  %v13531_v52 = vld [vmem:[%s17399_s21 + $0x70] sm:$0xff] }
 0xa60   :  { %v8279_v17 = vpop.f32.mrf.mxu0 }
 0xa61   :  { %v8239_v7 = vpop.f32.mrf.mxu2 }
 0xa62   :  { %v8260_v30 = vpop.f32.mrf.mxu3  ;;  %v8240_v42 = vadd.f32 %v8239_v7, %v8220_v27 }
 0xa63   :  { %v8293_v50 = vpop.f32.mrf.mxu1 }
 0xa64   :  { %v8259_v25 = vadd.f32 %v8258_v26, %v8240_v42  ;;  %v8294_v20 = vadd.f32 %v8293_v50, %v8275_v38  ;;  %v7126_v50 = vmul.f32 %v13718_v31, %v16683_v60  ;;  %v13521_v38 = vld [vmem:[%s17399_s21 + $0x20] sm:$0xff] }
 0xa66   :  { %v8278_v45 = vadd.f32 %v8277_v59, %v8259_v25  ;;  %v8399_v25 = vld [vmem:[%s17398_s17] sm:$0xf] }
 0xa68   :  { %v8348_v41 = vpop.f32.mrf.mxu0 }
 0xa69   :  { %v8241_v28 = vpop.f32.mrf.mxu2 }
 0xa6a   :  { %v8329_v39 = vpop.f32.mrf.mxu3  ;;  %v8242_v62 = vadd.f32 %v8241_v28, %v8222_v24 }
 0xa6b   :  { %v8296_v15 = vpop.f32.mrf.mxu1 }
 0xa6c   :  { %v8297_v1 = vadd.f32 %v8296_v15, %v8278_v45  ;;  %v8261_v47 = vadd.f32 %v8260_v30, %v8242_v62  ;;  %v8453_v45 = vld [vmem:[%s17398_s17 + $0xc] sm:$0xf]  ;;  %v8471_v62 = vld [vmem:[%s17398_s17 + $0x10] sm:$0xf] }
 0xa6e   :  { %v8280_v35 = vadd.f32 %v8279_v17, %v8261_v47  ;;  %v7125_v17 = vmul.f32 %v13718_v31, %v16673_v53  ;;  %v13539_v47 = vld [vmem:[%s17399_s21 + $0xb0] sm:$0xff] }
 0xa70   :  { %v8350_v13 = vpop.f32.mrf.mxu0 }
 0xa71   :  { %v8310_v12 = vpop.f32.mrf.mxu2 }
 0xa72   :  { %v8311_v22 = vadd.f32 %v8310_v12, %v8292_v2  ;;  %v8331_v43 = vpop.f32.mrf.mxu3 }
 0xa73   :  { %v8298_v5 = vpop.f32.mrf.mxu1 }
 0xa74   :  { %v8330_v37 = vadd.f32 %v8329_v39, %v8311_v22  ;;  %v8299_v40 = vadd.f32 %v8298_v5, %v8280_v35  ;;  %v7132_v39 = vadd.f32 %v13719_v63, %v7126_v50  ;;  %v7131_v22 = vadd.f32 %v13719_v63, %v7125_v17  ;;  %v13526_v35 = vld [vmem:[%s17399_s21 + $0x48] sm:$0xff]  ;;  %v13561_v17 = vld [vmem:[%s17399_s21 + $0x160] sm:$0xff] }
 0xa75   :  { %v7133_v5 = vadd.f32 %v13719_v63, %v7127_v61  ;;  %v13524_v63 = vld [vmem:[%s17399_s21 + $0x38] sm:$0xff]  ;;  %v13562_v50 = vld [vmem:[%s17399_s21 + $0x168] sm:$0xff]  ;;  %v13553_v61 = vld [vmem:[%s17399_s21 + $0x120] sm:$0xff] }
 0xa76   :  { %v8349_v8 = vadd.f32 %v8348_v41, %v8330_v37 }
 0xa78   :  { %v8353_v55 = vpop.f32.mrf.mxu0 }
 0xa79   :  { %v8312_v29 = vpop.f32.mrf.mxu2 }
 0xa7a   :  { %v8334_v56 = vpop.f32.mrf.mxu3  ;;  %v8313_v9 = vadd.f32 %v8312_v29, %v8294_v20  ;;  %v13520_v20 = vld [vmem:[%s17399_s21 + $0x18] sm:$0xff] }
 0xa7b   :  { %v8367_v6 = vpop.f32.mrf.mxu1 }
 0xa7c   :  { %v8368_v10 = vadd.f32 %v8367_v6, %v8349_v8  ;;  %v8332_v3 = vadd.f32 %v8331_v43, %v8313_v9  ;;  %v8417_v8 = vld [vmem:[%s17398_s17 + $0x4] sm:$0xf]  ;;  %v8507_v6 = vld [vmem:[%s17398_s17 + $0x18] sm:$0xf]  ;;  %v13546_v9 = vld [vmem:[%s17399_s21 + $0xe8] sm:$0xff] }
 0xa7e   :  { %v8379_v4 = vmul.f32 %v13720_v0, %v8368_v10  ;;  %v8351_v24 = vadd.f32 %v8350_v13, %v8332_v3  ;;  %v13523_v10 = vld [vmem:[%s17399_s21 + $0x30] sm:$0xff]  ;;  %v13522_v13 = vld [vmem:[%s17399_s21 + $0x28] sm:$0xff]  ;;  %v8525_v3 = vld [vmem:[%s17398_s17 + $0x1c] sm:$0xf] }
 0xa80   :  { %v8385_v14 = vadd.f32 %v13721_v19, %v8379_v4  ;;  %v8355_v7 = vpop.f32.mrf.mxu0  ;;  %v8489_v4 = vld [vmem:[%s17398_s17 + $0x14] sm:$0xf] }
 0xa81   :  { %v8315_v58 = vpop.f32.mrf.mxu2 }
 0xa82   :  { %v8389_v16 = vadd.f32 %v8385_v14, %v7130_v49  ;;  %v8316_v18 = vadd.f32 %v8315_v58, %v8297_v1  ;;  %v8336_v23 = vpop.f32.mrf.mxu3  ;;  %v13529_v49 = vld [vmem:[%s17399_s21 + $0x60] sm:$0xff]  ;;  %v13540_v1 = vld [vmem:[%s17399_s21 + $0xb8] sm:$0xff] }
 0xa83   :  { %v8369_v48 = vpop.f32.mrf.mxu1  ;;  %v13548_v14 = vld [vmem:[%s17399_s21 + $0xf8] sm:$0xff] }
 0xa84   :  { %v8335_v54 = vadd.f32 %v8334_v56, %v8316_v18  ;;  %v8370_v34 = vadd.f32 %v8369_v48, %v8351_v24  ;;  %v8393_v36 = vmax.f32 %v8389_v16, 0.0  ;;  %v13528_v58 = vld [vmem:[%s17399_s21 + $0x58] sm:$0xff]  ;;  %v13547_v16 = vld [vmem:[%s17399_s21 + $0xf0] sm:$0xff]  ;;  %v13538_v48 = vld [vmem:[%s17399_s21 + $0xa8] sm:$0xff] }
 0xa85   :  { %v13527_v18 = vld [vmem:[%s17399_s21 + $0x50] sm:$0xff]  ;;  %v13556_v24 = vld [vmem:[%s17399_s21 + $0x138] sm:$0xff] }
 0xa86   :  { %v8354_v57 = vadd.f32 %v8353_v55, %v8335_v54  ;;  %v8380_v30 = vmul.f32 %v13720_v0, %v8370_v34  ;;  %v13519_v56 = vld [vmem:[%s17399_s21 + $0x10] sm:$0xff]  ;;  %v13518_v54 = vld [vmem:[%s17399_s21 + $0x8] sm:$0xff]  ;;  %v13537_v55 = vld [vmem:[%s17399_s21 + $0xa0] sm:$0xff] }
 0xa87   :  { %v13563_v34 = vld [vmem:[%s17399_s21 + $0x170] sm:$0xff] }
 0xa88   :  { %v8386_v2 = vadd.f32 %v13721_v19, %v8380_v30  ;;  %v13554_v30 = vld [vmem:[%s17399_s21 + $0x128] sm:$0xff] }
 0xa89   :  { %v8317_v27 = vpop.f32.mrf.mxu2 }
 0xa8a   :  { %v8318_v33 = vadd.f32 %v8317_v27, %v8299_v40  ;;  %v8390_v37 = vadd.f32 %v8386_v2, %v7131_v22  ;;  %v13545_v40 = vld [vmem:[%s17399_s21 + $0xe0] sm:$0xff]  ;;  %v13558_v2 = vld [vmem:[%s17399_s21 + $0x148] sm:$0xff]  ;;  %v13572_v22 = vld [vmem:[%s17399_s21 + $0x1b8] sm:$0xff] }
 0xa8b   :  { %v8372_v44 = vpop.f32.mrf.mxu1  ;;  %v8543_v27 = vld [vmem:[%s17398_s17 + $0x20] sm:$0xf] }
 0xa8c   :  { %v8373_v46 = vadd.f32 %v8372_v44, %v8354_v57  ;;  %v8337_v26 = vadd.f32 %v8336_v23, %v8318_v33  ;;  %v8394_v43 = vmax.f32 %v8390_v37, 0.0  ;;  %v13525_v57 = vld [vmem:[%s17399_s21 + $0x40] sm:$0xff]  ;;  %v13564_v44 = vld [vmem:[%s17399_s21 + $0x178] sm:$0xff] }
 0xa8d   :  { %v13517_v33 = vld [vmem:[%s17399_s21] sm:$0xff]  ;;  %v13544_v23 = vld [vmem:[%s17399_s21 + $0xd8] sm:$0xff] }
 0xa8e   :  { %v8381_v59 = vmul.f32 %v13720_v0, %v8373_v46  ;;  %v8356_v21 = vadd.f32 %v8355_v7, %v8337_v26  ;;  %v16745_v31 = vpack.c.bf16 %v8394_v43, %v8393_v36  ;;  %v13536_v46 = vld [vmem:[%s17399_s21 + $0x98] sm:$0xff]  ;;  %v13555_v26 = vld [vmem:[%s17399_s21 + $0x130] sm:$0xff]  ;;  %v13557_v37 = vld [vmem:[%s17399_s21 + $0x140] sm:$0xff] }
 0xa8f   :  { %v13543_v7 = vld [vmem:[%s17399_s21 + $0xd0] sm:$0xff]  ;;  %v13580_v43 = vld [vmem:[%s17399_s21 + $0x1f8] sm:$0xff]  ;;  %v13569_v36 = vld [vmem:[%s17399_s21 + $0x1a0] sm:$0xff] }
 0xa90   :  { %v8387_v15 = vadd.f32 %v13721_v19, %v8381_v59  ;;  %v13535_v59 = vld [vmem:[%s17399_s21 + $0x90] sm:$0xff] }
 0xa92   :  { %v8391_v41 = vadd.f32 %v8387_v15, %v7132_v39  ;;  %v13560_v15 = vld [vmem:[%s17399_s21 + $0x158] sm:$0xff]  ;;  %v13559_v39 = vld [vmem:[%s17399_s21 + $0x150] sm:$0xff] }
 0xa93   :  { %v8374_v28 = vpop.f32.mrf.mxu1 }
 0xa94   :  { %v8375_v51 = vadd.f32 %v8374_v28, %v8356_v21  ;;  %v8395_v60 = vmax.f32 %v8391_v41, 0.0  ;;  %v13534_v21 = vld [vmem:[%s17399_s21 + $0x88] sm:$0xff]  ;;  %v13571_v41 = vld [vmem:[%s17399_s21 + $0x1b0] sm:$0xff] }
 0xa95   :  { %v13542_v28 = vld [vmem:[%s17399_s21 + $0xc8] sm:$0xff] }
 0xa96   :  { %v8382_v12 = vmul.f32 %v13720_v0, %v8375_v51  ;;  %v8435_v0 = vld [vmem:[%s17398_s17 + $0x8] sm:$0xf]  ;;  %v13552_v51 = vld [vmem:[%s17399_s21 + $0x118] sm:$0xff] }
 0xa98   :  { %v8388_v42 = vadd.f32 %v13721_v19, %v8382_v12  ;;  %v13530_v19 = vld [vmem:[%s17399_s21 + $0x68] sm:$0xff]  ;;  %v13533_v12 = vld [vmem:[%s17399_s21 + $0x80] sm:$0xff] }
 0xa9a   :  { %v8392_v11 = vadd.f32 %v8388_v42, %v7133_v5  ;;  %v13551_v5 = vld [vmem:[%s17399_s21 + $0x110] sm:$0xff]  ;;  %v13550_v42 = vld [vmem:[%s17399_s21 + $0x108] sm:$0xff] }
 0xa9c   :  { %v8396_v29 = vmax.f32 %v8392_v11, 0.0  ;;  %v13570_v11 = vld [vmem:[%s17399_s21 + $0x1a8] sm:$0xff] }
 0xa9e   :  { %v16739_v53 = vpack.c.bf16 %v8396_v29, %v8395_v60  ;;  %v13541_v60 = vld [vmem:[%s17399_s21 + $0xc0] sm:$0xff] }
 0xa9f   :  { %v13549_v29 = vld [vmem:[%s17399_s21 + $0x100] sm:$0xff] }
 0xaa0   :  { %8409 = vmatpush.bf16.msrb.mxu2 %v16739_v53  ;;  %8427 = vmatpush.bf16.msrb.mxu3 %v16739_v53 }
 0xaa1   :  { %8445 = vmatpush.bf16.msrb.mxu0 %v16739_v53  ;;  %8517 = vmatpush.bf16.msrb.mxu1 %v16739_v53 }
 0xaa4   :  { %8410 = vmatpush.bf16.msrb.mxu2 %v16745_v31  ;;  %8428 = vmatpush.bf16.msrb.mxu3 %v16745_v31 }
 0xaa5   :  { %8446 = vmatpush.bf16.msrb.mxu0 %v16745_v31  ;;  %8518 = vmatpush.bf16.msrb.mxu1 %v16745_v31 }
 0xaa7   :  { %12367 = vmatmul.msk.bf16.vlgmr.msrb.gmra.mxu2 %vm7148_vm1, %v8399_v25  ;;  %12368 = vmatmul.msk.bf16.vlgmr.msrb.gmra.mxu3 %vm7148_vm1, %v8417_v8  ;;  %v13579_v25 = vld [vmem:[%s17399_s21 + $0x1f0] sm:$0xff]  ;;  %v13578_v8 = vld [vmem:[%s17399_s21 + $0x1e8] sm:$0xff] }
 0xaa8   :  { %8463 = vmatpush.bf16.msra.mxu2 %v16739_v53  ;;  %8481 = vmatpush.bf16.msra.mxu3 %v16739_v53 }
 0xaa9   :  { %8499 = vmatpush.bf16.msra.mxu0 %v16739_v53  ;;  %12373 = vmatmul.msk.bf16.vlgmr.msrb.gmra.mxu1 %vm7148_vm1, %v8507_v6  ;;  %v13567_v6 = vld [vmem:[%s17399_s21 + $0x190] sm:$0xff] }
 0xaaa   :  { %12369 = vmatmul.msk.bf16.vlgmr.msrb.gmra.mxu0 %vm7148_vm1, %v8435_v0  ;;  %9150 = vmatpush.bf16.msra.mxu1 %v13532_v32  ;;  %v13568_v0 = vld [vmem:[%s17399_s21 + $0x198] sm:$0xff]  ;;  %v13577_v32 = vld [vmem:[%s17399_s21 + $0x1e0] sm:$0xff] }
 0xaac   :  { %8464 = vmatpush.bf16.msra.mxu2 %v16745_v31  ;;  %8482 = vmatpush.bf16.msra.mxu3 %v16745_v31 }
 0xaad   :  { %8500 = vmatpush.bf16.msra.mxu0 %v16745_v31 }
 0xaae   :  { %9151 = vmatpush.bf16.msra.mxu1 %v13531_v52  ;;  %v13576_v52 = vld [vmem:[%s17399_s21 + $0x1d8] sm:$0xff] }
 0xab0   :  { %8535 = vmatpush.bf16.msrb.mxu2 %v16739_v53  ;;  %8553 = vmatpush.bf16.msrb.mxu3 %v16739_v53 }
 0xab1   :  { %9137 = vmatpush.bf16.msrb.mxu0 %v13524_v63  ;;  %v13566_v63 = vld [vmem:[%s17399_s21 + $0x188] sm:$0xff] }
 0xab2   :  { %9152 = vmatpush.bf16.msra.mxu1 %v13530_v19  ;;  %v13575_v19 = vld [vmem:[%s17399_s21 + $0x1d0] sm:$0xff] }
 0xab4   :  { %8536 = vmatpush.bf16.msrb.mxu2 %v16745_v31  ;;  %8554 = vmatpush.bf16.msrb.mxu3 %v16745_v31 }
 0xab5   :  { %9138 = vmatpush.bf16.msrb.mxu0 %v13523_v10  ;;  %v13565_v10 = vld [vmem:[%s17399_s21 + $0x180] sm:$0xff] }
 0xab6   :  { %9153 = vmatpush.bf16.msra.mxu1 %v13529_v49 }
 0xab7   :  { %12370 = vmatmul.msk.bf16.vlgmr.msra.gmra.mxu2 %vm7148_vm1, %v8453_v45  ;;  %12371 = vmatmul.msk.bf16.vlgmr.msra.gmra.mxu3 %vm7148_vm1, %v8471_v62 }
 0xab8   :  { %9163 = vmatpush.bf16.msra.mxu2 %v13540_v1  ;;  %9176 = vmatpush.bf16.msra.mxu3 %v13548_v14  ;;  %v13573_v1 = vld [vmem:[%s17399_s21 + $0x1c0] sm:$0xff] }
 0xab9   :  { %9139 = vmatpush.bf16.msrb.mxu0 %v13522_v13  ;;  %v13574_v13 = vld [vmem:[%s17399_s21 + $0x1c8] sm:$0xff] }
 0xaba   :  { %12372 = vmatmul.msk.bf16.vlgmr.msra.gmra.mxu0 %vm7148_vm1, %v8489_v4  ;;  %9154 = vmatpush.bf16.msra.mxu1 %v13528_v58 }
 0xabc   :  { %9164 = vmatpush.bf16.msra.mxu2 %v13539_v47  ;;  %9177 = vmatpush.bf16.msra.mxu3 %v13547_v16  ;;  %v13587_v16 = vld [vmem:[%s17399_s21 + $0x230] sm:$0xff] }
 0xabd   :  { %9140 = vmatpush.bf16.msrb.mxu0 %v13521_v38  ;;  %v13588_v38 = vld [vmem:[%s17399_s21 + $0x238] sm:$0xff] }
 0xabe   :  { %9155 = vmatpush.bf16.msra.mxu1 %v13527_v18 }
 0xac0   :  { %9165 = vmatpush.bf16.msra.mxu2 %v13538_v48  ;;  %9178 = vmatpush.bf16.msra.mxu3 %v13546_v9  ;;  %v13586_v48 = vld [vmem:[%s17399_s21 + $0x228] sm:$0xff] }
 0xac1   :  { %9141 = vmatpush.bf16.msrb.mxu0 %v13520_v20 }
 0xac2   :  { %9156 = vmatpush.bf16.msra.mxu1 %v13526_v35 }
 0xac4   :  { %9166 = vmatpush.bf16.msra.mxu2 %v13537_v55  ;;  %9179 = vmatpush.bf16.msra.mxu3 %v13545_v40  ;;  %v13585_v55 = vld [vmem:[%s17399_s21 + $0x220] sm:$0xff] }
 0xac5   :  { %9142 = vmatpush.bf16.msrb.mxu0 %v13519_v56 }
 0xac6   :  { %9157 = vmatpush.bf16.msra.mxu1 %v13525_v57  ;;  %v13584_v57 = vld [vmem:[%s17399_s21 + $0x218] sm:$0xff] }
 0xac7   :  { %12374 = vmatmul.msk.bf16.vlgmr.msrb.gmra.mxu2 %vm7148_vm1, %v8525_v3  ;;  %12375 = vmatmul.msk.bf16.vlgmr.msrb.gmra.mxu3 %vm7148_vm1, %v8543_v27 }
 0xac8   :  { %9167 = vmatpush.bf16.msra.mxu2 %v13536_v46  ;;  %9180 = vmatpush.bf16.msra.mxu3 %v13544_v23  ;;  %v13582_v23 = vld [vmem:[%s17399_s21 + $0x208] sm:$0xff] }
 0xac9   :  { %9143 = vmatpush.bf16.msrb.mxu0 %v13518_v54 }
 0xaca   :  { %9202 = vmatpush.bf16.msrb.mxu1 %v13564_v44 }
 0xacc   :  { %9168 = vmatpush.bf16.msra.mxu2 %v13535_v59  ;;  %9181 = vmatpush.bf16.msra.mxu3 %v13543_v7 }
 0xacd   :  { %9144 = vmatpush.bf16.msrb.mxu0 %v13517_v33 }
 0xace   :  { %9203 = vmatpush.bf16.msrb.mxu1 %v13563_v34  ;;  %v13581_v34 = vld [vmem:[%s17399_s21 + $0x200] sm:$0xff] }
 0xad0   :  { %9169 = vmatpush.bf16.msra.mxu2 %v13534_v21  ;;  %9182 = vmatpush.bf16.msra.mxu3 %v13542_v28 }
 0xad1   :  { %9189 = vmatpush.bf16.msra.mxu0 %v13556_v24 }
 0xad2   :  { %9204 = vmatpush.bf16.msrb.mxu1 %v13562_v50  ;;  %v9262_v50 = vld [vmem:[%s17400_s25] sm:$0xf] }
 0xad4   :  { %9170 = vmatpush.bf16.msra.mxu2 %v13533_v12  ;;  %9183 = vmatpush.bf16.msra.mxu3 %v13541_v60  ;;  %v13593_v12 = vld [vmem:[%s17401_s29 + $0x20] sm:$0xff] }
 0xad5   :  { %9190 = vmatpush.bf16.msra.mxu0 %v13555_v26 }
 0xad6   :  { %9205 = vmatpush.bf16.msrb.mxu1 %v13561_v17  ;;  %v13596_v17 = vld [vmem:[%s17401_s29 + $0x38] sm:$0xff] }
 0xad8   :  { %9215 = vmatpush.bf16.msrb.mxu2 %v13572_v22  ;;  %9228 = vmatpush.bf16.msrb.mxu3 %v13580_v43  ;;  %v13592_v22 = vld [vmem:[%s17401_s29 + $0x18] sm:$0xff] }
 0xad9   :  { %9191 = vmatpush.bf16.msra.mxu0 %v13554_v30 }
 0xada   :  { %9206 = vmatpush.bf16.msrb.mxu1 %v13560_v15  ;;  %v13594_v15 = vld [vmem:[%s17401_s29 + $0x28] sm:$0xff] }
 0xadc   :  { %9216 = vmatpush.bf16.msrb.mxu2 %v13571_v41  ;;  %9229 = vmatpush.bf16.msrb.mxu3 %v13579_v25  ;;  %v13589_v25 = vld [vmem:[%s17401_s29] sm:$0xff] }
 0xadd   :  { %9192 = vmatpush.bf16.msra.mxu0 %v13553_v61  ;;  %v13595_v61 = vld [vmem:[%s17401_s29 + $0x30] sm:$0xff] }
 0xade   :  { %9207 = vmatpush.bf16.msrb.mxu1 %v13559_v39 }
 0xae0   :  { %9217 = vmatpush.bf16.msrb.mxu2 %v13570_v11  ;;  %9230 = vmatpush.bf16.msrb.mxu3 %v13578_v8  ;;  %v13590_v11 = vld [vmem:[%s17401_s29 + $0x8] sm:$0xff] }
 0xae1   :  { %9193 = vmatpush.bf16.msra.mxu0 %v13552_v51 }
 0xae2   :  { %9208 = vmatpush.bf16.msrb.mxu1 %v13558_v2 }
 0xae4   :  { %9218 = vmatpush.bf16.msrb.mxu2 %v13569_v36  ;;  %9231 = vmatpush.bf16.msrb.mxu3 %v13577_v32 }
 0xae5   :  { %9194 = vmatpush.bf16.msra.mxu0 %v13551_v5 }
 0xae6   :  { %9209 = vmatpush.bf16.msrb.mxu1 %v13557_v37  ;;  %v13591_v37 = vld [vmem:[%s17401_s29 + $0x10] sm:$0xff] }
 0xae8   :  { %9219 = vmatpush.bf16.msrb.mxu2 %v13568_v0  ;;  %9232 = vmatpush.bf16.msrb.mxu3 %v13576_v52 }
 0xae9   :  { %9195 = vmatpush.bf16.msra.mxu0 %v13550_v42 }
 0xaec   :  { %9220 = vmatpush.bf16.msrb.mxu2 %v13567_v6  ;;  %9233 = vmatpush.bf16.msrb.mxu3 %v13575_v19 }
 0xaed   :  { %9196 = vmatpush.bf16.msra.mxu0 %v13549_v29 }
 0xaf0   :  { %9221 = vmatpush.bf16.msrb.mxu2 %v13566_v63  ;;  %9234 = vmatpush.bf16.msrb.mxu3 %v13574_v13 }
 0xaf4   :  { %9222 = vmatpush.bf16.msrb.mxu2 %v13565_v10  ;;  %9235 = vmatpush.bf16.msrb.mxu3 %v13573_v1 }
 0xb26   :  { %v8520_v4 = vpop.f32.mrf.mxu1 }
 0xb27   :  { %v8448_v45 = vpop.f32.mrf.mxu0  ;;  %v8524_v35 = vpack.c.bf16 %v8520_v4, %v8520_v4 }
 0xb28   :  { %v8452_v62 = vpack.c.bf16 %v8448_v45, %v8448_v45 }
 0xb2a   :  { %9171 = vmatmul.bf16.vlgmr.msra.gmra.mxu2 %v8452_v62  ;;  %v8412_v49 = vpop.f32.mrf.mxu2  ;;  %v8430_v58 = vpop.f32.mrf.mxu3 }
 0xb2b   :  { %v8416_v14 = vpack.c.bf16 %v8412_v49, %v8412_v49  ;;  %v8434_v20 = vpack.c.bf16 %v8430_v58, %v8430_v58  ;;  %9344 = vmatpush.bf16.msra.mxu2 %v13596_v17  ;;  %v13599_v17 = vld [vmem:[%s17404_s14 + $0x10] sm:$0xff] }
 0xb2d   :  { %9145 = vmatmul.bf16.vlgmr.msrb.gmra.mxu0 %v8416_v14  ;;  %9158 = vmatmul.bf16.vlgmr.msra.gmra.mxu1 %v8434_v20  ;;  %v13722_v14 = vld [vmem:[%s17402_s3] ss:$0 sm:$0xff]  ;;  %v13723_v20 = vld [vmem:[%s17402_s3 + $0x1] ss:$0 sm:$0xff] }
 0xb2e   :  { %9241 = vmatpush.bf16.msrb.mxu0 %v13588_v38  ;;  %v8522_v18 = vpop.f32.mrf.mxu1  ;;  %9272 = vmatpush.bf16.msra.mxu1 %v16739_v53 }
 0xb2f   :  { %v8450_v47 = vpop.f32.mrf.mxu0  ;;  %9345 = vmatpush.bf16.msra.mxu2 %v13595_v61  ;;  %v13616_v61 = vld [vmem:[%s17404_s14 + $0x98] sm:$0xff] }
 0xb32   :  { %v8414_v56 = vpop.f32.mrf.mxu2  ;;  %9242 = vmatpush.bf16.msrb.mxu0 %v13587_v16  ;;  %9273 = vmatpush.bf16.msra.mxu1 %v16745_v31  ;;  %v8432_v9 = vpop.f32.mrf.mxu3  ;;  %v13583_v31 = vld [vmem:[%s17399_s21 + $0x210] sm:$0xff] }
 0xb33   :  { %9346 = vmatpush.bf16.msra.mxu2 %v13594_v15  ;;  %v13610_v15 = vld [vmem:[%s17404_s14 + $0x68] sm:$0xff] }
 0xb36   :  { %9243 = vmatpush.bf16.msrb.mxu0 %v13586_v48 }
 0xb37   :  { %v8502_v54 = vpop.f32.mrf.mxu0  ;;  %9347 = vmatpush.bf16.msra.mxu2 %v13593_v12  ;;  %v13609_v12 = vld [vmem:[%s17404_s14 + $0x60] sm:$0xff] }
 0xb38   :  { %v8506_v3 = vpack.c.bf16 %v8502_v54, %v8502_v54 }
 0xb3a   :  { %9223 = vmatmul.bf16.vlgmr.msrb.gmra.mxu2 %v8524_v35  ;;  %v8466_v40 = vpop.f32.mrf.mxu2  ;;  %9244 = vmatpush.bf16.msrb.mxu0 %v13585_v55  ;;  %v8484_v53 = vpop.f32.mrf.mxu3  ;;  %v9363_v55 = vld [vmem:[%s17403_s8] sm:$0xf] }
 0xb3b   :  { %v8470_v27 = vpack.c.bf16 %v8466_v40, %v8466_v40  ;;  %v8488_v33 = vpack.c.bf16 %v8484_v53, %v8484_v53  ;;  %9348 = vmatpush.bf16.msra.mxu2 %v13592_v22  ;;  %v9386_v40 = vld [vmem:[%s17403_s8 + $0x4] sm:$0xf]  ;;  %v13604_v53 = vld [vmem:[%s17404_s14 + $0x38] sm:$0xff] }
 0xb3c   :  { %v13625_v22 = vld [vmem:[%s17404_s14 + $0xe0] sm:$0xff] }
 0xb3d   :  { %9184 = vmatmul.bf16.vlgmr.msra.gmra.mxu3 %v8470_v27  ;;  %9197 = vmatmul.bf16.vlgmr.msra.gmra.mxu0 %v8488_v33  ;;  %v9458_v27 = vld [vmem:[%s17403_s8 + $0x14] sm:$0xf]  ;;  %v13620_v33 = vld [vmem:[%s17404_s14 + $0xb8] sm:$0xff] }
 0xb3e   :  { %9210 = vmatmul.bf16.vlgmr.msrb.gmra.mxu1 %v8506_v3  ;;  %9245 = vmatpush.bf16.msrb.mxu0 %v13584_v57  ;;  %v9422_v3 = vld [vmem:[%s17403_s8 + $0xc] sm:$0xf]  ;;  %v13603_v57 = vld [vmem:[%s17404_s14 + $0x30] sm:$0xff] }
 0xb3f   :  { %v8504_v44 = vpop.f32.mrf.mxu0  ;;  %9349 = vmatpush.bf16.msra.mxu2 %v13591_v37  ;;  %v13636_v37 = vld [vmem:[%s17404_s14 + $0x138] sm:$0xff] }
 0xb40   :  { %v13619_v44 = vld [vmem:[%s17404_s14 + $0xb0] sm:$0xff] }
 0xb42   :  { %v8468_v24 = vpop.f32.mrf.mxu2  ;;  %v8486_v46 = vpop.f32.mrf.mxu3  ;;  %9246 = vmatpush.bf16.msrb.mxu0 %v13583_v31  ;;  %v13602_v31 = vld [vmem:[%s17404_s14 + $0x28] sm:$0xff] }
 0xb43   :  { %9350 = vmatpush.bf16.msra.mxu2 %v13590_v11  ;;  %v13618_v24 = vld [vmem:[%s17404_s14 + $0xa8] sm:$0xff]  ;;  %v13601_v46 = vld [vmem:[%s17404_s14 + $0x20] sm:$0xff]  ;;  %v13608_v11 = vld [vmem:[%s17404_s14 + $0x58] sm:$0xff] }
 0xb46   :  { %9247 = vmatpush.bf16.msrb.mxu0 %v13582_v23  ;;  %v9404_v23 = vld [vmem:[%s17403_s8 + $0x8] sm:$0xf] }
 0xb47   :  { %9351 = vmatpush.bf16.msra.mxu2 %v13589_v25  ;;  %v13634_v25 = vld [vmem:[%s17404_s14 + $0x128] sm:$0xff] }
 0xb4a   :  { %v8538_v26 = vpop.f32.mrf.mxu2  ;;  %v8556_v7 = vpop.f32.mrf.mxu3  ;;  %9248 = vmatpush.bf16.msrb.mxu0 %v13581_v34  ;;  %v9440_v34 = vld [vmem:[%s17403_s8 + $0x10] sm:$0xf] }
 0xb4b   :  { %v8542_v59 = vpack.c.bf16 %v8538_v26, %v8538_v26  ;;  %v8560_v30 = vpack.c.bf16 %v8556_v7, %v8556_v7  ;;  %v13612_v26 = vld [vmem:[%s17404_s14 + $0x78] sm:$0xff] }
 0xb4c   :  { %v9494_v7 = vld [vmem:[%s17403_s8 + $0x1c] sm:$0xf] }
 0xb4d   :  { %9236 = vmatmul.bf16.vlgmr.msrb.gmra.mxu3 %v8542_v59  ;;  %9249 = vmatmul.bf16.vlgmr.msrb.gmra.mxu0 %v8560_v30  ;;  %v13628_v59 = vld [vmem:[%s17404_s14 + $0xf8] sm:$0xff]  ;;  %v13617_v30 = vld [vmem:[%s17404_s14 + $0xa0] sm:$0xff] }
 0xb4e   :  { %12664 = vmatmul.msk.bf16.vlgmr.msra.gmra.mxu1 %vm7148_vm1, %v9262_v50  ;;  %v13600_v50 = vld [vmem:[%s17404_s14 + $0x18] sm:$0xff] }
 0xb52   :  { %v8540_v21 = vpop.f32.mrf.mxu2  ;;  %v8558_v28 = vpop.f32.mrf.mxu3 }
 0xb53   :  { %v13611_v21 = vld [vmem:[%s17404_s14 + $0x70] sm:$0xff] }
 0xb54   :  { %v13627_v28 = vld [vmem:[%s17404_s14 + $0xf0] sm:$0xff] }
 0xbaa   :  { %v9146_v51 = vpop.f32.mrf.mxu0  ;;  %v9159_v39 = vpop.f32.mrf.mxu1 }
 0xbab   :  { %v9160_v36 = vadd.f32 %v9159_v39, %v9146_v51  ;;  %v13626_v51 = vld [vmem:[%s17404_s14 + $0xe8] sm:$0xff] }
 0xbac   :  { %v13598_v39 = vld [vmem:[%s17404_s14 + $0x8] sm:$0xff] }
 0xbad   :  { %v9172_v2 = vpop.f32.mrf.mxu2 }
 0xbae   :  { %v9173_v0 = vadd.f32 %v9172_v2, %v9160_v36  ;;  %v13615_v2 = vld [vmem:[%s17404_s14 + $0x90] sm:$0xff] }
 0xbaf   :  { %v13623_v36 = vld [vmem:[%s17404_s14 + $0xd0] sm:$0xff] }
 0xbb2   :  { %v9148_v5 = vpop.f32.mrf.mxu0  ;;  %v9161_v41 = vpop.f32.mrf.mxu1 }
 0xbb3   :  { %v13597_v5 = vld [vmem:[%s17404_s14] sm:$0xff]  ;;  %v9476_v41 = vld [vmem:[%s17403_s8 + $0x18] sm:$0xf] }
 0xbb5   :  { %v9174_v42 = vpop.f32.mrf.mxu2 }
 0xbb6   :  { %v9512_v42 = vld [vmem:[%s17403_s8 + $0x20] sm:$0xf] }
 0xbba   :  { %v9198_v60 = vpop.f32.mrf.mxu0 }
 0xbbb   :  { %v9211_v29 = vpop.f32.mrf.mxu1 }
 0xbbd   :  { %v9224_v43 = vpop.f32.mrf.mxu2 }
 0xbc0   :  { %v9185_v8 = vpop.f32.mrf.mxu3 }
 0xbc1   :  { %v9186_v6 = vadd.f32 %v9185_v8, %v9173_v0  ;;  %v13606_v8 = vld [vmem:[%s17404_s14 + $0x48] sm:$0xff]  ;;  %v13633_v0 = vld [vmem:[%s17404_s14 + $0x120] sm:$0xff] }
 0xbc2   :  { %v9200_v32 = vpop.f32.mrf.mxu0 }
 0xbc3   :  { %v9213_v63 = vpop.f32.mrf.mxu1  ;;  %v9199_v10 = vadd.f32 %v9198_v60, %v9186_v6  ;;  %v13624_v60 = vld [vmem:[%s17404_s14 + $0xd8] sm:$0xff]  ;;  %v13605_v6 = vld [vmem:[%s17404_s14 + $0x40] sm:$0xff] }
 0xbc4   :  { %v13644_v32 = vld [vmem:[%s17404_s14 + $0x178] sm:$0xff] }
 0xbc5   :  { %v9226_v52 = vpop.f32.mrf.mxu2  ;;  %v9212_v13 = vadd.f32 %v9211_v29, %v9199_v10  ;;  %v13635_v29 = vld [vmem:[%s17404_s14 + $0x130] sm:$0xff]  ;;  %v13632_v63 = vld [vmem:[%s17404_s14 + $0x118] sm:$0xff]  ;;  %v13630_v10 = vld [vmem:[%s17404_s14 + $0x108] sm:$0xff] }
 0xbc6   :  { %v13631_v52 = vld [vmem:[%s17404_s14 + $0x110] sm:$0xff] }
 0xbc7   :  { %v9225_v49 = vadd.f32 %v9224_v43, %v9212_v13  ;;  %v13607_v43 = vld [vmem:[%s17404_s14 + $0x50] sm:$0xff]  ;;  %v13622_v13 = vld [vmem:[%s17404_s14 + $0xc8] sm:$0xff] }
 0xbc8   :  { %v9187_v19 = vpop.f32.mrf.mxu3 }
 0xbc9   :  { %v13643_v19 = vld [vmem:[%s17404_s14 + $0x170] sm:$0xff] }
 0xbca   :  { %v9250_v45 = vpop.f32.mrf.mxu0 }
 0xbcb   :  { %v9275_v62 = vpop.f32.mrf.mxu1 }
 0xbcc   :  { %v9279_v4 = vpack.c.bf16 %v9275_v62, %v9275_v62  ;;  %v13642_v62 = vld [vmem:[%s17404_s14 + $0x168] sm:$0xff] }
 0xbce   :  { %9352 = vmatmul.bf16.vlgmr.msra.gmra.mxu2 %v9279_v4  ;;  %v13621_v4 = vld [vmem:[%s17404_s14 + $0xc0] sm:$0xff] }
 0xbd0   :  { %v9237_v38 = vpop.f32.mrf.mxu3 }
 0xbd1   :  { %v9238_v1 = vadd.f32 %v9237_v38, %v9225_v49  ;;  %v13629_v49 = vld [vmem:[%s17404_s14 + $0x100] sm:$0xff]  ;;  %v13660_v38 = vld [vmem:[%s17404_s14 + $0x1f8] sm:$0xff] }
 0xbd2   :  { %v9252_v47 = vpop.f32.mrf.mxu0 }
 0xbd3   :  { %v9251_v58 = vadd.f32 %v9250_v45, %v9238_v1  ;;  %v9277_v16 = vpop.f32.mrf.mxu1  ;;  %v13614_v45 = vld [vmem:[%s17404_s14 + $0x88] sm:$0xff]  ;;  %v13613_v1 = vld [vmem:[%s17404_s14 + $0x80] sm:$0xff]  ;;  %v13651_v47 = vld [vmem:[%s17404_s14 + $0x1b0] sm:$0xff] }
 0xbd4   :  { %v13640_v16 = vld [vmem:[%s17404_s14 + $0x158] sm:$0xff] }
 0xbd5   :  { %v9256_v18 = vmul.f32 %v13722_v14, %v9251_v58  ;;  %v13652_v14 = vld [vmem:[%s17404_s14 + $0x1b8] sm:$0xff]  ;;  %v13641_v58 = vld [vmem:[%s17404_s14 + $0x160] sm:$0xff] }
 0xbd7   :  { %v9259_v56 = vadd.f32 %v13723_v20, %v9256_v18  ;;  %v13659_v20 = vld [vmem:[%s17404_s14 + $0x1f0] sm:$0xff]  ;;  %v13658_v18 = vld [vmem:[%s17404_s14 + $0x1e8] sm:$0xff] }
 0xbd8   :  { %v9239_v48 = vpop.f32.mrf.mxu3 }
 0xbd9   :  { %v9260_v9 = vmax.f32 %v9259_v56, 0.0  ;;  %v13650_v56 = vld [vmem:[%s17404_s14 + $0x1a8] sm:$0xff] }
 0xbdb   :  { %v9261_v35 = vpack.c.bf16 %v9260_v9, %v9260_v9  ;;  %v13639_v9 = vld [vmem:[%s17404_s14 + $0x150] sm:$0xff] }
 0xbdd   :  { %v9370_v54 = vsel %vm9368_vm2, %v9261_v35, 0  ;;  %v13657_v35 = vld [vmem:[%s17404_s14 + $0x1e0] sm:$0xff] }
 0xbde   :  { %9379 = vmatpush.bf16.msra.mxu3 %v9370_v54  ;;  %9397 = vmatpush.bf16.msrb.mxu1 %v9370_v54 }
 0xbdf   :  { %9433 = vmatpush.bf16.msra.mxu0 %v9370_v54  ;;  %9469 = vmatpush.bf16.msrb.mxu2 %v9370_v54 }
 0xbe1   :  { %12697 = vmatmul.msk.bf16.vlgmr.msra.gmra.mxu3 %vm9364_vm3, %v9363_v55  ;;  %12698 = vmatmul.msk.bf16.vlgmr.msrb.gmra.mxu1 %vm9364_vm3, %v9386_v40  ;;  %v13638_v55 = vld [vmem:[%s17404_s14 + $0x148] sm:$0xff]  ;;  %v13656_v40 = vld [vmem:[%s17404_s14 + $0x1d8] sm:$0xff] }
 0xbe2   :  { %9415 = vmatpush.bf16.msrb.mxu3 %v9370_v54  ;;  %9451 = vmatpush.bf16.msra.mxu1 %v9370_v54 }
 0xbe3   :  { %12700 = vmatmul.msk.bf16.vlgmr.msra.gmra.mxu0 %vm9364_vm3, %v9422_v3  ;;  %12702 = vmatmul.msk.bf16.vlgmr.msrb.gmra.mxu2 %vm9364_vm3, %v9458_v27  ;;  %v13648_v3 = vld [vmem:[%s17404_s14 + $0x198] sm:$0xff] }
 0xbe4   :  { %9505 = vmatpush.bf16.msrb.mxu0 %v9370_v54  ;;  %10106 = vmatpush.bf16.msra.mxu2 %v13604_v53  ;;  %v13637_v53 = vld [vmem:[%s17404_s14 + $0x140] sm:$0xff] }
 0xbe6   :  { %9487 = vmatpush.bf16.msra.mxu3 %v9370_v54  ;;  %9523 = vmatpush.bf16.msrb.mxu1 %v9370_v54  ;;  %v13649_v54 = vld [vmem:[%s17404_s14 + $0x1a0] sm:$0xff] }
 0xbe8   :  { %10132 = vmatpush.bf16.msra.mxu0 %v13620_v33  ;;  %10107 = vmatpush.bf16.msra.mxu2 %v13603_v57  ;;  %v13655_v57 = vld [vmem:[%s17404_s14 + $0x1d0] sm:$0xff] }
 0xbe9   :  { %v13647_v33 = vld [vmem:[%s17404_s14 + $0x190] sm:$0xff] }
 0xbec   :  { %10133 = vmatpush.bf16.msra.mxu0 %v13619_v44  ;;  %10108 = vmatpush.bf16.msra.mxu2 %v13602_v31 }
 0xbf0   :  { %10134 = vmatpush.bf16.msra.mxu0 %v13618_v24  ;;  %10109 = vmatpush.bf16.msra.mxu2 %v13601_v46  ;;  %v13654_v24 = vld [vmem:[%s17404_s14 + $0x1c8] sm:$0xff] }
 0xbf1   :  { %12699 = vmatmul.msk.bf16.vlgmr.msrb.gmra.mxu3 %vm9364_vm3, %v9404_v23  ;;  %12701 = vmatmul.msk.bf16.vlgmr.msra.gmra.mxu1 %vm9364_vm3, %v9440_v34  ;;  %v13646_v23 = vld [vmem:[%s17404_s14 + $0x188] sm:$0xff] }
 0xbf2   :  { %10119 = vmatpush.bf16.msrb.mxu3 %v13612_v26  ;;  %10145 = vmatpush.bf16.msra.mxu1 %v13628_v59  ;;  %v13653_v26 = vld [vmem:[%s17404_s14 + $0x1c0] sm:$0xff] }
 0xbf3   :  { %12704 = vmatmul.msk.bf16.vlgmr.msrb.gmra.mxu0 %vm9364_vm3, %v9494_v7  ;;  %v13668_v7 = vld [vmem:[%s17404_s14 + $0x238] sm:$0xff] }
 0xbf4   :  { %10110 = vmatpush.bf16.msra.mxu2 %v13600_v50  ;;  %10135 = vmatpush.bf16.msra.mxu0 %v13617_v30  ;;  %v13645_v30 = vld [vmem:[%s17404_s14 + $0x180] sm:$0xff] }
 0xbf6   :  { %10120 = vmatpush.bf16.msrb.mxu3 %v13611_v21  ;;  %10146 = vmatpush.bf16.msra.mxu1 %v13627_v28 }
 0xbf8   :  { %10111 = vmatpush.bf16.msra.mxu2 %v13599_v17  ;;  %10136 = vmatpush.bf16.msra.mxu0 %v13616_v61  ;;  %v13667_v17 = vld [vmem:[%s17404_s14 + $0x230] sm:$0xff] }
 0xbfa   :  { %10121 = vmatpush.bf16.msrb.mxu3 %v13610_v15  ;;  %10147 = vmatpush.bf16.msra.mxu1 %v13626_v51  ;;  %v13666_v51 = vld [vmem:[%s17404_s14 + $0x228] sm:$0xff] }
 0xbfc   :  { %10112 = vmatpush.bf16.msra.mxu2 %v13598_v39  ;;  %10137 = vmatpush.bf16.msra.mxu0 %v13615_v2 }
 0xbfe   :  { %10122 = vmatpush.bf16.msrb.mxu3 %v13609_v12  ;;  %10148 = vmatpush.bf16.msra.mxu1 %v13625_v22  ;;  %v13665_v22 = vld [vmem:[%s17404_s14 + $0x220] sm:$0xff] }
 0xc00   :  { %10113 = vmatpush.bf16.msra.mxu2 %v13597_v5  ;;  %10138 = vmatpush.bf16.msra.mxu0 %v13614_v45 }
 0xc01   :  { %12703 = vmatmul.msk.bf16.vlgmr.msra.gmra.mxu3 %vm9364_vm3, %v9476_v41  ;;  %12705 = vmatmul.msk.bf16.vlgmr.msrb.gmra.mxu1 %vm9364_vm3, %v9512_v42 }
 0xc02   :  { %10123 = vmatpush.bf16.msrb.mxu3 %v13608_v11  ;;  %10149 = vmatpush.bf16.msra.mxu1 %v13624_v60  ;;  %v13664_v11 = vld [vmem:[%s17404_s14 + $0x218] sm:$0xff] }
 0xc04   :  { %10158 = vmatpush.bf16.msrb.mxu2 %v13636_v37  ;;  %10139 = vmatpush.bf16.msra.mxu0 %v13613_v1 }
 0xc06   :  { %10124 = vmatpush.bf16.msrb.mxu3 %v13607_v43  ;;  %10150 = vmatpush.bf16.msra.mxu1 %v13623_v36  ;;  %v13663_v43 = vld [vmem:[%s17404_s14 + $0x210] sm:$0xff] }
 0xc08   :  { %10159 = vmatpush.bf16.msrb.mxu2 %v13635_v29  ;;  %10184 = vmatpush.bf16.msrb.mxu0 %v13652_v14 }
 0xc0a   :  { %10125 = vmatpush.bf16.msrb.mxu3 %v13606_v8  ;;  %10151 = vmatpush.bf16.msra.mxu1 %v13622_v13  ;;  %v13662_v8 = vld [vmem:[%s17404_s14 + $0x208] sm:$0xff] }
 0xc0c   :  { %10160 = vmatpush.bf16.msrb.mxu2 %v13634_v25  ;;  %10185 = vmatpush.bf16.msrb.mxu0 %v13651_v47 }
 0xc0e   :  { %10126 = vmatpush.bf16.msrb.mxu3 %v13605_v6  ;;  %10152 = vmatpush.bf16.msra.mxu1 %v13621_v4  ;;  %v13661_v6 = vld [vmem:[%s17404_s14 + $0x200] sm:$0xff] }
 0xc10   :  { %10161 = vmatpush.bf16.msrb.mxu2 %v13633_v0  ;;  %10186 = vmatpush.bf16.msrb.mxu0 %v13650_v56  ;;  %v13676_v56 = vld [vmem:[%s13934_s27 + $0x38] sm:$0xff] }
 0xc12   :  { %10171 = vmatpush.bf16.msra.mxu3 %v13644_v32  ;;  %10197 = vmatpush.bf16.msrb.mxu1 %v13660_v38 }
 0xc14   :  { %10162 = vmatpush.bf16.msrb.mxu2 %v13632_v63  ;;  %10187 = vmatpush.bf16.msrb.mxu0 %v13649_v54 }
 0xc16   :  { %10172 = vmatpush.bf16.msra.mxu3 %v13643_v19  ;;  %10198 = vmatpush.bf16.msrb.mxu1 %v13659_v20 }
 0xc18   :  { %10163 = vmatpush.bf16.msrb.mxu2 %v13631_v52  ;;  %10188 = vmatpush.bf16.msrb.mxu0 %v13648_v3  ;;  %v13674_v3 = vld [vmem:[%s13934_s27 + $0x28] sm:$0xff] }
 0xc1a   :  { %10173 = vmatpush.bf16.msra.mxu3 %v13642_v62  ;;  %10199 = vmatpush.bf16.msrb.mxu1 %v13658_v18 }
 0xc1c   :  { %10164 = vmatpush.bf16.msrb.mxu2 %v13630_v10  ;;  %10189 = vmatpush.bf16.msrb.mxu0 %v13647_v33 }
 0xc1e   :  { %10174 = vmatpush.bf16.msra.mxu3 %v13641_v58  ;;  %10200 = vmatpush.bf16.msrb.mxu1 %v13657_v35 }
 0xc20   :  { %10165 = vmatpush.bf16.msrb.mxu2 %v13629_v49  ;;  %10190 = vmatpush.bf16.msrb.mxu0 %v13646_v23  ;;  %v13672_v23 = vld [vmem:[%s13934_s27 + $0x18] sm:$0xff] }
 0xc22   :  { %10175 = vmatpush.bf16.msra.mxu3 %v13640_v16  ;;  %10201 = vmatpush.bf16.msrb.mxu1 %v13656_v40 }
 0xc24   :  { %10191 = vmatpush.bf16.msrb.mxu0 %v13645_v30 }
 0xc26   :  { %10176 = vmatpush.bf16.msra.mxu3 %v13639_v9  ;;  %10202 = vmatpush.bf16.msrb.mxu1 %v13655_v57 }
 0xc2a   :  { %10177 = vmatpush.bf16.msra.mxu3 %v13638_v55  ;;  %10203 = vmatpush.bf16.msrb.mxu1 %v13654_v24  ;;  %v13675_v55 = vld [vmem:[%s13934_s27 + $0x30] sm:$0xff] }
 0xc2e   :  { %10178 = vmatpush.bf16.msra.mxu3 %v13637_v53  ;;  %10204 = vmatpush.bf16.msrb.mxu1 %v13653_v26 }
 0xc51   :  { %v16935_v48 = vpop.f32.mrf.mxu2 }
 0xc59   :  { %v9355_v27 = vpop.f32.mrf.mxu2 }
 0xc5e   :  { %v9399_v44 = vpop.f32.mrf.mxu1 }
 0xc5f   :  { %v9403_v31 = vpack.c.bf16 %v9399_v44, %v9399_v44  ;;  %v13673_v44 = vld [vmem:[%s13934_s27 + $0x20] sm:$0xff] }
 0xc60   :  { %v9435_v46 = vpop.f32.mrf.mxu0 }
 0xc61   :  { %10127 = vmatmul.bf16.vlgmr.msrb.gmra.mxu3 %v9403_v31  ;;  %v9439_v34 = vpack.c.bf16 %v9435_v46, %v9435_v46  ;;  %v13724_v31 = vld [vmem:[%s17405_s19] ss:$0 sm:$0xff] }
 0xc62   :  { %v13726_v46 = vld [vmem:[%s17406_s24] ss:$0 sm:$0xff]  ;;  %v9359_v26 = vmul.f32 %v13724_v31, %v16935_v48 }
 0xc63   :  { %10153 = vmatmul.bf16.vlgmr.msra.gmra.mxu1 %v9439_v34 }
 0xc64   :  { %v9381_v59 = vpop.f32.mrf.mxu3 }
 0xc65   :  { %v9385_v50 = vpack.c.bf16 %v9381_v59, %v9381_v59  ;;  %v13725_v59 = vld [vmem:[%s17405_s19 + $0x1] ss:$0 sm:$0xff] }
 0xc66   :  { %v9401_v21 = vpop.f32.mrf.mxu1  ;;  %v9471_v28 = vpop.f32.mrf.mxu2 }
 0xc67   :  { %10114 = vmatmul.bf16.vlgmr.msra.gmra.mxu2 %v9385_v50  ;;  %v9475_v39 = vpack.c.bf16 %v9471_v28, %v9471_v28  ;;  %v13727_v50 = vld [vmem:[%s17406_s24 + $0x1] ss:$0 sm:$0xff]  ;;  %v13671_v28 = vld [vmem:[%s13934_s27 + $0x10] sm:$0xff] }
 0xc68   :  { %10210 = vmatpush.bf16.msra.mxu2 %v13668_v7  ;;  %v9437_v61 = vpop.f32.mrf.mxu0 }
 0xc6c   :  { %10211 = vmatpush.bf16.msra.mxu2 %v13667_v17  ;;  %v9383_v15 = vpop.f32.mrf.mxu3  ;;  %v9362_v17 = vadd.f32 %v13725_v59, %v9359_v26 }
 0xc6e   :  { %v9453_v2 = vpop.f32.mrf.mxu1  ;;  %v9473_v12 = vpop.f32.mrf.mxu2 }
 0xc6f   :  { %v9457_v42 = vpack.c.bf16 %v9453_v2, %v9453_v2 }
 0xc70   :  { %10212 = vmatpush.bf16.msra.mxu2 %v13666_v51  ;;  %v9507_v5 = vpop.f32.mrf.mxu0  ;;  %v13670_v51 = vld [vmem:[%s13934_s27 + $0x8] sm:$0xff] }
 0xc71   :  { %10179 = vmatmul.bf16.vlgmr.msra.gmra.mxu3 %v9475_v39  ;;  %v9511_v41 = vpack.c.bf16 %v9507_v5, %v9507_v5  ;;  %v13669_v5 = vld [vmem:[%s13934_s27] sm:$0xff]  ;;  %s13745_s27 = scalar_lea.hbm %s13944_s12, 2 }
 0xc73   :  { %10205 = vmatmul.bf16.vlgmr.msrb.gmra.mxu1 %v9511_v41 }
 0xc74   :  { %10213 = vmatpush.bf16.msra.mxu2 %v13665_v22  ;;  %v9417_v37 = vpop.f32.mrf.mxu3  ;;  %v10232_v22 = vld [vmem:[%s13929_s20] sm:$0x1]  ;;  %s13741_s20 = sshra.s32 %s10343_s15, 4  ;;  %s13742_s20 = int_to_ptr.hbm [resolvable:$true] %s13741_s20 }
 0xc75   :  { %v9421_v60 = vpack.c.bf16 %v9417_v37, %v9417_v37  ;;  %s13743_s16 = scalar_lea.hbm %s13742_s20, 2  ;;  %p13746_p1 = scmp.lt.s32.totalorder %s13742_s20, %s13944_s12 }
 0xc76   :  { %v9455_v29 = vpop.f32.mrf.mxu1  ;;  %p13744_p0 = scmp.ne.s32.totalorder %s13742_s20, %s13743_s16  ;;  %p13747_p2 = scmp.lt.s32.totalorder %s13745_s27, %s13743_s16 }
 0xc77   :  { %10166 = vmatmul.bf16.vlgmr.msrb.gmra.mxu2 %v9457_v42  ;;  %10140 = vmatmul.bf16.vlgmr.msra.gmra.mxu0 %v9421_v60 }
 0xc78   :  { %10214 = vmatpush.bf16.msra.mxu2 %v13664_v11  ;;  %v9509_v36 = vpop.f32.mrf.mxu0  ;;  %10321 = vmatpush.bf16.msra.mxu0 %v13676_v56  ;;  %v13728_v11 = vld [vmem:[%s13939_s4] ss:$0 sm:$0xff]  ;;  %p13748_p3 = por %p13747_p2, %p13746_p1 }
 0xc7a   :  { %p13749_p4 = pnand %p13748_p3, %p13744_p0 }
 0xc7c   :  { %10215 = vmatpush.bf16.msra.mxu2 %v13663_v43  ;;  %v9419_v25 = vpop.f32.mrf.mxu3  ;;  %10322 = vmatpush.bf16.msra.mxu0 %v13675_v55 }
 0xc7e   :  { %v9525_v0 = vpop.f32.mrf.mxu1 }
 0xc7f   :  { %v9529_v32 = vpack.c.bf16 %v9525_v0, %v9525_v0 }
 0xc80   :  { %10216 = vmatpush.bf16.msra.mxu2 %v13662_v8  ;;  %10323 = vmatpush.bf16.msra.mxu0 %v13674_v3 }
 0xc84   :  { %10217 = vmatpush.bf16.msra.mxu2 %v13661_v6  ;;  %v9489_v63 = vpop.f32.mrf.mxu3  ;;  %10324 = vmatpush.bf16.msra.mxu0 %v13673_v44 }
 0xc85   :  { %v9493_v52 = vpack.c.bf16 %v9489_v63, %v9489_v63 }
 0xc86   :  { %v9527_v10 = vpop.f32.mrf.mxu1 }
 0xc87   :  { %10218 = vmatmul.bf16.vlgmr.msra.gmra.mxu2 %v9529_v32  ;;  %10192 = vmatmul.bf16.vlgmr.msrb.gmra.mxu0 %v9493_v52 }
 0xc88   :  { %10325 = vmatpush.bf16.msra.mxu0 %v13672_v23 }
 0xc8c   :  { %v9491_v19 = vpop.f32.mrf.mxu3  ;;  %10326 = vmatpush.bf16.msra.mxu0 %v13671_v28 }
 0xc90   :  { %10327 = vmatpush.bf16.msra.mxu0 %v13670_v51 }
 0xc94   :  { %10328 = vmatpush.bf16.msra.mxu0 %v13669_v5 }
 0xce0   :  { %v10154_v13 = vpop.f32.mrf.mxu1 }
 0xce4   :  { %v10128_v45 = vpop.f32.mrf.mxu3 }
 0xce8   :  { %v10156_v62 = vpop.f32.mrf.mxu1 }
 0xcea   :  { %v10115_v4 = vpop.f32.mrf.mxu2 }
 0xceb   :  { %v10129_v20 = vadd.f32 %v10128_v45, %v10115_v4 }
 0xcec   :  { %v10130_v49 = vpop.f32.mrf.mxu3 }
 0xcf0   :  { %v10206_v38 = vpop.f32.mrf.mxu1 }
 0xcf2   :  { %v10117_v1 = vpop.f32.mrf.mxu2 }
 0xcf4   :  { %v10141_v14 = vpop.f32.mrf.mxu0  ;;  %v10180_v58 = vpop.f32.mrf.mxu3 }
 0xcf5   :  { %v10142_v16 = vadd.f32 %v10141_v14, %v10129_v20 }
 0xcf7   :  { %v10155_v54 = vadd.f32 %v10154_v13, %v10142_v16 }
 0xcf8   :  { %v10208_v47 = vpop.f32.mrf.mxu1 }
 0xcfa   :  { %v10167_v18 = vpop.f32.mrf.mxu2 }
 0xcfb   :  { %v10168_v40 = vadd.f32 %v10167_v18, %v10155_v54 }
 0xcfc   :  { %v10143_v9 = vpop.f32.mrf.mxu0  ;;  %v10182_v35 = vpop.f32.mrf.mxu3 }
 0xcfd   :  { %v10181_v53 = vadd.f32 %v10180_v58, %v10168_v40 }
 0xd02   :  { %v10169_v27 = vpop.f32.mrf.mxu2 }
 0xd04   :  { %v10193_v57 = vpop.f32.mrf.mxu0 }
 0xd05   :  { %v10194_v33 = vadd.f32 %v10193_v57, %v10181_v53 }
 0xd07   :  { %v10207_v24 = vadd.f32 %v10206_v38, %v10194_v33 }
 0xd0a   :  { %v10219_v34 = vpop.f32.mrf.mxu2 }
 0xd0b   :  { %v10220_v7 = vadd.f32 %v10219_v34, %v10207_v24 }
 0xd0c   :  { %v10195_v30 = vpop.f32.mrf.mxu0 }
 0xd0d   :  { %v10225_v21 = vmul.f32 %v13726_v46, %v10220_v7 }
 0xd0f   :  { %v10228_v61 = vadd.f32 %v13727_v50, %v10225_v21 }
 0xd11   :  { %v10229_v15 = vadd.f32 %v10228_v61, %v9362_v17 }
 0xd12   :  { %v10221_v39 = vpop.f32.mrf.mxu2 }
 0xd13   :  { %v10230_v2 = vmax.f32 %v10229_v15, 0.0 }
 0xd15   :  { %v10231_v12 = vpack.c.bf16 %v10230_v2, %v10230_v2 }
 0xd17   :  { %v10237_v48 = vsel %vm9368_vm2, %v10231_v12, 0 }
 0xd18   :  { %10246 = vmatpush.bf16.msrb.mxu3 %v10237_v48 }
 0xd1b   :  { %12994 = vmatmul.msk.bf16.vlgmr.msrb.gmra.mxu3 %vm9364_vm3, %v10232_v22 }
 0xd9e   :  { %v10248_v41 = vpop.f32.mrf.mxu3 }
 0xd9f   :  { %v10252_v42 = vpack.c.bf16 %v10248_v41, %v10248_v41 }
 0xda1   :  { %10329 = vmatmul.bf16.vlgmr.msra.gmra.mxu0 %v10252_v42 }
 0xda6   :  { %v10250_v37 = vpop.f32.mrf.mxu3 }
 0xe1e   :  { %v10330_v60 = vpop.f32.mrf.mxu0 }
 0xe1f   :  { %v10331_v29 = vadd.f32 %v13728_v11, %v10330_v60 }
 0xe21   :  { %10334 = vst [vmem:[#allocation2] sm:$0x3] %v10331_v29 }
 0xe22   :  { %13752 = shalt.err (!%p13749_p4)
}
 0xe23   :  { %10345 = dma.vmem_to_hbm [thread:$0]  %s10341_s6, 32, %s10343_s15, [#allocation3]  }
 0xe26   :  { %v10332_v43 = vpop.f32.mrf.mxu0 }
 0xe27   :  { %13753 = dma.done.wait [#allocation3], 32  }
 0xe28   :  { %13754 = vsyncadd [#allocation3], 4294967264 }
 0xe29   :  { %10350 = vsyncpa [#allocation3], 1 }

</bundles_post_ra>
